<compile_context>
chip_gen: v7x
topology: tpu7x:2x2x1
jax: 0.10.0
libtpu: 0.0.40
codegen_flags: <defaults>
</compile_context>

<pallas_src>
import functools
import math

import jax
import jax.numpy as jnp
from jax.experimental import pallas as pl
from jax.experimental.pallas import tpu as pltpu


# ----------------------------------------------------------------------------
# Kernel 1: fused conv tower
#   Conv2d(3->32, 3x3, pad=1) + ReLU -> Conv2d(32->64) + ReLU -> Conv2d(64->64) + ReLU
# Each layer = 9 accumulated per-tap matmuls: (B*H*W, Cin) @ (Cin, Cout), M = 128.
# ----------------------------------------------------------------------------
def _conv_tower_kernel(x_ref, wc1_ref, bc1_ref, wc2_ref, bc2_ref, wc3_ref, bc3_ref,
                       y_ref, pad_ref, *, B, H, W):
    # x_ref  : (B, H, W, 3) int8 (bit pattern of the original uint8 pixels)
    # wcN_ref: (9, Cin, Cout) f32 per-tap conv weights (tap index = dy*3 + dx)
    # bcN_ref: (1, Cout) f32
    # y_ref  : (B*H*W, 64) bf16 conv3 output, rows ordered (b, h, w), lanes = channels
    # pad_ref: (B, H+2, W+2, 64) f32 zero-padded activation scratch (reused per layer).
    #   The single full zeroing below is what keeps every layer's halo ring (and the
    #   channels >= cin of earlier layers) at zero -- do NOT "optimize" it away.
    pad_ref[...] = jnp.zeros_like(pad_ref)

    # uint8 pixels -> float in [0, 1] (decode the int8 bit pattern back to [0, 255]).
    xi = x_ref[...].astype(jnp.int32) & 0xFF
    x0 = xi.astype(jnp.float32) * (1.0 / 255.0)                 # (B, H, W, 3)

    def conv3x3_relu(cin, w_ref, b_ref):
        cout = w_ref.shape[-1]
        acc = jnp.zeros((B * H * W, cout), jnp.float32)
        for dy in range(3):
            for dx in range(3):
                # Shifted window of the padded activation, folded to (B*H*W, cin):
                # a pure major-dim collapse (no lane/sublane mixing, unlike im2col concat).
                panel = pad_ref[:, dy:dy + H, dx:dx + W, 0:cin].reshape(B * H * W, cin)
                acc += jnp.dot(panel, w_ref[dy * 3 + dx],
                               preferred_element_type=jnp.float32)
        return jnp.maximum(acc + b_ref[...], 0.0)               # (B*H*W, cout)

    # Layer 1: 3 -> 32   (interior of pad_ref holds the current activation; border stays 0)
    pad_ref[:, 1:H + 1, 1:W + 1, 0:3] = x0
    h = conv3x3_relu(3, wc1_ref, bc1_ref)                       # (B*H*W, 32)
    # Layer 2: 32 -> 64
    pad_ref[:, 1:H + 1, 1:W + 1, 0:32] = h.reshape(B, H, W, 32)
    h = conv3x3_relu(32, wc2_ref, bc2_ref)                      # (B*H*W, 64)
    # Layer 3: 64 -> 64
    pad_ref[:, 1:H + 1, 1:W + 1, 0:64] = h.reshape(B, H, W, 64)
    y_ref[...] = conv3x3_relu(64, wc3_ref, bc3_ref).astype(y_ref.dtype)


def conv_tower(x_i8, pp):
    """x_i8: (B, H, W, 3) int8 -> (B*H*W, 64) bf16 conv features (NHWC row order)."""
    B, H, W, _ = x_i8.shape

    def full(shape):
        return pl.BlockSpec(shape, lambda i, _n=len(shape): (0,) * _n)

    kernel = functools.partial(_conv_tower_kernel, B=B, H=H, W=W)
    return pl.pallas_call(
        kernel,
        out_shape=jax.ShapeDtypeStruct((B * H * W, 64), jnp.bfloat16),
        grid=(1,),
        in_specs=[
            full((B, H, W, 3)),
            full(pp["wc1"].shape), full(pp["bc1"].shape),
            full(pp["wc2"].shape), full(pp["bc2"].shape),
            full(pp["wc3"].shape), full(pp["bc3"].shape),
        ],
        out_specs=full((B * H * W, 64)),
        scratch_shapes=[pltpu.VMEM((B, H + 2, W + 2, 64), jnp.float32)],
        compiler_params=pltpu.CompilerParams(dimension_semantics=("arbitrary",)),
    )(x_i8, pp["wc1"], pp["bc1"], pp["wc2"], pp["bc2"], pp["wc3"], pp["bc3"])


# ----------------------------------------------------------------------------
# Kernel 2: fused FC + dueling head (single block -- at M=B=2 the whole call is
# w1-DMA-bound, so K-streaming + accumulator machinery only added overhead).
#   h1 = relu(f @ W1 + b1); h2 = relu(h1 @ W2 + b2)
#   [v | a] = h2 @ [Wv | Wa] + [bv | ba];  q = v + (a - mean(a))
# ----------------------------------------------------------------------------
def _head_kernel(f_ref, w1_ref, b1_ref, w2_ref, b2_ref, wva_ref, bva_ref, o_ref):
    # f: (B, D) bf16; w1: (D, 512) bf16; w2: (512, 256) bf16; wva: (256, A+1) f32
    h1 = jnp.dot(f_ref[...], w1_ref[...],
                 preferred_element_type=jnp.float32) + b1_ref[...]
    h1 = jnp.maximum(h1, 0.0)
    h2 = jnp.dot(h1.astype(jnp.bfloat16), w2_ref[...],
                 preferred_element_type=jnp.float32) + b2_ref[...]
    h2 = jnp.maximum(h2, 0.0)
    va = jnp.dot(h2, wva_ref[...], preferred_element_type=jnp.float32) + bva_ref[...]
    v = va[:, 0:1]                       # value stream
    a = va[:, 1:]                        # advantage stream
    o_ref[...] = v + (a - jnp.mean(a, axis=1, keepdims=True))


def dueling_head(f, pp):
    """f: (B, D) bf16 features in NHWC-flatten order -> (B, A) f32 Q-values."""
    B, D = f.shape
    A = pp["wva"].shape[1] - 1

    def full(shape):
        return pl.BlockSpec(shape, lambda i, _n=len(shape): (0,) * _n)

    return pl.pallas_call(
        _head_kernel,
        out_shape=jax.ShapeDtypeStruct((B, A), jnp.float32),
        grid=(1,),
        in_specs=[
            full((B, D)),
            full(pp["w1"].shape), full(pp["b1"].shape),
            full(pp["w2"].shape), full(pp["b2"].shape),
            full(pp["wva"].shape), full(pp["bva"].shape),
        ],
        out_specs=full((B, A)),
        compiler_params=pltpu.CompilerParams(dimension_semantics=("arbitrary",)),
    )(f, pp["w1"], pp["b1"], pp["w2"], pp["b2"], pp["wva"], pp["bva"])


# ----------------------------------------------------------------------------
# Forward pass
# ----------------------------------------------------------------------------
def forward(x_u8, pp):
    B, H, W, _ = x_u8.shape
    # Free same-width bitcast: the image crosses HBM at 1 byte/pixel; the kernel does
    # the [0,255] decode and the /255 scaling, so no separate XLA cast op runs.
    x_i8 = jax.lax.bitcast_convert_type(x_u8, jnp.int8)
    feat = conv_tower(x_i8, pp)                    # (B*H*W, 64) bf16, rows (b, h, w)
    f = feat.reshape(B, H * W * 64)                # free row-major reshape = NHWC flatten
    return dueling_head(f, pp)


# ----------------------------------------------------------------------------
# One-time parameter re-layout for the kernels
# ----------------------------------------------------------------------------
def prepare_params(p, H, W):
    def conv(w, b):
        kh, kw, cin, cout = w.shape
        # Per-tap split: tap index t = dy*3 + dx, matching the kernel's loop order.
        return w.reshape(kh * kw, cin, cout), b.reshape(1, cout)

    wc1, bc1 = conv(p["w_c1"], p["b_c1"])
    wc2, bc2 = conv(p["w_c2"], p["b_c2"])
    wc3, bc3 = conv(p["w_c3"], p["b_c3"])

    # fc1 rows are in PyTorch NCHW-flatten order (c*H*W + h*W + w); permute them once to
    # the kernel's NHWC-flatten order ((h*W + w)*C + c) so no transpose is needed at
    # runtime, and store in bf16 (the fc1 weight DMA dominates the head; accumulate in f32).
    C = p["w_c3"].shape[-1]
    w1 = p["w1"].reshape(C, H * W, p["w1"].shape[1])
    w1 = jnp.transpose(w1, (1, 0, 2)).reshape(H * W * C, -1)

    # Dueling head: fuse value and advantage weights into one (256, A+1) matmul.
    wva = jnp.concatenate([p["wv"], p["wa"]], axis=1)
    bva = jnp.concatenate([p["bv"], p["ba"]], axis=0).reshape(1, -1)

    return {
        "wc1": wc1, "bc1": bc1, "wc2": wc2, "bc2": bc2, "wc3": wc3, "bc3": bc3,
        "w1": w1.astype(jnp.bfloat16), "b1": p["b1"].reshape(1, -1),
        "w2": p["w2"].astype(jnp.bfloat16), "b2": p["b2"].reshape(1, -1),
        "wva": wva, "bva": bva,
    }


# ----------------------------------------------------------------------------
# Pure-JAX reference (matches the PyTorch module) for the correctness check
# ----------------------------------------------------------------------------
def ref_forward(x_u8, p):
    hi = jax.lax.Precision.HIGHEST
    x = x_u8.astype(jnp.float32) / 255.0
    for wk, bk in (("w_c1", "b_c1"), ("w_c2", "b_c2"), ("w_c3", "b_c3")):
        x = jax.lax.conv_general_dilated(
            x, p[wk], window_strides=(1, 1), padding="SAME",
            dimension_numbers=("NHWC", "HWIO", "NHWC"), precision=hi) + p[bk]
        x = jnp.maximum(x, 0.0)
    B, H, W, C = x.shape
    f = jnp.transpose(x, (0, 3, 1, 2)).reshape(B, C * H * W)   # PyTorch NCHW flatten
    h1 = jnp.maximum(jnp.dot(f, p["w1"], precision=hi) + p["b1"], 0.0)
    h2 = jnp.maximum(jnp.dot(h1, p["w2"], precision=hi) + p["b2"], 0.0)
    v = jnp.dot(h2, p["wv"], precision=hi) + p["bv"]
    a = jnp.dot(h2, p["wa"], precision=hi) + p["ba"]
    return v + (a - jnp.mean(a, axis=1, keepdims=True))


# ----------------------------------------------------------------------------
# Deterministic parameter init (PyTorch-style uniform(-1/sqrt(fan_in), +))
# ----------------------------------------------------------------------------
def init_params(key, H, W, action_size):
    ks = jax.random.split(key, 14)

    def u(k, shape, fan_in):
        b = 1.0 / math.sqrt(fan_in)
        return jax.random.uniform(k, shape, jnp.float32, -b, b)

    D = 64 * H * W
    return {
        "w_c1": u(ks[0], (3, 3, 3, 32), 3 * 9),    "b_c1": u(ks[1], (32,), 3 * 9),
        "w_c2": u(ks[2], (3, 3, 32, 64), 32 * 9),  "b_c2": u(ks[3], (64,), 32 * 9),
        "w_c3": u(ks[4], (3, 3, 64, 64), 64 * 9),  "b_c3": u(ks[5], (64,), 64 * 9),
        "w1": u(ks[6], (D, 512), D),               "b1": u(ks[7], (512,), D),
        "w2": u(ks[8], (512, 256), 512),           "b2": u(ks[9], (256,), 512),
        "wv": u(ks[10], (256, 1), 256),            "bv": u(ks[11], (1,), 256),
        "wa": u(ks[12], (256, action_size), 256),  "ba": u(ks[13], (action_size,), 256),
    }


if __name__ == "__main__":
    B, H, W, A = 2, 8, 8, 4          # input_shape = (8, 8), action_size = 4
    key = jax.random.PRNGKey(0)
    kx, kp = jax.random.split(key)
    x = jax.random.randint(kx, (B, H, W, 3), 0, 256, dtype=jnp.int32).astype(jnp.uint8)

    params = init_params(kp, H, W, A)
    pp = prepare_params(params, H, W)          # one-time weight re-layout (not per forward)

    fwd = jax.jit(forward)
    out = jax.block_until_ready(fwd(x, pp))
    assert out.shape == (B, A) and out.dtype == jnp.float32

    ref = jax.block_until_ready(ref_forward(x, params))
    err = float(jnp.max(jnp.abs(out - ref)))
    assert jnp.allclose(out, ref, atol=2e-2, rtol=2e-2), err

    print("KERNEL_OK")
</pallas_src>

<mosaic_0001>
module attributes {stable_mosaic.version = 11 : i64} {
  func.func @_conv_tower_kernel(%arg0: i32, %arg1: memref<2x8x8x3xi8, #tpu.memory_space<vmem>>, %arg2: memref<9x3x32xf32, #tpu.memory_space<vmem>>, %arg3: memref<1x32xf32, #tpu.memory_space<vmem>>, %arg4: memref<9x32x64xf32, #tpu.memory_space<vmem>>, %arg5: memref<1x64xf32, #tpu.memory_space<vmem>>, %arg6: memref<9x64x64xf32, #tpu.memory_space<vmem>>, %arg7: memref<1x64xf32, #tpu.memory_space<vmem>>, %arg8: memref<128x64xbf16, #tpu.memory_space<vmem>>, %arg9: memref<2x10x10x64xf32, #tpu.memory_space<vmem>>) attributes {dimension_semantics = [#tpu.dimension_semantics<arbitrary>], iteration_bounds = array<i64: 1>, scalar_prefetch = 0 : i64, scratch_operands = 1 : i64, tpu.core_type = #tpu.core_type<tc>, window_params = [{pipeline_mode = #tpu.pipeline_mode<synchronous>, transform_indices = @transform_0, window_bounds = array<i64: 2, 8, 8, 3>}, {pipeline_mode = #tpu.pipeline_mode<synchronous>, transform_indices = @transform_1, window_bounds = array<i64: 9, 3, 32>}, {pipeline_mode = #tpu.pipeline_mode<synchronous>, transform_indices = @transform_2, window_bounds = array<i64: 1, 32>}, {pipeline_mode = #tpu.pipeline_mode<synchronous>, transform_indices = @transform_3, window_bounds = array<i64: 9, 32, 64>}, {pipeline_mode = #tpu.pipeline_mode<synchronous>, transform_indices = @transform_4, window_bounds = array<i64: 1, 64>}, {pipeline_mode = #tpu.pipeline_mode<synchronous>, transform_indices = @transform_5, window_bounds = array<i64: 9, 64, 64>}, {pipeline_mode = #tpu.pipeline_mode<synchronous>, transform_indices = @transform_6, window_bounds = array<i64: 1, 64>}, {pipeline_mode = #tpu.pipeline_mode<synchronous>, transform_indices = @transform_7, window_bounds = array<i64: 128, 64>}]} {
    %cst = arith.constant 0.000000e+00 : f32
    %0 = vector.broadcast %cst : f32 to vector<2x10x10x64xf32>
    %c0 = arith.constant 0 : index
    %c0_0 = arith.constant 0 : index
    %c0_1 = arith.constant 0 : index
    %c0_2 = arith.constant 0 : index
    %1 = vector.load %arg9[%c0, %c0_0, %c0_1, %c0_2] : memref<2x10x10x64xf32, #tpu.memory_space<vmem>>, vector<2x10x10x64xf32>
    tpu.vector_store %arg9[%c0, %c0_0, %c0_1, %c0_2], %0 {strides = array<i32>} : memref<2x10x10x64xf32, #tpu.memory_space<vmem>>, vector<2x10x10x64xf32>,
    %c0_3 = arith.constant 0 : index
    %c0_4 = arith.constant 0 : index
    %c0_5 = arith.constant 0 : index
    %c0_6 = arith.constant 0 : index
    %2 = vector.load %arg1[%c0_3, %c0_4, %c0_5, %c0_6] : memref<2x8x8x3xi8, #tpu.memory_space<vmem>>, vector<2x8x8x3xi8>
    %3 = arith.extsi %2 : vector<2x8x8x3xi8> to vector<2x8x8x3xi32>
    %c255_i32 = arith.constant 255 : i32
    %4 = vector.broadcast %c255_i32 : i32 to vector<2x8x8x3xi32>
    %5 = arith.andi %3, %4 : vector<2x8x8x3xi32>
    %6 = arith.sitofp %5 : vector<2x8x8x3xi32> to vector<2x8x8x3xf32>
    %cst_7 = arith.constant 0.00392156886 : f32
    %7 = vector.broadcast %cst_7 : f32 to vector<2x8x8x3xf32>
    %8 = arith.mulf %6, %7 : vector<2x8x8x3xf32>
    %c0_8 = arith.constant 0 : index
    %c1 = arith.constant 1 : index
    %c1_9 = arith.constant 1 : index
    %c0_10 = arith.constant 0 : index
    %9 = vector.load %arg9[%c0_8, %c1, %c1_9, %c0_10] : memref<2x10x10x64xf32, #tpu.memory_space<vmem>>, vector<2x8x8x3xf32>
    tpu.vector_store %arg9[%c0_8, %c1, %c1_9, %c0_10], %8 {strides = array<i32>} : memref<2x10x10x64xf32, #tpu.memory_space<vmem>>, vector<2x8x8x3xf32>,
    %cst_11 = arith.constant 0.000000e+00 : f32
    %10 = vector.broadcast %cst_11 : f32 to vector<128x32xf32>
    %c0_12 = arith.constant 0 : index
    %c0_13 = arith.constant 0 : index
    %c0_14 = arith.constant 0 : index
    %c0_15 = arith.constant 0 : index
    %11 = vector.load %arg9[%c0_12, %c0_13, %c0_14, %c0_15] : memref<2x10x10x64xf32, #tpu.memory_space<vmem>>, vector<2x8x8x3xf32>
    %12 = vector.shape_cast %11 : vector<2x8x8x3xf32> to vector<128x3xf32>
    %c0_16 = arith.constant 0 : index
    %c0_17 = arith.constant 0 : index
    %c0_18 = arith.constant 0 : index
    %13 = vector.load %arg2[%c0_16, %c0_17, %c0_18] : memref<9x3x32xf32, #tpu.memory_space<vmem>>, vector<1x3x32xf32>
    %14 = vector.shape_cast %13 : vector<1x3x32xf32> to vector<3x32xf32>
    %cst_19 = arith.constant dense<0.000000e+00> : vector<128x32xf32>
    %15 = tpu.matmul %12, %14, %cst_19 {dimension_numbers = #tpu.dot_dimension_numbers<[1], [0], [0], [1], [0, 0, 1, 1], [], []>} : vector<128x3xf32>, vector<3x32xf32>, vector<128x32xf32> -> vector<128x32xf32>
    %16 = arith.addf %10, %15 : vector<128x32xf32>
    %c0_20 = arith.constant 0 : index
    %c0_21 = arith.constant 0 : index
    %c1_22 = arith.constant 1 : index
    %c0_23 = arith.constant 0 : index
    %17 = vector.load %arg9[%c0_20, %c0_21, %c1_22, %c0_23] : memref<2x10x10x64xf32, #tpu.memory_space<vmem>>, vector<2x8x8x3xf32>
    %18 = vector.shape_cast %17 : vector<2x8x8x3xf32> to vector<128x3xf32>
    %c1_24 = arith.constant 1 : index
    %c0_25 = arith.constant 0 : index
    %c0_26 = arith.constant 0 : index
    %19 = vector.load %arg2[%c1_24, %c0_25, %c0_26] : memref<9x3x32xf32, #tpu.memory_space<vmem>>, vector<1x3x32xf32>
    %20 = vector.shape_cast %19 : vector<1x3x32xf32> to vector<3x32xf32>
    %cst_27 = arith.constant dense<0.000000e+00> : vector<128x32xf32>
    %21 = tpu.matmul %18, %20, %cst_27 {dimension_numbers = #tpu.dot_dimension_numbers<[1], [0], [0], [1], [0, 0, 1, 1], [], []>} : vector<128x3xf32>, vector<3x32xf32>, vector<128x32xf32> -> vector<128x32xf32>
    %22 = arith.addf %16, %21 : vector<128x32xf32>
    %c0_28 = arith.constant 0 : index
    %c0_29 = arith.constant 0 : index
    %c2 = arith.constant 2 : index
    %c0_30 = arith.constant 0 : index
    %23 = vector.load %arg9[%c0_28, %c0_29, %c2, %c0_30] : memref<2x10x10x64xf32, #tpu.memory_space<vmem>>, vector<2x8x8x3xf32>
    %24 = vector.shape_cast %23 : vector<2x8x8x3xf32> to vector<128x3xf32>
    %c2_31 = arith.constant 2 : index
    %c0_32 = arith.constant 0 : index
    %c0_33 = arith.constant 0 : index
    %25 = vector.load %arg2[%c2_31, %c0_32, %c0_33] : memref<9x3x32xf32, #tpu.memory_space<vmem>>, vector<1x3x32xf32>
    %26 = vector.shape_cast %25 : vector<1x3x32xf32> to vector<3x32xf32>
    %cst_34 = arith.constant dense<0.000000e+00> : vector<128x32xf32>
    %27 = tpu.matmul %24, %26, %cst_34 {dimension_numbers = #tpu.dot_dimension_numbers<[1], [0], [0], [1], [0, 0, 1, 1], [], []>} : vector<128x3xf32>, vector<3x32xf32>, vector<128x32xf32> -> vector<128x32xf32>
    %28 = arith.addf %22, %27 : vector<128x32xf32>
    %c0_35 = arith.constant 0 : index
    %c1_36 = arith.constant 1 : index
    %c0_37 = arith.constant 0 : index
    %c0_38 = arith.constant 0 : index
    %29 = vector.load %arg9[%c0_35, %c1_36, %c0_37, %c0_38] : memref<2x10x10x64xf32, #tpu.memory_space<vmem>>, vector<2x8x8x3xf32>
    %30 = vector.shape_cast %29 : vector<2x8x8x3xf32> to vector<128x3xf32>
    %c3 = arith.constant 3 : index
    %c0_39 = arith.constant 0 : index
    %c0_40 = arith.constant 0 : index
    %31 = vector.load %arg2[%c3, %c0_39, %c0_40] : memref<9x3x32xf32, #tpu.memory_space<vmem>>, vector<1x3x32xf32>
    %32 = vector.shape_cast %31 : vector<1x3x32xf32> to vector<3x32xf32>
    %cst_41 = arith.constant dense<0.000000e+00> : vector<128x32xf32>
    %33 = tpu.matmul %30, %32, %cst_41 {dimension_numbers = #tpu.dot_dimension_numbers<[1], [0], [0], [1], [0, 0, 1, 1], [], []>} : vector<128x3xf32>, vector<3x32xf32>, vector<128x32xf32> -> vector<128x32xf32>
    %34 = arith.addf %28, %33 : vector<128x32xf32>
    %c0_42 = arith.constant 0 : index
    %c1_43 = arith.constant 1 : index
    %c1_44 = arith.constant 1 : index
    %c0_45 = arith.constant 0 : index
    %35 = vector.load %arg9[%c0_42, %c1_43, %c1_44, %c0_45] : memref<2x10x10x64xf32, #tpu.memory_space<vmem>>, vector<2x8x8x3xf32>
    %36 = vector.shape_cast %35 : vector<2x8x8x3xf32> to vector<128x3xf32>
    %c4 = arith.constant 4 : index
    %c0_46 = arith.constant 0 : index
    %c0_47 = arith.constant 0 : index
    %37 = vector.load %arg2[%c4, %c0_46, %c0_47] : memref<9x3x32xf32, #tpu.memory_space<vmem>>, vector<1x3x32xf32>
    %38 = vector.shape_cast %37 : vector<1x3x32xf32> to vector<3x32xf32>
    %cst_48 = arith.constant dense<0.000000e+00> : vector<128x32xf32>
    %39 = tpu.matmul %36, %38, %cst_48 {dimension_numbers = #tpu.dot_dimension_numbers<[1], [0], [0], [1], [0, 0, 1, 1], [], []>} : vector<128x3xf32>, vector<3x32xf32>, vector<128x32xf32> -> vector<128x32xf32>
    %40 = arith.addf %34, %39 : vector<128x32xf32>
    %c0_49 = arith.constant 0 : index
    %c1_50 = arith.constant 1 : index
    %c2_51 = arith.constant 2 : index
    %c0_52 = arith.constant 0 : index
    %41 = vector.load %arg9[%c0_49, %c1_50, %c2_51, %c0_52] : memref<2x10x10x64xf32, #tpu.memory_space<vmem>>, vector<2x8x8x3xf32>
    %42 = vector.shape_cast %41 : vector<2x8x8x3xf32> to vector<128x3xf32>
    %c5 = arith.constant 5 : index
    %c0_53 = arith.constant 0 : index
    %c0_54 = arith.constant 0 : index
    %43 = vector.load %arg2[%c5, %c0_53, %c0_54] : memref<9x3x32xf32, #tpu.memory_space<vmem>>, vector<1x3x32xf32>
    %44 = vector.shape_cast %43 : vector<1x3x32xf32> to vector<3x32xf32>
    %cst_55 = arith.constant dense<0.000000e+00> : vector<128x32xf32>
    %45 = tpu.matmul %42, %44, %cst_55 {dimension_numbers = #tpu.dot_dimension_numbers<[1], [0], [0], [1], [0, 0, 1, 1], [], []>} : vector<128x3xf32>, vector<3x32xf32>, vector<128x32xf32> -> vector<128x32xf32>
    %46 = arith.addf %40, %45 : vector<128x32xf32>
    %c0_56 = arith.constant 0 : index
    %c2_57 = arith.constant 2 : index
    %c0_58 = arith.constant 0 : index
    %c0_59 = arith.constant 0 : index
    %47 = vector.load %arg9[%c0_56, %c2_57, %c0_58, %c0_59] : memref<2x10x10x64xf32, #tpu.memory_space<vmem>>, vector<2x8x8x3xf32>
    %48 = vector.shape_cast %47 : vector<2x8x8x3xf32> to vector<128x3xf32>
    %c6 = arith.constant 6 : index
    %c0_60 = arith.constant 0 : index
    %c0_61 = arith.constant 0 : index
    %49 = vector.load %arg2[%c6, %c0_60, %c0_61] : memref<9x3x32xf32, #tpu.memory_space<vmem>>, vector<1x3x32xf32>
    %50 = vector.shape_cast %49 : vector<1x3x32xf32> to vector<3x32xf32>
    %cst_62 = arith.constant dense<0.000000e+00> : vector<128x32xf32>
    %51 = tpu.matmul %48, %50, %cst_62 {dimension_numbers = #tpu.dot_dimension_numbers<[1], [0], [0], [1], [0, 0, 1, 1], [], []>} : vector<128x3xf32>, vector<3x32xf32>, vector<128x32xf32> -> vector<128x32xf32>
    %52 = arith.addf %46, %51 : vector<128x32xf32>
    %c0_63 = arith.constant 0 : index
    %c2_64 = arith.constant 2 : index
    %c1_65 = arith.constant 1 : index
    %c0_66 = arith.constant 0 : index
    %53 = vector.load %arg9[%c0_63, %c2_64, %c1_65, %c0_66] : memref<2x10x10x64xf32, #tpu.memory_space<vmem>>, vector<2x8x8x3xf32>
    %54 = vector.shape_cast %53 : vector<2x8x8x3xf32> to vector<128x3xf32>
    %c7 = arith.constant 7 : index
    %c0_67 = arith.constant 0 : index
    %c0_68 = arith.constant 0 : index
    %55 = vector.load %arg2[%c7, %c0_67, %c0_68] : memref<9x3x32xf32, #tpu.memory_space<vmem>>, vector<1x3x32xf32>
    %56 = vector.shape_cast %55 : vector<1x3x32xf32> to vector<3x32xf32>
    %cst_69 = arith.constant dense<0.000000e+00> : vector<128x32xf32>
    %57 = tpu.matmul %54, %56, %cst_69 {dimension_numbers = #tpu.dot_dimension_numbers<[1], [0], [0], [1], [0, 0, 1, 1], [], []>} : vector<128x3xf32>, vector<3x32xf32>, vector<128x32xf32> -> vector<128x32xf32>
    %58 = arith.addf %52, %57 : vector<128x32xf32>
    %c0_70 = arith.constant 0 : index
    %c2_71 = arith.constant 2 : index
    %c2_72 = arith.constant 2 : index
    %c0_73 = arith.constant 0 : index
    %59 = vector.load %arg9[%c0_70, %c2_71, %c2_72, %c0_73] : memref<2x10x10x64xf32, #tpu.memory_space<vmem>>, vector<2x8x8x3xf32>
    %60 = vector.shape_cast %59 : vector<2x8x8x3xf32> to vector<128x3xf32>
    %c8 = arith.constant 8 : index
    %c0_74 = arith.constant 0 : index
    %c0_75 = arith.constant 0 : index
    %61 = vector.load %arg2[%c8, %c0_74, %c0_75] : memref<9x3x32xf32, #tpu.memory_space<vmem>>, vector<1x3x32xf32>
    %62 = vector.shape_cast %61 : vector<1x3x32xf32> to vector<3x32xf32>
    %cst_76 = arith.constant dense<0.000000e+00> : vector<128x32xf32>
    %63 = tpu.matmul %60, %62, %cst_76 {dimension_numbers = #tpu.dot_dimension_numbers<[1], [0], [0], [1], [0, 0, 1, 1], [], []>} : vector<128x3xf32>, vector<3x32xf32>, vector<128x32xf32> -> vector<128x32xf32>
    %64 = arith.addf %58, %63 : vector<128x32xf32>
    %c0_77 = arith.constant 0 : index
    %c0_78 = arith.constant 0 : index
    %65 = vector.load %arg3[%c0_77, %c0_78] : memref<1x32xf32, #tpu.memory_space<vmem>>, vector<1x32xf32>
    %66 = vector.broadcast %65 : vector<1x32xf32> to vector<128x32xf32>
    %67 = arith.addf %64, %66 : vector<128x32xf32>
    %cst_79 = arith.constant 0.000000e+00 : f32
    %68 = vector.broadcast %cst_79 : f32 to vector<128x32xf32>
    %69 = arith.maximumf %67, %68 : vector<128x32xf32>
    %70 = vector.shape_cast %69 : vector<128x32xf32> to vector<2x8x8x32xf32>
    %c0_80 = arith.constant 0 : index
    %c1_81 = arith.constant 1 : index
    %c1_82 = arith.constant 1 : index
    %c0_83 = arith.constant 0 : index
    %71 = vector.load %arg9[%c0_80, %c1_81, %c1_82, %c0_83] : memref<2x10x10x64xf32, #tpu.memory_space<vmem>>, vector<2x8x8x32xf32>
    tpu.vector_store %arg9[%c0_80, %c1_81, %c1_82, %c0_83], %70 {strides = array<i32>} : memref<2x10x10x64xf32, #tpu.memory_space<vmem>>, vector<2x8x8x32xf32>,
    %cst_84 = arith.constant 0.000000e+00 : f32
    %72 = vector.broadcast %cst_84 : f32 to vector<128x64xf32>
    %c0_85 = arith.constant 0 : index
    %c0_86 = arith.constant 0 : index
    %c0_87 = arith.constant 0 : index
    %c0_88 = arith.constant 0 : index
    %73 = vector.load %arg9[%c0_85, %c0_86, %c0_87, %c0_88] : memref<2x10x10x64xf32, #tpu.memory_space<vmem>>, vector<2x8x8x32xf32>
    %74 = vector.shape_cast %73 : vector<2x8x8x32xf32> to vector<128x32xf32>
    %c0_89 = arith.constant 0 : index
    %c0_90 = arith.constant 0 : index
    %c0_91 = arith.constant 0 : index
    %75 = vector.load %arg4[%c0_89, %c0_90, %c0_91] : memref<9x32x64xf32, #tpu.memory_space<vmem>>, vector<1x32x64xf32>
    %76 = vector.shape_cast %75 : vector<1x32x64xf32> to vector<32x64xf32>
    %cst_92 = arith.constant dense<0.000000e+00> : vector<128x64xf32>
    %77 = tpu.matmul %74, %76, %cst_92 {dimension_numbers = #tpu.dot_dimension_numbers<[1], [0], [0], [1], [0, 0, 1, 1], [], []>} : vector<128x32xf32>, vector<32x64xf32>, vector<128x64xf32> -> vector<128x64xf32>
    %78 = arith.addf %72, %77 : vector<128x64xf32>
    %c0_93 = arith.constant 0 : index
    %c0_94 = arith.constant 0 : index
    %c1_95 = arith.constant 1 : index
    %c0_96 = arith.constant 0 : index
    %79 = vector.load %arg9[%c0_93, %c0_94, %c1_95, %c0_96] : memref<2x10x10x64xf32, #tpu.memory_space<vmem>>, vector<2x8x8x32xf32>
    %80 = vector.shape_cast %79 : vector<2x8x8x32xf32> to vector<128x32xf32>
    %c1_97 = arith.constant 1 : index
    %c0_98 = arith.constant 0 : index
    %c0_99 = arith.constant 0 : index
    %81 = vector.load %arg4[%c1_97, %c0_98, %c0_99] : memref<9x32x64xf32, #tpu.memory_space<vmem>>, vector<1x32x64xf32>
    %82 = vector.shape_cast %81 : vector<1x32x64xf32> to vector<32x64xf32>
    %cst_100 = arith.constant dense<0.000000e+00> : vector<128x64xf32>
    %83 = tpu.matmul %80, %82, %cst_100 {dimension_numbers = #tpu.dot_dimension_numbers<[1], [0], [0], [1], [0, 0, 1, 1], [], []>} : vector<128x32xf32>, vector<32x64xf32>, vector<128x64xf32> -> vector<128x64xf32>
    %84 = arith.addf %78, %83 : vector<128x64xf32>
    %c0_101 = arith.constant 0 : index
    %c0_102 = arith.constant 0 : index
    %c2_103 = arith.constant 2 : index
    %c0_104 = arith.constant 0 : index
    %85 = vector.load %arg9[%c0_101, %c0_102, %c2_103, %c0_104] : memref<2x10x10x64xf32, #tpu.memory_space<vmem>>, vector<2x8x8x32xf32>
    %86 = vector.shape_cast %85 : vector<2x8x8x32xf32> to vector<128x32xf32>
    %c2_105 = arith.constant 2 : index
    %c0_106 = arith.constant 0 : index
    %c0_107 = arith.constant 0 : index
    %87 = vector.load %arg4[%c2_105, %c0_106, %c0_107] : memref<9x32x64xf32, #tpu.memory_space<vmem>>, vector<1x32x64xf32>
    %88 = vector.shape_cast %87 : vector<1x32x64xf32> to vector<32x64xf32>
    %cst_108 = arith.constant dense<0.000000e+00> : vector<128x64xf32>
    %89 = tpu.matmul %86, %88, %cst_108 {dimension_numbers = #tpu.dot_dimension_numbers<[1], [0], [0], [1], [0, 0, 1, 1], [], []>} : vector<128x32xf32>, vector<32x64xf32>, vector<128x64xf32> -> vector<128x64xf32>
    %90 = arith.addf %84, %89 : vector<128x64xf32>
    %c0_109 = arith.constant 0 : index
    %c1_110 = arith.constant 1 : index
    %c0_111 = arith.constant 0 : index
    %c0_112 = arith.constant 0 : index
    %91 = vector.load %arg9[%c0_109, %c1_110, %c0_111, %c0_112] : memref<2x10x10x64xf32, #tpu.memory_space<vmem>>, vector<2x8x8x32xf32>
    %92 = vector.shape_cast %91 : vector<2x8x8x32xf32> to vector<128x32xf32>
    %c3_113 = arith.constant 3 : index
    %c0_114 = arith.constant 0 : index
    %c0_115 = arith.constant 0 : index
    %93 = vector.load %arg4[%c3_113, %c0_114, %c0_115] : memref<9x32x64xf32, #tpu.memory_space<vmem>>, vector<1x32x64xf32>
    %94 = vector.shape_cast %93 : vector<1x32x64xf32> to vector<32x64xf32>
    %cst_116 = arith.constant dense<0.000000e+00> : vector<128x64xf32>
    %95 = tpu.matmul %92, %94, %cst_116 {dimension_numbers = #tpu.dot_dimension_numbers<[1], [0], [0], [1], [0, 0, 1, 1], [], []>} : vector<128x32xf32>, vector<32x64xf32>, vector<128x64xf32> -> vector<128x64xf32>
    %96 = arith.addf %90, %95 : vector<128x64xf32>
    %c0_117 = arith.constant 0 : index
    %c1_118 = arith.constant 1 : index
    %c1_119 = arith.constant 1 : index
    %c0_120 = arith.constant 0 : index
    %97 = vector.load %arg9[%c0_117, %c1_118, %c1_119, %c0_120] : memref<2x10x10x64xf32, #tpu.memory_space<vmem>>, vector<2x8x8x32xf32>
    %98 = vector.shape_cast %97 : vector<2x8x8x32xf32> to vector<128x32xf32>
    %c4_121 = arith.constant 4 : index
    %c0_122 = arith.constant 0 : index
    %c0_123 = arith.constant 0 : index
    %99 = vector.load %arg4[%c4_121, %c0_122, %c0_123] : memref<9x32x64xf32, #tpu.memory_space<vmem>>, vector<1x32x64xf32>
    %100 = vector.shape_cast %99 : vector<1x32x64xf32> to vector<32x64xf32>
    %cst_124 = arith.constant dense<0.000000e+00> : vector<128x64xf32>
    %101 = tpu.matmul %98, %100, %cst_124 {dimension_numbers = #tpu.dot_dimension_numbers<[1], [0], [0], [1], [0, 0, 1, 1], [], []>} : vector<128x32xf32>, vector<32x64xf32>, vector<128x64xf32> -> vector<128x64xf32>
    %102 = arith.addf %96, %101 : vector<128x64xf32>
    %c0_125 = arith.constant 0 : index
    %c1_126 = arith.constant 1 : index
    %c2_127 = arith.constant 2 : index
    %c0_128 = arith.constant 0 : index
    %103 = vector.load %arg9[%c0_125, %c1_126, %c2_127, %c0_128] : memref<2x10x10x64xf32, #tpu.memory_space<vmem>>, vector<2x8x8x32xf32>
    %104 = vector.shape_cast %103 : vector<2x8x8x32xf32> to vector<128x32xf32>
    %c5_129 = arith.constant 5 : index
    %c0_130 = arith.constant 0 : index
    %c0_131 = arith.constant 0 : index
    %105 = vector.load %arg4[%c5_129, %c0_130, %c0_131] : memref<9x32x64xf32, #tpu.memory_space<vmem>>, vector<1x32x64xf32>
    %106 = vector.shape_cast %105 : vector<1x32x64xf32> to vector<32x64xf32>
    %cst_132 = arith.constant dense<0.000000e+00> : vector<128x64xf32>
    %107 = tpu.matmul %104, %106, %cst_132 {dimension_numbers = #tpu.dot_dimension_numbers<[1], [0], [0], [1], [0, 0, 1, 1], [], []>} : vector<128x32xf32>, vector<32x64xf32>, vector<128x64xf32> -> vector<128x64xf32>
    %108 = arith.addf %102, %107 : vector<128x64xf32>
    %c0_133 = arith.constant 0 : index
    %c2_134 = arith.constant 2 : index
    %c0_135 = arith.constant 0 : index
    %c0_136 = arith.constant 0 : index
    %109 = vector.load %arg9[%c0_133, %c2_134, %c0_135, %c0_136] : memref<2x10x10x64xf32, #tpu.memory_space<vmem>>, vector<2x8x8x32xf32>
    %110 = vector.shape_cast %109 : vector<2x8x8x32xf32> to vector<128x32xf32>
    %c6_137 = arith.constant 6 : index
    %c0_138 = arith.constant 0 : index
    %c0_139 = arith.constant 0 : index
    %111 = vector.load %arg4[%c6_137, %c0_138, %c0_139] : memref<9x32x64xf32, #tpu.memory_space<vmem>>, vector<1x32x64xf32>
    %112 = vector.shape_cast %111 : vector<1x32x64xf32> to vector<32x64xf32>
    %cst_140 = arith.constant dense<0.000000e+00> : vector<128x64xf32>
    %113 = tpu.matmul %110, %112, %cst_140 {dimension_numbers = #tpu.dot_dimension_numbers<[1], [0], [0], [1], [0, 0, 1, 1], [], []>} : vector<128x32xf32>, vector<32x64xf32>, vector<128x64xf32> -> vector<128x64xf32>
    %114 = arith.addf %108, %113 : vector<128x64xf32>
    %c0_141 = arith.constant 0 : index
    %c2_142 = arith.constant 2 : index
    %c1_143 = arith.constant 1 : index
    %c0_144 = arith.constant 0 : index
    %115 = vector.load %arg9[%c0_141, %c2_142, %c1_143, %c0_144] : memref<2x10x10x64xf32, #tpu.memory_space<vmem>>, vector<2x8x8x32xf32>
    %116 = vector.shape_cast %115 : vector<2x8x8x32xf32> to vector<128x32xf32>
    %c7_145 = arith.constant 7 : index
    %c0_146 = arith.constant 0 : index
    %c0_147 = arith.constant 0 : index
    %117 = vector.load %arg4[%c7_145, %c0_146, %c0_147] : memref<9x32x64xf32, #tpu.memory_space<vmem>>, vector<1x32x64xf32>
    %118 = vector.shape_cast %117 : vector<1x32x64xf32> to vector<32x64xf32>
    %cst_148 = arith.constant dense<0.000000e+00> : vector<128x64xf32>
    %119 = tpu.matmul %116, %118, %cst_148 {dimension_numbers = #tpu.dot_dimension_numbers<[1], [0], [0], [1], [0, 0, 1, 1], [], []>} : vector<128x32xf32>, vector<32x64xf32>, vector<128x64xf32> -> vector<128x64xf32>
    %120 = arith.addf %114, %119 : vector<128x64xf32>
    %c0_149 = arith.constant 0 : index
    %c2_150 = arith.constant 2 : index
    %c2_151 = arith.constant 2 : index
    %c0_152 = arith.constant 0 : index
    %121 = vector.load %arg9[%c0_149, %c2_150, %c2_151, %c0_152] : memref<2x10x10x64xf32, #tpu.memory_space<vmem>>, vector<2x8x8x32xf32>
    %122 = vector.shape_cast %121 : vector<2x8x8x32xf32> to vector<128x32xf32>
    %c8_153 = arith.constant 8 : index
    %c0_154 = arith.constant 0 : index
    %c0_155 = arith.constant 0 : index
    %123 = vector.load %arg4[%c8_153, %c0_154, %c0_155] : memref<9x32x64xf32, #tpu.memory_space<vmem>>, vector<1x32x64xf32>
    %124 = vector.shape_cast %123 : vector<1x32x64xf32> to vector<32x64xf32>
    %cst_156 = arith.constant dense<0.000000e+00> : vector<128x64xf32>
    %125 = tpu.matmul %122, %124, %cst_156 {dimension_numbers = #tpu.dot_dimension_numbers<[1], [0], [0], [1], [0, 0, 1, 1], [], []>} : vector<128x32xf32>, vector<32x64xf32>, vector<128x64xf32> -> vector<128x64xf32>
    %126 = arith.addf %120, %125 : vector<128x64xf32>
    %c0_157 = arith.constant 0 : index
    %c0_158 = arith.constant 0 : index
    %127 = vector.load %arg5[%c0_157, %c0_158] : memref<1x64xf32, #tpu.memory_space<vmem>>, vector<1x64xf32>
    %128 = vector.broadcast %127 : vector<1x64xf32> to vector<128x64xf32>
    %129 = arith.addf %126, %128 : vector<128x64xf32>
    %cst_159 = arith.constant 0.000000e+00 : f32
    %130 = vector.broadcast %cst_159 : f32 to vector<128x64xf32>
    %131 = arith.maximumf %129, %130 : vector<128x64xf32>
    %132 = vector.shape_cast %131 : vector<128x64xf32> to vector<2x8x8x64xf32>
    %c0_160 = arith.constant 0 : index
    %c1_161 = arith.constant 1 : index
    %c1_162 = arith.constant 1 : index
    %c0_163 = arith.constant 0 : index
    %133 = vector.load %arg9[%c0_160, %c1_161, %c1_162, %c0_163] : memref<2x10x10x64xf32, #tpu.memory_space<vmem>>, vector<2x8x8x64xf32>
    tpu.vector_store %arg9[%c0_160, %c1_161, %c1_162, %c0_163], %132 {strides = array<i32>} : memref<2x10x10x64xf32, #tpu.memory_space<vmem>>, vector<2x8x8x64xf32>,
    %cst_164 = arith.constant 0.000000e+00 : f32
    %134 = vector.broadcast %cst_164 : f32 to vector<128x64xf32>
    %c0_165 = arith.constant 0 : index
    %c0_166 = arith.constant 0 : index
    %c0_167 = arith.constant 0 : index
    %c0_168 = arith.constant 0 : index
    %135 = vector.load %arg9[%c0_165, %c0_166, %c0_167, %c0_168] : memref<2x10x10x64xf32, #tpu.memory_space<vmem>>, vector<2x8x8x64xf32>
    %136 = vector.shape_cast %135 : vector<2x8x8x64xf32> to vector<128x64xf32>
    %c0_169 = arith.constant 0 : index
    %c0_170 = arith.constant 0 : index
    %c0_171 = arith.constant 0 : index
    %137 = vector.load %arg6[%c0_169, %c0_170, %c0_171] : memref<9x64x64xf32, #tpu.memory_space<vmem>>, vector<1x64x64xf32>
    %138 = vector.shape_cast %137 : vector<1x64x64xf32> to vector<64x64xf32>
    %cst_172 = arith.constant dense<0.000000e+00> : vector<128x64xf32>
    %139 = tpu.matmul %136, %138, %cst_172 {dimension_numbers = #tpu.dot_dimension_numbers<[1], [0], [0], [1], [0, 0, 1, 1], [], []>} : vector<128x64xf32>, vector<64x64xf32>, vector<128x64xf32> -> vector<128x64xf32>
    %140 = arith.addf %134, %139 : vector<128x64xf32>
    %c0_173 = arith.constant 0 : index
    %c0_174 = arith.constant 0 : index
    %c1_175 = arith.constant 1 : index
    %c0_176 = arith.constant 0 : index
    %141 = vector.load %arg9[%c0_173, %c0_174, %c1_175, %c0_176] : memref<2x10x10x64xf32, #tpu.memory_space<vmem>>, vector<2x8x8x64xf32>
    %142 = vector.shape_cast %141 : vector<2x8x8x64xf32> to vector<128x64xf32>
    %c1_177 = arith.constant 1 : index
    %c0_178 = arith.constant 0 : index
    %c0_179 = arith.constant 0 : index
    %143 = vector.load %arg6[%c1_177, %c0_178, %c0_179] : memref<9x64x64xf32, #tpu.memory_space<vmem>>, vector<1x64x64xf32>
    %144 = vector.shape_cast %143 : vector<1x64x64xf32> to vector<64x64xf32>
    %cst_180 = arith.constant dense<0.000000e+00> : vector<128x64xf32>
    %145 = tpu.matmul %142, %144, %cst_180 {dimension_numbers = #tpu.dot_dimension_numbers<[1], [0], [0], [1], [0, 0, 1, 1], [], []>} : vector<128x64xf32>, vector<64x64xf32>, vector<128x64xf32> -> vector<128x64xf32>
    %146 = arith.addf %140, %145 : vector<128x64xf32>
    %c0_181 = arith.constant 0 : index
    %c0_182 = arith.constant 0 : index
    %c2_183 = arith.constant 2 : index
    %c0_184 = arith.constant 0 : index
    %147 = vector.load %arg9[%c0_181, %c0_182, %c2_183, %c0_184] : memref<2x10x10x64xf32, #tpu.memory_space<vmem>>, vector<2x8x8x64xf32>
    %148 = vector.shape_cast %147 : vector<2x8x8x64xf32> to vector<128x64xf32>
    %c2_185 = arith.constant 2 : index
    %c0_186 = arith.constant 0 : index
    %c0_187 = arith.constant 0 : index
    %149 = vector.load %arg6[%c2_185, %c0_186, %c0_187] : memref<9x64x64xf32, #tpu.memory_space<vmem>>, vector<1x64x64xf32>
    %150 = vector.shape_cast %149 : vector<1x64x64xf32> to vector<64x64xf32>
    %cst_188 = arith.constant dense<0.000000e+00> : vector<128x64xf32>
    %151 = tpu.matmul %148, %150, %cst_188 {dimension_numbers = #tpu.dot_dimension_numbers<[1], [0], [0], [1], [0, 0, 1, 1], [], []>} : vector<128x64xf32>, vector<64x64xf32>, vector<128x64xf32> -> vector<128x64xf32>
    %152 = arith.addf %146, %151 : vector<128x64xf32>
    %c0_189 = arith.constant 0 : index
    %c1_190 = arith.constant 1 : index
    %c0_191 = arith.constant 0 : index
    %c0_192 = arith.constant 0 : index
    %153 = vector.load %arg9[%c0_189, %c1_190, %c0_191, %c0_192] : memref<2x10x10x64xf32, #tpu.memory_space<vmem>>, vector<2x8x8x64xf32>
    %154 = vector.shape_cast %153 : vector<2x8x8x64xf32> to vector<128x64xf32>
    %c3_193 = arith.constant 3 : index
    %c0_194 = arith.constant 0 : index
    %c0_195 = arith.constant 0 : index
    %155 = vector.load %arg6[%c3_193, %c0_194, %c0_195] : memref<9x64x64xf32, #tpu.memory_space<vmem>>, vector<1x64x64xf32>
    %156 = vector.shape_cast %155 : vector<1x64x64xf32> to vector<64x64xf32>
    %cst_196 = arith.constant dense<0.000000e+00> : vector<128x64xf32>
    %157 = tpu.matmul %154, %156, %cst_196 {dimension_numbers = #tpu.dot_dimension_numbers<[1], [0], [0], [1], [0, 0, 1, 1], [], []>} : vector<128x64xf32>, vector<64x64xf32>, vector<128x64xf32> -> vector<128x64xf32>
    %158 = arith.addf %152, %157 : vector<128x64xf32>
    %c0_197 = arith.constant 0 : index
    %c1_198 = arith.constant 1 : index
    %c1_199 = arith.constant 1 : index
    %c0_200 = arith.constant 0 : index
    %159 = vector.load %arg9[%c0_197, %c1_198, %c1_199, %c0_200] : memref<2x10x10x64xf32, #tpu.memory_space<vmem>>, vector<2x8x8x64xf32>
    %160 = vector.shape_cast %159 : vector<2x8x8x64xf32> to vector<128x64xf32>
    %c4_201 = arith.constant 4 : index
    %c0_202 = arith.constant 0 : index
    %c0_203 = arith.constant 0 : index
    %161 = vector.load %arg6[%c4_201, %c0_202, %c0_203] : memref<9x64x64xf32, #tpu.memory_space<vmem>>, vector<1x64x64xf32>
    %162 = vector.shape_cast %161 : vector<1x64x64xf32> to vector<64x64xf32>
    %cst_204 = arith.constant dense<0.000000e+00> : vector<128x64xf32>
    %163 = tpu.matmul %160, %162, %cst_204 {dimension_numbers = #tpu.dot_dimension_numbers<[1], [0], [0], [1], [0, 0, 1, 1], [], []>} : vector<128x64xf32>, vector<64x64xf32>, vector<128x64xf32> -> vector<128x64xf32>
    %164 = arith.addf %158, %163 : vector<128x64xf32>
    %c0_205 = arith.constant 0 : index
    %c1_206 = arith.constant 1 : index
    %c2_207 = arith.constant 2 : index
    %c0_208 = arith.constant 0 : index
    %165 = vector.load %arg9[%c0_205, %c1_206, %c2_207, %c0_208] : memref<2x10x10x64xf32, #tpu.memory_space<vmem>>, vector<2x8x8x64xf32>
    %166 = vector.shape_cast %165 : vector<2x8x8x64xf32> to vector<128x64xf32>
    %c5_209 = arith.constant 5 : index
    %c0_210 = arith.constant 0 : index
    %c0_211 = arith.constant 0 : index
    %167 = vector.load %arg6[%c5_209, %c0_210, %c0_211] : memref<9x64x64xf32, #tpu.memory_space<vmem>>, vector<1x64x64xf32>
    %168 = vector.shape_cast %167 : vector<1x64x64xf32> to vector<64x64xf32>
    %cst_212 = arith.constant dense<0.000000e+00> : vector<128x64xf32>
    %169 = tpu.matmul %166, %168, %cst_212 {dimension_numbers = #tpu.dot_dimension_numbers<[1], [0], [0], [1], [0, 0, 1, 1], [], []>} : vector<128x64xf32>, vector<64x64xf32>, vector<128x64xf32> -> vector<128x64xf32>
    %170 = arith.addf %164, %169 : vector<128x64xf32>
    %c0_213 = arith.constant 0 : index
    %c2_214 = arith.constant 2 : index
    %c0_215 = arith.constant 0 : index
    %c0_216 = arith.constant 0 : index
    %171 = vector.load %arg9[%c0_213, %c2_214, %c0_215, %c0_216] : memref<2x10x10x64xf32, #tpu.memory_space<vmem>>, vector<2x8x8x64xf32>
    %172 = vector.shape_cast %171 : vector<2x8x8x64xf32> to vector<128x64xf32>
    %c6_217 = arith.constant 6 : index
    %c0_218 = arith.constant 0 : index
    %c0_219 = arith.constant 0 : index
    %173 = vector.load %arg6[%c6_217, %c0_218, %c0_219] : memref<9x64x64xf32, #tpu.memory_space<vmem>>, vector<1x64x64xf32>
    %174 = vector.shape_cast %173 : vector<1x64x64xf32> to vector<64x64xf32>
    %cst_220 = arith.constant dense<0.000000e+00> : vector<128x64xf32>
    %175 = tpu.matmul %172, %174, %cst_220 {dimension_numbers = #tpu.dot_dimension_numbers<[1], [0], [0], [1], [0, 0, 1, 1], [], []>} : vector<128x64xf32>, vector<64x64xf32>, vector<128x64xf32> -> vector<128x64xf32>
    %176 = arith.addf %170, %175 : vector<128x64xf32>
    %c0_221 = arith.constant 0 : index
    %c2_222 = arith.constant 2 : index
    %c1_223 = arith.constant 1 : index
    %c0_224 = arith.constant 0 : index
    %177 = vector.load %arg9[%c0_221, %c2_222, %c1_223, %c0_224] : memref<2x10x10x64xf32, #tpu.memory_space<vmem>>, vector<2x8x8x64xf32>
    %178 = vector.shape_cast %177 : vector<2x8x8x64xf32> to vector<128x64xf32>
    %c7_225 = arith.constant 7 : index
    %c0_226 = arith.constant 0 : index
    %c0_227 = arith.constant 0 : index
    %179 = vector.load %arg6[%c7_225, %c0_226, %c0_227] : memref<9x64x64xf32, #tpu.memory_space<vmem>>, vector<1x64x64xf32>
    %180 = vector.shape_cast %179 : vector<1x64x64xf32> to vector<64x64xf32>
    %cst_228 = arith.constant dense<0.000000e+00> : vector<128x64xf32>
    %181 = tpu.matmul %178, %180, %cst_228 {dimension_numbers = #tpu.dot_dimension_numbers<[1], [0], [0], [1], [0, 0, 1, 1], [], []>} : vector<128x64xf32>, vector<64x64xf32>, vector<128x64xf32> -> vector<128x64xf32>
    %182 = arith.addf %176, %181 : vector<128x64xf32>
    %c0_229 = arith.constant 0 : index
    %c2_230 = arith.constant 2 : index
    %c2_231 = arith.constant 2 : index
    %c0_232 = arith.constant 0 : index
    %183 = vector.load %arg9[%c0_229, %c2_230, %c2_231, %c0_232] : memref<2x10x10x64xf32, #tpu.memory_space<vmem>>, vector<2x8x8x64xf32>
    %184 = vector.shape_cast %183 : vector<2x8x8x64xf32> to vector<128x64xf32>
    %c8_233 = arith.constant 8 : index
    %c0_234 = arith.constant 0 : index
    %c0_235 = arith.constant 0 : index
    %185 = vector.load %arg6[%c8_233, %c0_234, %c0_235] : memref<9x64x64xf32, #tpu.memory_space<vmem>>, vector<1x64x64xf32>
    %186 = vector.shape_cast %185 : vector<1x64x64xf32> to vector<64x64xf32>
    %cst_236 = arith.constant dense<0.000000e+00> : vector<128x64xf32>
    %187 = tpu.matmul %184, %186, %cst_236 {dimension_numbers = #tpu.dot_dimension_numbers<[1], [0], [0], [1], [0, 0, 1, 1], [], []>} : vector<128x64xf32>, vector<64x64xf32>, vector<128x64xf32> -> vector<128x64xf32>
    %188 = arith.addf %182, %187 : vector<128x64xf32>
    %c0_237 = arith.constant 0 : index
    %c0_238 = arith.constant 0 : index
    %189 = vector.load %arg7[%c0_237, %c0_238] : memref<1x64xf32, #tpu.memory_space<vmem>>, vector<1x64xf32>
    %190 = vector.broadcast %189 : vector<1x64xf32> to vector<128x64xf32>
    %191 = arith.addf %188, %190 : vector<128x64xf32>
    %cst_239 = arith.constant 0.000000e+00 : f32
    %192 = vector.broadcast %cst_239 : f32 to vector<128x64xf32>
    %193 = arith.maximumf %191, %192 : vector<128x64xf32>
    %194 = arith.truncf %193 : vector<128x64xf32> to vector<128x64xbf16>
    %c0_240 = arith.constant 0 : index
    %c0_241 = arith.constant 0 : index
    %195 = vector.load %arg8[%c0_240, %c0_241] : memref<128x64xbf16, #tpu.memory_space<vmem>>, vector<128x64xbf16>
    tpu.vector_store %arg8[%c0_240, %c0_241], %194 {strides = array<i32>} : memref<128x64xbf16, #tpu.memory_space<vmem>>, vector<128x64xbf16>,
    return
  }
  func.func @transform_0(%arg0: i32) -> (i32, i32, i32, i32) {
    %c0_i32 = arith.constant 0 : i32
    %c0_i32_0 = arith.constant 0 : i32
    %c0_i32_1 = arith.constant 0 : i32
    %c0_i32_2 = arith.constant 0 : i32
    %c0_i32_3 = arith.constant 0 : i32
    return %c0_i32, %c0_i32_0, %c0_i32_1, %c0_i32_2 : i32, i32, i32, i32
  }
  func.func @transform_1(%arg0: i32) -> (i32, i32, i32) {
    %c0_i32 = arith.constant 0 : i32
    %c0_i32_0 = arith.constant 0 : i32
    %c0_i32_1 = arith.constant 0 : i32
    %c0_i32_2 = arith.constant 0 : i32
    return %c0_i32, %c0_i32_0, %c0_i32_1 : i32, i32, i32
  }
  func.func @transform_2(%arg0: i32) -> (i32, i32) {
    %c0_i32 = arith.constant 0 : i32
    %c0_i32_0 = arith.constant 0 : i32
    %c0_i32_1 = arith.constant 0 : i32
    return %c0_i32, %c0_i32_0 : i32, i32
  }
  func.func @transform_3(%arg0: i32) -> (i32, i32, i32) {
    %c0_i32 = arith.constant 0 : i32
    %c0_i32_0 = arith.constant 0 : i32
    %c0_i32_1 = arith.constant 0 : i32
    %c0_i32_2 = arith.constant 0 : i32
    return %c0_i32, %c0_i32_0, %c0_i32_1 : i32, i32, i32
  }
  func.func @transform_4(%arg0: i32) -> (i32, i32) {
    %c0_i32 = arith.constant 0 : i32
    %c0_i32_0 = arith.constant 0 : i32
    %c0_i32_1 = arith.constant 0 : i32
    return %c0_i32, %c0_i32_0 : i32, i32
  }
  func.func @transform_5(%arg0: i32) -> (i32, i32, i32) {
    %c0_i32 = arith.constant 0 : i32
    %c0_i32_0 = arith.constant 0 : i32
    %c0_i32_1 = arith.constant 0 : i32
    %c0_i32_2 = arith.constant 0 : i32
    return %c0_i32, %c0_i32_0, %c0_i32_1 : i32, i32, i32
  }
  func.func @transform_6(%arg0: i32) -> (i32, i32) {
    %c0_i32 = arith.constant 0 : i32
    %c0_i32_0 = arith.constant 0 : i32
    %c0_i32_1 = arith.constant 0 : i32
    return %c0_i32, %c0_i32_0 : i32, i32
  }
  func.func @transform_7(%arg0: i32) -> (i32, i32) {
    %c0_i32 = arith.constant 0 : i32
    %c0_i32_0 = arith.constant 0 : i32
    %c0_i32_1 = arith.constant 0 : i32
    return %c0_i32, %c0_i32_0 : i32, i32
  }
}

module attributes {stable_mosaic.version = 11 : i64} {
  func.func @_head_kernel(%arg0: i32, %arg1: memref<2x4096xbf16, #tpu.memory_space<vmem>>, %arg2: memref<4096x512xbf16, #tpu.memory_space<vmem>>, %arg3: memref<1x512xf32, #tpu.memory_space<vmem>>, %arg4: memref<512x256xbf16, #tpu.memory_space<vmem>>, %arg5: memref<1x256xf32, #tpu.memory_space<vmem>>, %arg6: memref<256x5xf32, #tpu.memory_space<vmem>>, %arg7: memref<1x5xf32, #tpu.memory_space<vmem>>, %arg8: memref<2x4xf32, #tpu.memory_space<vmem>>) attributes {dimension_semantics = [#tpu.dimension_semantics<arbitrary>], iteration_bounds = array<i64: 1>, scalar_prefetch = 0 : i64, scratch_operands = 0 : i64, tpu.core_type = #tpu.core_type<tc>, window_params = [{pipeline_mode = #tpu.pipeline_mode<synchronous>, transform_indices = @transform_0, window_bounds = array<i64: 2, 4096>}, {pipeline_mode = #tpu.pipeline_mode<synchronous>, transform_indices = @transform_1, window_bounds = array<i64: 4096, 512>}, {pipeline_mode = #tpu.pipeline_mode<synchronous>, transform_indices = @transform_2, window_bounds = array<i64: 1, 512>}, {pipeline_mode = #tpu.pipeline_mode<synchronous>, transform_indices = @transform_3, window_bounds = array<i64: 512, 256>}, {pipeline_mode = #tpu.pipeline_mode<synchronous>, transform_indices = @transform_4, window_bounds = array<i64: 1, 256>}, {pipeline_mode = #tpu.pipeline_mode<synchronous>, transform_indices = @transform_5, window_bounds = array<i64: 256, 5>}, {pipeline_mode = #tpu.pipeline_mode<synchronous>, transform_indices = @transform_6, window_bounds = array<i64: 1, 5>}, {pipeline_mode = #tpu.pipeline_mode<synchronous>, transform_indices = @transform_7, window_bounds = array<i64: 2, 4>}]} {
    %c0 = arith.constant 0 : index
    %c0_0 = arith.constant 0 : index
    %0 = vector.load %arg1[%c0, %c0_0] : memref<2x4096xbf16, #tpu.memory_space<vmem>>, vector<2x4096xbf16>
    %c0_1 = arith.constant 0 : index
    %c0_2 = arith.constant 0 : index
    %1 = vector.load %arg2[%c0_1, %c0_2] : memref<4096x512xbf16, #tpu.memory_space<vmem>>, vector<4096x512xbf16>
    %cst = arith.constant dense<0.000000e+00> : vector<2x512xf32>
    %2 = tpu.matmul %0, %1, %cst {dimension_numbers = #tpu.dot_dimension_numbers<[1], [0], [0], [1], [0, 0, 1, 1], [], []>} : vector<2x4096xbf16>, vector<4096x512xbf16>, vector<2x512xf32> -> vector<2x512xf32>
    %c0_3 = arith.constant 0 : index
    %c0_4 = arith.constant 0 : index
    %3 = vector.load %arg3[%c0_3, %c0_4] : memref<1x512xf32, #tpu.memory_space<vmem>>, vector<1x512xf32>
    %4 = vector.broadcast %3 : vector<1x512xf32> to vector<2x512xf32>
    %5 = arith.addf %2, %4 : vector<2x512xf32>
    %cst_5 = arith.constant 0.000000e+00 : f32
    %6 = vector.broadcast %cst_5 : f32 to vector<2x512xf32>
    %7 = arith.maximumf %5, %6 : vector<2x512xf32>
    %8 = arith.truncf %7 : vector<2x512xf32> to vector<2x512xbf16>
    %c0_6 = arith.constant 0 : index
    %c0_7 = arith.constant 0 : index
    %9 = vector.load %arg4[%c0_6, %c0_7] : memref<512x256xbf16, #tpu.memory_space<vmem>>, vector<512x256xbf16>
    %cst_8 = arith.constant dense<0.000000e+00> : vector<2x256xf32>
    %10 = tpu.matmul %8, %9, %cst_8 {dimension_numbers = #tpu.dot_dimension_numbers<[1], [0], [0], [1], [0, 0, 1, 1], [], []>} : vector<2x512xbf16>, vector<512x256xbf16>, vector<2x256xf32> -> vector<2x256xf32>
    %c0_9 = arith.constant 0 : index
    %c0_10 = arith.constant 0 : index
    %11 = vector.load %arg5[%c0_9, %c0_10] : memref<1x256xf32, #tpu.memory_space<vmem>>, vector<1x256xf32>
    %12 = vector.broadcast %11 : vector<1x256xf32> to vector<2x256xf32>
    %13 = arith.addf %10, %12 : vector<2x256xf32>
    %cst_11 = arith.constant 0.000000e+00 : f32
    %14 = vector.broadcast %cst_11 : f32 to vector<2x256xf32>
    %15 = arith.maximumf %13, %14 : vector<2x256xf32>
    %c0_12 = arith.constant 0 : index
    %c0_13 = arith.constant 0 : index
    %16 = vector.load %arg6[%c0_12, %c0_13] : memref<256x5xf32, #tpu.memory_space<vmem>>, vector<256x5xf32>
    %cst_14 = arith.constant dense<0.000000e+00> : vector<2x5xf32>
    %17 = tpu.matmul %15, %16, %cst_14 {dimension_numbers = #tpu.dot_dimension_numbers<[1], [0], [0], [1], [0, 0, 1, 1], [], []>} : vector<2x256xf32>, vector<256x5xf32>, vector<2x5xf32> -> vector<2x5xf32>
    %c0_15 = arith.constant 0 : index
    %c0_16 = arith.constant 0 : index
    %18 = vector.load %arg7[%c0_15, %c0_16] : memref<1x5xf32, #tpu.memory_space<vmem>>, vector<1x5xf32>
    %19 = vector.broadcast %18 : vector<1x5xf32> to vector<2x5xf32>
    %20 = arith.addf %17, %19 : vector<2x5xf32>
    %21 = vector.extract_strided_slice %20 {offsets = [0, 0], sizes = [2, 1], strides = [1, 1]} : vector<2x5xf32> to vector<2x1xf32>
    %22 = vector.extract_strided_slice %20 {offsets = [0, 1], sizes = [2, 4], strides = [1, 1]} : vector<2x5xf32> to vector<2x4xf32>
    %cst_17 = arith.constant dense<0.000000e+00> : vector<2xf32>
    %23 = vector.multi_reduction <add>, %22, %cst_17 [1] : vector<2x4xf32> to vector<2xf32>
    %24 = vector.shape_cast %23 : vector<2xf32> to vector<2x1xf32>
    %cst_18 = arith.constant 4.000000e+00 : f32
    %25 = vector.broadcast %cst_18 : f32 to vector<2x1xf32>
    %26 = arith.divf %24, %25 : vector<2x1xf32>
    %27 = vector.broadcast %26 : vector<2x1xf32> to vector<2x4xf32>
    %28 = arith.subf %22, %27 : vector<2x4xf32>
    %29 = vector.broadcast %21 : vector<2x1xf32> to vector<2x4xf32>
    %30 = arith.addf %29, %28 : vector<2x4xf32>
    %c0_19 = arith.constant 0 : index
    %c0_20 = arith.constant 0 : index
    %31 = vector.load %arg8[%c0_19, %c0_20] : memref<2x4xf32, #tpu.memory_space<vmem>>, vector<2x4xf32>
    tpu.vector_store %arg8[%c0_19, %c0_20], %30 {strides = array<i32>} : memref<2x4xf32, #tpu.memory_space<vmem>>, vector<2x4xf32>,
    return
  }
  func.func @transform_0(%arg0: i32) -> (i32, i32) {
    %c0_i32 = arith.constant 0 : i32
    %c0_i32_0 = arith.constant 0 : i32
    %c0_i32_1 = arith.constant 0 : i32
    return %c0_i32, %c0_i32_0 : i32, i32
  }
  func.func @transform_1(%arg0: i32) -> (i32, i32) {
    %c0_i32 = arith.constant 0 : i32
    %c0_i32_0 = arith.constant 0 : i32
    %c0_i32_1 = arith.constant 0 : i32
    return %c0_i32, %c0_i32_0 : i32, i32
  }
  func.func @transform_2(%arg0: i32) -> (i32, i32) {
    %c0_i32 = arith.constant 0 : i32
    %c0_i32_0 = arith.constant 0 : i32
    %c0_i32_1 = arith.constant 0 : i32
    return %c0_i32, %c0_i32_0 : i32, i32
  }
  func.func @transform_3(%arg0: i32) -> (i32, i32) {
    %c0_i32 = arith.constant 0 : i32
    %c0_i32_0 = arith.constant 0 : i32
    %c0_i32_1 = arith.constant 0 : i32
    return %c0_i32, %c0_i32_0 : i32, i32
  }
  func.func @transform_4(%arg0: i32) -> (i32, i32) {
    %c0_i32 = arith.constant 0 : i32
    %c0_i32_0 = arith.constant 0 : i32
    %c0_i32_1 = arith.constant 0 : i32
    return %c0_i32, %c0_i32_0 : i32, i32
  }
  func.func @transform_5(%arg0: i32) -> (i32, i32) {
    %c0_i32 = arith.constant 0 : i32
    %c0_i32_0 = arith.constant 0 : i32
    %c0_i32_1 = arith.constant 0 : i32
    return %c0_i32, %c0_i32_0 : i32, i32
  }
  func.func @transform_6(%arg0: i32) -> (i32, i32) {
    %c0_i32 = arith.constant 0 : i32
    %c0_i32_0 = arith.constant 0 : i32
    %c0_i32_1 = arith.constant 0 : i32
    return %c0_i32, %c0_i32_0 : i32, i32
  }
  func.func @transform_7(%arg0: i32) -> (i32, i32) {
    %c0_i32 = arith.constant 0 : i32
    %c0_i32_0 = arith.constant 0 : i32
    %c0_i32_1 = arith.constant 0 : i32
    return %c0_i32, %c0_i32_0 : i32, i32
  }
}

</mosaic_0001>

<bundles_post_ra>
// kernel: forward.2
= control target key start
LH: loop header
LB: loop body
LE: loop exit
PB: predicated region body
PF: predicated region fallthrough
CT: control target
= control target key end

     0   :  { %12 = vsyncpa [#allocation4], 0  ;;  %s10856_s0 = inlined_call_operand.vmem [shape: s8[2,8,8,3], index: 0, kind: input, shape index: {}]   ;;  %s10857_s1 = inlined_call_operand.hbm [shape: f32[9,3,32], index: 1, kind: input, shape index: {}]   ;;  %s10858_s2 = inlined_call_operand.hbm [shape: f32[1,32], index: 2, kind: input, shape index: {}]   ;;  %s10859_s3 = inlined_call_operand.hbm [shape: f32[9,32,64], index: 3, kind: input, shape index: {}]   ;;  %s10860_s4 = inlined_call_operand.hbm [shape: f32[1,64], index: 4, kind: input, shape index: {}]   ;;  %s10861_s5 = inlined_call_operand.hbm [shape: f32[9,64,64], index: 5, kind: input, shape index: {}]   ;;  %s10862_s6 = inlined_call_operand.hbm [shape: f32[1,64], index: 6, kind: input, shape index: {}]   ;;  %s10863_s7 = inlined_call_operand.vmem [shape: bf16[128,64], index: 7, kind: output, shape index: {}]  }
   0x1   :  { %13 = vsyncpa [#allocation6], 0 }
   0x2   :  { %14 = vsyncpa [#allocation9], 0 }
   0x3   :  { %15 = vsyncpa [#allocation12], 0  ;;  %s9329_s24 = smov [#allocation5]   ;;  %s9330_s26 = smov [#allocation8]  }
   0x4   :  { %s36_s25 = sshll.u32 %s9329_s24, 4  ;;  %s58_s27 = sshll.u32 %s9330_s26, 4  ;;  %s37_s25 = int_to_ptr.vmem [resolvable:$true] %s36_s25  ;;  %s59_s27 = int_to_ptr.vmem [resolvable:$true] %s58_s27 }
   0x5   :  { %s9189_s30 = scalar_lea.hbm %s10858_s2, 16 }
   0x6   :  { %p9190_p0 = scmp.ne.s32.totalorder %s10858_s2, %s9189_s30  ;;  %p9193_p1 = scmp.lt.u32.totalorder %s9189_s30, %s10858_s2 }
   0x8   :  { %p9195_p2 = pnand %p9193_p1, %p9190_p0 }
   0xa   :  { %9198 = shalt.err (!%p9195_p2)
}
   0xb   :  { %s9199_s12 = scalar_lea.vmem %s37_s25, 16  ;;  %s9203_s13 = scalar_lea.vmem %s37_s25, 32 }
   0xc   :  { %p9200_p3 = scmp.ne.s32.totalorder %s37_s25, %s9199_s12  ;;  %p9204_p4 = scmp.lt.s32.totalorder %s37_s25, %s37_s25 }
   0xd   :  { %p9205_p5 = scmp.lt.s32.totalorder %s9203_s13, %s9199_s12 }
   0xf   :  { %p9206_p6 = por %p9205_p5, %p9204_p4 }
  0x11   :  { %p9207_p7 = pnand %p9206_p6, %p9200_p3 }
  0x13   :  { %9210 = shalt.err (!%p9207_p7)
}
  0x14   :  { %39 = dma.hbm_to_vmem [thread:$0]  %s10858_s2, 16, %s37_s25, [#allocation6]  }
  0x15   :  { %s9211_s18 = scalar_lea.hbm %s10860_s4, 16 }
  0x16   :  { %p9212_p8 = scmp.ne.s32.totalorder %s10860_s4, %s9211_s18  ;;  %p9215_p9 = scmp.lt.u32.totalorder %s9211_s18, %s10860_s4 }
  0x18   :  { %p9217_p10 = pnand %p9215_p9, %p9212_p8 }
  0x1a   :  { %9220 = shalt.err (!%p9217_p10)
}
  0x1b   :  { %s9221_s23 = scalar_lea.vmem %s59_s27, 16  ;;  %s9225_s24 = scalar_lea.vmem %s59_s27, 32 }
  0x1c   :  { %p9222_p11 = scmp.ne.s32.totalorder %s59_s27, %s9221_s23  ;;  %p9226_p12 = scmp.lt.s32.totalorder %s59_s27, %s59_s27 }
  0x1d   :  { %p9227_p13 = scmp.lt.s32.totalorder %s9225_s24, %s9221_s23 }
  0x1f   :  { %p9228_p0 = por %p9227_p13, %p9226_p12 }
  0x21   :  { %p9229_p1 = pnand %p9228_p0, %p9222_p11 }
  0x23   :  { %9232 = shalt.err (!%p9229_p1)
}
  0x24   :  { %61 = dma.hbm_to_vmem [thread:$0]  %s10860_s4, 16, %s59_s27, [#allocation9]  }
  0x25   :  { %s9331_s26 = smov [#allocation3]   ;;  %s9233_s8 = scalar_lea.hbm %s10857_s1, 576 }
  0x26   :  { %s23_s28 = sshll.u32 %s9331_s26, 4  ;;  %p9234_p2 = scmp.ne.s32.totalorder %s10857_s1, %s9233_s8  ;;  %s24_s28 = int_to_ptr.vmem [resolvable:$true] %s23_s28 }
  0x27   :  { %p9237_p3 = scmp.lt.u32.totalorder %s9233_s8, %s10857_s1 }
  0x29   :  { %p9239_p4 = pnand %p9237_p3, %p9234_p2 }
  0x2b   :  { %9242 = shalt.err (!%p9239_p4)
}
  0x2c   :  { %s9243_s13 = scalar_lea.vmem %s24_s28, 576  ;;  %p9248_p6 = scmp.lt.s32.totalorder %s24_s28, %s24_s28 }
  0x2d   :  { %p9244_p5 = scmp.ne.s32.totalorder %s24_s28, %s9243_s13  ;;  %p9249_p7 = scmp.lt.s32.totalorder %s9243_s13, %s9243_s13 }
  0x2f   :  { %p9250_p8 = por %p9249_p7, %p9248_p6 }
  0x31   :  { %p9251_p9 = pnand %p9250_p8, %p9244_p5 }
  0x33   :  { %9254 = shalt.err (!%p9251_p9)
}
  0x34   :  { %s9332_s4 = smov 64   ;;  %s9333_s27 = smov 4  }
  0x35   :  { %29 = dma.hbm_to_vmem [thread:$0]  %s10857_s1, 576, %s24_s28, [#allocation4], %s9332_s4, %s9332_s4, %s9333_s27  }
  0x36   :  { %s9334_s16 = smov [#allocation7]   ;;  %s9255_s20 = scalar_lea.hbm %s10859_s3, 4608 }
  0x37   :  { %s45_s17 = sshll.u32 %s9334_s16, 4  ;;  %p9256_p10 = scmp.ne.s32.totalorder %s10859_s3, %s9255_s20  ;;  %s46_s17 = int_to_ptr.vmem [resolvable:$true] %s45_s17 }
  0x38   :  { %p9259_p11 = scmp.lt.u32.totalorder %s9255_s20, %s10859_s3 }
  0x3a   :  { %p9261_p12 = pnand %p9259_p11, %p9256_p10 }
  0x3c   :  { %9264 = shalt.err (!%p9261_p12)
}
  0x3d   :  { %s9265_s2 = scalar_lea.vmem %s46_s17, 4608  ;;  %p9270_p0 = scmp.lt.s32.totalorder %s46_s17, %s46_s17 }
  0x3e   :  { %p9266_p13 = scmp.ne.s32.totalorder %s46_s17, %s9265_s2  ;;  %p9271_p1 = scmp.lt.s32.totalorder %s9265_s2, %s9265_s2 }
  0x40   :  { %p9272_p2 = por %p9271_p1, %p9270_p0 }
  0x42   :  { %p9273_p3 = pnand %p9272_p2, %p9266_p13 }
  0x44   :  { %9276 = shalt.err (!%p9273_p3)
}
  0x45   :  { %s9335_s1 = smov 128   ;;  %s9336_s25 = smov 8  }
  0x46   :  { %51 = dma.hbm_to_vmem [thread:$0]  %s10859_s3, 4608, %s46_s17, [#allocation6], %s9335_s1, %s9335_s1, %s9336_s25  }
  0x47   :  { %s9337_s29 = smov [#allocation10]   ;;  %s9338_s8 = smov [#allocation11]  }
  0x48   :  { %s67_s30 = sshll.u32 %s9337_s29, 4  ;;  %s80_s9 = sshll.u32 %s9338_s8, 4  ;;  %s68_s30 = int_to_ptr.vmem [resolvable:$true] %s67_s30  ;;  %s81_s9 = int_to_ptr.vmem [resolvable:$true] %s80_s9 }
  0x49   :  { %s9277_s12 = scalar_lea.hbm %s10861_s5, 9216 }
  0x4a   :  { %p9278_p4 = scmp.ne.s32.totalorder %s10861_s5, %s9277_s12  ;;  %p9281_p5 = scmp.lt.u32.totalorder %s9277_s12, %s10861_s5 }
  0x4c   :  { %p9283_p6 = pnand %p9281_p5, %p9278_p4 }
  0x4e   :  { %9286 = shalt.err (!%p9283_p6)
}
  0x4f   :  { %s9287_s3 = scalar_lea.vmem %s68_s30, 9216  ;;  %p9292_p8 = scmp.lt.s32.totalorder %s68_s30, %s68_s30 }
  0x50   :  { %p9288_p7 = scmp.ne.s32.totalorder %s68_s30, %s9287_s3  ;;  %p9293_p9 = scmp.lt.s32.totalorder %s9287_s3, %s9287_s3 }
  0x52   :  { %p9294_p10 = por %p9293_p9, %p9292_p8 }
  0x54   :  { %p9295_p11 = pnand %p9294_p10, %p9288_p7 }
  0x56   :  { %9298 = shalt.err (!%p9295_p11)
}
  0x57   :  { %73 = dma.hbm_to_vmem [thread:$0]  %s10861_s5, 9216, %s68_s30, [#allocation9], %s9335_s1, %s9335_s1, %s9336_s25  }
  0x58   :  { %s9299_s19 = scalar_lea.hbm %s10862_s6, 16 }
  0x59   :  { %p9300_p12 = scmp.ne.s32.totalorder %s10862_s6, %s9299_s19  ;;  %p9303_p13 = scmp.lt.u32.totalorder %s9299_s19, %s10862_s6 }
  0x5b   :  { %p9305_p0 = pnand %p9303_p13, %p9300_p12 }
  0x5d   :  { %9308 = shalt.err (!%p9305_p0)
}
  0x5e   :  { %s9309_s24 = scalar_lea.vmem %s81_s9, 16  ;;  %s9313_s2 = scalar_lea.vmem %s81_s9, 32 }
  0x5f   :  { %p9310_p1 = scmp.ne.s32.totalorder %s81_s9, %s9309_s24  ;;  %p9314_p2 = scmp.lt.s32.totalorder %s81_s9, %s81_s9 }
  0x60   :  { %p9315_p3 = scmp.lt.s32.totalorder %s9313_s2, %s9309_s24 }
  0x62   :  { %p9316_p4 = por %p9315_p3, %p9314_p2 }
  0x64   :  { %p9317_p5 = pnand %p9316_p4, %p9310_p1 }
  0x66   :  { %9320 = shalt.err (!%p9317_p5)
}
  0x67   :  { %83 = dma.hbm_to_vmem [thread:$0]  %s10862_s6, 16, %s81_s9, [#allocation12]  }
  0x68   :  { %9321 = dma.done.wait [#allocation4], 576  }
  0x69   :  { %9322 = vsyncadd [#allocation4], 4294966720 }
  0x6a   :  { %9323 = dma.done.wait [#allocation6], 4624  }
  0x6b   :  { %9324 = vsyncadd [#allocation6], 4294962672 }
  0x6c   :  { %9325 = dma.done.wait [#allocation9], 9232  }
  0x6d   :  { %9326 = vsyncadd [#allocation9], 4294958064 }
  0x6e   :  { %9327 = dma.done.wait [#allocation12], 16  }
  0x6f   :  { %9328 = vsyncadd [#allocation12], 4294967280  ;;  %vm102_vm0 = vcmask 523264   ;;  %vm104_vm1 = vcmask 517120   ;;  %v9339_v0 = vmov 0.0   ;;  %vm325_vm2 = vcmask 1042432  }
  0x70   :  { %103 = vst.msk [vmem:[#allocation2] sm:$0xff] %vm102_vm0, %v9339_v0  ;;  %106 = vst.msk [vmem:[#allocation2 + $0x10] sm:$0xff] %vm102_vm0, %v9339_v0  ;;  %v276_v1 = vld [vmem:[#allocation3 + $0x4] sm:$0x7]  ;;  %v9492_v2 = vld [vmem:[#allocation3 + $0x10] sm:$0x7] }
  0x71   :  { %105 = vst.msk [vmem:[#allocation2 + $0x8] sm:$0x3] %vm104_vm1, %v9339_v0  ;;  %107 = vst.msk [vmem:[#allocation2 + $0x18] sm:$0x3] %vm104_vm1, %v9339_v0  ;;  %vm225_vm3 = vcmask 23552   ;;  %v7107_v3 = vld [vmem:[%s10856_s0] sm:$0xff]   ;;  %7687 = vmatprep.subr.msk.mxu1 %vm325_vm2, %v276_v1  ;;  %7791 = vmatprep.subr.msk.mxu0 %vm325_vm2, %v9492_v2 }
  0x72   :  { %108 = vst.msk [vmem:[#allocation2 + $0x20] sm:$0xff] %vm102_vm0, %v9339_v0  ;;  %110 = vst.msk [vmem:[#allocation2 + $0x30] sm:$0xff] %vm102_vm0, %v9339_v0  ;;  %v7108_v5 = vunpack.c.0.s8 %v7107_v3  ;;  %v9502_v6 = vld [vmem:[#allocation3] sm:$0x7]  ;;  %v9504_v7 = vld [vmem:[#allocation3 + $0x14] sm:$0x7]  ;;  %v7109_v8 = vunpack.c.1.s8 %v7107_v3  ;;  %v7112_v9 = vunpack.c.2.s8 %v7107_v3  ;;  %v7113_v10 = vunpack.c.3.s8 %v7107_v3  ;;  %7688 = vmatpush3.msk.msra.mxu1 %vm325_vm2, %v276_v1  ;;  %7792 = vmatpush3.msk.msra.mxu0 %vm325_vm2, %v9492_v2 }
  0x73   :  { %109 = vst.msk [vmem:[#allocation2 + $0x28] sm:$0x3] %vm104_vm1, %v9339_v0  ;;  %111 = vst.msk [vmem:[#allocation2 + $0x38] sm:$0x3] %vm104_vm1, %v9339_v0  ;;  %v9172_v11 = vld [vmem:[%s10856_s0 + $0x8] sm:$0xff]   ;;  %7713 = vmatprep.subr.msk.mxu1 %vm325_vm2, %v9502_v6  ;;  %7817 = vmatprep.subr.msk.mxu0 %vm325_vm2, %v9504_v7  ;;  %v9174_v20 = vld [vmem:[%s10856_s0 + $0x10] sm:$0xff]  }
  0x74   :  { %112 = vst.msk [vmem:[#allocation2 + $0x40] sm:$0xff] %vm102_vm0, %v9339_v0  ;;  %114 = vst.msk [vmem:[#allocation2 + $0x50] sm:$0xff] %vm102_vm0, %v9339_v0  ;;  %v176_v12 = vand.u32 255, %v7108_v5  ;;  %v177_v13 = vand.u32 255, %v7109_v8  ;;  %v178_v14 = vand.u32 255, %v7112_v9  ;;  %v179_v15 = vand.u32 255, %v7113_v10 }
  0x75   :  { %113 = vst.msk [vmem:[#allocation2 + $0x48] sm:$0x3] %vm104_vm1, %v9339_v0  ;;  %115 = vst.msk [vmem:[#allocation2 + $0x58] sm:$0x3] %vm104_vm1, %v9339_v0  ;;  %v7116_v16 = vunpack.c.0.s8 %v9172_v11  ;;  %v7117_v17 = vunpack.c.1.s8 %v9172_v11  ;;  %v7120_v18 = vunpack.c.2.s8 %v9172_v11  ;;  %v7121_v19 = vunpack.c.3.s8 %v9172_v11  ;;  %v9176_v41 = vld [vmem:[%s10856_s0 + $0x18] sm:$0xff]  }
  0x76   :  { %116 = vst.msk [vmem:[#allocation2 + $0x60] sm:$0xff] %vm102_vm0, %v9339_v0  ;;  %118 = vst.msk [vmem:[#allocation2 + $0x70] sm:$0xff] %vm102_vm0, %v9339_v0  ;;  %v192_v21 = vcvt.s32.f32 %v176_v12  ;;  %v193_v22 = vcvt.s32.f32 %v177_v13  ;;  %v194_v23 = vcvt.s32.f32 %v178_v14  ;;  %v195_v24 = vcvt.s32.f32 %v179_v15  ;;  %v1608_v12 = vld [vmem:[#allocation3 + $0x18] sm:$0x7] }
  0x77   :  { %117 = vst.msk [vmem:[#allocation2 + $0x68] sm:$0x3] %vm104_vm1, %v9339_v0  ;;  %119 = vst.msk [vmem:[#allocation2 + $0x78] sm:$0x3] %vm104_vm1, %v9339_v0  ;;  %v180_v25 = vand.u32 255, %v7116_v16  ;;  %v181_v26 = vand.u32 255, %v7117_v17  ;;  %v7124_v32 = vunpack.c.0.s8 %v9174_v20  ;;  %v7125_v39 = vunpack.c.1.s8 %v9174_v20 }
  0x78   :  { %120 = vst.msk [vmem:[#allocation2 + $0x80] sm:$0xff] %vm102_vm0, %v9339_v0  ;;  %122 = vst.msk [vmem:[#allocation2 + $0x90] sm:$0xff] %vm102_vm0, %v9339_v0  ;;  %v9500_v4 = vld [vmem:[#allocation2 + $0x1] sm:$0xff]  ;;  %v182_v27 = vand.u32 255, %v7120_v18  ;;  %v183_v28 = vand.u32 255, %v7121_v19  ;;  %v7128_v40 = vunpack.c.2.s8 %v9174_v20  ;;  %v7129_v45 = vunpack.c.3.s8 %v9174_v20 }
  0x79   :  { %121 = vst.msk [vmem:[#allocation2 + $0x88] sm:$0x3] %vm104_vm1, %v9339_v0  ;;  %123 = vst.msk [vmem:[#allocation2 + $0x98] sm:$0x3] %vm104_vm1, %v9339_v0  ;;  %7689 = vmatprep.mubr.msk.f32.mxu1 %vm225_vm3, %v9500_v4  ;;  %v208_v29 = vmul.f32 0.003921569, %v192_v21  ;;  %v196_v34 = vcvt.s32.f32 %v180_v25  ;;  %v197_v35 = vcvt.s32.f32 %v181_v26  ;;  %v7132_v51 = vunpack.c.0.s8 %v9176_v41 }
  0x7a   :  { %124 = vst.msk [vmem:[#allocation2 + $0xa0] sm:$0xff] %vm102_vm0, %v9339_v0  ;;  %126 = vst.msk [vmem:[#allocation2 + $0xb0] sm:$0xff] %vm102_vm0, %v9339_v0  ;;  %v209_v30 = vmul.f32 0.003921569, %v193_v22  ;;  %v210_v31 = vmul.f32 0.003921569, %v194_v23  ;;  %v198_v36 = vcvt.s32.f32 %v182_v27  ;;  %v199_v37 = vcvt.s32.f32 %v183_v28 }
  0x7b   :  { %125 = vst.msk [vmem:[#allocation2 + $0xa8] sm:$0x3] %vm104_vm1, %v9339_v0  ;;  %127 = vst.msk [vmem:[#allocation2 + $0xb8] sm:$0x3] %vm104_vm1, %v9339_v0  ;;  %v211_v33 = vmul.f32 0.003921569, %v195_v24  ;;  %v7133_v52 = vunpack.c.1.s8 %v9176_v41  ;;  %v7136_v53 = vunpack.c.2.s8 %v9176_v41  ;;  %v7137_v57 = vunpack.c.3.s8 %v9176_v41 }
  0x7c   :  { %128 = vst.msk [vmem:[#allocation2 + $0xc0] sm:$0xff] %vm102_vm0, %v9339_v0  ;;  %130 = vst.msk [vmem:[#allocation2 + $0xd0] sm:$0xff] %vm102_vm0, %v9339_v0  ;;  %v184_v38 = vand.u32 255, %v7124_v32  ;;  %v212_v42 = vmul.f32 0.003921569, %v196_v34  ;;  %v185_v48 = vand.u32 255, %v7125_v39 }
  0x7d   :  { %129 = vst.msk [vmem:[#allocation2 + $0xc8] sm:$0x3] %vm104_vm1, %v9339_v0  ;;  %131 = vst.msk [vmem:[#allocation2 + $0xd8] sm:$0x3] %vm104_vm1, %v9339_v0  ;;  %v213_v43 = vmul.f32 0.003921569, %v197_v35 }
  0x7e   :  { %132 = vst.msk [vmem:[#allocation2 + $0xe0] sm:$0xff] %vm102_vm0, %v9339_v0  ;;  %134 = vst.msk [vmem:[#allocation2 + $0xf0] sm:$0xff] %vm102_vm0, %v9339_v0  ;;  %v214_v44 = vmul.f32 0.003921569, %v198_v36  ;;  %v215_v46 = vmul.f32 0.003921569, %v199_v37  ;;  %v200_v47 = vcvt.s32.f32 %v184_v38  ;;  %v201_v55 = vcvt.s32.f32 %v185_v48 }
  0x7f   :  { %133 = vst.msk [vmem:[#allocation2 + $0xe8] sm:$0x3] %vm104_vm1, %v9339_v0  ;;  %135 = vst.msk [vmem:[#allocation2 + $0xf8] sm:$0x3] %vm104_vm1, %v9339_v0  ;;  %v186_v49 = vand.u32 255, %v7128_v40  ;;  %v187_v50 = vand.u32 255, %v7129_v45 }
  0x80   :  { %136 = vst.msk [vmem:[#allocation2 + $0x100] sm:$0xff] %vm102_vm0, %v9339_v0  ;;  %138 = vst.msk [vmem:[#allocation2 + $0x110] sm:$0xff] %vm102_vm0, %v9339_v0  ;;  %v216_v54 = vmul.f32 0.003921569, %v200_v47  ;;  %v188_v59 = vand.u32 255, %v7132_v51  ;;  %v189_v60 = vand.u32 255, %v7133_v52 }
  0x81   :  { %137 = vst.msk [vmem:[#allocation2 + $0x108] sm:$0x3] %vm104_vm1, %v9339_v0  ;;  %139 = vst.msk [vmem:[#allocation2 + $0x118] sm:$0x3] %vm104_vm1, %v9339_v0  ;;  %v202_v56 = vcvt.s32.f32 %v186_v49  ;;  %v203_v58 = vcvt.s32.f32 %v187_v50  ;;  %v190_v61 = vand.u32 255, %v7136_v53  ;;  %v9656_v39 = vld [vmem:[#allocation2] sm:$0xff] }
  0x82   :  { %140 = vst.msk [vmem:[#allocation2 + $0x120] sm:$0xff] %vm102_vm0, %v9339_v0  ;;  %142 = vst.msk [vmem:[#allocation2 + $0x130] sm:$0xff] %vm102_vm0, %v9339_v0  ;;  %v217_v62 = vmul.f32 0.003921569, %v201_v55  ;;  %v204_v8 = vcvt.s32.f32 %v188_v59  ;;  %v205_v9 = vcvt.s32.f32 %v189_v60  ;;  %v9546_v16 = vld [vmem:[#allocation3 + $0x8] sm:$0x7] }
  0x83   :  { %141 = vst.msk [vmem:[#allocation2 + $0x128] sm:$0x3] %vm104_vm1, %v9339_v0  ;;  %143 = vst.msk [vmem:[#allocation2 + $0x138] sm:$0x3] %vm104_vm1, %v9339_v0  ;;  %v218_v63 = vmul.f32 0.003921569, %v202_v56  ;;  %v206_v10 = vcvt.s32.f32 %v190_v61 }
  0x84   :  { %226 = vst.msk [vmem:[#allocation2 + $0x11] sm:$0xff] %vm225_vm3, %v208_v29  ;;  %227 = vst.msk [vmem:[#allocation2 + $0x21] sm:$0xff] %vm225_vm3, %v209_v30  ;;  %v191_v0 = vand.u32 255, %v7137_v57  ;;  %v219_v5 = vmul.f32 0.003921569, %v203_v58  ;;  %v9587_v22 = vld [vmem:[#allocation2 + $0xa1] sm:$0xff] }
  0x85   :  { %228 = vst.msk [vmem:[#allocation2 + $0x31] sm:$0xff] %vm225_vm3, %v210_v31  ;;  %229 = vst.msk [vmem:[#allocation2 + $0x41] sm:$0xff] %vm225_vm3, %v211_v33  ;;  %v220_v14 = vmul.f32 0.003921569, %v204_v8  ;;  %v221_v15 = vmul.f32 0.003921569, %v205_v9 }
  0x86   :  { %230 = vst.msk [vmem:[#allocation2 + $0x51] sm:$0xff] %vm225_vm3, %v212_v42  ;;  %231 = vst.msk [vmem:[#allocation2 + $0x61] sm:$0xff] %vm225_vm3, %v213_v43  ;;  %v207_v13 = vcvt.s32.f32 %v191_v0  ;;  %v222_v18 = vmul.f32 0.003921569, %v206_v10  ;;  %v9609_v28 = vld [vmem:[#allocation3 + $0x1c] sm:$0x7] }
  0x87   :  { %232 = vst.msk [vmem:[#allocation2 + $0x71] sm:$0xff] %vm225_vm3, %v214_v44  ;;  %233 = vst.msk [vmem:[#allocation2 + $0x81] sm:$0xff] %vm225_vm3, %v215_v46  ;;  %v917_v45 = vld [vmem:[#allocation3 + $0xc] sm:$0x7]  ;;  %v9723_v56 = vld [vmem:[#allocation2 + $0xa0] sm:$0xff]  ;;  %vm2320_vm4 = vcmask 261120  }
  0x88   :  { %234 = vst.msk [vmem:[#allocation2 + $0xb1] sm:$0xff] %vm225_vm3, %v216_v54  ;;  %235 = vst.msk [vmem:[#allocation2 + $0xc1] sm:$0xff] %vm225_vm3, %v217_v62  ;;  %v223_v19 = vmul.f32 0.003921569, %v207_v13  ;;  %v2068_v59 = vld [vmem:[#allocation3 + $0x20] sm:$0x7] }
  0x89   :  { %236 = vst.msk [vmem:[#allocation2 + $0xd1] sm:$0xff] %vm225_vm3, %v218_v63  ;;  %237 = vst.msk [vmem:[#allocation2 + $0xe1] sm:$0xff] %vm225_vm3, %v219_v5  ;;  %v1598_v5 = vld [vmem:[#allocation2 + $0x90] sm:$0xff]  ;;  %v9776_v8 = vld [vmem:[#allocation2 + $0x2] sm:$0xff]  ;;  %vm6605_vm5 = vcmask 519168  }
  0x8a   :  { %238 = vst.msk [vmem:[#allocation2 + $0xf1] sm:$0xff] %vm225_vm3, %v220_v14  ;;  %239 = vst.msk [vmem:[#allocation2 + $0x101] sm:$0xff] %vm225_vm3, %v221_v15  ;;  %v1606_v10 = vld [vmem:[#allocation2 + $0x130] sm:$0xff]  ;;  %v2374_v15 = vld [vmem:[#allocation7 + $0x20] sm:$0xff] }
  0x8b   :  { %v260_v1 = vld [vmem:[#allocation2 + $0x11] sm:$0xff]  ;;  %v9533_v3 = vld [vmem:[#allocation2 + $0x21] sm:$0xff]  ;;  %240 = vst.msk [vmem:[#allocation2 + $0x111] sm:$0xff] %vm225_vm3, %v222_v18  ;;  %241 = vst.msk [vmem:[#allocation2 + $0x121] sm:$0xff] %vm225_vm3, %v223_v19 }
  0x8c   :  { %7690 = vmatmul.mubr.msk.f32.vlgmr.msra.gmra.mrb[0].mxu1 %vm225_vm3, %v260_v1  ;;  %7793 = vmatprep.mubr.msk.f32.mxu0 %vm225_vm3, %v260_v1  ;;  %v9537_v11 = vld [vmem:[#allocation2 + $0x31] sm:$0xff]  ;;  %v9552_v17 = vld [vmem:[#allocation2 + $0x41] sm:$0xff] }
  0x8d   :  { %7714 = vmatpush3.msk.msra.mxu1 %vm325_vm2, %v9502_v6  ;;  %7794 = vmatmul.mubr.msk.f32.vlgmr.msra.gmra.mrb[0].mxu0 %vm225_vm3, %v9533_v3  ;;  %v9556_v6 = vld [vmem:[#allocation2 + $0x51] sm:$0xff]  ;;  %v9601_v25 = vld [vmem:[#allocation2 + $0x22] sm:$0xff] }
  0x8e   :  { %7818 = vmatpush3.msk.msra.mxu0 %vm325_vm2, %v9504_v7  ;;  %7692 = vmatprep.mubr.msk.f32.mxu1 %vm225_vm3, %v9533_v3  ;;  %v9573_v7 = vld [vmem:[#allocation2 + $0x61] sm:$0xff]  ;;  %v9575_v20 = vld [vmem:[#allocation2 + $0x71] sm:$0xff] }
  0x8f   :  { %7796 = vmatprep.mubr.msk.f32.mxu0 %vm225_vm3, %v9537_v11  ;;  %7843 = vmatprep.subr.msk.mxu0 %vm325_vm2, %v1608_v12  ;;  %v9585_v21 = vld [vmem:[#allocation2 + $0x81] sm:$0xff]  ;;  %v9589_v23 = vld [vmem:[#allocation2 + $0x12] sm:$0xff] }
  0x90   :  { %7693 = vmatmul.mubr.msk.f32.gmra.mrb[2].mxu1 %vm225_vm3, %v9537_v11  ;;  %7739 = vmatprep.subr.msk.mxu1 %vm325_vm2, %v9546_v16  ;;  %v9597_v24 = vld [vmem:[#allocation2 + $0xb1] sm:$0xff]  ;;  %v9603_v26 = vld [vmem:[#allocation2 + $0xc1] sm:$0xff] }
  0x91   :  { %7797 = vmatmul.mubr.msk.f32.gmra.mrb[2].mxu0 %vm225_vm3, %v9552_v17  ;;  %7695 = vmatprep.mubr.msk.f32.mxu1 %vm225_vm3, %v9552_v17  ;;  %v9605_v27 = vld [vmem:[#allocation2 + $0x32] sm:$0xff]  ;;  %v9620_v30 = vld [vmem:[#allocation2 + $0x42] sm:$0xff] }
  0x92   :  { %7799 = vmatprep.mubr.msk.f32.mxu0 %vm225_vm3, %v9556_v6  ;;  %v9615_v29 = vld [vmem:[#allocation2 + $0xd1] sm:$0xff]  ;;  %v9622_v31 = vld [vmem:[#allocation2 + $0xe1] sm:$0xff] }
  0x93   :  { %v9624_v32 = vld [vmem:[#allocation2 + $0x52] sm:$0xff]  ;;  %v9638_v34 = vld [vmem:[#allocation2 + $0x62] sm:$0xff] }
  0x94   :  { %7696 = vmatmul.mubr.msk.f32.gmra.mrb[4].mxu1 %vm225_vm3, %v9556_v6  ;;  %v9634_v33 = vld [vmem:[#allocation2 + $0xf1] sm:$0xff]  ;;  %v9640_v35 = vld [vmem:[#allocation2 + $0x101] sm:$0xff] }
  0x95   :  { %7800 = vmatmul.mubr.msk.f32.gmra.mrb[4].mxu0 %vm225_vm3, %v9573_v7  ;;  %7698 = vmatprep.mubr.msk.f32.mxu1 %vm225_vm3, %v9573_v7  ;;  %v9642_v36 = vld [vmem:[#allocation2 + $0x72] sm:$0xff]  ;;  %v9654_v38 = vld [vmem:[#allocation2 + $0x82] sm:$0xff] }
  0x96   :  { %7802 = vmatprep.mubr.msk.f32.mxu0 %vm225_vm3, %v9575_v20  ;;  %v9650_v37 = vld [vmem:[#allocation2 + $0x111] sm:$0xff]  ;;  %v9670_v42 = vld [vmem:[#allocation2 + $0xc2] sm:$0xff] }
  0x97   :  { %v9658_v40 = vld [vmem:[#allocation2 + $0xb2] sm:$0xff]  ;;  %v9672_v43 = vld [vmem:[#allocation2 + $0x20] sm:$0xff] }
  0x98   :  { %7699 = vmatmul.mubr.msk.f32.gmra.mrb[6].mxu1 %vm225_vm3, %v9575_v20  ;;  %v9666_v41 = vld [vmem:[#allocation2 + $0x10] sm:$0xff]  ;;  %v9688_v47 = vld [vmem:[#allocation2 + $0xe2] sm:$0xff] }
  0x99   :  { %7803 = vmatmul.mubr.msk.f32.gmra.mrb[6].mxu0 %vm225_vm3, %v9585_v21  ;;  %7701 = vmatprep.mubr.msk.f32.mxu1 %vm225_vm3, %v9587_v22  ;;  %v9674_v44 = vld [vmem:[#allocation2 + $0xd2] sm:$0xff]  ;;  %v9690_v48 = vld [vmem:[#allocation2 + $0x40] sm:$0xff] }
  0x9a   :  { %7819 = vmatprep.mubr.msk.f32.mxu0 %vm225_vm3, %v9589_v23  ;;  %v9682_v46 = vld [vmem:[#allocation2 + $0x30] sm:$0xff]  ;;  %v9705_v51 = vld [vmem:[#allocation2 + $0x102] sm:$0xff] }
  0x9b   :  { %v9692_v49 = vld [vmem:[#allocation2 + $0xf2] sm:$0xff]  ;;  %v9707_v52 = vld [vmem:[#allocation2 + $0x60] sm:$0xff] }
  0x9c   :  { %7702 = vmatmul.mubr.msk.f32.gmra.mrb[8].mxu1 %vm225_vm3, %v9597_v24  ;;  %v9701_v50 = vld [vmem:[#allocation2 + $0x50] sm:$0xff]  ;;  %v9721_v55 = vld [vmem:[#allocation2 + $0x122] sm:$0xff] }
  0x9d   :  { %7820 = vmatmul.mubr.msk.f32.vlgmr.msra.gmra.mrb[0].mxu0 %vm225_vm3, %v9601_v25  ;;  %7704 = vmatprep.mubr.msk.f32.mxu1 %vm225_vm3, %v9603_v26  ;;  %v9709_v53 = vld [vmem:[#allocation2 + $0x112] sm:$0xff]  ;;  %v9735_v58 = vld [vmem:[#allocation2 + $0xc0] sm:$0xff] }
  0x9e   :  { %7844 = vmatpush3.msk.msra.mxu0 %vm325_vm2, %v1608_v12  ;;  %7822 = vmatprep.mubr.msk.f32.mxu0 %vm225_vm3, %v9605_v27  ;;  %v9717_v54 = vld [vmem:[#allocation2 + $0x70] sm:$0xff]  ;;  %v9749_v61 = vld [vmem:[#allocation2 + $0xe0] sm:$0xff] }
  0x9f   :  { %7869 = vmatprep.subr.msk.mxu0 %vm325_vm2, %v9609_v28  ;;  %v9731_v57 = vld [vmem:[#allocation2 + $0xb0] sm:$0xff]  ;;  %v9762_v63 = vld [vmem:[#allocation2 + $0x100] sm:$0xff] }
  0xa0   :  { %7705 = vmatmul.mubr.msk.f32.gmra.mrb[10].mxu1 %vm225_vm3, %v9615_v29  ;;  %v9743_v60 = vld [vmem:[#allocation2 + $0xd0] sm:$0xff]  ;;  %v9764_v0 = vld [vmem:[#allocation2 + $0x80] sm:$0xff] }
  0xa1   :  { %7823 = vmatmul.mubr.msk.f32.gmra.mrb[2].mxu0 %vm225_vm3, %v9620_v30  ;;  %7707 = vmatprep.mubr.msk.f32.mxu1 %vm225_vm3, %v9622_v31  ;;  %v9758_v62 = vld [vmem:[#allocation2 + $0xf0] sm:$0xff]  ;;  %v1605_v9 = vld [vmem:[#allocation2 + $0x120] sm:$0xff] }
  0xa2   :  { %7825 = vmatprep.mubr.msk.f32.mxu0 %vm225_vm3, %v9624_v32  ;;  %v9772_v1 = vld [vmem:[#allocation2 + $0x110] sm:$0xff]  ;;  %v9811_v12 = vld [vmem:[#allocation2 + $0xa2] sm:$0xff] }
  0xa3   :  { %v9911_v13 = vld [vmem:[#allocation2 + $0x92] sm:$0xff] }
  0xa4   :  { %7708 = vmatmul.mubr.msk.f32.gmra.mrb[12].mxu1 %vm225_vm3, %v9634_v33  ;;  %v9944_v14 = vld [vmem:[#allocation2 + $0x132] sm:$0xff] }
  0xa5   :  { %7826 = vmatmul.mubr.msk.f32.gmra.mrb[4].mxu0 %vm225_vm3, %v9638_v34  ;;  %7710 = vmatprep.mubr.msk.f32.mxu1 %vm225_vm3, %v9640_v35  ;;  %v2376_v18 = vld [vmem:[#allocation7 + $0x30] sm:$0xff] }
  0xa6   :  { %7828 = vmatprep.mubr.msk.f32.mxu0 %vm225_vm3, %v9642_v36 }
  0xa8   :  { %7711 = vmatmul.mubr.msk.f32.gmra.mrb[14].mxu1 %vm225_vm3, %v9650_v37 }
  0xa9   :  { %7829 = vmatmul.mubr.msk.f32.gmra.mrb[6].mxu0 %vm225_vm3, %v9654_v38  ;;  %7715 = vmatprep.mubr.msk.f32.mxu1 %vm225_vm3, %v9656_v39 }
  0xaa   :  { %7831 = vmatprep.mubr.msk.f32.mxu0 %vm225_vm3, %v9658_v40 }
  0xac   :  { %7716 = vmatmul.mubr.msk.f32.vlgmr.msra.gmra.mrb[0].mxu1 %vm225_vm3, %v9666_v41 }
  0xad   :  { %7740 = vmatpush3.msk.msra.mxu1 %vm325_vm2, %v9546_v16  ;;  %7832 = vmatmul.mubr.msk.f32.gmra.mrb[8].mxu0 %vm225_vm3, %v9670_v42  ;;  %v2375_v16 = vld [vmem:[#allocation7 + $0x28] sm:$0xff] }
  0xae   :  { %7718 = vmatprep.mubr.msk.f32.mxu1 %vm225_vm3, %v9672_v43  ;;  %7834 = vmatprep.mubr.msk.f32.mxu0 %vm225_vm3, %v9674_v44 }
  0xaf   :  { %7765 = vmatprep.subr.msk.mxu1 %vm325_vm2, %v917_v45 }
  0xb0   :  { %7719 = vmatmul.mubr.msk.f32.gmra.mrb[2].mxu1 %vm225_vm3, %v9682_v46 }
  0xb1   :  { %7835 = vmatmul.mubr.msk.f32.gmra.mrb[10].mxu0 %vm225_vm3, %v9688_v47  ;;  %7721 = vmatprep.mubr.msk.f32.mxu1 %vm225_vm3, %v9690_v48 }
  0xb2   :  { %7837 = vmatprep.mubr.msk.f32.mxu0 %vm225_vm3, %v9692_v49 }
  0xb4   :  { %7722 = vmatmul.mubr.msk.f32.gmra.mrb[4].mxu1 %vm225_vm3, %v9701_v50 }
  0xb5   :  { %7838 = vmatmul.mubr.msk.f32.gmra.mrb[12].mxu0 %vm225_vm3, %v9705_v51  ;;  %7724 = vmatprep.mubr.msk.f32.mxu1 %vm225_vm3, %v9707_v52 }
  0xb6   :  { %7840 = vmatprep.mubr.msk.f32.mxu0 %vm225_vm3, %v9709_v53 }
  0xb8   :  { %7725 = vmatmul.mubr.msk.f32.gmra.mrb[6].mxu1 %vm225_vm3, %v9717_v54 }
  0xb9   :  { %7841 = vmatmul.mubr.msk.f32.gmra.mrb[14].mxu0 %vm225_vm3, %v9721_v55  ;;  %7727 = vmatprep.mubr.msk.f32.mxu1 %vm225_vm3, %v9723_v56 }
  0xba   :  { %7845 = vmatprep.mubr.msk.f32.mxu0 %vm225_vm3, %v9672_v43 }
  0xbc   :  { %7728 = vmatmul.mubr.msk.f32.gmra.mrb[8].mxu1 %vm225_vm3, %v9731_v57 }
  0xbd   :  { %7846 = vmatmul.mubr.msk.f32.vlgmr.msra.gmra.mrb[0].mxu0 %vm225_vm3, %v9682_v46  ;;  %7730 = vmatprep.mubr.msk.f32.mxu1 %vm225_vm3, %v9735_v58 }
  0xbe   :  { %7870 = vmatpush3.msk.msra.mxu0 %vm325_vm2, %v9609_v28  ;;  %7848 = vmatprep.mubr.msk.f32.mxu0 %vm225_vm3, %v9690_v48 }
  0xbf   :  { %7895 = vmatprep.subr.msk.mxu0 %vm325_vm2, %v2068_v59 }
  0xc0   :  { %7731 = vmatmul.mubr.msk.f32.gmra.mrb[10].mxu1 %vm225_vm3, %v9743_v60 }
  0xc1   :  { %7849 = vmatmul.mubr.msk.f32.gmra.mrb[2].mxu0 %vm225_vm3, %v9701_v50  ;;  %7733 = vmatprep.mubr.msk.f32.mxu1 %vm225_vm3, %v9749_v61 }
  0xc2   :  { %7851 = vmatprep.mubr.msk.f32.mxu0 %vm225_vm3, %v9707_v52 }
  0xc4   :  { %7734 = vmatmul.mubr.msk.f32.gmra.mrb[12].mxu1 %vm225_vm3, %v9758_v62 }
  0xc5   :  { %7852 = vmatmul.mubr.msk.f32.gmra.mrb[4].mxu0 %vm225_vm3, %v9717_v54  ;;  %7736 = vmatprep.mubr.msk.f32.mxu1 %vm225_vm3, %v9762_v63 }
  0xc6   :  { %7854 = vmatprep.mubr.msk.f32.mxu0 %vm225_vm3, %v9764_v0 }
  0xc8   :  { %7737 = vmatmul.mubr.msk.f32.gmra.mrb[14].mxu1 %vm225_vm3, %v9772_v1 }
  0xc9   :  { %7855 = vmatmul.mubr.msk.f32.gmra.mrb[6].mxu0 %vm225_vm3, %v1598_v5  ;;  %7741 = vmatprep.mubr.msk.f32.mxu1 %vm225_vm3, %v9776_v8 }
  0xca   :  { %7857 = vmatprep.mubr.msk.f32.mxu0 %vm225_vm3, %v9735_v58 }
  0xcc   :  { %7742 = vmatmul.mubr.msk.f32.vlgmr.msra.gmra.mrb[0].mxu1 %vm225_vm3, %v9589_v23 }
  0xcd   :  { %7766 = vmatpush3.msk.msra.mxu1 %vm325_vm2, %v917_v45  ;;  %7858 = vmatmul.mubr.msk.f32.gmra.mrb[8].mxu0 %vm225_vm3, %v9743_v60 }
  0xce   :  { %7744 = vmatprep.mubr.msk.f32.mxu1 %vm225_vm3, %v9601_v25  ;;  %7860 = vmatprep.mubr.msk.f32.mxu0 %vm225_vm3, %v9749_v61 }
  0xcf   :  { %8785 = vmatprep.subr.msk.mxu1 %vm325_vm2, %v9492_v2 }
  0xd0   :  { %7745 = vmatmul.mubr.msk.f32.gmra.mrb[2].mxu1 %vm225_vm3, %v9605_v27 }
  0xd1   :  { %7861 = vmatmul.mubr.msk.f32.gmra.mrb[10].mxu0 %vm225_vm3, %v9758_v62  ;;  %7747 = vmatprep.mubr.msk.f32.mxu1 %vm225_vm3, %v9620_v30 }
  0xd2   :  { %7863 = vmatprep.mubr.msk.f32.mxu0 %vm225_vm3, %v9762_v63 }
  0xd4   :  { %7748 = vmatmul.mubr.msk.f32.gmra.mrb[4].mxu1 %vm225_vm3, %v9624_v32 }
  0xd5   :  { %7864 = vmatmul.mubr.msk.f32.gmra.mrb[12].mxu0 %vm225_vm3, %v9772_v1  ;;  %7750 = vmatprep.mubr.msk.f32.mxu1 %vm225_vm3, %v9638_v34 }
  0xd6   :  { %7866 = vmatprep.mubr.msk.f32.mxu0 %vm225_vm3, %v1605_v9 }
  0xd8   :  { %7751 = vmatmul.mubr.msk.f32.gmra.mrb[6].mxu1 %vm225_vm3, %v9642_v36 }
  0xd9   :  { %7867 = vmatmul.mubr.msk.f32.gmra.mrb[14].mxu0 %vm225_vm3, %v1606_v10  ;;  %7753 = vmatprep.mubr.msk.f32.mxu1 %vm225_vm3, %v9811_v12  ;;  %v2782_v10 = vld [vmem:[#allocation7 + $0x48] sm:$0xff] }
  0xda   :  { %7871 = vmatprep.mubr.msk.f32.mxu0 %vm225_vm3, %v9533_v3  ;;  %v1828_v3 = vld [vmem:[#allocation2 + $0x91] sm:$0xff] }
  0xdc   :  { %7754 = vmatmul.mubr.msk.f32.gmra.mrb[8].mxu1 %vm225_vm3, %v9658_v40 }
  0xdd   :  { %7872 = vmatmul.mubr.msk.f32.vlgmr.msra.gmra.mrb[0].mxu0 %vm225_vm3, %v9537_v11  ;;  %7756 = vmatprep.mubr.msk.f32.mxu1 %vm225_vm3, %v9670_v42  ;;  %v9877_v11 = vld [vmem:[#allocation2 + $0x131] sm:$0xff] }
  0xde   :  { %7896 = vmatpush3.msk.msra.mxu0 %vm325_vm2, %v2068_v59  ;;  %7874 = vmatprep.mubr.msk.f32.mxu0 %vm225_vm3, %v9552_v17  ;;  %v8569_v17 = vpack.c.bf16 %v2375_v16, %v2374_v15 }
  0xe0   :  { %7757 = vmatmul.mubr.msk.f32.gmra.mrb[10].mxu1 %vm225_vm3, %v9674_v44 }
  0xe1   :  { %7875 = vmatmul.mubr.msk.f32.gmra.mrb[2].mxu0 %vm225_vm3, %v9556_v6  ;;  %7759 = vmatprep.mubr.msk.f32.mxu1 %vm225_vm3, %v9688_v47  ;;  %v2377_v6 = vld [vmem:[#allocation7 + $0x38] sm:$0xff] }
  0xe2   :  { %7877 = vmatprep.mubr.msk.f32.mxu0 %vm225_vm3, %v9573_v7  ;;  %v8573_v19 = vpack.c.bf16 %v2377_v6, %v2376_v18  ;;  %v2353_v7 = vld [vmem:[#allocation7] sm:$0xff] }
  0xe4   :  { %7760 = vmatmul.mubr.msk.f32.gmra.mrb[12].mxu1 %vm225_vm3, %v9692_v49 }
  0xe5   :  { %7878 = vmatmul.mubr.msk.f32.gmra.mrb[4].mxu0 %vm225_vm3, %v9575_v20  ;;  %7762 = vmatprep.mubr.msk.f32.mxu1 %vm225_vm3, %v9705_v51  ;;  %v2354_v20 = vld [vmem:[#allocation7 + $0x8] sm:$0xff] }
  0xe6   :  { %7880 = vmatprep.mubr.msk.f32.mxu0 %vm225_vm3, %v9585_v21  ;;  %v8577_v21 = vpack.c.bf16 %v2354_v20, %v2353_v7 }
  0xe8   :  { %7763 = vmatmul.mubr.msk.f32.gmra.mrb[14].mxu1 %vm225_vm3, %v9709_v53 }
  0xe9   :  { %7881 = vmatmul.mubr.msk.f32.gmra.mrb[6].mxu0 %vm225_vm3, %v1828_v3  ;;  %7767 = vmatprep.mubr.msk.f32.mxu1 %vm225_vm3, %v9666_v41 }
  0xea   :  { %7883 = vmatprep.mubr.msk.f32.mxu0 %vm225_vm3, %v9603_v26 }
  0xec   :  { %7768 = vmatmul.mubr.msk.f32.vlgmr.msra.gmra.mrb[0].mxu1 %vm225_vm3, %v9672_v43 }
  0xed   :  { %8786 = vmatpush3.msk.msra.mxu1 %vm325_vm2, %v9492_v2  ;;  %7884 = vmatmul.mubr.msk.f32.gmra.mrb[8].mxu0 %vm225_vm3, %v9615_v29  ;;  %v1835_v2 = vld [vmem:[#allocation2 + $0x121] sm:$0xff] }
  0xee   :  { %7770 = vmatprep.mubr.msk.f32.mxu1 %vm225_vm3, %v9682_v46  ;;  %7886 = vmatprep.mubr.msk.f32.mxu0 %vm225_vm3, %v9622_v31 }
  0xef   :  { %8570 = vmatprep.subr.bf16.mxu1 %v8569_v17 }
  0xf0   :  { %7771 = vmatmul.mubr.msk.f32.gmra.mrb[2].mxu1 %vm225_vm3, %v9690_v48 }
  0xf1   :  { %7887 = vmatmul.mubr.msk.f32.gmra.mrb[10].mxu0 %vm225_vm3, %v9634_v33  ;;  %7773 = vmatprep.mubr.msk.f32.mxu1 %vm225_vm3, %v9701_v50 }
  0xf2   :  { %7889 = vmatprep.mubr.msk.f32.mxu0 %vm225_vm3, %v9640_v35 }
  0xf4   :  { %7774 = vmatmul.mubr.msk.f32.gmra.mrb[4].mxu1 %vm225_vm3, %v9707_v52 }
  0xf5   :  { %7890 = vmatmul.mubr.msk.f32.gmra.mrb[12].mxu0 %vm225_vm3, %v9650_v37  ;;  %7776 = vmatprep.mubr.msk.f32.mxu1 %vm225_vm3, %v9717_v54  ;;  %v2356_v54 = vld [vmem:[#allocation7 + $0x18] sm:$0xff] }
  0xf6   :  { %7892 = vmatprep.mubr.msk.f32.mxu0 %vm225_vm3, %v1835_v2 }
  0xf8   :  { %7777 = vmatmul.mubr.msk.f32.gmra.mrb[6].mxu1 %vm225_vm3, %v9764_v0 }
  0xf9   :  { %7893 = vmatmul.mubr.msk.f32.gmra.mrb[14].mxu0 %vm225_vm3, %v9877_v11  ;;  %7779 = vmatprep.mubr.msk.f32.mxu1 %vm225_vm3, %v9731_v57 }
  0xfa   :  { %7897 = vmatprep.mubr.msk.f32.mxu0 %vm225_vm3, %v9601_v25 }
  0xfc   :  { %7780 = vmatmul.mubr.msk.f32.gmra.mrb[8].mxu1 %vm225_vm3, %v9735_v58 }
  0xfd   :  { %7898 = vmatmul.mubr.msk.f32.vlgmr.msra.gmra.mrb[0].mxu0 %vm225_vm3, %v9605_v27  ;;  %7782 = vmatprep.mubr.msk.f32.mxu1 %vm225_vm3, %v9743_v60 }
  0xfe   :  { %7900 = vmatprep.mubr.msk.f32.mxu0 %vm225_vm3, %v9620_v30 }
 0x100   :  { %7783 = vmatmul.mubr.msk.f32.gmra.mrb[10].mxu1 %vm225_vm3, %v9749_v61 }
 0x101   :  { %7901 = vmatmul.mubr.msk.f32.gmra.mrb[2].mxu0 %vm225_vm3, %v9624_v32  ;;  %7785 = vmatprep.mubr.msk.f32.mxu1 %vm225_vm3, %v9758_v62  ;;  %v9951_v32 = vld [vmem:[#allocation5] ss:$0 sm:$0xff] }
 0x102   :  { %7903 = vmatprep.mubr.msk.f32.mxu0 %vm225_vm3, %v9638_v34 }
 0x104   :  { %7786 = vmatmul.mubr.msk.f32.gmra.mrb[12].mxu1 %vm225_vm3, %v9762_v63 }
 0x105   :  { %7904 = vmatmul.mubr.msk.f32.gmra.mrb[4].mxu0 %vm225_vm3, %v9642_v36  ;;  %7788 = vmatprep.mubr.msk.f32.mxu1 %vm225_vm3, %v9772_v1 }
 0x106   :  { %7906 = vmatprep.mubr.msk.f32.mxu0 %vm225_vm3, %v9654_v38 }
 0x108   :  { %7789 = vmatmul.mubr.msk.f32.gmra.mrb[14].mxu1 %vm225_vm3, %v1605_v9  ;;  %v2781_v9 = vld [vmem:[#allocation7 + $0x40] sm:$0xff] }
 0x109   :  { %7907 = vmatmul.mubr.msk.f32.gmra.mrb[6].mxu0 %vm225_vm3, %v9911_v13  ;;  %7805 = vmatprep.mubr.msk.f32.mxu1 %vm225_vm3, %v9597_v24  ;;  %v9975_v20 = vpack.c.bf16 %v2782_v10, %v2781_v9 }
 0x10a   :  { %7909 = vmatprep.mubr.msk.f32.mxu0 %vm225_vm3, %v9670_v42 }
 0x10c   :  { %7806 = vmatmul.mubr.msk.f32.vlgmr.msra.gmra.mrb[8].mxu1 %vm225_vm3, %v9603_v26 }
 0x10d   :  { %7910 = vmatmul.mubr.msk.f32.gmra.mrb[8].mxu0 %vm225_vm3, %v9674_v44  ;;  %7808 = vmatprep.mubr.msk.f32.mxu1 %vm225_vm3, %v9615_v29 }
 0x10e   :  { %7912 = vmatprep.mubr.msk.f32.mxu0 %vm225_vm3, %v9688_v47  ;;  %8572 = vmatpush3.bf16.msra.mxu1 %v8569_v17 }
 0x10f   :  { %8574 = vmatprep.subr.bf16.mxu1 %v8573_v19 }
 0x110   :  { %7809 = vmatmul.mubr.msk.f32.gmra.mrb[10].mxu1 %vm225_vm3, %v9622_v31 }
 0x111   :  { %7913 = vmatmul.mubr.msk.f32.gmra.mrb[10].mxu0 %vm225_vm3, %v9692_v49  ;;  %7811 = vmatprep.mubr.msk.f32.mxu1 %vm225_vm3, %v9634_v33 }
 0x112   :  { %7915 = vmatprep.mubr.msk.f32.mxu0 %vm225_vm3, %v9705_v51  ;;  %8576 = vmatpush3.bf16.msra.mxu1 %v8573_v19 }
 0x113   :  { %8578 = vmatprep.subr.bf16.mxu1 %v8577_v21 }
 0x114   :  { %7812 = vmatmul.mubr.msk.f32.gmra.mrb[12].mxu1 %vm225_vm3, %v9640_v35 }
 0x115   :  { %7916 = vmatmul.mubr.msk.f32.gmra.mrb[12].mxu0 %vm225_vm3, %v9709_v53  ;;  %7814 = vmatprep.mubr.msk.f32.mxu1 %vm225_vm3, %v9650_v37  ;;  %v2355_v53 = vld [vmem:[#allocation7 + $0x10] sm:$0xff] }
 0x116   :  { %7918 = vmatprep.mubr.msk.f32.mxu0 %vm225_vm3, %v9721_v55  ;;  %v8581_v63 = vpack.c.bf16 %v2356_v54, %v2355_v53 }
 0x118   :  { %7815 = vmatmul.mubr.msk.f32.gmra.mrb[14].mxu1 %vm225_vm3, %v1835_v2 }
 0x119   :  { %7919 = vmatmul.mubr.msk.f32.gmra.mrb[14].mxu0 %vm225_vm3, %v9944_v14  ;;  %7929 = vmatprep.mubr.msk.f32.mxu1 %vm2320_vm4, %v9500_v4 }
 0x1bf   :  { %v7769_v23 = vpop.f32.mrb[0].mxu1 }
 0x1c0   :  { %v1035_v24 = vpop.f32.mrb[1].mxu1 }
 0x1c3   :  { %v7772_v25 = vpop.f32.mrb[2].mxu1 }
 0x1c4   :  { %v1045_v26 = vpop.f32.mrb[3].mxu1 }
 0x1c7   :  { %v7775_v27 = vpop.f32.mrb[4].mxu1 }
 0x1c8   :  { %v1055_v28 = vpop.f32.mrb[5].mxu1 }
 0x1cb   :  { %v7778_v29 = vpop.f32.mrb[6].mxu1 }
 0x1cc   :  { %v1065_v30 = vpop.f32.mrb[7].mxu1 }
 0x1d0   :  { %v7899_v31 = vpop.f32.mrb[0].mxu0 }
 0x1d1   :  { %v8787_v4 = vadd.f32 %v7899_v31, %v7769_v23  ;;  %v2186_v33 = vpop.f32.mrb[1].mxu0 }
 0x1d2   :  { %v8788_v34 = vadd.f32 %v2186_v33, %v1035_v24 }
 0x1d3   :  { %v2289_v35 = vadd.f32 %v8787_v4, %v9951_v32 }
 0x1d4   :  { %v2288_v36 = vadd.f32 %v8788_v34, %v9951_v32  ;;  %v7902_v37 = vpop.f32.mrb[2].mxu0 }
 0x1d5   :  { %v2305_v38 = vmax.f32 %v2289_v35, 0.0  ;;  %v8789_v40 = vadd.f32 %v7902_v37, %v7772_v25  ;;  %v2196_v41 = vpop.f32.mrb[3].mxu0 }
 0x1d6   :  { %v2304_v42 = vmax.f32 %v2288_v36, 0.0  ;;  %v8790_v43 = vadd.f32 %v2196_v41, %v1045_v26 }
 0x1d7   :  { %v2291_v44 = vadd.f32 %v8789_v40, %v9951_v32  ;;  %2322 = vst.msk [vmem:[#allocation2 + $0x21] sm:$0xff] %vm2320_vm4, %v2305_v38 }
 0x1d8   :  { %v2290_v45 = vadd.f32 %v8790_v43, %v9951_v32  ;;  %v7905_v46 = vpop.f32.mrb[4].mxu0  ;;  %2321 = vst.msk [vmem:[#allocation2 + $0x11] sm:$0xff] %vm2320_vm4, %v2304_v42 }
 0x1d9   :  { %v2307_v47 = vmax.f32 %v2291_v44, 0.0  ;;  %v8791_v48 = vadd.f32 %v7905_v46, %v7775_v27  ;;  %v2206_v49 = vpop.f32.mrb[5].mxu0 }
 0x1da   :  { %v2306_v50 = vmax.f32 %v2290_v45, 0.0  ;;  %v8792_v51 = vadd.f32 %v2206_v49, %v1055_v28 }
 0x1db   :  { %v2293_v52 = vadd.f32 %v8791_v48, %v9951_v32  ;;  %2324 = vst.msk [vmem:[#allocation2 + $0x41] sm:$0xff] %vm2320_vm4, %v2307_v47 }
 0x1dc   :  { %v2292_v55 = vadd.f32 %v8792_v51, %v9951_v32  ;;  %v7908_v57 = vpop.f32.mrb[6].mxu0  ;;  %2323 = vst.msk [vmem:[#allocation2 + $0x31] sm:$0xff] %vm2320_vm4, %v2306_v50 }
 0x1dd   :  { %v2309_v58 = vmax.f32 %v2293_v52, 0.0  ;;  %v8793_v59 = vadd.f32 %v7908_v57, %v7778_v29  ;;  %v2216_v60 = vpop.f32.mrb[7].mxu0 }
 0x1de   :  { %v2308_v61 = vmax.f32 %v2292_v55, 0.0  ;;  %v8794_v62 = vadd.f32 %v2216_v60, %v1065_v30  ;;  %v9971_v16 = vld [vmem:[#allocation2 + $0x21] sm:$0xff] }
 0x1df   :  { %v2295_v0 = vadd.f32 %v8793_v59, %v9951_v32  ;;  %v7807_v1 = vpop.f32.mrb[8].mxu1  ;;  %2326 = vst.msk [vmem:[#allocation2 + $0x61] sm:$0xff] %vm2320_vm4, %v2309_v58  ;;  %v9965_v5 = vld [vmem:[#allocation2 + $0x11] sm:$0xff] }
 0x1e0   :  { %v2294_v3 = vadd.f32 %v8794_v62, %v9951_v32  ;;  %2325 = vst.msk [vmem:[#allocation2 + $0x51] sm:$0xff] %vm2320_vm4, %v2308_v61  ;;  %v1305_v2 = vpop.f32.mrb[9].mxu1  ;;  %v7911_v15 = vpop.f32.mrb[8].mxu0  ;;  %7930 = vmatmul.mubr.msk.f32.vlgmr.msra.gmra.mrb[16].mxu1 %vm2320_vm4, %v9965_v5 }
 0x1e1   :  { %v2311_v17 = vmax.f32 %v2295_v0, 0.0  ;;  %v8795_v18 = vadd.f32 %v7911_v15, %v7807_v1  ;;  %8580 = vmatpush3.bf16.msra.mxu1 %v8577_v21  ;;  %v2226_v6 = vpop.f32.mrb[9].mxu0  ;;  %7932 = vmatprep.mubr.msk.f32.mxu1 %vm2320_vm4, %v9971_v16 }
 0x1e2   :  { %v2310_v19 = vmax.f32 %v2294_v3, 0.0  ;;  %v8796_v7 = vadd.f32 %v2226_v6, %v1305_v2  ;;  %8582 = vmatprep.subr.bf16.mxu1 %v8581_v63  ;;  %v9985_v28 = vld [vmem:[#allocation2 + $0x41] sm:$0xff]  ;;  %v2783_v3 = vld [vmem:[#allocation7 + $0x50] sm:$0xff]  ;;  %v3012_v6 = vld [vmem:[#allocation7 + $0x68] sm:$0xff] }
 0x1e3   :  { %2328 = vst.msk [vmem:[#allocation2 + $0x81] sm:$0xff] %vm2320_vm4, %v2311_v17  ;;  %v2297_v23 = vadd.f32 %v8795_v18, %v9951_v32  ;;  %v7810_v24 = vpop.f32.mrb[10].mxu1  ;;  %v9979_v25 = vld [vmem:[#allocation2 + $0x31] sm:$0xff]  ;;  %v2784_v2 = vld [vmem:[#allocation7 + $0x58] sm:$0xff]  ;;  %v3011_v18 = vld [vmem:[#allocation7 + $0x60] sm:$0xff] }
 0x1e4   :  { %2327 = vst.msk [vmem:[#allocation2 + $0x71] sm:$0xff] %vm2320_vm4, %v2310_v19  ;;  %v2296_v21 = vadd.f32 %v8796_v7, %v9951_v32  ;;  %v1315_v26 = vpop.f32.mrb[11].mxu1  ;;  %v7914_v27 = vpop.f32.mrb[10].mxu0  ;;  %7933 = vmatmul.mubr.msk.f32.gmra.mrb[18].mxu1 %vm2320_vm4, %v9979_v25  ;;  %v8589_v15 = vpack.c.bf16 %v2784_v2, %v2783_v3  ;;  %v10048_v17 = vld [vmem:[#allocation2 + $0x10] sm:$0xff]  ;;  %v10052_v19 = vld [vmem:[#allocation2 + $0x20] sm:$0xff]  ;;  %v8593_v7 = vpack.c.bf16 %v3012_v6, %v3011_v18 }
 0x1e5   :  { %v2313_v29 = vmax.f32 %v2297_v23, 0.0  ;;  %v8797_v30 = vadd.f32 %v7914_v27, %v7810_v24  ;;  %v2236_v31 = vpop.f32.mrb[11].mxu0  ;;  %7935 = vmatprep.mubr.msk.f32.mxu1 %vm2320_vm4, %v9985_v28  ;;  %8584 = vmatpush3.bf16.msra.mxu1 %v8581_v63  ;;  %v10057_v23 = vld [vmem:[#allocation2 + $0x30] sm:$0xff]  ;;  %v3701_v18 = vld [vmem:[#allocation7 + $0xc0] sm:$0xff] }
 0x1e6   :  { %v2312_v4 = vmax.f32 %v2296_v21, 0.0  ;;  %v8798_v33 = vadd.f32 %v2236_v31, %v1315_v26  ;;  %8586 = vmatprep.subr.bf16.mxu1 %v9975_v20  ;;  %v9998_v41 = vld [vmem:[#allocation2 + $0x61] sm:$0xff]  ;;  %v3473_v2 = vld [vmem:[#allocation7 + $0xb0] sm:$0xff]  ;;  %v3702_v6 = vld [vmem:[#allocation7 + $0xc8] sm:$0xff] }
 0x1e7   :  { %2330 = vst.msk [vmem:[#allocation2 + $0xc1] sm:$0xff] %vm2320_vm4, %v2313_v29  ;;  %v2299_v34 = vadd.f32 %v8797_v30, %v9951_v32  ;;  %v7813_v35 = vpop.f32.mrb[12].mxu1  ;;  %v9992_v36 = vld [vmem:[#allocation2 + $0x51] sm:$0xff] }
 0x1e8   :  { %2329 = vst.msk [vmem:[#allocation2 + $0xb1] sm:$0xff] %vm2320_vm4, %v2312_v4  ;;  %v2298_v37 = vadd.f32 %v8798_v33, %v9951_v32  ;;  %v1325_v38 = vpop.f32.mrb[13].mxu1  ;;  %v7917_v40 = vpop.f32.mrb[12].mxu0  ;;  %7936 = vmatmul.mubr.msk.f32.gmra.mrb[20].mxu1 %vm2320_vm4, %v9992_v36  ;;  %v10065_v24 = vld [vmem:[#allocation2 + $0x50] sm:$0xff] }
 0x1e9   :  { %v2315_v42 = vmax.f32 %v2299_v34, 0.0  ;;  %v8799_v43 = vadd.f32 %v7917_v40, %v7813_v35  ;;  %v2246_v44 = vpop.f32.mrb[13].mxu0  ;;  %7938 = vmatprep.mubr.msk.f32.mxu1 %vm2320_vm4, %v9998_v41  ;;  %v3013_v33 = vld [vmem:[#allocation7 + $0x70] sm:$0xff]  ;;  %v3014_v34 = vld [vmem:[#allocation7 + $0x78] sm:$0xff]  ;;  %v3242_v40 = vld [vmem:[#allocation7 + $0x88] sm:$0xff] }
 0x1ea   :  { %v2314_v45 = vmax.f32 %v2298_v37, 0.0  ;;  %v8800_v46 = vadd.f32 %v2246_v44, %v1325_v38  ;;  %v8597_v35 = vpack.c.bf16 %v3014_v34, %v3013_v33  ;;  %v10109_v37 = vld [vmem:[#allocation2 + $0x12] sm:$0xff]  ;;  %v3241_v38 = vld [vmem:[#allocation7 + $0x80] sm:$0xff]  ;;  %v3704_v33 = vld [vmem:[#allocation7 + $0xd8] sm:$0xff] }
 0x1eb   :  { %2332 = vst.msk [vmem:[#allocation2 + $0xe1] sm:$0xff] %vm2320_vm4, %v2315_v42  ;;  %v2301_v47 = vadd.f32 %v8799_v43, %v9951_v32  ;;  %v7816_v48 = vpop.f32.mrb[14].mxu1  ;;  %v10004_v49 = vld [vmem:[#allocation2 + $0x71] sm:$0xff]  ;;  %v10113_v42 = vld [vmem:[#allocation2 + $0x22] sm:$0xff]  ;;  %v8601_v43 = vpack.c.bf16 %v3242_v40, %v3241_v38 }
 0x1ec   :  { %2331 = vst.msk [vmem:[#allocation2 + $0xd1] sm:$0xff] %vm2320_vm4, %v2314_v45  ;;  %v2300_v50 = vadd.f32 %v8800_v46, %v9951_v32  ;;  %v1335_v51 = vpop.f32.mrb[15].mxu1  ;;  %v7920_v52 = vpop.f32.mrb[14].mxu0  ;;  %7939 = vmatmul.mubr.msk.f32.gmra.mrb[22].mxu1 %vm2320_vm4, %v10004_v49  ;;  %v10073_v21 = vld [vmem:[#allocation2 + $0x70] sm:$0xff]  ;;  %v10129_v46 = vld [vmem:[#allocation2 + $0x62] sm:$0xff]  ;;  %v4472_v38 = vld [vmem:[#allocation10 + $0x50] sm:$0xff] }
 0x1ed   :  { %v2317_v53 = vmax.f32 %v2301_v47, 0.0  ;;  %v8801_v54 = vadd.f32 %v7920_v52, %v7816_v48  ;;  %v2256_v55 = vpop.f32.mrb[15].mxu0  ;;  %7941 = vmatprep.mubr.msk.f32.mxu1 %vm2320_vm4, %v9587_v22  ;;  %v10117_v44 = vld [vmem:[#allocation2 + $0x32] sm:$0xff]  ;;  %v4470_v34 = vld [vmem:[#allocation10 + $0x40] sm:$0xff] }
 0x1ee   :  { %v2316_v57 = vmax.f32 %v2300_v50, 0.0  ;;  %v8802_v58 = vadd.f32 %v2256_v55, %v1335_v51  ;;  %v10020_v62 = vld [vmem:[#allocation2 + $0xc1] sm:$0xff]  ;;  %v10125_v45 = vld [vmem:[#allocation2 + $0x52] sm:$0xff] }
 0x1ef   :  { %2334 = vst.msk [vmem:[#allocation2 + $0x101] sm:$0xff] %vm2320_vm4, %v2317_v53  ;;  %v2303_v59 = vadd.f32 %v8801_v54, %v9951_v32  ;;  %v10014_v60 = vld [vmem:[#allocation2 + $0xb1] sm:$0xff]  ;;  %v10083_v27 = vld [vmem:[#allocation2 + $0xc0] sm:$0xff] }
 0x1f0   :  { %2333 = vst.msk [vmem:[#allocation2 + $0xf1] sm:$0xff] %vm2320_vm4, %v2316_v57  ;;  %v2302_v61 = vadd.f32 %v8802_v58, %v9951_v32  ;;  %7942 = vmatmul.mubr.msk.f32.gmra.mrb[24].mxu1 %vm2320_vm4, %v10014_v60  ;;  %v10079_v26 = vld [vmem:[#allocation2 + $0xb0] sm:$0xff]  ;;  %v10143_v50 = vld [vmem:[#allocation2 + $0xc2] sm:$0xff] }
 0x1f1   :  { %v2319_v63 = vmax.f32 %v2303_v59, 0.0  ;;  %7944 = vmatprep.mubr.msk.f32.mxu1 %vm2320_vm4, %v10020_v62  ;;  %v10133_v47 = vld [vmem:[#allocation2 + $0x72] sm:$0xff]  ;;  %v3244_v57 = vld [vmem:[#allocation7 + $0x98] sm:$0xff]  ;;  %v3471_v59 = vld [vmem:[#allocation7 + $0xa0] sm:$0xff] }
 0x1f2   :  { %v2318_v22 = vmax.f32 %v2302_v61, 0.0  ;;  %v10030_v32 = vld [vmem:[#allocation2 + $0xe1] sm:$0xff]  ;;  %v10139_v48 = vld [vmem:[#allocation2 + $0xb2] sm:$0xff] }
 0x1f3   :  { %2336 = vst.msk [vmem:[#allocation2 + $0x121] sm:$0xff] %vm2320_vm4, %v2319_v63  ;;  %v10025_v0 = vld [vmem:[#allocation2 + $0xd1] sm:$0xff]  ;;  %v10091_v30 = vld [vmem:[#allocation2 + $0xe0] sm:$0xff] }
 0x1f4   :  { %2335 = vst.msk [vmem:[#allocation2 + $0x111] sm:$0xff] %vm2320_vm4, %v2318_v22  ;;  %7945 = vmatmul.mubr.msk.f32.gmra.mrb[26].mxu1 %vm2320_vm4, %v10025_v0  ;;  %v10087_v29 = vld [vmem:[#allocation2 + $0xd0] sm:$0xff]  ;;  %v10151_v52 = vld [vmem:[#allocation2 + $0xe2] sm:$0xff] }
 0x1f5   :  { %7947 = vmatprep.mubr.msk.f32.mxu1 %vm2320_vm4, %v10030_v32  ;;  %v10147_v51 = vld [vmem:[#allocation2 + $0xd2] sm:$0xff]  ;;  %v10181_v22 = vld [vmem:[#allocation2 + $0x80] sm:$0xff] }
 0x1f6   :  { %v10038_v9 = vld [vmem:[#allocation2 + $0x101] sm:$0xff]  ;;  %v3243_v55 = vld [vmem:[#allocation7 + $0x90] sm:$0xff]  ;;  %v3472_v61 = vld [vmem:[#allocation7 + $0xa8] sm:$0xff] }
 0x1f7   :  { %v10034_v1 = vld [vmem:[#allocation2 + $0xf1] sm:$0xff]  ;;  %v10099_v31 = vld [vmem:[#allocation2 + $0x100] sm:$0xff]  ;;  %v8605_v58 = vpack.c.bf16 %v3244_v57, %v3243_v55  ;;  %v8609_v63 = vpack.c.bf16 %v3472_v61, %v3471_v59  ;;  %v4474_v61 = vld [vmem:[#allocation10 + $0x60] sm:$0xff] }
 0x1f8   :  { %7948 = vmatmul.mubr.msk.f32.gmra.mrb[28].mxu1 %vm2320_vm4, %v10034_v1  ;;  %v10159_v53 = vld [vmem:[#allocation2 + $0x102] sm:$0xff]  ;;  %v3932_v59 = vld [vmem:[#allocation7 + $0xe8] sm:$0xff] }
 0x1f9   :  { %7950 = vmatprep.mubr.msk.f32.mxu1 %vm2320_vm4, %v10038_v9  ;;  %v3931_v57 = vld [vmem:[#allocation7 + $0xe0] sm:$0xff] }
 0x1fa   :  { %v10199_v3 = vld [vmem:[#allocation2 + $0x120] sm:$0xff] }
 0x1fb   :  { %v10042_v10 = vld [vmem:[#allocation2 + $0x111] sm:$0xff] }
 0x1fc   :  { %7951 = vmatmul.mubr.msk.f32.gmra.mrb[30].mxu1 %vm2320_vm4, %v10042_v10  ;;  %v10103_v4 = vld [vmem:[#allocation2 + $0x110] sm:$0xff] }
 0x1fd   :  { %7961 = vmatprep.mubr.msk.f32.mxu1 %vm2320_vm4, %v9656_v39  ;;  %v10061_v39 = vld [vmem:[#allocation2 + $0x40] sm:$0xff]  ;;  %v10163_v54 = vld [vmem:[#allocation2 + $0x112] sm:$0xff] }
 0x200   :  { %7962 = vmatmul.mubr.msk.f32.vlgmr.msra.gmra.mrb[16].mxu1 %vm2320_vm4, %v10048_v17 }
 0x201   :  { %8588 = vmatpush3.bf16.msra.mxu1 %v9975_v20  ;;  %7964 = vmatprep.mubr.msk.f32.mxu1 %vm2320_vm4, %v10052_v19  ;;  %v10069_v20 = vld [vmem:[#allocation2 + $0x60] sm:$0xff] }
 0x202   :  { %8590 = vmatprep.subr.bf16.mxu1 %v8589_v15 }
 0x204   :  { %7965 = vmatmul.mubr.msk.f32.gmra.mrb[18].mxu1 %vm2320_vm4, %v10057_v23 }
 0x205   :  { %7967 = vmatprep.mubr.msk.f32.mxu1 %vm2320_vm4, %v10061_v39  ;;  %8592 = vmatpush3.bf16.msra.mxu1 %v8589_v15  ;;  %v3474_v15 = vld [vmem:[#allocation7 + $0xb8] sm:$0xff] }
 0x206   :  { %8594 = vmatprep.subr.bf16.mxu1 %v8593_v7 }
 0x208   :  { %7968 = vmatmul.mubr.msk.f32.gmra.mrb[20].mxu1 %vm2320_vm4, %v10065_v24 }
 0x209   :  { %7970 = vmatprep.mubr.msk.f32.mxu1 %vm2320_vm4, %v10069_v20 }
 0x20c   :  { %7971 = vmatmul.mubr.msk.f32.gmra.mrb[22].mxu1 %vm2320_vm4, %v10073_v21 }
 0x20d   :  { %7973 = vmatprep.mubr.msk.f32.mxu1 %vm2320_vm4, %v9723_v56  ;;  %v10095_v56 = vld [vmem:[#allocation2 + $0xf0] sm:$0xff] }
 0x210   :  { %7974 = vmatmul.mubr.msk.f32.gmra.mrb[24].mxu1 %vm2320_vm4, %v10079_v26 }
 0x211   :  { %7976 = vmatprep.mubr.msk.f32.mxu1 %vm2320_vm4, %v10083_v27 }
 0x214   :  { %7977 = vmatmul.mubr.msk.f32.gmra.mrb[26].mxu1 %vm2320_vm4, %v10087_v29 }
 0x215   :  { %7979 = vmatprep.mubr.msk.f32.mxu1 %vm2320_vm4, %v10091_v30 }
 0x218   :  { %7980 = vmatmul.mubr.msk.f32.gmra.mrb[28].mxu1 %vm2320_vm4, %v10095_v56 }
 0x219   :  { %7982 = vmatprep.mubr.msk.f32.mxu1 %vm2320_vm4, %v10099_v31 }
 0x21c   :  { %7983 = vmatmul.mubr.msk.f32.gmra.mrb[30].mxu1 %vm2320_vm4, %v10103_v4 }
 0x21d   :  { %7993 = vmatprep.mubr.msk.f32.mxu1 %vm2320_vm4, %v9776_v8  ;;  %v10121_v8 = vld [vmem:[#allocation2 + $0x42] sm:$0xff] }
 0x220   :  { %7994 = vmatmul.mubr.msk.f32.vlgmr.msra.gmra.mrb[16].mxu1 %vm2320_vm4, %v10109_v37 }
 0x221   :  { %8596 = vmatpush3.bf16.msra.mxu1 %v8593_v7  ;;  %7996 = vmatprep.mubr.msk.f32.mxu1 %vm2320_vm4, %v10113_v42  ;;  %v8617_v7 = vpack.c.bf16 %v3702_v6, %v3701_v18  ;;  %v3934_v18 = vld [vmem:[#allocation7 + $0xf8] sm:$0xff] }
 0x222   :  { %8598 = vmatprep.subr.bf16.mxu1 %v8597_v35 }
 0x224   :  { %7997 = vmatmul.mubr.msk.f32.gmra.mrb[18].mxu1 %vm2320_vm4, %v10117_v44 }
 0x225   :  { %7999 = vmatprep.mubr.msk.f32.mxu1 %vm2320_vm4, %v10121_v8  ;;  %8600 = vmatpush3.bf16.msra.mxu1 %v8597_v35  ;;  %v4471_v35 = vld [vmem:[#allocation10 + $0x48] sm:$0xff] }
 0x226   :  { %8602 = vmatprep.subr.bf16.mxu1 %v8601_v43  ;;  %v8641_v40 = vpack.c.bf16 %v4471_v35, %v4470_v34 }
 0x228   :  { %8000 = vmatmul.mubr.msk.f32.gmra.mrb[20].mxu1 %vm2320_vm4, %v10125_v45  ;;  %8642 = vmatprep.subr.bf16.mxu0 %v8641_v40 }
 0x229   :  { %8002 = vmatprep.mubr.msk.f32.mxu1 %vm2320_vm4, %v10129_v46  ;;  %8644 = vmatpush3.bf16.msra.mxu0 %v8641_v40 }
 0x22c   :  { %8003 = vmatmul.mubr.msk.f32.gmra.mrb[22].mxu1 %vm2320_vm4, %v10133_v47 }
 0x22d   :  { %8005 = vmatprep.mubr.msk.f32.mxu1 %vm2320_vm4, %v9811_v12  ;;  %v10155_v12 = vld [vmem:[#allocation2 + $0xf2] sm:$0xff] }
 0x230   :  { %8006 = vmatmul.mubr.msk.f32.gmra.mrb[24].mxu1 %vm2320_vm4, %v10139_v48 }
 0x231   :  { %8008 = vmatprep.mubr.msk.f32.mxu1 %vm2320_vm4, %v10143_v50 }
 0x234   :  { %8009 = vmatmul.mubr.msk.f32.gmra.mrb[26].mxu1 %vm2320_vm4, %v10147_v51 }
 0x235   :  { %8011 = vmatprep.mubr.msk.f32.mxu1 %vm2320_vm4, %v10151_v52 }
 0x238   :  { %8012 = vmatmul.mubr.msk.f32.gmra.mrb[28].mxu1 %vm2320_vm4, %v10155_v12 }
 0x239   :  { %8014 = vmatprep.mubr.msk.f32.mxu1 %vm2320_vm4, %v10159_v53 }
 0x23c   :  { %8015 = vmatmul.mubr.msk.f32.gmra.mrb[30].mxu1 %vm2320_vm4, %v10163_v54 }
 0x23d   :  { %8025 = vmatprep.mubr.msk.f32.mxu1 %vm2320_vm4, %v10048_v17  ;;  %v8613_v17 = vpack.c.bf16 %v3474_v15, %v3473_v2  ;;  %v8625_v2 = vpack.c.bf16 %v3932_v59, %v3931_v57  ;;  %v10253_v15 = vld [vmem:[#allocation2 + $0x82] sm:$0xff] }
 0x23e   :  { %v4452_v59 = vld [vmem:[#allocation10 + $0x38] sm:$0xff] }
 0x240   :  { %8026 = vmatmul.mubr.msk.f32.vlgmr.msra.gmra.mrb[16].mxu1 %vm2320_vm4, %v10052_v19 }
 0x241   :  { %8604 = vmatpush3.bf16.msra.mxu1 %v8601_v43  ;;  %8028 = vmatprep.mubr.msk.f32.mxu1 %vm2320_vm4, %v10057_v23  ;;  %v4473_v43 = vld [vmem:[#allocation10 + $0x58] sm:$0xff] }
 0x242   :  { %8606 = vmatprep.subr.bf16.mxu1 %v8605_v58 }
 0x244   :  { %8029 = vmatmul.mubr.msk.f32.gmra.mrb[18].mxu1 %vm2320_vm4, %v10061_v39 }
 0x245   :  { %8031 = vmatprep.mubr.msk.f32.mxu1 %vm2320_vm4, %v10065_v24  ;;  %8608 = vmatpush3.bf16.msra.mxu1 %v8605_v58  ;;  %v8645_v58 = vpack.c.bf16 %v4473_v43, %v4472_v38 }
 0x246   :  { %8610 = vmatprep.subr.bf16.mxu1 %v8609_v63 }
 0x247   :  { %8646 = vmatprep.subr.bf16.mxu0 %v8645_v58 }
 0x248   :  { %8032 = vmatmul.mubr.msk.f32.gmra.mrb[20].mxu1 %vm2320_vm4, %v10069_v20  ;;  %8648 = vmatpush3.bf16.msra.mxu0 %v8645_v58  ;;  %v4451_v58 = vld [vmem:[#allocation10 + $0x30] sm:$0xff] }
 0x249   :  { %8034 = vmatprep.mubr.msk.f32.mxu1 %vm2320_vm4, %v10073_v21 }
 0x24c   :  { %8035 = vmatmul.mubr.msk.f32.gmra.mrb[22].mxu1 %vm2320_vm4, %v10181_v22 }
 0x24d   :  { %8037 = vmatprep.mubr.msk.f32.mxu1 %vm2320_vm4, %v10079_v26  ;;  %v10235_v26 = vld [vmem:[#allocation2 + $0x121] sm:$0xff] }
 0x250   :  { %8038 = vmatmul.mubr.msk.f32.gmra.mrb[24].mxu1 %vm2320_vm4, %v10083_v27 }
 0x251   :  { %8040 = vmatprep.mubr.msk.f32.mxu1 %vm2320_vm4, %v10087_v29 }
 0x254   :  { %8041 = vmatmul.mubr.msk.f32.gmra.mrb[26].mxu1 %vm2320_vm4, %v10091_v30 }
 0x255   :  { %8043 = vmatprep.mubr.msk.f32.mxu1 %vm2320_vm4, %v10095_v56 }
 0x258   :  { %8044 = vmatmul.mubr.msk.f32.gmra.mrb[28].mxu1 %vm2320_vm4, %v10099_v31 }
 0x259   :  { %8046 = vmatprep.mubr.msk.f32.mxu1 %vm2320_vm4, %v10103_v4 }
 0x25c   :  { %8047 = vmatmul.mubr.msk.f32.gmra.mrb[30].mxu1 %vm2320_vm4, %v10199_v3 }
 0x25d   :  { %8057 = vmatprep.mubr.msk.f32.mxu1 %vm2320_vm4, %v9965_v5  ;;  %v10217_v5 = vld [vmem:[#allocation2 + $0x81] sm:$0xff] }
 0x260   :  { %8058 = vmatmul.mubr.msk.f32.vlgmr.msra.gmra.mrb[16].mxu1 %vm2320_vm4, %v9971_v16 }
 0x261   :  { %8612 = vmatpush3.bf16.msra.mxu1 %v8609_v63  ;;  %8060 = vmatprep.mubr.msk.f32.mxu1 %vm2320_vm4, %v9979_v25  ;;  %v4475_v63 = vld [vmem:[#allocation10 + $0x68] sm:$0xff] }
 0x262   :  { %8614 = vmatprep.subr.bf16.mxu1 %v8613_v17 }
 0x264   :  { %8061 = vmatmul.mubr.msk.f32.gmra.mrb[18].mxu1 %vm2320_vm4, %v9985_v28 }
 0x265   :  { %8063 = vmatprep.mubr.msk.f32.mxu1 %vm2320_vm4, %v9992_v36  ;;  %8616 = vmatpush3.bf16.msra.mxu1 %v8613_v17  ;;  %v10271_v17 = vld [vmem:[#allocation2 + $0x122] sm:$0xff] }
 0x266   :  { %8618 = vmatprep.subr.bf16.mxu1 %v8617_v7 }
 0x268   :  { %8064 = vmatmul.mubr.msk.f32.gmra.mrb[20].mxu1 %vm2320_vm4, %v9998_v41 }
 0x269   :  { %8066 = vmatprep.mubr.msk.f32.mxu1 %vm2320_vm4, %v10004_v49 }
 0x26c   :  { %8067 = vmatmul.mubr.msk.f32.gmra.mrb[22].mxu1 %vm2320_vm4, %v10217_v5 }
 0x26d   :  { %8069 = vmatprep.mubr.msk.f32.mxu1 %vm2320_vm4, %v10014_v60  ;;  %v3703_v60 = vld [vmem:[#allocation7 + $0xd0] sm:$0xff] }
 0x26e   :  { %v8621_v55 = vpack.c.bf16 %v3704_v33, %v3703_v60  ;;  %v4162_v60 = vld [vmem:[#allocation7 + $0x108] sm:$0xff] }
 0x270   :  { %8070 = vmatmul.mubr.msk.f32.gmra.mrb[24].mxu1 %vm2320_vm4, %v10020_v62 }
 0x271   :  { %8072 = vmatprep.mubr.msk.f32.mxu1 %vm2320_vm4, %v10025_v0 }
 0x274   :  { %8073 = vmatmul.mubr.msk.f32.gmra.mrb[26].mxu1 %vm2320_vm4, %v10030_v32 }
 0x275   :  { %8075 = vmatprep.mubr.msk.f32.mxu1 %vm2320_vm4, %v10034_v1 }
 0x278   :  { %8076 = vmatmul.mubr.msk.f32.gmra.mrb[28].mxu1 %vm2320_vm4, %v10038_v9 }
 0x279   :  { %8078 = vmatprep.mubr.msk.f32.mxu1 %vm2320_vm4, %v10042_v10 }
 0x27c   :  { %8079 = vmatmul.mubr.msk.f32.gmra.mrb[30].mxu1 %vm2320_vm4, %v10235_v26 }
 0x27d   :  { %8089 = vmatprep.mubr.msk.f32.mxu1 %vm2320_vm4, %v10109_v37  ;;  %v8649_v37 = vpack.c.bf16 %v4475_v63, %v4474_v61 }
 0x27f   :  { %8650 = vmatprep.subr.bf16.mxu0 %v8649_v37 }
 0x280   :  { %8090 = vmatmul.mubr.msk.f32.vlgmr.msra.gmra.mrb[16].mxu1 %vm2320_vm4, %v10113_v42  ;;  %8652 = vmatpush3.bf16.msra.mxu0 %v8649_v37 }
 0x281   :  { %8620 = vmatpush3.bf16.msra.mxu1 %v8617_v7  ;;  %8092 = vmatprep.mubr.msk.f32.mxu1 %vm2320_vm4, %v10117_v44  ;;  %v4161_v7 = vld [vmem:[#allocation7 + $0x100] sm:$0xff] }
 0x282   :  { %8622 = vmatprep.subr.bf16.mxu1 %v8621_v55  ;;  %v8633_v33 = vpack.c.bf16 %v4162_v60, %v4161_v7  ;;  %v4881_v7 = vld [vmem:[#allocation10 + $0x80] sm:$0xff]  ;;  %v4882_v60 = vld [vmem:[#allocation10 + $0x88] sm:$0xff] }
 0x284   :  { %8093 = vmatmul.mubr.msk.f32.gmra.mrb[18].mxu1 %vm2320_vm4, %v10121_v8 }
 0x285   :  { %8095 = vmatprep.mubr.msk.f32.mxu1 %vm2320_vm4, %v10125_v45  ;;  %8624 = vmatpush3.bf16.msra.mxu1 %v8621_v55 }
 0x286   :  { %8626 = vmatprep.subr.bf16.mxu1 %v8625_v2 }
 0x288   :  { %8096 = vmatmul.mubr.msk.f32.gmra.mrb[20].mxu1 %vm2320_vm4, %v10129_v46 }
 0x289   :  { %8098 = vmatprep.mubr.msk.f32.mxu1 %vm2320_vm4, %v10133_v47 }
 0x28c   :  { %8099 = vmatmul.mubr.msk.f32.gmra.mrb[22].mxu1 %vm2320_vm4, %v10253_v15 }
 0x28d   :  { %8101 = vmatprep.mubr.msk.f32.mxu1 %vm2320_vm4, %v10139_v48  ;;  %v3933_v48 = vld [vmem:[#allocation7 + $0xf0] sm:$0xff] }
 0x28e   :  { %v8629_v6 = vpack.c.bf16 %v3934_v18, %v3933_v48 }
 0x290   :  { %8102 = vmatmul.mubr.msk.f32.gmra.mrb[24].mxu1 %vm2320_vm4, %v10143_v50 }
 0x291   :  { %8104 = vmatprep.mubr.msk.f32.mxu1 %vm2320_vm4, %v10147_v51 }
 0x294   :  { %8105 = vmatmul.mubr.msk.f32.gmra.mrb[26].mxu1 %vm2320_vm4, %v10151_v52 }
 0x295   :  { %8107 = vmatprep.mubr.msk.f32.mxu1 %vm2320_vm4, %v10155_v12 }
 0x298   :  { %8108 = vmatmul.mubr.msk.f32.gmra.mrb[28].mxu1 %vm2320_vm4, %v10159_v53 }
 0x299   :  { %8110 = vmatprep.mubr.msk.f32.mxu1 %vm2320_vm4, %v10163_v54 }
 0x29c   :  { %8111 = vmatmul.mubr.msk.f32.gmra.mrb[30].mxu1 %vm2320_vm4, %v10271_v17 }
 0x29d   :  { %8121 = vmatprep.mubr.msk.f32.mxu1 %vm2320_vm4, %v10052_v19  ;;  %v3691_v19 = vld [vmem:[#allocation2 + $0x90] sm:$0xff] }
 0x2a0   :  { %8122 = vmatmul.mubr.msk.f32.vlgmr.msra.gmra.mrb[16].mxu1 %vm2320_vm4, %v10057_v23  ;;  %v3699_v23 = vld [vmem:[#allocation2 + $0x130] sm:$0xff] }
 0x2a1   :  { %8628 = vmatpush3.bf16.msra.mxu1 %v8625_v2  ;;  %8124 = vmatprep.mubr.msk.f32.mxu1 %vm2320_vm4, %v10061_v39  ;;  %v4163_v39 = vld [vmem:[#allocation7 + $0x110] sm:$0xff] }
 0x2a2   :  { %8630 = vmatprep.subr.bf16.mxu1 %v8629_v6 }
 0x2a4   :  { %8125 = vmatmul.mubr.msk.f32.gmra.mrb[18].mxu1 %vm2320_vm4, %v10065_v24  ;;  %v4164_v24 = vld [vmem:[#allocation7 + $0x118] sm:$0xff] }
 0x2a5   :  { %8127 = vmatprep.mubr.msk.f32.mxu1 %vm2320_vm4, %v10069_v20  ;;  %8632 = vmatpush3.bf16.msra.mxu1 %v8629_v6  ;;  %v8637_v20 = vpack.c.bf16 %v4164_v24, %v4163_v39 }
 0x2a6   :  { %8634 = vmatprep.subr.bf16.mxu1 %v8633_v33 }
 0x2a8   :  { %8128 = vmatmul.mubr.msk.f32.gmra.mrb[20].mxu1 %vm2320_vm4, %v10073_v21 }
 0x2a9   :  { %8130 = vmatprep.mubr.msk.f32.mxu1 %vm2320_vm4, %v10181_v22  ;;  %v4449_v22 = vld [vmem:[#allocation10 + $0x20] sm:$0xff] }
 0x2ac   :  { %8131 = vmatmul.mubr.msk.f32.gmra.mrb[22].mxu1 %vm2320_vm4, %v3691_v19 }
 0x2ad   :  { %8133 = vmatprep.mubr.msk.f32.mxu1 %vm2320_vm4, %v10083_v27 }
 0x2b0   :  { %8134 = vmatmul.mubr.msk.f32.gmra.mrb[24].mxu1 %vm2320_vm4, %v10087_v29 }
 0x2b1   :  { %8136 = vmatprep.mubr.msk.f32.mxu1 %vm2320_vm4, %v10091_v30 }
 0x2b4   :  { %8137 = vmatmul.mubr.msk.f32.gmra.mrb[26].mxu1 %vm2320_vm4, %v10095_v56 }
 0x2b5   :  { %8139 = vmatprep.mubr.msk.f32.mxu1 %vm2320_vm4, %v10099_v31 }
 0x2b8   :  { %8140 = vmatmul.mubr.msk.f32.gmra.mrb[28].mxu1 %vm2320_vm4, %v10103_v4 }
 0x2b9   :  { %8142 = vmatprep.mubr.msk.f32.mxu1 %vm2320_vm4, %v10199_v3  ;;  %v4450_v3 = vld [vmem:[#allocation10 + $0x28] sm:$0xff] }
 0x2ba   :  { %v8665_v40 = vpack.c.bf16 %v4450_v3, %v4449_v22 }
 0x2bc   :  { %8143 = vmatmul.mubr.msk.f32.gmra.mrb[30].mxu1 %vm2320_vm4, %v3699_v23 }
 0x2bd   :  { %8153 = vmatprep.mubr.msk.f32.mxu1 %vm2320_vm4, %v9971_v16  ;;  %v3921_v16 = vld [vmem:[#allocation2 + $0x91] sm:$0xff] }
 0x2c0   :  { %8154 = vmatmul.mubr.msk.f32.vlgmr.msra.gmra.mrb[16].mxu1 %vm2320_vm4, %v9979_v25 }
 0x2c1   :  { %8636 = vmatpush3.bf16.msra.mxu1 %v8633_v33  ;;  %8156 = vmatprep.mubr.msk.f32.mxu1 %vm2320_vm4, %v9985_v28  ;;  %v4453_v28 = vld [vmem:[#allocation2 + $0x1] sm:$0xff] }
 0x2c2   :  { %8638 = vmatprep.subr.bf16.mxu1 %v8637_v20  ;;  %8225 = vmatprep.mubr.msk.f32.mxu0 %vm102_vm0, %v4453_v28 }
 0x2c4   :  { %8157 = vmatmul.mubr.msk.f32.gmra.mrb[18].mxu1 %vm2320_vm4, %v9992_v36  ;;  %v4445_v36 = vld [vmem:[#allocation10] sm:$0xff] }
 0x2c5   :  { %8159 = vmatprep.mubr.msk.f32.mxu1 %vm2320_vm4, %v9998_v41  ;;  %8640 = vmatpush3.bf16.msra.mxu1 %v8637_v20  ;;  %v4446_v41 = vld [vmem:[#allocation10 + $0x8] sm:$0xff]  ;;  %v4461_v20 = vld [vmem:[#allocation2 + $0xa1] sm:$0xff] }
 0x2c8   :  { %8160 = vmatmul.mubr.msk.f32.gmra.mrb[20].mxu1 %vm2320_vm4, %v10004_v49  ;;  %v8657_v49 = vpack.c.bf16 %v4446_v41, %v4445_v36 }
 0x2c9   :  { %8162 = vmatprep.mubr.msk.f32.mxu1 %vm2320_vm4, %v10217_v5 }
 0x2cc   :  { %8163 = vmatmul.mubr.msk.f32.gmra.mrb[22].mxu1 %vm2320_vm4, %v3921_v16  ;;  %v8673_v16 = vpack.c.bf16 %v4882_v60, %v4881_v7 }
 0x2cd   :  { %8165 = vmatprep.mubr.msk.f32.mxu1 %vm2320_vm4, %v10020_v62  ;;  %v10369_v62 = vld [vmem:[#allocation8] ss:$0 sm:$0xff] }
 0x2d0   :  { %8166 = vmatmul.mubr.msk.f32.gmra.mrb[24].mxu1 %vm2320_vm4, %v10025_v0 }
 0x2d1   :  { %8168 = vmatprep.mubr.msk.f32.mxu1 %vm2320_vm4, %v10030_v32 }
 0x2d4   :  { %8169 = vmatmul.mubr.msk.f32.gmra.mrb[26].mxu1 %vm2320_vm4, %v10034_v1 }
 0x2d5   :  { %8171 = vmatprep.mubr.msk.f32.mxu1 %vm2320_vm4, %v10038_v9 }
 0x2d8   :  { %8172 = vmatmul.mubr.msk.f32.gmra.mrb[28].mxu1 %vm2320_vm4, %v10042_v10 }
 0x2d9   :  { %8174 = vmatprep.mubr.msk.f32.mxu1 %vm2320_vm4, %v10235_v26 }
 0x2dc   :  { %8175 = vmatmul.mubr.msk.f32.gmra.mrb[30].mxu1 %vm2320_vm4, %v9877_v11  ;;  %v4476_v11 = vld [vmem:[#allocation10 + $0x70] sm:$0xff] }
 0x2dd   :  { %8185 = vmatprep.mubr.msk.f32.mxu1 %vm2320_vm4, %v10113_v42 }
 0x2e0   :  { %8186 = vmatmul.mubr.msk.f32.vlgmr.msra.gmra.mrb[16].mxu1 %vm2320_vm4, %v10117_v44 }
 0x2e1   :  { %8188 = vmatprep.mubr.msk.f32.mxu1 %vm2320_vm4, %v10121_v8  ;;  %v4447_v8 = vld [vmem:[#allocation10 + $0x10] sm:$0xff] }
 0x2e4   :  { %8189 = vmatmul.mubr.msk.f32.gmra.mrb[18].mxu1 %vm2320_vm4, %v10125_v45  ;;  %v4448_v45 = vld [vmem:[#allocation10 + $0x18] sm:$0xff] }
 0x2e5   :  { %8191 = vmatprep.mubr.msk.f32.mxu1 %vm2320_vm4, %v10129_v46 }
 0x2e8   :  { %8192 = vmatmul.mubr.msk.f32.gmra.mrb[20].mxu1 %vm2320_vm4, %v10133_v47 }
 0x2e9   :  { %8194 = vmatprep.mubr.msk.f32.mxu1 %vm2320_vm4, %v10253_v15 }
 0x2ec   :  { %8195 = vmatmul.mubr.msk.f32.gmra.mrb[22].mxu1 %vm2320_vm4, %v9911_v13  ;;  %v4477_v13 = vld [vmem:[#allocation10 + $0x78] sm:$0xff] }
 0x2ed   :  { %8197 = vmatprep.mubr.msk.f32.mxu1 %vm2320_vm4, %v10143_v50  ;;  %v8653_v25 = vpack.c.bf16 %v4477_v13, %v4476_v11 }
 0x2ef   :  { %8654 = vmatprep.subr.bf16.mxu0 %v8653_v25 }
 0x2f0   :  { %8198 = vmatmul.mubr.msk.f32.gmra.mrb[24].mxu1 %vm2320_vm4, %v10147_v51  ;;  %8656 = vmatpush3.bf16.msra.mxu0 %v8653_v25 }
 0x2f1   :  { %8200 = vmatprep.mubr.msk.f32.mxu1 %vm2320_vm4, %v10151_v52  ;;  %8658 = vmatprep.subr.bf16.mxu0 %v8657_v49  ;;  %v8661_v52 = vpack.c.bf16 %v4448_v45, %v4447_v8  ;;  %v4885_v45 = vld [vmem:[#allocation10 + $0xa0] sm:$0xff] }
 0x2f4   :  { %8201 = vmatmul.mubr.msk.f32.gmra.mrb[26].mxu1 %vm2320_vm4, %v10155_v12 }
 0x2f5   :  { %8203 = vmatprep.mubr.msk.f32.mxu1 %vm2320_vm4, %v10159_v53 }
 0x2f8   :  { %8204 = vmatmul.mubr.msk.f32.gmra.mrb[28].mxu1 %vm2320_vm4, %v10163_v54 }
 0x2f9   :  { %8206 = vmatprep.mubr.msk.f32.mxu1 %vm2320_vm4, %v10271_v17  ;;  %v8669_v17 = vpack.c.bf16 %v4452_v59, %v4451_v58 }
 0x2fc   :  { %8207 = vmatmul.mubr.msk.f32.gmra.mrb[30].mxu1 %vm2320_vm4, %v9944_v14 }
 0x3b3   :  { %v8187_v0 = vpop.f32.mrb[16].mxu1 }
 0x3b4   :  { %v4382_v32 = vadd.f32 %v8187_v0, %v10369_v62  ;;  %v4279_v1 = vpop.f32.mrb[17].mxu1 }
 0x3b5   :  { %v4381_v14 = vadd.f32 %v10369_v62, %v4279_v1 }
 0x3b6   :  { %v4398_v9 = vmax.f32 %v4382_v32, 0.0 }
 0x3b7   :  { %v4397_v10 = vmax.f32 %v4381_v14, 0.0  ;;  %v8190_v21 = vpop.f32.mrb[18].mxu1 }
 0x3b8   :  { %4414 = vst.msk [vmem:[#allocation2 + $0x21] sm:$0xff] %vm102_vm0, %v4398_v9  ;;  %v4384_v27 = vadd.f32 %v8190_v21, %v10369_v62  ;;  %v4289_v29 = vpop.f32.mrb[19].mxu1 }
 0x3b9   :  { %4413 = vst.msk [vmem:[#allocation2 + $0x11] sm:$0xff] %vm102_vm0, %v4397_v10  ;;  %v4383_v30 = vadd.f32 %v10369_v62, %v4289_v29 }
 0x3ba   :  { %v4400_v56 = vmax.f32 %v4384_v27, 0.0 }
 0x3bb   :  { %v4399_v31 = vmax.f32 %v4383_v30, 0.0  ;;  %v8193_v4 = vpop.f32.mrb[20].mxu1 }
 0x3bc   :  { %4416 = vst.msk [vmem:[#allocation2 + $0x41] sm:$0xff] %vm102_vm0, %v4400_v56  ;;  %v4386_v42 = vadd.f32 %v8193_v4, %v10369_v62  ;;  %v4299_v44 = vpop.f32.mrb[21].mxu1  ;;  %v4429_v56 = vld [vmem:[#allocation2] sm:$0xff]  ;;  %v4883_v4 = vld [vmem:[#allocation10 + $0x90] sm:$0xff] }
 0x3bd   :  { %4415 = vst.msk [vmem:[#allocation2 + $0x31] sm:$0xff] %vm102_vm0, %v4399_v31  ;;  %v4385_v46 = vadd.f32 %v10369_v62, %v4299_v44 }
 0x3be   :  { %v4402_v47 = vmax.f32 %v4386_v42, 0.0  ;;  %v4884_v42 = vld [vmem:[#allocation10 + $0x98] sm:$0xff] }
 0x3bf   :  { %v4401_v50 = vmax.f32 %v4385_v46, 0.0  ;;  %v8196_v51 = vpop.f32.mrb[22].mxu1  ;;  %v10389_v26 = vld [vmem:[#allocation2 + $0x21] sm:$0xff]  ;;  %v8677_v44 = vpack.c.bf16 %v4884_v42, %v4883_v4  ;;  %v4886_v46 = vld [vmem:[#allocation10 + $0xa8] sm:$0xff] }
 0x3c0   :  { %4418 = vst.msk [vmem:[#allocation2 + $0x61] sm:$0xff] %vm102_vm0, %v4402_v47  ;;  %v4388_v12 = vadd.f32 %v8196_v51, %v10369_v62  ;;  %v4309_v53 = vpop.f32.mrb[23].mxu1  ;;  %v10383_v54 = vld [vmem:[#allocation2 + $0x11] sm:$0xff]  ;;  %v10465_v47 = vld [vmem:[#allocation2 + $0x20] sm:$0xff] }
 0x3c1   :  { %4417 = vst.msk [vmem:[#allocation2 + $0x51] sm:$0xff] %vm102_vm0, %v4401_v50  ;;  %v4387_v5 = vadd.f32 %v10369_v62, %v4309_v53  ;;  %8226 = vmatmul.mubr.msk.f32.vlgmr.msra.gmra.mrb[16].mxu0 %vm102_vm0, %v10383_v54  ;;  %v10461_v8 = vld [vmem:[#allocation2 + $0x10] sm:$0xff]  ;;  %v8681_v50 = vpack.c.bf16 %v4886_v46, %v4885_v45 }
 0x3c2   :  { %v4404_v34 = vmax.f32 %v4388_v12, 0.0  ;;  %8660 = vmatpush3.bf16.msra.mxu0 %v8657_v49  ;;  %8228 = vmatprep.mubr.msk.f32.mxu0 %vm102_vm0, %v10389_v26  ;;  %v4888_v12 = vld [vmem:[#allocation10 + $0xb8] sm:$0xff]  ;;  %v10519_v60 = vld [vmem:[#allocation2 + $0x12] sm:$0xff] }
 0x3c3   :  { %v4403_v35 = vmax.f32 %v4387_v5, 0.0  ;;  %v8199_v38 = vpop.f32.mrb[24].mxu1  ;;  %8662 = vmatprep.subr.bf16.mxu0 %v8661_v52  ;;  %v10401_v63 = vld [vmem:[#allocation2 + $0x41] sm:$0xff] }
 0x3c4   :  { %4420 = vst.msk [vmem:[#allocation2 + $0x81] sm:$0xff] %vm102_vm0, %v4404_v34  ;;  %v4390_v43 = vadd.f32 %v8199_v38, %v10369_v62  ;;  %v4319_v55 = vpop.f32.mrb[25].mxu1  ;;  %v10395_v57 = vld [vmem:[#allocation2 + $0x31] sm:$0xff]  ;;  %v10473_v53 = vld [vmem:[#allocation2 + $0x40] sm:$0xff]  ;;  %v5115_v5 = vld [vmem:[#allocation10 + $0xc0] sm:$0xff] }
 0x3c5   :  { %4419 = vst.msk [vmem:[#allocation2 + $0x71] sm:$0xff] %vm102_vm0, %v4403_v35  ;;  %v4389_v61 = vadd.f32 %v10369_v62, %v4319_v55  ;;  %8229 = vmatmul.mubr.msk.f32.gmra.mrb[18].mxu0 %vm102_vm0, %v10395_v57  ;;  %v10469_v51 = vld [vmem:[#allocation2 + $0x30] sm:$0xff]  ;;  %v4437_v38 = vld [vmem:[#allocation2 + $0xa0] sm:$0xff] }
 0x3c6   :  { %v4406_v2 = vmax.f32 %v4390_v43, 0.0  ;;  %8231 = vmatprep.mubr.msk.f32.mxu0 %vm102_vm0, %v10401_v63  ;;  %8664 = vmatpush3.bf16.msra.mxu0 %v8661_v52  ;;  %v4887_v52 = vld [vmem:[#allocation10 + $0xb0] sm:$0xff]  ;;  %v5116_v34 = vld [vmem:[#allocation10 + $0xc8] sm:$0xff] }
 0x3c7   :  { %v4405_v37 = vmax.f32 %v4389_v61, 0.0  ;;  %v8202_v15 = vpop.f32.mrb[26].mxu1  ;;  %8666 = vmatprep.subr.bf16.mxu0 %v8665_v40  ;;  %v10413_v19 = vld [vmem:[#allocation2 + $0x61] sm:$0xff]  ;;  %v8685_v22 = vpack.c.bf16 %v4888_v12, %v4887_v52 }
 0x3c8   :  { %4422 = vst.msk [vmem:[#allocation2 + $0xc1] sm:$0xff] %vm102_vm0, %v4406_v2  ;;  %v4392_v48 = vadd.f32 %v8202_v15, %v10369_v62  ;;  %v4329_v18 = vpop.f32.mrb[27].mxu1  ;;  %v10407_v6 = vld [vmem:[#allocation2 + $0x51] sm:$0xff]  ;;  %v10481_v35 = vld [vmem:[#allocation2 + $0x60] sm:$0xff] }
 0x3c9   :  { %4421 = vst.msk [vmem:[#allocation2 + $0xb1] sm:$0xff] %vm102_vm0, %v4405_v37  ;;  %v4391_v33 = vadd.f32 %v10369_v62, %v4329_v18  ;;  %8232 = vmatmul.mubr.msk.f32.gmra.mrb[20].mxu0 %vm102_vm0, %v10407_v6  ;;  %v10477_v3 = vld [vmem:[#allocation2 + $0x50] sm:$0xff]  ;;  %v4864_v15 = vld [vmem:[#allocation2 + $0x2] sm:$0xff] }
 0x3ca   :  { %v4408_v23 = vmax.f32 %v4392_v48, 0.0  ;;  %8234 = vmatprep.mubr.msk.f32.mxu0 %vm102_vm0, %v10413_v19  ;;  %8668 = vmatpush3.bf16.msra.mxu0 %v8665_v40  ;;  %v8689_v40 = vpack.c.bf16 %v5116_v34, %v5115_v5  ;;  %v5117_v48 = vld [vmem:[#allocation10 + $0xd0] sm:$0xff]  ;;  %v5118_v18 = vld [vmem:[#allocation10 + $0xd8] sm:$0xff]  ;;  %v5354_v5 = vld [vmem:[#allocation10 + $0x128] sm:$0xff] }
 0x3cb   :  { %v4407_v39 = vmax.f32 %v4391_v33, 0.0  ;;  %v8205_v24 = vpop.f32.mrb[28].mxu1  ;;  %8670 = vmatprep.subr.bf16.mxu0 %v8669_v17  ;;  %v8693_v7 = vpack.c.bf16 %v5118_v18, %v5117_v48  ;;  %v5119_v33 = vld [vmem:[#allocation10 + $0xe0] sm:$0xff]  ;;  %v5352_v52 = vld [vmem:[#allocation10 + $0x118] sm:$0xff]  ;;  %v5584_v48 = vld [vmem:[#allocation10 + $0x148] sm:$0xff] }
 0x3cc   :  { %4424 = vst.msk [vmem:[#allocation2 + $0xe1] sm:$0xff] %vm102_vm0, %v4408_v23  ;;  %v4394_v11 = vadd.f32 %v8205_v24, %v10369_v62  ;;  %v4339_v13 = vpop.f32.mrb[29].mxu1  ;;  %v10419_v25 = vld [vmem:[#allocation2 + $0x71] sm:$0xff] }
 0x3cd   :  { %4423 = vst.msk [vmem:[#allocation2 + $0xd1] sm:$0xff] %vm102_vm0, %v4407_v39  ;;  %v4393_v28 = vadd.f32 %v10369_v62, %v4339_v13  ;;  %8235 = vmatmul.mubr.msk.f32.gmra.mrb[22].mxu0 %vm102_vm0, %v10419_v25  ;;  %v10485_v43 = vld [vmem:[#allocation2 + $0x70] sm:$0xff]  ;;  %v10523_v39 = vld [vmem:[#allocation2 + $0x22] sm:$0xff] }
 0x3ce   :  { %v4410_v36 = vmax.f32 %v4394_v11, 0.0  ;;  %8237 = vmatprep.mubr.msk.f32.mxu0 %vm102_vm0, %v4461_v20  ;;  %8672 = vmatpush3.bf16.msra.mxu0 %v8669_v17  ;;  %v5120_v23 = vld [vmem:[#allocation10 + $0xe8] sm:$0xff]  ;;  %v5122_v11 = vld [vmem:[#allocation10 + $0xf8] sm:$0xff] }
 0x3cf   :  { %v4409_v41 = vmax.f32 %v4393_v28, 0.0  ;;  %v8208_v49 = vpop.f32.mrb[30].mxu1  ;;  %8674 = vmatprep.subr.bf16.mxu0 %v8673_v16  ;;  %v10434_v9 = vld [vmem:[#allocation2 + $0xc1] sm:$0xff]  ;;  %v8697_v24 = vpack.c.bf16 %v5120_v23, %v5119_v33  ;;  %v10527_v20 = vld [vmem:[#allocation2 + $0x32] sm:$0xff] }
 0x3d0   :  { %4426 = vst.msk [vmem:[#allocation2 + $0x101] sm:$0xff] %vm102_vm0, %v4410_v36  ;;  %v4396_v0 = vadd.f32 %v8208_v49, %v10369_v62  ;;  %v4349_v32 = vpop.f32.mrb[31].mxu1  ;;  %v10428_v1 = vld [vmem:[#allocation2 + $0xb1] sm:$0xff]  ;;  %v10494_v58 = vld [vmem:[#allocation2 + $0xc0] sm:$0xff] }
 0x3d1   :  { %4425 = vst.msk [vmem:[#allocation2 + $0xf1] sm:$0xff] %vm102_vm0, %v4409_v41  ;;  %v4395_v14 = vadd.f32 %v10369_v62, %v4349_v32  ;;  %8238 = vmatmul.mubr.msk.f32.gmra.mrb[24].mxu0 %vm102_vm0, %v10428_v1  ;;  %v10490_v55 = vld [vmem:[#allocation2 + $0xb0] sm:$0xff]  ;;  %v10531_v13 = vld [vmem:[#allocation2 + $0x42] sm:$0xff]  ;;  %v5585_v33 = vld [vmem:[#allocation10 + $0x150] sm:$0xff] }
 0x3d2   :  { %v4412_v10 = vmax.f32 %v4396_v0, 0.0  ;;  %8240 = vmatprep.mubr.msk.f32.mxu0 %vm102_vm0, %v10434_v9  ;;  %v10535_v36 = vld [vmem:[#allocation2 + $0x52] sm:$0xff]  ;;  %v5349_v41 = vld [vmem:[#allocation10 + $0x100] sm:$0xff]  ;;  %v5586_v23 = vld [vmem:[#allocation10 + $0x158] sm:$0xff] }
 0x3d3   :  { %v4411_v21 = vmax.f32 %v4395_v14, 0.0  ;;  %v10444_v62 = vld [vmem:[#allocation2 + $0xe1] sm:$0xff]  ;;  %v5350_v49 = vld [vmem:[#allocation10 + $0x108] sm:$0xff] }
 0x3d4   :  { %4428 = vst.msk [vmem:[#allocation2 + $0x121] sm:$0xff] %vm102_vm0, %v4412_v10  ;;  %v10439_v27 = vld [vmem:[#allocation2 + $0xd1] sm:$0xff]  ;;  %v10502_v61 = vld [vmem:[#allocation2 + $0xe0] sm:$0xff]  ;;  %v8705_v14 = vpack.c.bf16 %v5350_v49, %v5349_v41 }
 0x3d5   :  { %4427 = vst.msk [vmem:[#allocation2 + $0x111] sm:$0xff] %vm102_vm0, %v4411_v21  ;;  %8241 = vmatmul.mubr.msk.f32.gmra.mrb[26].mxu0 %vm102_vm0, %v10439_v27  ;;  %v10498_v59 = vld [vmem:[#allocation2 + $0xd0] sm:$0xff]  ;;  %v10539_v0 = vld [vmem:[#allocation2 + $0x62] sm:$0xff]  ;;  %v5589_v41 = vld [vmem:[#allocation10 + $0x170] sm:$0xff] }
 0x3d6   :  { %8243 = vmatprep.mubr.msk.f32.mxu0 %vm102_vm0, %v10444_v62  ;;  %v4872_v32 = vld [vmem:[#allocation2 + $0xa2] sm:$0xff]  ;;  %v10543_v10 = vld [vmem:[#allocation2 + $0x72] sm:$0xff] }
 0x3d7   :  { %v10452_v30 = vld [vmem:[#allocation2 + $0x101] sm:$0xff]  ;;  %v10548_v21 = vld [vmem:[#allocation2 + $0xb2] sm:$0xff] }
 0x3d8   :  { %v10448_v29 = vld [vmem:[#allocation2 + $0xf1] sm:$0xff]  ;;  %v10510_v37 = vld [vmem:[#allocation2 + $0x100] sm:$0xff] }
 0x3d9   :  { %8244 = vmatmul.mubr.msk.f32.gmra.mrb[28].mxu0 %vm102_vm0, %v10448_v29  ;;  %v10506_v2 = vld [vmem:[#allocation2 + $0xf0] sm:$0xff]  ;;  %v10560_v42 = vld [vmem:[#allocation2 + $0xe2] sm:$0xff] }
 0x3da   :  { %8246 = vmatprep.mubr.msk.f32.mxu0 %vm102_vm0, %v10452_v30  ;;  %v10556_v4 = vld [vmem:[#allocation2 + $0xd2] sm:$0xff]  ;;  %v10568_v45 = vld [vmem:[#allocation2 + $0x102] sm:$0xff] }
 0x3db   :  { %v5590_v49 = vld [vmem:[#allocation10 + $0x178] sm:$0xff] }
 0x3dc   :  { %v10456_v31 = vld [vmem:[#allocation2 + $0x111] sm:$0xff] }
 0x3dd   :  { %8247 = vmatmul.mubr.msk.f32.gmra.mrb[30].mxu0 %vm102_vm0, %v10456_v31  ;;  %v10514_v17 = vld [vmem:[#allocation2 + $0x110] sm:$0xff] }
 0x3de   :  { %8265 = vmatprep.mubr.msk.f32.mxu0 %vm102_vm0, %v4429_v56  ;;  %v10552_v56 = vld [vmem:[#allocation2 + $0xc2] sm:$0xff]  ;;  %v10572_v46 = vld [vmem:[#allocation2 + $0x112] sm:$0xff] }
 0x3e1   :  { %8266 = vmatmul.mubr.msk.f32.vlgmr.msra.gmra.mrb[16].mxu0 %vm102_vm0, %v10461_v8 }
 0x3e2   :  { %8676 = vmatpush3.bf16.msra.mxu0 %v8673_v16  ;;  %8268 = vmatprep.mubr.msk.f32.mxu0 %vm102_vm0, %v10465_v47  ;;  %v5121_v16 = vld [vmem:[#allocation10 + $0xf0] sm:$0xff] }
 0x3e3   :  { %8678 = vmatprep.subr.bf16.mxu0 %v8677_v44  ;;  %v8701_v28 = vpack.c.bf16 %v5122_v11, %v5121_v16  ;;  %v5587_v16 = vld [vmem:[#allocation10 + $0x160] sm:$0xff]  ;;  %v5588_v11 = vld [vmem:[#allocation10 + $0x168] sm:$0xff] }
 0x3e5   :  { %8269 = vmatmul.mubr.msk.f32.gmra.mrb[18].mxu0 %vm102_vm0, %v10469_v51 }
 0x3e6   :  { %8271 = vmatprep.mubr.msk.f32.mxu0 %vm102_vm0, %v10473_v53  ;;  %8680 = vmatpush3.bf16.msra.mxu0 %v8677_v44  ;;  %v10564_v44 = vld [vmem:[#allocation2 + $0xf2] sm:$0xff] }
 0x3e7   :  { %8682 = vmatprep.subr.bf16.mxu0 %v8681_v50 }
 0x3e9   :  { %8272 = vmatmul.mubr.msk.f32.gmra.mrb[20].mxu0 %vm102_vm0, %v10477_v3 }
 0x3ea   :  { %8274 = vmatprep.mubr.msk.f32.mxu0 %vm102_vm0, %v10481_v35  ;;  %8684 = vmatpush3.bf16.msra.mxu0 %v8681_v50  ;;  %v5351_v50 = vld [vmem:[#allocation10 + $0x110] sm:$0xff] }
 0x3eb   :  { %8686 = vmatprep.subr.bf16.mxu0 %v8685_v22  ;;  %v8709_v12 = vpack.c.bf16 %v5352_v52, %v5351_v50  ;;  %v10626_v52 = vld [vmem:[#allocation2 + $0x81] sm:$0xff] }
 0x3ed   :  { %8275 = vmatmul.mubr.msk.f32.gmra.mrb[22].mxu0 %vm102_vm0, %v10485_v43 }
 0x3ee   :  { %8277 = vmatprep.mubr.msk.f32.mxu0 %vm102_vm0, %v4437_v38  ;;  %8688 = vmatpush3.bf16.msra.mxu0 %v8685_v22  ;;  %v5353_v22 = vld [vmem:[#allocation10 + $0x120] sm:$0xff]  ;;  %v5355_v38 = vld [vmem:[#allocation10 + $0x130] sm:$0xff] }
 0x3ef   :  { %8690 = vmatprep.subr.bf16.mxu0 %v8689_v40  ;;  %v8713_v34 = vpack.c.bf16 %v5354_v5, %v5353_v22  ;;  %v5820_v22 = vld [vmem:[#allocation10 + $0x198] sm:$0xff] }
 0x3f1   :  { %8278 = vmatmul.mubr.msk.f32.gmra.mrb[24].mxu0 %vm102_vm0, %v10490_v55 }
 0x3f2   :  { %8280 = vmatprep.mubr.msk.f32.mxu0 %vm102_vm0, %v10494_v58 }
 0x3f5   :  { %8281 = vmatmul.mubr.msk.f32.gmra.mrb[26].mxu0 %vm102_vm0, %v10498_v59 }
 0x3f6   :  { %8283 = vmatprep.mubr.msk.f32.mxu0 %vm102_vm0, %v10502_v61 }
 0x3f9   :  { %8284 = vmatmul.mubr.msk.f32.gmra.mrb[28].mxu0 %vm102_vm0, %v10506_v2 }
 0x3fa   :  { %8286 = vmatprep.mubr.msk.f32.mxu0 %vm102_vm0, %v10510_v37 }
 0x3fd   :  { %8287 = vmatmul.mubr.msk.f32.gmra.mrb[30].mxu0 %vm102_vm0, %v10514_v17 }
 0x3fe   :  { %8305 = vmatprep.mubr.msk.f32.mxu0 %vm102_vm0, %v4864_v15  ;;  %v5583_v15 = vld [vmem:[#allocation10 + $0x140] sm:$0xff] }
 0x3ff   :  { %v8721_v18 = vpack.c.bf16 %v5584_v48, %v5583_v15  ;;  %v5824_v15 = vld [vmem:[#allocation10 + $0x1b8] sm:$0xff]  ;;  %v6051_v48 = vld [vmem:[#allocation10 + $0x1c0] sm:$0xff] }
 0x401   :  { %8306 = vmatmul.mubr.msk.f32.vlgmr.msra.gmra.mrb[16].mxu0 %vm102_vm0, %v10519_v60 }
 0x402   :  { %8692 = vmatpush3.bf16.msra.mxu0 %v8689_v40  ;;  %8308 = vmatprep.mubr.msk.f32.mxu0 %vm102_vm0, %v10523_v39  ;;  %v5356_v40 = vld [vmem:[#allocation10 + $0x138] sm:$0xff] }
 0x403   :  { %8694 = vmatprep.subr.bf16.mxu0 %v8693_v7 }
 0x405   :  { %8309 = vmatmul.mubr.msk.f32.gmra.mrb[18].mxu0 %vm102_vm0, %v10527_v20 }
 0x406   :  { %8311 = vmatprep.mubr.msk.f32.mxu0 %vm102_vm0, %v10531_v13  ;;  %8696 = vmatpush3.bf16.msra.mxu0 %v8693_v7  ;;  %v10590_v7 = vld [vmem:[#allocation2 + $0x80] sm:$0xff] }
 0x407   :  { %8698 = vmatprep.subr.bf16.mxu0 %v8697_v24 }
 0x409   :  { %8312 = vmatmul.mubr.msk.f32.gmra.mrb[20].mxu0 %vm102_vm0, %v10535_v36 }
 0x40a   :  { %8314 = vmatprep.mubr.msk.f32.mxu0 %vm102_vm0, %v10539_v0  ;;  %8700 = vmatpush3.bf16.msra.mxu0 %v8697_v24  ;;  %v8725_v24 = vpack.c.bf16 %v5586_v23, %v5585_v33  ;;  %v10662_v23 = vld [vmem:[#allocation2 + $0x82] sm:$0xff] }
 0x40b   :  { %8702 = vmatprep.subr.bf16.mxu0 %v8701_v28 }
 0x40d   :  { %8315 = vmatmul.mubr.msk.f32.gmra.mrb[22].mxu0 %vm102_vm0, %v10543_v10 }
 0x40e   :  { %8317 = vmatprep.mubr.msk.f32.mxu0 %vm102_vm0, %v4872_v32  ;;  %8704 = vmatpush3.bf16.msra.mxu0 %v8701_v28  ;;  %v8729_v28 = vpack.c.bf16 %v5588_v11, %v5587_v16  ;;  %v5817_v32 = vld [vmem:[#allocation10 + $0x180] sm:$0xff]  ;;  %v6054_v16 = vld [vmem:[#allocation10 + $0x1d8] sm:$0xff] }
 0x40f   :  { %8706 = vmatprep.subr.bf16.mxu0 %v8705_v14 }
 0x411   :  { %8318 = vmatmul.mubr.msk.f32.gmra.mrb[24].mxu0 %vm102_vm0, %v10548_v21 }
 0x412   :  { %8320 = vmatprep.mubr.msk.f32.mxu0 %vm102_vm0, %v10552_v56 }
 0x415   :  { %8321 = vmatmul.mubr.msk.f32.gmra.mrb[26].mxu0 %vm102_vm0, %v10556_v4 }
 0x416   :  { %8323 = vmatprep.mubr.msk.f32.mxu0 %vm102_vm0, %v10560_v42 }
 0x419   :  { %8324 = vmatmul.mubr.msk.f32.gmra.mrb[28].mxu0 %vm102_vm0, %v10564_v44 }
 0x41a   :  { %8326 = vmatprep.mubr.msk.f32.mxu0 %vm102_vm0, %v10568_v45 }
 0x41d   :  { %8327 = vmatmul.mubr.msk.f32.gmra.mrb[30].mxu0 %vm102_vm0, %v10572_v46 }
 0x41e   :  { %8345 = vmatprep.mubr.msk.f32.mxu0 %vm102_vm0, %v10461_v8  ;;  %v8717_v8 = vpack.c.bf16 %v5356_v40, %v5355_v38  ;;  %v5822_v38 = vld [vmem:[#allocation10 + $0x1a8] sm:$0xff] }
 0x421   :  { %8346 = vmatmul.mubr.msk.f32.vlgmr.msra.gmra.mrb[16].mxu0 %vm102_vm0, %v10465_v47 }
 0x422   :  { %8708 = vmatpush3.bf16.msra.mxu0 %v8705_v14  ;;  %8348 = vmatprep.mubr.msk.f32.mxu0 %vm102_vm0, %v10469_v51  ;;  %v5818_v14 = vld [vmem:[#allocation10 + $0x188] sm:$0xff] }
 0x423   :  { %8710 = vmatprep.subr.bf16.mxu0 %v8709_v12  ;;  %v8737_v50 = vpack.c.bf16 %v5818_v14, %v5817_v32  ;;  %v6058_v32 = vld [vmem:[#allocation10 + $0x1f8] sm:$0xff]  ;;  %v6285_v14 = vld [vmem:[#allocation10 + $0x200] sm:$0xff] }
 0x425   :  { %8349 = vmatmul.mubr.msk.f32.gmra.mrb[18].mxu0 %vm102_vm0, %v10473_v53 }
 0x426   :  { %8351 = vmatprep.mubr.msk.f32.mxu0 %vm102_vm0, %v10477_v3  ;;  %8712 = vmatpush3.bf16.msra.mxu0 %v8709_v12  ;;  %v5819_v12 = vld [vmem:[#allocation10 + $0x190] sm:$0xff] }
 0x427   :  { %8714 = vmatprep.subr.bf16.mxu0 %v8713_v34  ;;  %v8741_v5 = vpack.c.bf16 %v5820_v22, %v5819_v12 }
 0x429   :  { %8352 = vmatmul.mubr.msk.f32.gmra.mrb[20].mxu0 %vm102_vm0, %v10481_v35 }
 0x42a   :  { %8354 = vmatprep.mubr.msk.f32.mxu0 %vm102_vm0, %v10485_v43  ;;  %8716 = vmatpush3.bf16.msra.mxu0 %v8713_v34  ;;  %v5821_v34 = vld [vmem:[#allocation10 + $0x1a0] sm:$0xff] }
 0x42b   :  { %8718 = vmatprep.subr.bf16.mxu0 %v8717_v8  ;;  %v8745_v40 = vpack.c.bf16 %v5822_v38, %v5821_v34 }
 0x42d   :  { %8355 = vmatmul.mubr.msk.f32.gmra.mrb[22].mxu0 %vm102_vm0, %v10590_v7 }
 0x42e   :  { %8357 = vmatprep.mubr.msk.f32.mxu0 %vm102_vm0, %v10490_v55  ;;  %8720 = vmatpush3.bf16.msra.mxu0 %v8717_v8  ;;  %v10608_v55 = vld [vmem:[#allocation2 + $0x120] sm:$0xff]  ;;  %v5823_v8 = vld [vmem:[#allocation10 + $0x1b0] sm:$0xff] }
 0x42f   :  { %8722 = vmatprep.subr.bf16.mxu0 %v8721_v18 }
 0x431   :  { %8358 = vmatmul.mubr.msk.f32.gmra.mrb[24].mxu0 %vm102_vm0, %v10494_v58 }
 0x432   :  { %8360 = vmatprep.mubr.msk.f32.mxu0 %vm102_vm0, %v10498_v59 }
 0x435   :  { %8361 = vmatmul.mubr.msk.f32.gmra.mrb[26].mxu0 %vm102_vm0, %v10502_v61 }
 0x436   :  { %8363 = vmatprep.mubr.msk.f32.mxu0 %vm102_vm0, %v10506_v2 }
 0x439   :  { %8364 = vmatmul.mubr.msk.f32.gmra.mrb[28].mxu0 %vm102_vm0, %v10510_v37 }
 0x43a   :  { %8366 = vmatprep.mubr.msk.f32.mxu0 %vm102_vm0, %v10514_v17 }
 0x43d   :  { %8367 = vmatmul.mubr.msk.f32.gmra.mrb[30].mxu0 %vm102_vm0, %v10608_v55 }
 0x43e   :  { %8385 = vmatprep.mubr.msk.f32.mxu0 %vm102_vm0, %v10383_v54  ;;  %v8733_v54 = vpack.c.bf16 %v5590_v49, %v5589_v41  ;;  %v6056_v41 = vld [vmem:[#allocation10 + $0x1e8] sm:$0xff] }
 0x441   :  { %8386 = vmatmul.mubr.msk.f32.vlgmr.msra.gmra.mrb[16].mxu0 %vm102_vm0, %v10389_v26 }
 0x442   :  { %8724 = vmatpush3.bf16.msra.mxu0 %v8721_v18  ;;  %8388 = vmatprep.mubr.msk.f32.mxu0 %vm102_vm0, %v10395_v57  ;;  %v6052_v18 = vld [vmem:[#allocation10 + $0x1c8] sm:$0xff] }
 0x443   :  { %8726 = vmatprep.subr.bf16.mxu0 %v8725_v24  ;;  %v8753_v33 = vpack.c.bf16 %v6052_v18, %v6051_v48 }
 0x445   :  { %8389 = vmatmul.mubr.msk.f32.gmra.mrb[18].mxu0 %vm102_vm0, %v10401_v63 }
 0x446   :  { %8391 = vmatprep.mubr.msk.f32.mxu0 %vm102_vm0, %v10407_v6  ;;  %8728 = vmatpush3.bf16.msra.mxu0 %v8725_v24  ;;  %v6053_v24 = vld [vmem:[#allocation10 + $0x1d0] sm:$0xff] }
 0x447   :  { %8730 = vmatprep.subr.bf16.mxu0 %v8729_v28  ;;  %v8757_v11 = vpack.c.bf16 %v6054_v16, %v6053_v24 }
 0x449   :  { %8392 = vmatmul.mubr.msk.f32.gmra.mrb[20].mxu0 %vm102_vm0, %v10413_v19 }
 0x44a   :  { %8394 = vmatprep.mubr.msk.f32.mxu0 %vm102_vm0, %v10419_v25  ;;  %8732 = vmatpush3.bf16.msra.mxu0 %v8729_v28  ;;  %v6055_v28 = vld [vmem:[#allocation10 + $0x1e0] sm:$0xff] }
 0x44b   :  { %8734 = vmatprep.subr.bf16.mxu0 %v8733_v54  ;;  %v8761_v49 = vpack.c.bf16 %v6056_v41, %v6055_v28 }
 0x44d   :  { %8395 = vmatmul.mubr.msk.f32.gmra.mrb[22].mxu0 %vm102_vm0, %v10626_v52 }
 0x44e   :  { %8397 = vmatprep.mubr.msk.f32.mxu0 %vm102_vm0, %v10428_v1  ;;  %8736 = vmatpush3.bf16.msra.mxu0 %v8733_v54  ;;  %v10644_v1 = vld [vmem:[#allocation2 + $0x121] sm:$0xff]  ;;  %v6057_v54 = vld [vmem:[#allocation10 + $0x1f0] sm:$0xff] }
 0x44f   :  { %8738 = vmatprep.subr.bf16.mxu0 %v8737_v50 }
 0x451   :  { %8398 = vmatmul.mubr.msk.f32.gmra.mrb[24].mxu0 %vm102_vm0, %v10434_v9 }
 0x452   :  { %8400 = vmatprep.mubr.msk.f32.mxu0 %vm102_vm0, %v10439_v27 }
 0x455   :  { %8401 = vmatmul.mubr.msk.f32.gmra.mrb[26].mxu0 %vm102_vm0, %v10444_v62 }
 0x456   :  { %8403 = vmatprep.mubr.msk.f32.mxu0 %vm102_vm0, %v10448_v29 }
 0x459   :  { %8404 = vmatmul.mubr.msk.f32.gmra.mrb[28].mxu0 %vm102_vm0, %v10452_v30 }
 0x45a   :  { %8406 = vmatprep.mubr.msk.f32.mxu0 %vm102_vm0, %v10456_v31 }
 0x45d   :  { %8407 = vmatmul.mubr.msk.f32.gmra.mrb[30].mxu0 %vm102_vm0, %v10644_v1 }
 0x45e   :  { %8425 = vmatprep.mubr.msk.f32.mxu0 %vm102_vm0, %v10519_v60  ;;  %v8749_v60 = vpack.c.bf16 %v5824_v15, %v5823_v8 }
 0x461   :  { %8426 = vmatmul.mubr.msk.f32.vlgmr.msra.gmra.mrb[16].mxu0 %vm102_vm0, %v10523_v39 }
 0x462   :  { %8740 = vmatpush3.bf16.msra.mxu0 %v8737_v50  ;;  %8428 = vmatprep.mubr.msk.f32.mxu0 %vm102_vm0, %v10527_v20  ;;  %v6286_v50 = vld [vmem:[#allocation10 + $0x208] sm:$0xff] }
 0x463   :  { %8742 = vmatprep.subr.bf16.mxu0 %v8741_v5 }
 0x465   :  { %8429 = vmatmul.mubr.msk.f32.gmra.mrb[18].mxu0 %vm102_vm0, %v10531_v13 }
 0x466   :  { %8431 = vmatprep.mubr.msk.f32.mxu0 %vm102_vm0, %v10535_v36  ;;  %8744 = vmatpush3.bf16.msra.mxu0 %v8741_v5 }
 0x467   :  { %8746 = vmatprep.subr.bf16.mxu0 %v8745_v40 }
 0x469   :  { %8432 = vmatmul.mubr.msk.f32.gmra.mrb[20].mxu0 %vm102_vm0, %v10539_v0 }
 0x46a   :  { %8434 = vmatprep.mubr.msk.f32.mxu0 %vm102_vm0, %v10543_v10  ;;  %8748 = vmatpush3.bf16.msra.mxu0 %v8745_v40 }
 0x46b   :  { %8750 = vmatprep.subr.bf16.mxu0 %v8749_v60 }
 0x46d   :  { %8435 = vmatmul.mubr.msk.f32.gmra.mrb[22].mxu0 %vm102_vm0, %v10662_v23 }
 0x46e   :  { %8437 = vmatprep.mubr.msk.f32.mxu0 %vm102_vm0, %v10548_v21  ;;  %8752 = vmatpush3.bf16.msra.mxu0 %v8749_v60  ;;  %v10680_v21 = vld [vmem:[#allocation2 + $0x122] sm:$0xff] }
 0x46f   :  { %8754 = vmatprep.subr.bf16.mxu0 %v8753_v33 }
 0x471   :  { %8438 = vmatmul.mubr.msk.f32.gmra.mrb[24].mxu0 %vm102_vm0, %v10552_v56 }
 0x472   :  { %8440 = vmatprep.mubr.msk.f32.mxu0 %vm102_vm0, %v10556_v4 }
 0x475   :  { %8441 = vmatmul.mubr.msk.f32.gmra.mrb[26].mxu0 %vm102_vm0, %v10560_v42 }
 0x476   :  { %8443 = vmatprep.mubr.msk.f32.mxu0 %vm102_vm0, %v10564_v44 }
 0x479   :  { %8444 = vmatmul.mubr.msk.f32.gmra.mrb[28].mxu0 %vm102_vm0, %v10568_v45 }
 0x47a   :  { %8446 = vmatprep.mubr.msk.f32.mxu0 %vm102_vm0, %v10572_v46 }
 0x47d   :  { %8447 = vmatmul.mubr.msk.f32.gmra.mrb[30].mxu0 %vm102_vm0, %v10680_v21 }
 0x47e   :  { %8465 = vmatprep.mubr.msk.f32.mxu0 %vm102_vm0, %v10465_v47  ;;  %v8765_v47 = vpack.c.bf16 %v6058_v32, %v6057_v54 }
 0x481   :  { %8466 = vmatmul.mubr.msk.f32.vlgmr.msra.gmra.mrb[16].mxu0 %vm102_vm0, %v10469_v51  ;;  %v5807_v51 = vld [vmem:[#allocation2 + $0x90] sm:$0xff] }
 0x482   :  { %8756 = vmatpush3.bf16.msra.mxu0 %v8753_v33  ;;  %8468 = vmatprep.mubr.msk.f32.mxu0 %vm102_vm0, %v10473_v53  ;;  %v8769_v53 = vpack.c.bf16 %v6286_v50, %v6285_v14 }
 0x483   :  { %8758 = vmatprep.subr.bf16.mxu0 %v8757_v11 }
 0x485   :  { %8469 = vmatmul.mubr.msk.f32.gmra.mrb[18].mxu0 %vm102_vm0, %v10477_v3  ;;  %v5815_v3 = vld [vmem:[#allocation2 + $0x130] sm:$0xff] }
 0x486   :  { %8471 = vmatprep.mubr.msk.f32.mxu0 %vm102_vm0, %v10481_v35  ;;  %8760 = vmatpush3.bf16.msra.mxu0 %v8757_v11  ;;  %v6287_v35 = vld [vmem:[#allocation10 + $0x210] sm:$0xff] }
 0x487   :  { %8762 = vmatprep.subr.bf16.mxu0 %v8761_v49 }
 0x489   :  { %8472 = vmatmul.mubr.msk.f32.gmra.mrb[20].mxu0 %vm102_vm0, %v10485_v43  ;;  %v6288_v43 = vld [vmem:[#allocation10 + $0x218] sm:$0xff] }
 0x48a   :  { %8474 = vmatprep.mubr.msk.f32.mxu0 %vm102_vm0, %v10590_v7  ;;  %8764 = vmatpush3.bf16.msra.mxu0 %v8761_v49 }
 0x48b   :  { %8766 = vmatprep.subr.bf16.mxu0 %v8765_v47 }
 0x48d   :  { %8475 = vmatmul.mubr.msk.f32.gmra.mrb[22].mxu0 %vm102_vm0, %v5807_v51 }
 0x48e   :  { %8477 = vmatprep.mubr.msk.f32.mxu0 %vm102_vm0, %v10494_v58  ;;  %8768 = vmatpush3.bf16.msra.mxu0 %v8765_v47  ;;  %v8773_v58 = vpack.c.bf16 %v6288_v43, %v6287_v35 }
 0x48f   :  { %8770 = vmatprep.subr.bf16.mxu0 %v8769_v53 }
 0x491   :  { %8478 = vmatmul.mubr.msk.f32.gmra.mrb[24].mxu0 %vm102_vm0, %v10498_v59  ;;  %v6289_v59 = vld [vmem:[#allocation10 + $0x220] sm:$0xff] }
 0x492   :  { %8480 = vmatprep.mubr.msk.f32.mxu0 %vm102_vm0, %v10502_v61  ;;  %v6290_v61 = vld [vmem:[#allocation10 + $0x228] sm:$0xff] }
 0x495   :  { %8481 = vmatmul.mubr.msk.f32.gmra.mrb[26].mxu0 %vm102_vm0, %v10506_v2  ;;  %v8777_v2 = vpack.c.bf16 %v6290_v61, %v6289_v59 }
 0x496   :  { %8483 = vmatprep.mubr.msk.f32.mxu0 %vm102_vm0, %v10510_v37  ;;  %v6291_v37 = vld [vmem:[#allocation10 + $0x230] sm:$0xff] }
 0x499   :  { %8484 = vmatmul.mubr.msk.f32.gmra.mrb[28].mxu0 %vm102_vm0, %v10514_v17  ;;  %v6292_v17 = vld [vmem:[#allocation10 + $0x238] sm:$0xff] }
 0x49a   :  { %8486 = vmatprep.mubr.msk.f32.mxu0 %vm102_vm0, %v10608_v55 }
 0x49d   :  { %8487 = vmatmul.mubr.msk.f32.gmra.mrb[30].mxu0 %vm102_vm0, %v5815_v3 }
 0x49e   :  { %8505 = vmatprep.mubr.msk.f32.mxu0 %vm102_vm0, %v10389_v26  ;;  %v8781_v26 = vpack.c.bf16 %v6292_v17, %v6291_v37 }
 0x4a1   :  { %8506 = vmatmul.mubr.msk.f32.vlgmr.msra.gmra.mrb[16].mxu0 %vm102_vm0, %v10395_v57  ;;  %v6041_v57 = vld [vmem:[#allocation2 + $0x91] sm:$0xff] }
 0x4a2   :  { %8772 = vmatpush3.bf16.msra.mxu0 %v8769_v53  ;;  %8508 = vmatprep.mubr.msk.f32.mxu0 %vm102_vm0, %v10401_v63  ;;  %v6049_v63 = vld [vmem:[#allocation2 + $0x131] sm:$0xff] }
 0x4a3   :  { %8774 = vmatprep.subr.bf16.mxu0 %v8773_v58 }
 0x4a5   :  { %8509 = vmatmul.mubr.msk.f32.gmra.mrb[18].mxu0 %vm102_vm0, %v10407_v6  ;;  %v6275_v6 = vld [vmem:[#allocation2 + $0x92] sm:$0xff] }
 0x4a6   :  { %8511 = vmatprep.mubr.msk.f32.mxu0 %vm102_vm0, %v10413_v19  ;;  %8776 = vmatpush3.bf16.msra.mxu0 %v8773_v58  ;;  %v6283_v19 = vld [vmem:[#allocation2 + $0x132] sm:$0xff] }
 0x4a7   :  { %8778 = vmatprep.subr.bf16.mxu0 %v8777_v2 }
 0x4a9   :  { %8512 = vmatmul.mubr.msk.f32.gmra.mrb[20].mxu0 %vm102_vm0, %v10419_v25  ;;  %v10774_v25 = vld [vmem:[#allocation11] ss:$0 sm:$0xff] }
 0x4aa   :  { %8514 = vmatprep.mubr.msk.f32.mxu0 %vm102_vm0, %v10626_v52  ;;  %8780 = vmatpush3.bf16.msra.mxu0 %v8777_v2 }
 0x4ab   :  { %8782 = vmatprep.subr.bf16.mxu0 %v8781_v26 }
 0x4ad   :  { %8515 = vmatmul.mubr.msk.f32.gmra.mrb[22].mxu0 %vm102_vm0, %v6041_v57 }
 0x4ae   :  { %8517 = vmatprep.mubr.msk.f32.mxu0 %vm102_vm0, %v10434_v9  ;;  %8784 = vmatpush3.bf16.msra.mxu0 %v8781_v26 }
 0x4b1   :  { %8518 = vmatmul.mubr.msk.f32.gmra.mrb[24].mxu0 %vm102_vm0, %v10439_v27 }
 0x4b2   :  { %8520 = vmatprep.mubr.msk.f32.mxu0 %vm102_vm0, %v10444_v62 }
 0x4b5   :  { %8521 = vmatmul.mubr.msk.f32.gmra.mrb[26].mxu0 %vm102_vm0, %v10448_v29 }
 0x4b6   :  { %8523 = vmatprep.mubr.msk.f32.mxu0 %vm102_vm0, %v10452_v30 }
 0x4b9   :  { %8524 = vmatmul.mubr.msk.f32.gmra.mrb[28].mxu0 %vm102_vm0, %v10456_v31 }
 0x4ba   :  { %8526 = vmatprep.mubr.msk.f32.mxu0 %vm102_vm0, %v10644_v1 }
 0x4bd   :  { %8527 = vmatmul.mubr.msk.f32.gmra.mrb[30].mxu0 %vm102_vm0, %v6049_v63 }
 0x4be   :  { %8545 = vmatprep.mubr.msk.f32.mxu0 %vm102_vm0, %v10523_v39 }
 0x4c1   :  { %8546 = vmatmul.mubr.msk.f32.vlgmr.msra.gmra.mrb[16].mxu0 %vm102_vm0, %v10527_v20 }
 0x4c2   :  { %8548 = vmatprep.mubr.msk.f32.mxu0 %vm102_vm0, %v10531_v13 }
 0x4c5   :  { %8549 = vmatmul.mubr.msk.f32.gmra.mrb[18].mxu0 %vm102_vm0, %v10535_v36 }
 0x4c6   :  { %8551 = vmatprep.mubr.msk.f32.mxu0 %vm102_vm0, %v10539_v0 }
 0x4c9   :  { %8552 = vmatmul.mubr.msk.f32.gmra.mrb[20].mxu0 %vm102_vm0, %v10543_v10 }
 0x4ca   :  { %8554 = vmatprep.mubr.msk.f32.mxu0 %vm102_vm0, %v10662_v23 }
 0x4cd   :  { %8555 = vmatmul.mubr.msk.f32.gmra.mrb[22].mxu0 %vm102_vm0, %v6275_v6 }
 0x4ce   :  { %8557 = vmatprep.mubr.msk.f32.mxu0 %vm102_vm0, %v10552_v56 }
 0x4d1   :  { %8558 = vmatmul.mubr.msk.f32.gmra.mrb[24].mxu0 %vm102_vm0, %v10556_v4 }
 0x4d2   :  { %8560 = vmatprep.mubr.msk.f32.mxu0 %vm102_vm0, %v10560_v42 }
 0x4d5   :  { %8561 = vmatmul.mubr.msk.f32.gmra.mrb[26].mxu0 %vm102_vm0, %v10564_v44 }
 0x4d6   :  { %8563 = vmatprep.mubr.msk.f32.mxu0 %vm102_vm0, %v10568_v45 }
 0x4d9   :  { %8564 = vmatmul.mubr.msk.f32.gmra.mrb[28].mxu0 %vm102_vm0, %v10572_v46 }
 0x4da   :  { %8566 = vmatprep.mubr.msk.f32.mxu0 %vm102_vm0, %v10680_v21 }
 0x4dd   :  { %8567 = vmatmul.mubr.msk.f32.gmra.mrb[30].mxu0 %vm102_vm0, %v6283_v19 }
 0x594   :  { %v8547_v9 = vpop.f32.mrb[16].mxu0 }
 0x595   :  { %v6510_v27 = vadd.f32 %v8547_v9, %v10774_v25  ;;  %v6407_v62 = vpop.f32.mrb[17].mxu0 }
 0x596   :  { %v6509_v29 = vadd.f32 %v10774_v25, %v6407_v62 }
 0x597   :  { %v6526_v30 = vmax.f32 %v6510_v27, 0.0 }
 0x598   :  { %v6525_v31 = vmax.f32 %v6509_v29, 0.0  ;;  %v8550_v39 = vpop.f32.mrb[18].mxu0 }
 0x599   :  { %v7091_v20 = vpack.c.bf16 %v6526_v30, %v6526_v30  ;;  %v6512_v13 = vadd.f32 %v8550_v39, %v10774_v25  ;;  %v6417_v36 = vpop.f32.mrb[19].mxu0 }
 0x59a   :  { %v7090_v0 = vpack.c.bf16 %v6525_v31, %v6525_v31  ;;  %v6511_v10 = vadd.f32 %v10774_v25, %v6417_v36 }
 0x59b   :  { %6607 = vst.msk [vmem:[%s10863_s7 + $0x4] sm:$0xf] %vm6605_vm5, %v7091_v20  ;;  %v6528_v56 = vmax.f32 %v6512_v13, 0.0 }
 0x59c   :  { %6606 = vst.msk [vmem:[%s10863_s7] sm:$0xf] %vm6605_vm5, %v7090_v0  ;;  %v6527_v4 = vmax.f32 %v6511_v10, 0.0  ;;  %v8553_v42 = vpop.f32.mrb[20].mxu0 }
 0x59d   :  { %v7093_v44 = vpack.c.bf16 %v6528_v56, %v6528_v56  ;;  %v6514_v45 = vadd.f32 %v8553_v42, %v10774_v25  ;;  %v6427_v46 = vpop.f32.mrb[21].mxu0 }
 0x59e   :  { %v7092_v7 = vpack.c.bf16 %v6527_v4, %v6527_v4  ;;  %v6513_v55 = vadd.f32 %v10774_v25, %v6427_v46 }
 0x59f   :  { %6609 = vst.msk [vmem:[%s10863_s7 + $0xc] sm:$0xf] %vm6605_vm5, %v7093_v44  ;;  %v6530_v52 = vmax.f32 %v6514_v45, 0.0 }
 0x5a0   :  { %6608 = vst.msk [vmem:[%s10863_s7 + $0x8] sm:$0xf] %vm6605_vm5, %v7092_v7  ;;  %v6529_v1 = vmax.f32 %v6513_v55, 0.0  ;;  %v8556_v12 = vpop.f32.mrb[22].mxu0 }
 0x5a1   :  { %v7095_v22 = vpack.c.bf16 %v6530_v52, %v6530_v52  ;;  %v6516_v5 = vadd.f32 %v8556_v12, %v10774_v25  ;;  %v6437_v34 = vpop.f32.mrb[23].mxu0 }
 0x5a2   :  { %v7094_v38 = vpack.c.bf16 %v6529_v1, %v6529_v1  ;;  %v6515_v40 = vadd.f32 %v10774_v25, %v6437_v34 }
 0x5a3   :  { %6611 = vst.msk [vmem:[%s10863_s7 + $0x14] sm:$0xf] %vm6605_vm5, %v7095_v22  ;;  %v6532_v8 = vmax.f32 %v6516_v5, 0.0 }
 0x5a4   :  { %6610 = vst.msk [vmem:[%s10863_s7 + $0x10] sm:$0xf] %vm6605_vm5, %v7094_v38  ;;  %v6531_v15 = vmax.f32 %v6515_v40, 0.0  ;;  %v8559_v60 = vpop.f32.mrb[24].mxu0 }
 0x5a5   :  { %v7097_v48 = vpack.c.bf16 %v6532_v8, %v6532_v8  ;;  %v6518_v18 = vadd.f32 %v8559_v60, %v10774_v25  ;;  %v6447_v33 = vpop.f32.mrb[25].mxu0 }
 0x5a6   :  { %v7096_v23 = vpack.c.bf16 %v6531_v15, %v6531_v15  ;;  %v6517_v21 = vadd.f32 %v10774_v25, %v6447_v33 }
 0x5a7   :  { %6613 = vst.msk [vmem:[%s10863_s7 + $0x1c] sm:$0xf] %vm6605_vm5, %v7097_v48  ;;  %v6534_v24 = vmax.f32 %v6518_v18, 0.0 }
 0x5a8   :  { %6612 = vst.msk [vmem:[%s10863_s7 + $0x18] sm:$0xf] %vm6605_vm5, %v7096_v23  ;;  %v6533_v16 = vmax.f32 %v6517_v21, 0.0  ;;  %v8562_v11 = vpop.f32.mrb[26].mxu0 }
 0x5a9   :  { %v7099_v28 = vpack.c.bf16 %v6534_v24, %v6534_v24  ;;  %v6520_v41 = vadd.f32 %v8562_v11, %v10774_v25  ;;  %v6457_v49 = vpop.f32.mrb[27].mxu0 }
 0x5aa   :  { %v7098_v54 = vpack.c.bf16 %v6533_v16, %v6533_v16  ;;  %v6519_v32 = vadd.f32 %v10774_v25, %v6457_v49 }
 0x5ab   :  { %6615 = vst.msk [vmem:[%s10863_s7 + $0x24] sm:$0xf] %vm6605_vm5, %v7099_v28  ;;  %v6536_v47 = vmax.f32 %v6520_v41, 0.0 }
 0x5ac   :  { %6614 = vst.msk [vmem:[%s10863_s7 + $0x20] sm:$0xf] %vm6605_vm5, %v7098_v54  ;;  %v6535_v14 = vmax.f32 %v6519_v32, 0.0  ;;  %v8565_v50 = vpop.f32.mrb[28].mxu0 }
 0x5ad   :  { %v7101_v51 = vpack.c.bf16 %v6536_v47, %v6536_v47  ;;  %v6522_v53 = vadd.f32 %v8565_v50, %v10774_v25  ;;  %v6467_v3 = vpop.f32.mrb[29].mxu0 }
 0x5ae   :  { %v7100_v35 = vpack.c.bf16 %v6535_v14, %v6535_v14  ;;  %v6521_v43 = vadd.f32 %v10774_v25, %v6467_v3 }
 0x5af   :  { %6617 = vst.msk [vmem:[%s10863_s7 + $0x2c] sm:$0xf] %vm6605_vm5, %v7101_v51  ;;  %v6538_v58 = vmax.f32 %v6522_v53, 0.0 }
 0x5b0   :  { %6616 = vst.msk [vmem:[%s10863_s7 + $0x28] sm:$0xf] %vm6605_vm5, %v7100_v35  ;;  %v6537_v59 = vmax.f32 %v6521_v43, 0.0  ;;  %v8568_v61 = vpop.f32.mrb[30].mxu0 }
 0x5b1   :  { %v7103_v2 = vpack.c.bf16 %v6538_v58, %v6538_v58  ;;  %v6524_v37 = vadd.f32 %v8568_v61, %v10774_v25  ;;  %v6477_v17 = vpop.f32.mrb[31].mxu0 }
 0x5b2   :  { %v7102_v26 = vpack.c.bf16 %v6537_v59, %v6537_v59  ;;  %v6523_v57 = vadd.f32 %v10774_v25, %v6477_v17 }
 0x5b3   :  { %6619 = vst.msk [vmem:[%s10863_s7 + $0x34] sm:$0xf] %vm6605_vm5, %v7103_v2  ;;  %v6540_v63 = vmax.f32 %v6524_v37, 0.0 }
 0x5b4   :  { %6618 = vst.msk [vmem:[%s10863_s7 + $0x30] sm:$0xf] %vm6605_vm5, %v7102_v26  ;;  %v6539_v6 = vmax.f32 %v6523_v57, 0.0 }
 0x5b5   :  { %v7105_v19 = vpack.c.bf16 %v6540_v63, %v6540_v63 }
 0x5b6   :  { %v7104_v9 = vpack.c.bf16 %v6539_v6, %v6539_v6 }
 0x5b7   :  { %6621 = vst.msk [vmem:[%s10863_s7 + $0x3c] sm:$0xf] %vm6605_vm5, %v7105_v19 }
 0x5b8   :  { %6620 = vst.msk [vmem:[%s10863_s7 + $0x38] sm:$0xf] %vm6605_vm5, %v7104_v9 }
 0x5b9   :  { %6626 = vsyncpa [#allocation4], 1 }
 0x5ba   :  { %6627 = vsyncpa [#allocation6], 1 }
 0x5bb   :  { %6628 = vsyncpa [#allocation9], 1 }
 0x5bc   :  { %6629 = vsyncpa [#allocation12], 1 }

// kernel: forward.3
= control target key start
LH: loop header
LB: loop body
LE: loop exit
PB: predicated region body
PF: predicated region fallthrough
CT: control target
= control target key end

     0   :  { %12 = vsyncpa [#allocation3], 0  ;;  %s12002_s0 = inlined_call_operand.vmem [shape: bf16[2,4096], index: 0, kind: input, shape index: {}]   ;;  %s12003_s1 = inlined_call_operand.hbm [shape: bf16[4096,512], index: 1, kind: input, shape index: {}]   ;;  %s12004_s2 = inlined_call_operand.hbm [shape: f32[1,512], index: 2, kind: input, shape index: {}]   ;;  %s12005_s3 = inlined_call_operand.hbm [shape: bf16[512,256], index: 3, kind: input, shape index: {}]   ;;  %s12006_s4 = inlined_call_operand.hbm [shape: f32[1,256], index: 4, kind: input, shape index: {}]   ;;  %s12007_s5 = inlined_call_operand.vmem [shape: f32[256,5], index: 5, kind: input, shape index: {}]   ;;  %s12008_s6 = inlined_call_operand.hbm [shape: f32[1,5], index: 6, kind: input, shape index: {}]   ;;  %s12009_s7 = inlined_call_operand.hbm [shape: f32[2,4], index: 7, kind: output, shape index: {}]  }
   0x1   :  { %13 = vsyncpa [#allocation6], 0 }
   0x2   :  { %14 = vsyncpa [#allocation9], 0 }
   0x3   :  { %15 = vsyncpa [#allocation4], 0  ;;  %s11515_s24 = smov [#allocation5]   ;;  %s11516_s26 = smov [#allocation8]  }
   0x4   :  { %s36_s25 = sshll.u32 %s11515_s24, 4  ;;  %s58_s27 = sshll.u32 %s11516_s26, 4  ;;  %s37_s25 = int_to_ptr.vmem [resolvable:$true] %s36_s25  ;;  %s59_s27 = int_to_ptr.vmem [resolvable:$true] %s58_s27 }
   0x5   :  { %s11375_s30 = scalar_lea.hbm %s12004_s2, 64 }
   0x6   :  { %p11376_p0 = scmp.ne.s32.totalorder %s12004_s2, %s11375_s30  ;;  %p11379_p1 = scmp.lt.u32.totalorder %s11375_s30, %s12004_s2 }
   0x8   :  { %p11381_p2 = pnand %p11379_p1, %p11376_p0 }
   0xa   :  { %11384 = shalt.err (!%p11381_p2)
}
   0xb   :  { %s11385_s12 = scalar_lea.vmem %s37_s25, 64  ;;  %p11390_p4 = scmp.lt.s32.totalorder %s37_s25, %s37_s25 }
   0xc   :  { %p11386_p3 = scmp.ne.s32.totalorder %s37_s25, %s11385_s12  ;;  %p11391_p5 = scmp.lt.s32.totalorder %s11385_s12, %s11385_s12 }
   0xe   :  { %p11392_p6 = por %p11391_p5, %p11390_p4 }
  0x10   :  { %p11393_p7 = pnand %p11392_p6, %p11386_p3 }
  0x12   :  { %11396 = shalt.err (!%p11393_p7)
}
  0x13   :  { %39 = dma.hbm_to_vmem [thread:$0]  %s12004_s2, 64, %s37_s25, [#allocation6]  }
  0x14   :  { %s11397_s17 = scalar_lea.hbm %s12006_s4, 32 }
  0x15   :  { %p11398_p8 = scmp.ne.s32.totalorder %s12006_s4, %s11397_s17  ;;  %p11401_p9 = scmp.lt.u32.totalorder %s11397_s17, %s12006_s4 }
  0x17   :  { %p11403_p10 = pnand %p11401_p9, %p11398_p8 }
  0x19   :  { %11406 = shalt.err (!%p11403_p10)
}
  0x1a   :  { %s11407_s22 = scalar_lea.vmem %s59_s27, 32  ;;  %p11412_p12 = scmp.lt.s32.totalorder %s59_s27, %s59_s27 }
  0x1b   :  { %p11408_p11 = scmp.ne.s32.totalorder %s59_s27, %s11407_s22  ;;  %p11413_p13 = scmp.lt.s32.totalorder %s11407_s22, %s11407_s22 }
  0x1d   :  { %p11414_p0 = por %p11413_p13, %p11412_p12 }
  0x1f   :  { %p11415_p1 = pnand %p11414_p0, %p11408_p11 }
  0x21   :  { %11418 = shalt.err (!%p11415_p1)
}
  0x22   :  { %61 = dma.hbm_to_vmem [thread:$0]  %s12006_s4, 32, %s59_s27, [#allocation9]  }
  0x23   :  { %s11517_s24 = smov [#allocation2]   ;;  %s11419_s29 = scalar_lea.hbm %s12003_s1, 131072 }
  0x24   :  { %s23_s25 = sshll.u32 %s11517_s24, 4  ;;  %p11420_p2 = scmp.ne.s32.totalorder %s12003_s1, %s11419_s29  ;;  %s24_s25 = int_to_ptr.vmem [resolvable:$true] %s23_s25 }
  0x25   :  { %p11423_p3 = scmp.lt.u32.totalorder %s11419_s29, %s12003_s1 }
  0x27   :  { %p11425_p4 = pnand %p11423_p3, %p11420_p2 }
  0x29   :  { %11428 = shalt.err (!%p11425_p4)
}
  0x2a   :  { %s11429_s11 = scalar_lea.vmem %s24_s25, 131072  ;;  %p11434_p6 = scmp.lt.s32.totalorder %s24_s25, %s24_s25 }
  0x2b   :  { %p11430_p5 = scmp.ne.s32.totalorder %s24_s25, %s11429_s11  ;;  %p11435_p7 = scmp.lt.s32.totalorder %s11429_s11, %s11429_s11 }
  0x2d   :  { %p11436_p8 = por %p11435_p7, %p11434_p6 }
  0x2f   :  { %p11437_p9 = pnand %p11436_p8, %p11430_p5 }
  0x31   :  { %11440 = shalt.err (!%p11437_p9)
}
  0x32   :  { %s11518_s4 = smov 256   ;;  %s11519_s27 = smov 16  }
  0x33   :  { %29 = dma.hbm_to_vmem [thread:$0]  %s12003_s1, 131072, %s24_s25, [#allocation3], %s11518_s4, %s11518_s4, %s11519_s27  }
  0x34   :  { %s11520_s14 = smov [#allocation7]   ;;  %s11441_s18 = scalar_lea.hbm %s12005_s3, 8192 }
  0x35   :  { %s45_s15 = sshll.u32 %s11520_s14, 4  ;;  %p11442_p10 = scmp.ne.s32.totalorder %s12005_s3, %s11441_s18  ;;  %s46_s15 = int_to_ptr.vmem [resolvable:$true] %s45_s15 }
  0x36   :  { %p11445_p11 = scmp.lt.u32.totalorder %s11441_s18, %s12005_s3 }
  0x38   :  { %p11447_p12 = pnand %p11445_p11, %p11442_p10 }
  0x3a   :  { %11450 = shalt.err (!%p11447_p12)
}
  0x3b   :  { %s11451_s2 = scalar_lea.vmem %s46_s15, 8192  ;;  %p11456_p0 = scmp.lt.s32.totalorder %s46_s15, %s46_s15 }
  0x3c   :  { %p11452_p13 = scmp.ne.s32.totalorder %s46_s15, %s11451_s2  ;;  %p11457_p1 = scmp.lt.s32.totalorder %s11451_s2, %s11451_s2 }
  0x3e   :  { %p11458_p2 = por %p11457_p1, %p11456_p0 }
  0x40   :  { %p11459_p3 = pnand %p11458_p2, %p11452_p13 }
  0x42   :  { %11462 = shalt.err (!%p11459_p3)
}
  0x43   :  { %s11521_s1 = smov 128   ;;  %s11522_s23 = smov 8  }
  0x44   :  { %51 = dma.hbm_to_vmem [thread:$0]  %s12005_s3, 8192, %s46_s15, [#allocation6], %s11521_s1, %s11521_s1, %s11522_s23  }
  0x45   :  { %s11523_s26 = smov [#allocation10]   ;;  %s11463_s8 = scalar_lea.hbm %s12008_s6, 16 }
  0x46   :  { %s70_s28 = sshll.u32 %s11523_s26, 4  ;;  %p11464_p4 = scmp.ne.s32.totalorder %s12008_s6, %s11463_s8  ;;  %s71_s28 = int_to_ptr.vmem [resolvable:$true] %s70_s28 }
  0x47   :  { %p11467_p5 = scmp.lt.u32.totalorder %s11463_s8, %s12008_s6 }
  0x49   :  { %p11469_p6 = pnand %p11467_p5, %p11464_p4 }
  0x4b   :  { %11472 = shalt.err (!%p11469_p6)
}
  0x4c   :  { %s11473_s27 = scalar_lea.vmem %s71_s28, 16  ;;  %s11477_s3 = scalar_lea.vmem %s71_s28, 32 }
  0x4d   :  { %p11474_p7 = scmp.ne.s32.totalorder %s71_s28, %s11473_s27  ;;  %p11478_p8 = scmp.lt.s32.totalorder %s71_s28, %s71_s28 }
  0x4e   :  { %p11479_p9 = scmp.lt.s32.totalorder %s11477_s3, %s11473_s27 }
  0x50   :  { %p11480_p10 = por %p11479_p9, %p11478_p8 }
  0x52   :  { %p11481_p11 = pnand %p11480_p10, %p11474_p7 }
  0x54   :  { %11484 = shalt.err (!%p11481_p11)
}
  0x55   :  { %73 = dma.hbm_to_vmem [thread:$0]  %s12008_s6, 16, %s71_s28, [#allocation9]  }
  0x56   :  { %11507 = dma.done.wait [#allocation3], 131072  }
  0x57   :  { %11508 = vsyncadd [#allocation3], 4294836224 }
  0x58   :  { %11509 = dma.done.wait [#allocation6], 8256  }
  0x59   :  { %11510 = vsyncadd [#allocation6], 4294959040 }
  0x5a   :  { %11511 = dma.done.wait [#allocation9], 48  }
  0x5b   :  { %11512 = vsyncadd [#allocation9], 4294967248  ;;  %v9737_v0 = vld [vmem:[#allocation2 + $0x4] ss:$16 sps:$4 sm:$0xff]   ;;  %v9741_v2 = vld [vmem:[#allocation2] ss:$16 sps:$4 sm:$0xff]   ;;  %v1119_v36 = vlaneseq }
  0x5c   :  { %v9739_v1 = vld [vmem:[#allocation2 + $0x204] ss:$16 sps:$4 sm:$0xff]   ;;  %6491 = vmatprep.subr.bf16.mxu1 %v9737_v0  ;;  %v9742_v3 = vld [vmem:[#allocation2 + $0x200] ss:$16 sps:$4 sm:$0xff]   ;;  %v11524_v37 = vmov 1966171168  }
  0x5d   :  { %6532 = vmatprep.subr.bf16.mxu0 %v9739_v1  ;;  %v9743_v4 = vld [vmem:[#allocation2 + $0x24] ss:$16 sps:$4 sm:$0xff]   ;;  %6492 = vmatpush1.bf16.msra.mxu1 %v9741_v2  ;;  %v9747_v6 = vld [vmem:[#allocation2 + $0x20] ss:$16 sps:$4 sm:$0xff]   ;;  %v1145_v38 = vunpack.c.l.s4 %v11524_v37  ;;  %v11628_v42 = vshrl.u32 %v1119_v36, 7  ;;  %vm8404_vm0 = vcmask 25600  }
  0x5e   :  { %6533 = vmatpush1.bf16.msra.mxu0 %v9742_v3  ;;  %v9745_v5 = vld [vmem:[#allocation2 + $0x224] ss:$16 sps:$4 sm:$0xff]   ;;  %6493 = vmatprep.subr.bf16.mxu1 %v9743_v4  ;;  %v9748_v7 = vld [vmem:[#allocation2 + $0x220] ss:$16 sps:$4 sm:$0xff]   ;;  %v9860_v36 = vld [vmem:[#allocation2 + $0x88] ss:$16 sps:$4 sm:$0xff]  }
  0x5f   :  { %6534 = vmatprep.subr.bf16.mxu0 %v9745_v5  ;;  %v9749_v8 = vld [vmem:[#allocation2 + $0x44] ss:$16 sps:$4 sm:$0xff]   ;;  %v9753_v10 = vld [vmem:[#allocation2 + $0x40] ss:$16 sps:$4 sm:$0xff]   ;;  %v1146_v43 = vunpack.c.0.s8 %v1145_v38  ;;  %v9868_v38 = vld [vmem:[#allocation2 + $0xac] ss:$16 sps:$4 sm:$0xff]  }
  0x60   :  { %v9751_v9 = vld [vmem:[#allocation2 + $0x244] ss:$16 sps:$4 sm:$0xff]   ;;  %v9754_v11 = vld [vmem:[#allocation2 + $0x240] ss:$16 sps:$4 sm:$0xff]   ;;  %s11527_s26 = smov [#allocation11]  }
  0x61   :  { %6494 = vmatpush1.bf16.msra.mxu1 %v9747_v6  ;;  %v9755_v12 = vld [vmem:[#allocation2 + $0x64] ss:$16 sps:$4 sm:$0xff]   ;;  %v9759_v14 = vld [vmem:[#allocation2 + $0x60] ss:$16 sps:$4 sm:$0xff]   ;;  %v11631_v49 = vsub.s32 %v1146_v43, %v11628_v42  ;;  %v9874_v43 = vld [vmem:[#allocation2 + $0xcc] ss:$16 sps:$4 sm:$0xff]  }
  0x62   :  { %6535 = vmatpush1.bf16.msra.mxu0 %v9748_v7  ;;  %6495 = vmatprep.subr.bf16.mxu1 %v9749_v8  ;;  %v9757_v13 = vld [vmem:[#allocation2 + $0x264] ss:$16 sps:$4 sm:$0xff]   ;;  %v9760_v15 = vld [vmem:[#allocation2 + $0x260] ss:$16 sps:$4 sm:$0xff]   ;;  %s8427_s28 = sshll.u32 %s11527_s26, 4  ;;  %s8428_s28 = int_to_ptr.vmem [resolvable:$true] %s8427_s28 }
  0x63   :  { %6536 = vmatprep.subr.bf16.mxu0 %v9751_v9  ;;  %v9761_v16 = vld [vmem:[#allocation2 + $0x84] ss:$16 sps:$4 sm:$0xff]   ;;  %v9765_v18 = vld [vmem:[#allocation2 + $0x80] ss:$16 sps:$4 sm:$0xff]   ;;  %s11485_s29 = scalar_lea.vmem %s8428_s28, 32  ;;  %p11490_p13 = scmp.lt.s32.totalorder %s8428_s28, %s8428_s28 }
  0x64   :  { %v9763_v17 = vld [vmem:[#allocation2 + $0x284] ss:$16 sps:$4 sm:$0xff]   ;;  %v9766_v19 = vld [vmem:[#allocation2 + $0x280] ss:$16 sps:$4 sm:$0xff]   ;;  %p11486_p12 = scmp.ne.s32.totalorder %s8428_s28, %s11485_s29  ;;  %p11491_p0 = scmp.lt.s32.totalorder %s11485_s29, %s11485_s29 }
  0x65   :  { %6496 = vmatpush1.bf16.msra.mxu1 %v9753_v10  ;;  %v9767_v20 = vld [vmem:[#allocation2 + $0xa4] ss:$16 sps:$4 sm:$0xff]   ;;  %v9771_v22 = vld [vmem:[#allocation2 + $0xa0] ss:$16 sps:$4 sm:$0xff]  }
  0x66   :  { %6537 = vmatpush1.bf16.msra.mxu0 %v9754_v11  ;;  %6497 = vmatprep.subr.bf16.mxu1 %v9755_v12  ;;  %v9769_v21 = vld [vmem:[#allocation2 + $0x2a4] ss:$16 sps:$4 sm:$0xff]   ;;  %v9772_v23 = vld [vmem:[#allocation2 + $0x2a0] ss:$16 sps:$4 sm:$0xff]   ;;  %p11492_p1 = por %p11491_p0, %p11490_p13 }
  0x67   :  { %6538 = vmatprep.subr.bf16.mxu0 %v9757_v13  ;;  %v9773_v24 = vld [vmem:[#allocation2 + $0xc4] ss:$16 sps:$4 sm:$0xff]   ;;  %v9777_v26 = vld [vmem:[#allocation2 + $0xc0] ss:$16 sps:$4 sm:$0xff]  }
  0x68   :  { %v9775_v25 = vld [vmem:[#allocation2 + $0x2c4] ss:$16 sps:$4 sm:$0xff]   ;;  %v9778_v27 = vld [vmem:[#allocation2 + $0x2c0] ss:$16 sps:$4 sm:$0xff]   ;;  %p11493_p2 = pnand %p11492_p1, %p11486_p12 }
  0x69   :  { %6498 = vmatpush1.bf16.msra.mxu1 %v9759_v14  ;;  %v9779_v28 = vld [vmem:[#allocation2 + $0xe4] ss:$16 sps:$4 sm:$0xff]   ;;  %v9783_v30 = vld [vmem:[#allocation2 + $0xe0] ss:$16 sps:$4 sm:$0xff]  }
  0x6a   :  { %6539 = vmatpush1.bf16.msra.mxu0 %v9760_v15  ;;  %6499 = vmatprep.subr.bf16.mxu1 %v9761_v16  ;;  %v9781_v29 = vld [vmem:[#allocation2 + $0x2e4] ss:$16 sps:$4 sm:$0xff]   ;;  %v9784_v31 = vld [vmem:[#allocation2 + $0x2e0] ss:$16 sps:$4 sm:$0xff]   ;;  %v9838_v15 = vld [vmem:[#allocation2 + $0xc] ss:$16 sps:$4 sm:$0xff]  }
  0x6b   :  { %6540 = vmatprep.subr.bf16.mxu0 %v9763_v17  ;;  %v9785_v32 = vld [vmem:[#allocation2 + $0x104] ss:$16 sps:$4 sm:$0xff]   ;;  %v9789_v34 = vld [vmem:[#allocation2 + $0x100] ss:$16 sps:$4 sm:$0xff]  }
  0x6c   :  { %v9787_v33 = vld [vmem:[#allocation2 + $0x304] ss:$16 sps:$4 sm:$0xff]   ;;  %v9790_v35 = vld [vmem:[#allocation2 + $0x300] ss:$16 sps:$4 sm:$0xff]  }
  0x6d   :  { %6500 = vmatpush1.bf16.msra.mxu1 %v9765_v18  ;;  %v9791_v39 = vld [vmem:[#allocation2 + $0x124] ss:$16 sps:$4 sm:$0xff]   ;;  %v9795_v41 = vld [vmem:[#allocation2 + $0x120] ss:$16 sps:$4 sm:$0xff]  }
  0x6e   :  { %6541 = vmatpush1.bf16.msra.mxu0 %v9766_v19  ;;  %6501 = vmatprep.subr.bf16.mxu1 %v9767_v20  ;;  %v9793_v40 = vld [vmem:[#allocation2 + $0x324] ss:$16 sps:$4 sm:$0xff]   ;;  %v9796_v44 = vld [vmem:[#allocation2 + $0x320] ss:$16 sps:$4 sm:$0xff]   ;;  %v9836_v19 = vld [vmem:[#allocation2 + $0x8] ss:$16 sps:$4 sm:$0xff]  }
  0x6f   :  { %6542 = vmatprep.subr.bf16.mxu0 %v9769_v21  ;;  %v9797_v45 = vld [vmem:[#allocation2 + $0x144] ss:$16 sps:$4 sm:$0xff]   ;;  %v9801_v47 = vld [vmem:[#allocation2 + $0x140] ss:$16 sps:$4 sm:$0xff]   ;;  %v9844_v21 = vld [vmem:[#allocation2 + $0x2c] ss:$16 sps:$4 sm:$0xff]  }
  0x70   :  { %v9799_v46 = vld [vmem:[#allocation2 + $0x344] ss:$16 sps:$4 sm:$0xff]   ;;  %v9802_v48 = vld [vmem:[#allocation2 + $0x340] ss:$16 sps:$4 sm:$0xff]  }
  0x71   :  { %6502 = vmatpush1.bf16.msra.mxu1 %v9771_v22  ;;  %v9803_v50 = vld [vmem:[#allocation2 + $0x164] ss:$16 sps:$4 sm:$0xff]   ;;  %v9807_v53 = vld [vmem:[#allocation2 + $0x160] ss:$16 sps:$4 sm:$0xff]  }
  0x72   :  { %6543 = vmatpush1.bf16.msra.mxu0 %v9772_v23  ;;  %6503 = vmatprep.subr.bf16.mxu1 %v9773_v24  ;;  %v9805_v51 = vld [vmem:[#allocation2 + $0x364] ss:$16 sps:$4 sm:$0xff]   ;;  %v9808_v55 = vld [vmem:[#allocation2 + $0x360] ss:$16 sps:$4 sm:$0xff]   ;;  %v9842_v24 = vld [vmem:[#allocation2 + $0x28] ss:$16 sps:$4 sm:$0xff]  }
  0x73   :  { %6544 = vmatprep.subr.bf16.mxu0 %v9775_v25  ;;  %v89_v52 = vld [vmem:[%s12002_s0] sm:$0xff] }
  0x74   :  { %v1150_v54 = vrot.slane %v89_v52, %v11631_v49  ;;  %v9809_v56 = vld [vmem:[#allocation2 + $0x184] ss:$16 sps:$4 sm:$0xff]   ;;  %v9813_v59 = vld [vmem:[#allocation2 + $0x180] ss:$16 sps:$4 sm:$0xff]   ;;  %v1143_v5 = vcombine.high %v89_v52, %v89_v52  ;;  %v9886_v52 = vld [vmem:[#allocation2 + $0x10c] ss:$16 sps:$4 sm:$0xff]  }
  0x75   :  { %6504 = vmatpush1.bf16.msra.mxu1 %v9777_v26  ;;  %v9811_v57 = vld [vmem:[#allocation2 + $0x384] ss:$16 sps:$4 sm:$0xff]   ;;  %v9814_v61 = vld [vmem:[#allocation2 + $0x380] ss:$16 sps:$4 sm:$0xff]   ;;  %v9850_v26 = vld [vmem:[#allocation2 + $0x4c] ss:$16 sps:$4 sm:$0xff]  }
  0x76   :  { %6545 = vmatpush1.bf16.msra.mxu0 %v9778_v27  ;;  %6505 = vmatprep.subr.bf16.mxu1 %v9779_v28  ;;  %v1158_v58 = vcombine.high %v1150_v54, %v1150_v54  ;;  %v9815_v62 = vld [vmem:[#allocation2 + $0x1a4] ss:$16 sps:$4 sm:$0xff]   ;;  %v9819_v1 = vld [vmem:[#allocation2 + $0x1a0] ss:$16 sps:$4 sm:$0xff]   ;;  %v11642_v10 = vrot.slane %v1143_v5, %v11631_v49  ;;  %v11645_v12 = vrot.slane %v1150_v54, %v11631_v49  ;;  %v9848_v28 = vld [vmem:[#allocation2 + $0x48] ss:$16 sps:$4 sm:$0xff]  }
  0x77   :  { %6546 = vmatprep.subr.bf16.mxu0 %v9781_v29  ;;  %v9817_v63 = vld [vmem:[#allocation2 + $0x3a4] ss:$16 sps:$4 sm:$0xff]   ;;  %v9820_v2 = vld [vmem:[#allocation2 + $0x3a0] ss:$16 sps:$4 sm:$0xff]   ;;  %v9884_v54 = vld [vmem:[#allocation2 + $0x108] ss:$16 sps:$4 sm:$0xff]  }
  0x78   :  { %v1180_v60 = vrot.slane %v1158_v58, %v11631_v49  ;;  %v9821_v3 = vld [vmem:[#allocation2 + $0x1c4] ss:$16 sps:$4 sm:$0xff]   ;;  %v9825_v6 = vld [vmem:[#allocation2 + $0x1c0] ss:$16 sps:$4 sm:$0xff]   ;;  %v1159_v16 = vcombine.high %v11642_v10, %v11642_v10  ;;  %v11651_v18 = vcombine.high %v11645_v12, %v11645_v12  ;;  %v9890_v58 = vld [vmem:[#allocation2 + $0x128] ss:$16 sps:$4 sm:$0xff]  }
  0x79   :  { %6506 = vmatpush1.bf16.msra.mxu1 %v9783_v30  ;;  %v9823_v4 = vld [vmem:[#allocation2 + $0x3c4] ss:$16 sps:$4 sm:$0xff]   ;;  %v9826_v7 = vld [vmem:[#allocation2 + $0x3c0] ss:$16 sps:$4 sm:$0xff]   ;;  %v9856_v30 = vld [vmem:[#allocation2 + $0x6c] ss:$16 sps:$4 sm:$0xff]  }
  0x7a   :  { %6547 = vmatpush1.bf16.msra.mxu0 %v9784_v31  ;;  %6507 = vmatprep.subr.bf16.mxu1 %v9785_v32  ;;  %v11638_v0 = vcombine.high %v1180_v60, %v1180_v60  ;;  %v9827_v8 = vld [vmem:[#allocation2 + $0x1e4] ss:$16 sps:$4 sm:$0xff]   ;;  %v9831_v11 = vld [vmem:[#allocation2 + $0x1e0] ss:$16 sps:$4 sm:$0xff]   ;;  %v11654_v22 = vrot.slane %v1159_v16, %v11631_v49  ;;  %v9854_v32 = vld [vmem:[#allocation2 + $0x68] ss:$16 sps:$4 sm:$0xff]  }
  0x7b   :  { %6548 = vmatprep.subr.bf16.mxu0 %v9787_v33  ;;  %6523 = vmatprep.mubr.bf16.mxu1 %v1180_v60  ;;  %v9829_v9 = vld [vmem:[#allocation2 + $0x3e4] ss:$16 sps:$4 sm:$0xff]   ;;  %v9832_v13 = vld [vmem:[#allocation2 + $0x3e0] ss:$16 sps:$4 sm:$0xff]   ;;  %v9910_v5 = vld [vmem:[#allocation2 + $0x18c] ss:$16 sps:$4 sm:$0xff]  }
  0x7c   :  { %6564 = vmatprep.mubr.bf16.mxu0 %v11638_v0  ;;  %v9835_v14 = vld [vmem:[#allocation2 + $0x404] ss:$16 sps:$4 sm:$0xff]   ;;  %v9833_v17 = vld [vmem:[#allocation2 + $0x400] ss:$16 sps:$4 sm:$0xff]  }
  0x7d   :  { %6508 = vmatpush1.bf16.msra.mxu1 %v9789_v34  ;;  %v9841_v20 = vld [vmem:[#allocation2 + $0x424] ss:$16 sps:$4 sm:$0xff]   ;;  %v9839_v23 = vld [vmem:[#allocation2 + $0x420] ss:$16 sps:$4 sm:$0xff]   ;;  %v9862_v34 = vld [vmem:[#allocation2 + $0x8c] ss:$16 sps:$4 sm:$0xff]  }
  0x7e   :  { %6549 = vmatpush1.bf16.msra.mxu0 %v9790_v35  ;;  %6509 = vmatprep.subr.bf16.mxu1 %v9791_v39  ;;  %v9847_v25 = vld [vmem:[#allocation2 + $0x444] ss:$16 sps:$4 sm:$0xff]   ;;  %v9845_v27 = vld [vmem:[#allocation2 + $0x440] ss:$16 sps:$4 sm:$0xff]  }
  0x7f   :  { %6550 = vmatprep.subr.bf16.mxu0 %v9793_v40  ;;  %v9853_v29 = vld [vmem:[#allocation2 + $0x464] ss:$16 sps:$4 sm:$0xff]   ;;  %v9851_v31 = vld [vmem:[#allocation2 + $0x460] ss:$16 sps:$4 sm:$0xff]   ;;  %v9866_v40 = vld [vmem:[#allocation2 + $0xa8] ss:$16 sps:$4 sm:$0xff]  }
  0x80   :  { %v9859_v33 = vld [vmem:[#allocation2 + $0x484] ss:$16 sps:$4 sm:$0xff]   ;;  %v9857_v35 = vld [vmem:[#allocation2 + $0x480] ss:$16 sps:$4 sm:$0xff]  }
  0x81   :  { %6510 = vmatpush1.bf16.msra.mxu1 %v9795_v41  ;;  %v9865_v37 = vld [vmem:[#allocation2 + $0x4a4] ss:$16 sps:$4 sm:$0xff]   ;;  %v9863_v39 = vld [vmem:[#allocation2 + $0x4a0] ss:$16 sps:$4 sm:$0xff]  }
  0x82   :  { %6551 = vmatpush1.bf16.msra.mxu0 %v9796_v44  ;;  %6511 = vmatprep.subr.bf16.mxu1 %v9797_v45  ;;  %v9871_v41 = vld [vmem:[#allocation2 + $0x4c4] ss:$16 sps:$4 sm:$0xff]   ;;  %v9869_v44 = vld [vmem:[#allocation2 + $0x4c0] ss:$16 sps:$4 sm:$0xff]   ;;  %v9872_v45 = vld [vmem:[#allocation2 + $0xc8] ss:$16 sps:$4 sm:$0xff]  }
  0x83   :  { %6552 = vmatprep.subr.bf16.mxu0 %v9799_v46  ;;  %v9877_v46 = vld [vmem:[#allocation2 + $0x4e4] ss:$16 sps:$4 sm:$0xff]   ;;  %v9917_v16 = vld [vmem:[#allocation2 + $0x5c0] ss:$16 sps:$4 sm:$0xff]  }
  0x85   :  { %6512 = vmatpush1.bf16.msra.mxu1 %v9801_v47  ;;  %v9880_v47 = vld [vmem:[#allocation2 + $0xec] ss:$16 sps:$4 sm:$0xff]  }
  0x86   :  { %6553 = vmatpush1.bf16.msra.mxu0 %v9802_v48  ;;  %6513 = vmatprep.subr.bf16.mxu1 %v9803_v50  ;;  %v9875_v48 = vld [vmem:[#allocation2 + $0x4e0] ss:$16 sps:$4 sm:$0xff]   ;;  %v9878_v50 = vld [vmem:[#allocation2 + $0xe8] ss:$16 sps:$4 sm:$0xff]  }
  0x87   :  { %6554 = vmatprep.subr.bf16.mxu0 %v9805_v51  ;;  %v9883_v51 = vld [vmem:[#allocation2 + $0x504] ss:$16 sps:$4 sm:$0xff]  }
  0x89   :  { %6514 = vmatpush1.bf16.msra.mxu1 %v9807_v53  ;;  %v9881_v53 = vld [vmem:[#allocation2 + $0x500] ss:$16 sps:$4 sm:$0xff]  }
  0x8a   :  { %6555 = vmatpush1.bf16.msra.mxu0 %v9808_v55  ;;  %6515 = vmatprep.subr.bf16.mxu1 %v9809_v56  ;;  %v9889_v55 = vld [vmem:[#allocation2 + $0x524] ss:$16 sps:$4 sm:$0xff]   ;;  %v9892_v56 = vld [vmem:[#allocation2 + $0x12c] ss:$16 sps:$4 sm:$0xff]  }
  0x8b   :  { %6556 = vmatprep.subr.bf16.mxu0 %v9811_v57  ;;  %v9887_v57 = vld [vmem:[#allocation2 + $0x520] ss:$16 sps:$4 sm:$0xff]  }
  0x8d   :  { %6516 = vmatpush1.bf16.msra.mxu1 %v9813_v59  ;;  %v9895_v59 = vld [vmem:[#allocation2 + $0x544] ss:$16 sps:$4 sm:$0xff]  }
  0x8e   :  { %6557 = vmatpush1.bf16.msra.mxu0 %v9814_v61  ;;  %6517 = vmatprep.subr.bf16.mxu1 %v9815_v62  ;;  %v9893_v61 = vld [vmem:[#allocation2 + $0x540] ss:$16 sps:$4 sm:$0xff]   ;;  %v9896_v62 = vld [vmem:[#allocation2 + $0x148] ss:$16 sps:$4 sm:$0xff]  }
  0x8f   :  { %6558 = vmatprep.subr.bf16.mxu0 %v9817_v63  ;;  %v9901_v63 = vld [vmem:[#allocation2 + $0x564] ss:$16 sps:$4 sm:$0xff]  }
  0x91   :  { %6518 = vmatpush1.bf16.msra.mxu1 %v9819_v1  ;;  %v9904_v1 = vld [vmem:[#allocation2 + $0x16c] ss:$16 sps:$4 sm:$0xff]  }
  0x92   :  { %6559 = vmatpush1.bf16.msra.mxu0 %v9820_v2  ;;  %6519 = vmatprep.subr.bf16.mxu1 %v9821_v3  ;;  %v9899_v2 = vld [vmem:[#allocation2 + $0x560] ss:$16 sps:$4 sm:$0xff]   ;;  %v9902_v3 = vld [vmem:[#allocation2 + $0x168] ss:$16 sps:$4 sm:$0xff]  }
  0x93   :  { %6560 = vmatprep.subr.bf16.mxu0 %v9823_v4  ;;  %v9907_v4 = vld [vmem:[#allocation2 + $0x584] ss:$16 sps:$4 sm:$0xff]  }
  0x95   :  { %6520 = vmatpush1.bf16.msra.mxu1 %v9825_v6  ;;  %v9905_v6 = vld [vmem:[#allocation2 + $0x580] ss:$16 sps:$4 sm:$0xff]  }
  0x96   :  { %6561 = vmatpush1.bf16.msra.mxu0 %v9826_v7  ;;  %6521 = vmatprep.subr.bf16.mxu1 %v9827_v8  ;;  %v9908_v7 = vld [vmem:[#allocation2 + $0x188] ss:$16 sps:$4 sm:$0xff]   ;;  %v9913_v8 = vld [vmem:[#allocation2 + $0x5a4] ss:$16 sps:$4 sm:$0xff]  }
  0x97   :  { %6562 = vmatprep.subr.bf16.mxu0 %v9829_v9  ;;  %v9916_v9 = vld [vmem:[#allocation2 + $0x1ac] ss:$16 sps:$4 sm:$0xff]  }
  0x99   :  { %6522 = vmatpush1.bf16.msra.mxu1 %v9831_v11  ;;  %v9911_v11 = vld [vmem:[#allocation2 + $0x5a0] ss:$16 sps:$4 sm:$0xff]  }
  0x9a   :  { %6563 = vmatpush1.bf16.msra.mxu0 %v9832_v13  ;;  %7147 = vmatprep.subr.bf16.mxu1 %v9838_v15  ;;  %v9914_v13 = vld [vmem:[#allocation2 + $0x1a8] ss:$16 sps:$4 sm:$0xff]   ;;  %v9922_v15 = vld [vmem:[#allocation2 + $0x1cc] ss:$16 sps:$4 sm:$0xff]  }
  0x9b   :  { %6573 = vmatprep.subr.bf16.mxu0 %v9835_v14  ;;  %v9919_v14 = vld [vmem:[#allocation2 + $0x5c4] ss:$16 sps:$4 sm:$0xff]  }
  0x9c   :  { %6524 = vmatmul.mubr.bf16.vlgmr.msra.gmra.mrb[0].mxu1 %v11645_v12 }
  0x9d   :  { %6565 = vmatmul.mubr.bf16.vlgmr.msra.gmra.mrb[0].mxu0 %v11651_v18  ;;  %7148 = vmatpush1.bf16.msra.mxu1 %v9836_v19  ;;  %v9925_v19 = vld [vmem:[#allocation2 + $0x5e4] ss:$16 sps:$4 sm:$0xff]  }
  0x9e   :  { %6574 = vmatpush1.bf16.msra.mxu0 %v9833_v17  ;;  %7149 = vmatprep.subr.bf16.mxu1 %v9844_v21  ;;  %v9920_v17 = vld [vmem:[#allocation2 + $0x1c8] ss:$16 sps:$4 sm:$0xff]   ;;  %v9923_v21 = vld [vmem:[#allocation2 + $0x5e0] ss:$16 sps:$4 sm:$0xff]  }
  0x9f   :  { %6575 = vmatprep.subr.bf16.mxu0 %v9841_v20  ;;  %6605 = vmatprep.mubr.bf16.mxu0 %v11654_v22  ;;  %v9928_v20 = vld [vmem:[#allocation2 + $0x1ec] ss:$16 sps:$4 sm:$0xff]  }
  0xa0   :  { %7179 = vmatprep.mubr.bf16.mxu1 %v1180_v60  ;;  %v9898_v60 = vld [vmem:[#allocation2 + $0x14c] ss:$16 sps:$4 sm:$0xff]  }
  0xa1   :  { %7150 = vmatpush1.bf16.msra.mxu1 %v9842_v24  ;;  %v9932_v24 = vld [vmem:[#allocation2 + $0x604] ss:$16 sps:$4 sm:$0xff]  }
  0xa2   :  { %6576 = vmatpush1.bf16.msra.mxu0 %v9839_v23  ;;  %7151 = vmatprep.subr.bf16.mxu1 %v9850_v26  ;;  %v9926_v23 = vld [vmem:[#allocation2 + $0x1e8] ss:$16 sps:$4 sm:$0xff]   ;;  %v9930_v26 = vld [vmem:[#allocation2 + $0x600] ss:$16 sps:$4 sm:$0xff]  }
  0xa3   :  { %6577 = vmatprep.subr.bf16.mxu0 %v9847_v25  ;;  %v9935_v25 = vld [vmem:[#allocation2 + $0x20c] ss:$16 sps:$4 sm:$0xff]  }
  0xa5   :  { %7152 = vmatpush1.bf16.msra.mxu1 %v9848_v28  ;;  %v9933_v28 = vld [vmem:[#allocation2 + $0x208] ss:$16 sps:$4 sm:$0xff]  }
  0xa6   :  { %6578 = vmatpush1.bf16.msra.mxu0 %v9845_v27  ;;  %7153 = vmatprep.subr.bf16.mxu1 %v9856_v30  ;;  %v11661_v27 = vrot.slane %v11642_v10, %v11631_v49  ;;  %v9941_v30 = vld [vmem:[#allocation2 + $0x22c] ss:$16 sps:$4 sm:$0xff]   ;;  %v9939_v10 = vld [vmem:[#allocation2 + $0x228] ss:$16 sps:$4 sm:$0xff]  }
  0xa7   :  { %6579 = vmatprep.subr.bf16.mxu0 %v9853_v29  ;;  %v9938_v29 = vld [vmem:[#allocation2 + $0x624] ss:$16 sps:$4 sm:$0xff]  }
  0xa9   :  { %7154 = vmatpush1.bf16.msra.mxu1 %v9854_v32  ;;  %v9936_v32 = vld [vmem:[#allocation2 + $0x620] ss:$16 sps:$4 sm:$0xff]  }
  0xaa   :  { %6580 = vmatpush1.bf16.msra.mxu0 %v9851_v31  ;;  %7155 = vmatprep.subr.bf16.mxu1 %v9862_v34  ;;  %v11665_v31 = vcombine.high %v11654_v22, %v11654_v22  ;;  %v9947_v34 = vld [vmem:[#allocation2 + $0x24c] ss:$16 sps:$4 sm:$0xff]  }
  0xab   :  { %6581 = vmatprep.subr.bf16.mxu0 %v9859_v33  ;;  %v9944_v33 = vld [vmem:[#allocation2 + $0x644] ss:$16 sps:$4 sm:$0xff]  }
  0xad   :  { %7156 = vmatpush1.bf16.msra.mxu1 %v9860_v36  ;;  %v9945_v36 = vld [vmem:[#allocation2 + $0x248] ss:$16 sps:$4 sm:$0xff]  }
  0xae   :  { %6582 = vmatpush1.bf16.msra.mxu0 %v9857_v35  ;;  %7157 = vmatprep.subr.bf16.mxu1 %v9868_v38  ;;  %v9942_v35 = vld [vmem:[#allocation2 + $0x640] ss:$16 sps:$4 sm:$0xff]  }
  0xaf   :  { %6583 = vmatprep.subr.bf16.mxu0 %v9865_v37  ;;  %v9950_v37 = vld [vmem:[#allocation2 + $0x664] ss:$16 sps:$4 sm:$0xff]   ;;  %v9948_v38 = vld [vmem:[#allocation2 + $0x660] ss:$16 sps:$4 sm:$0xff]  }
  0xb1   :  { %7158 = vmatpush1.bf16.msra.mxu1 %v9866_v40  ;;  %v9956_v40 = vld [vmem:[#allocation2 + $0x684] ss:$16 sps:$4 sm:$0xff]  }
  0xb2   :  { %6584 = vmatpush1.bf16.msra.mxu0 %v9863_v39  ;;  %7159 = vmatprep.subr.bf16.mxu1 %v9874_v43  ;;  %v9951_v39 = vld [vmem:[#allocation2 + $0x268] ss:$16 sps:$4 sm:$0xff]   ;;  %v9954_v43 = vld [vmem:[#allocation2 + $0x680] ss:$16 sps:$4 sm:$0xff]  }
  0xb3   :  { %6585 = vmatprep.subr.bf16.mxu0 %v9871_v41  ;;  %v9959_v41 = vld [vmem:[#allocation2 + $0x28c] ss:$16 sps:$4 sm:$0xff]  }
  0xb5   :  { %7160 = vmatpush1.bf16.msra.mxu1 %v9872_v45  ;;  %v9965_v45 = vld [vmem:[#allocation2 + $0x2ac] ss:$16 sps:$4 sm:$0xff]  }
  0xb6   :  { %6586 = vmatpush1.bf16.msra.mxu0 %v9869_v44  ;;  %7161 = vmatprep.subr.bf16.mxu1 %v9880_v47  ;;  %v9962_v44 = vld [vmem:[#allocation2 + $0x6a4] ss:$16 sps:$4 sm:$0xff]   ;;  %v9963_v47 = vld [vmem:[#allocation2 + $0x2a8] ss:$16 sps:$4 sm:$0xff]  }
  0xb7   :  { %6587 = vmatprep.subr.bf16.mxu0 %v9877_v46  ;;  %v9960_v46 = vld [vmem:[#allocation2 + $0x6a0] ss:$16 sps:$4 sm:$0xff]  }
  0xb9   :  { %7162 = vmatpush1.bf16.msra.mxu1 %v9878_v50  ;;  %v9971_v50 = vld [vmem:[#allocation2 + $0x2cc] ss:$16 sps:$4 sm:$0xff]  }
  0xba   :  { %6588 = vmatpush1.bf16.msra.mxu0 %v9875_v48  ;;  %7163 = vmatprep.subr.bf16.mxu1 %v9886_v52  ;;  %v9968_v48 = vld [vmem:[#allocation2 + $0x6c4] ss:$16 sps:$4 sm:$0xff]   ;;  %v9969_v52 = vld [vmem:[#allocation2 + $0x2c8] ss:$16 sps:$4 sm:$0xff]  }
  0xbb   :  { %6589 = vmatprep.subr.bf16.mxu0 %v9883_v51  ;;  %v9966_v51 = vld [vmem:[#allocation2 + $0x6c0] ss:$16 sps:$4 sm:$0xff]  }
  0xbd   :  { %7164 = vmatpush1.bf16.msra.mxu1 %v9884_v54  ;;  %v9977_v54 = vld [vmem:[#allocation2 + $0x2ec] ss:$16 sps:$4 sm:$0xff]  }
  0xbe   :  { %6590 = vmatpush1.bf16.msra.mxu0 %v9881_v53  ;;  %7165 = vmatprep.subr.bf16.mxu1 %v9892_v56  ;;  %v9974_v53 = vld [vmem:[#allocation2 + $0x6e4] ss:$16 sps:$4 sm:$0xff]   ;;  %v9975_v56 = vld [vmem:[#allocation2 + $0x2e8] ss:$16 sps:$4 sm:$0xff]  }
  0xbf   :  { %6591 = vmatprep.subr.bf16.mxu0 %v9889_v55  ;;  %v9972_v55 = vld [vmem:[#allocation2 + $0x6e0] ss:$16 sps:$4 sm:$0xff]  }
  0xc1   :  { %7166 = vmatpush1.bf16.msra.mxu1 %v9890_v58  ;;  %v9983_v58 = vld [vmem:[#allocation2 + $0x30c] ss:$16 sps:$4 sm:$0xff]  }
  0xc2   :  { %6592 = vmatpush1.bf16.msra.mxu0 %v9887_v57  ;;  %7167 = vmatprep.subr.bf16.mxu1 %v9898_v60  ;;  %v9980_v57 = vld [vmem:[#allocation2 + $0x704] ss:$16 sps:$4 sm:$0xff]   ;;  %v9981_v60 = vld [vmem:[#allocation2 + $0x308] ss:$16 sps:$4 sm:$0xff]  }
  0xc3   :  { %6593 = vmatprep.subr.bf16.mxu0 %v9895_v59  ;;  %v9978_v59 = vld [vmem:[#allocation2 + $0x700] ss:$16 sps:$4 sm:$0xff]  }
  0xc5   :  { %7168 = vmatpush1.bf16.msra.mxu1 %v9896_v62  ;;  %v9989_v62 = vld [vmem:[#allocation2 + $0x32c] ss:$16 sps:$4 sm:$0xff]  }
  0xc6   :  { %6594 = vmatpush1.bf16.msra.mxu0 %v9893_v61  ;;  %7169 = vmatprep.subr.bf16.mxu1 %v9904_v1  ;;  %v9986_v61 = vld [vmem:[#allocation2 + $0x724] ss:$16 sps:$4 sm:$0xff]   ;;  %v9987_v1 = vld [vmem:[#allocation2 + $0x328] ss:$16 sps:$4 sm:$0xff]  }
  0xc7   :  { %6595 = vmatprep.subr.bf16.mxu0 %v9901_v63  ;;  %v9984_v63 = vld [vmem:[#allocation2 + $0x720] ss:$16 sps:$4 sm:$0xff]  }
  0xc9   :  { %7170 = vmatpush1.bf16.msra.mxu1 %v9902_v3  ;;  %v9995_v3 = vld [vmem:[#allocation2 + $0x34c] ss:$16 sps:$4 sm:$0xff]  }
  0xca   :  { %6596 = vmatpush1.bf16.msra.mxu0 %v9899_v2  ;;  %7171 = vmatprep.subr.bf16.mxu1 %v9910_v5  ;;  %v9992_v2 = vld [vmem:[#allocation2 + $0x744] ss:$16 sps:$4 sm:$0xff]   ;;  %v9993_v5 = vld [vmem:[#allocation2 + $0x348] ss:$16 sps:$4 sm:$0xff]  }
  0xcb   :  { %6597 = vmatprep.subr.bf16.mxu0 %v9907_v4  ;;  %v9990_v4 = vld [vmem:[#allocation2 + $0x740] ss:$16 sps:$4 sm:$0xff]  }
  0xcd   :  { %7172 = vmatpush1.bf16.msra.mxu1 %v9908_v7  ;;  %v10001_v7 = vld [vmem:[#allocation2 + $0x36c] ss:$16 sps:$4 sm:$0xff]  }
  0xce   :  { %6598 = vmatpush1.bf16.msra.mxu0 %v9905_v6  ;;  %7173 = vmatprep.subr.bf16.mxu1 %v9916_v9  ;;  %v9998_v6 = vld [vmem:[#allocation2 + $0x764] ss:$16 sps:$4 sm:$0xff]   ;;  %v9999_v9 = vld [vmem:[#allocation2 + $0x368] ss:$16 sps:$4 sm:$0xff]  }
  0xcf   :  { %6599 = vmatprep.subr.bf16.mxu0 %v9913_v8  ;;  %v9996_v8 = vld [vmem:[#allocation2 + $0x760] ss:$16 sps:$4 sm:$0xff]  }
  0xd1   :  { %7174 = vmatpush1.bf16.msra.mxu1 %v9914_v13  ;;  %v10007_v13 = vld [vmem:[#allocation2 + $0x38c] ss:$16 sps:$4 sm:$0xff]  }
  0xd2   :  { %6600 = vmatpush1.bf16.msra.mxu0 %v9911_v11  ;;  %7175 = vmatprep.subr.bf16.mxu1 %v9922_v15  ;;  %v10004_v11 = vld [vmem:[#allocation2 + $0x784] ss:$16 sps:$4 sm:$0xff]   ;;  %v10005_v15 = vld [vmem:[#allocation2 + $0x388] ss:$16 sps:$4 sm:$0xff]  }
  0xd3   :  { %6601 = vmatprep.subr.bf16.mxu0 %v9919_v14  ;;  %v10002_v14 = vld [vmem:[#allocation2 + $0x780] ss:$16 sps:$4 sm:$0xff]  }
  0xd5   :  { %7176 = vmatpush1.bf16.msra.mxu1 %v9920_v17  ;;  %v10013_v17 = vld [vmem:[#allocation2 + $0x3ac] ss:$16 sps:$4 sm:$0xff]  }
  0xd6   :  { %6602 = vmatpush1.bf16.msra.mxu0 %v9917_v16  ;;  %7177 = vmatprep.subr.bf16.mxu1 %v9928_v20  ;;  %v10010_v16 = vld [vmem:[#allocation2 + $0x7a4] ss:$16 sps:$4 sm:$0xff]   ;;  %v10011_v20 = vld [vmem:[#allocation2 + $0x3a8] ss:$16 sps:$4 sm:$0xff]  }
  0xd7   :  { %6603 = vmatprep.subr.bf16.mxu0 %v9925_v19  ;;  %v10008_v19 = vld [vmem:[#allocation2 + $0x7a0] ss:$16 sps:$4 sm:$0xff]  }
  0xd9   :  { %7178 = vmatpush1.bf16.msra.mxu1 %v9926_v23  ;;  %v10019_v23 = vld [vmem:[#allocation2 + $0x3cc] ss:$16 sps:$4 sm:$0xff]  }
  0xda   :  { %6604 = vmatpush1.bf16.msra.mxu0 %v9923_v21  ;;  %7188 = vmatprep.subr.bf16.mxu1 %v9935_v25  ;;  %v10016_v21 = vld [vmem:[#allocation2 + $0x7c4] ss:$16 sps:$4 sm:$0xff]   ;;  %v10014_v25 = vld [vmem:[#allocation2 + $0x7c0] ss:$16 sps:$4 sm:$0xff]  }
  0xdb   :  { %6614 = vmatprep.subr.bf16.mxu0 %v9932_v24  ;;  %v11674_v24 = vld [vmem:[%s12002_s0 + $0x8] sm:$0xff] }
  0xdc   :  { %7180 = vmatmul.mubr.bf16.vlgmr.msra.gmra.mrb[4].mxu1 %v11645_v12  ;;  %v9953_v12 = vld [vmem:[#allocation2 + $0x26c] ss:$16 sps:$4 sm:$0xff]  }
  0xdd   :  { %6606 = vmatmul.mubr.bf16.vlgmr.msra.gmra.mrb[0].mxu0 %v11661_v27  ;;  %7189 = vmatpush1.bf16.msra.mxu1 %v9933_v28  ;;  %v10022_v28 = vld [vmem:[#allocation2 + $0x7e4] ss:$16 sps:$4 sm:$0xff]  }
  0xde   :  { %6615 = vmatpush1.bf16.msra.mxu0 %v9930_v26  ;;  %7190 = vmatprep.subr.bf16.mxu1 %v9941_v30  ;;  %v10017_v26 = vld [vmem:[#allocation2 + $0x3c8] ss:$16 sps:$4 sm:$0xff]   ;;  %v11678_v30 = vrot.slane %v11674_v24, %v11631_v49 }
  0xdf   :  { %6616 = vmatprep.subr.bf16.mxu0 %v9938_v29  ;;  %6646 = vmatprep.mubr.bf16.mxu0 %v11665_v31  ;;  %v10025_v29 = vld [vmem:[#allocation2 + $0x3ec] ss:$16 sps:$4 sm:$0xff]  }
  0xe0   :  { %7220 = vmatprep.mubr.bf16.mxu1 %v11638_v0  ;;  %v9957_v0 = vld [vmem:[#allocation2 + $0x288] ss:$16 sps:$4 sm:$0xff]  }
  0xe1   :  { %7191 = vmatpush1.bf16.msra.mxu1 %v9939_v10  ;;  %v10023_v10 = vld [vmem:[#allocation2 + $0x3e8] ss:$16 sps:$4 sm:$0xff]  }
  0xe2   :  { %6617 = vmatpush1.bf16.msra.mxu0 %v9936_v32  ;;  %7192 = vmatprep.subr.bf16.mxu1 %v9947_v34  ;;  %v10020_v32 = vld [vmem:[#allocation2 + $0x7e0] ss:$16 sps:$4 sm:$0xff]   ;;  %v10031_v34 = vld [vmem:[#allocation2 + $0x40c] ss:$16 sps:$4 sm:$0xff]  }
  0xe3   :  { %6618 = vmatprep.subr.bf16.mxu0 %v9944_v33  ;;  %v10028_v33 = vld [vmem:[#allocation2 + $0x804] ss:$16 sps:$4 sm:$0xff]  }
  0xe5   :  { %7193 = vmatpush1.bf16.msra.mxu1 %v9945_v36  ;;  %v10026_v36 = vld [vmem:[#allocation2 + $0x800] ss:$16 sps:$4 sm:$0xff]  }
  0xe6   :  { %6619 = vmatpush1.bf16.msra.mxu0 %v9942_v35  ;;  %7194 = vmatprep.subr.bf16.mxu1 %v9953_v12  ;;  %v1207_v35 = vcombine.high %v11678_v30, %v11678_v30  ;;  %v10029_v12 = vld [vmem:[#allocation2 + $0x408] ss:$16 sps:$4 sm:$0xff]  }
  0xe7   :  { %6620 = vmatprep.subr.bf16.mxu0 %v9950_v37  ;;  %v11684_v37 = vcombine.high %v11661_v27, %v11661_v27 }
  0xe9   :  { %7195 = vmatpush1.bf16.msra.mxu1 %v9951_v39  ;;  %v10037_v39 = vld [vmem:[#allocation2 + $0x42c] ss:$16 sps:$4 sm:$0xff]  }
  0xea   :  { %6621 = vmatpush1.bf16.msra.mxu0 %v9948_v38  ;;  %7196 = vmatprep.subr.bf16.mxu1 %v9959_v41  ;;  %v10034_v38 = vld [vmem:[#allocation2 + $0x824] ss:$16 sps:$4 sm:$0xff]   ;;  %v10032_v41 = vld [vmem:[#allocation2 + $0x820] ss:$16 sps:$4 sm:$0xff]  }
  0xeb   :  { %6622 = vmatprep.subr.bf16.mxu0 %v9956_v40  ;;  %v11687_v40 = vrot.slane %v1207_v35, %v11631_v49  ;;  %v10115_v35 = vld [vmem:[#allocation2 + $0x5cc] ss:$16 sps:$4 sm:$0xff]  }
  0xed   :  { %7197 = vmatpush1.bf16.msra.mxu1 %v9957_v0  ;;  %v10040_v0 = vld [vmem:[#allocation2 + $0x844] ss:$16 sps:$4 sm:$0xff]  }
  0xee   :  { %6623 = vmatpush1.bf16.msra.mxu0 %v9954_v43  ;;  %7198 = vmatprep.subr.bf16.mxu1 %v9965_v45  ;;  %v10035_v43 = vld [vmem:[#allocation2 + $0x428] ss:$16 sps:$4 sm:$0xff]   ;;  %v10038_v45 = vld [vmem:[#allocation2 + $0x840] ss:$16 sps:$4 sm:$0xff]  }
  0xef   :  { %6624 = vmatprep.subr.bf16.mxu0 %v9962_v44  ;;  %v10043_v44 = vld [vmem:[#allocation2 + $0x44c] ss:$16 sps:$4 sm:$0xff]  }
  0xf1   :  { %7199 = vmatpush1.bf16.msra.mxu1 %v9963_v47  ;;  %v10046_v47 = vld [vmem:[#allocation2 + $0x864] ss:$16 sps:$4 sm:$0xff]  }
  0xf2   :  { %6625 = vmatpush1.bf16.msra.mxu0 %v9960_v46  ;;  %7200 = vmatprep.subr.bf16.mxu1 %v9971_v50  ;;  %v10041_v46 = vld [vmem:[#allocation2 + $0x448] ss:$16 sps:$4 sm:$0xff]  }
  0xf3   :  { %6626 = vmatprep.subr.bf16.mxu0 %v9968_v48  ;;  %v10044_v48 = vld [vmem:[#allocation2 + $0x860] ss:$16 sps:$4 sm:$0xff]   ;;  %v10047_v50 = vld [vmem:[#allocation2 + $0x468] ss:$16 sps:$4 sm:$0xff]  }
  0xf5   :  { %7201 = vmatpush1.bf16.msra.mxu1 %v9969_v52  ;;  %v10055_v52 = vld [vmem:[#allocation2 + $0x48c] ss:$16 sps:$4 sm:$0xff]  }
  0xf6   :  { %6627 = vmatpush1.bf16.msra.mxu0 %v9966_v51  ;;  %7202 = vmatprep.subr.bf16.mxu1 %v9977_v54  ;;  %v10052_v51 = vld [vmem:[#allocation2 + $0x884] ss:$16 sps:$4 sm:$0xff]  }
  0xf7   :  { %6628 = vmatprep.subr.bf16.mxu0 %v9974_v53  ;;  %v10050_v53 = vld [vmem:[#allocation2 + $0x880] ss:$16 sps:$4 sm:$0xff]   ;;  %v10058_v54 = vld [vmem:[#allocation2 + $0x8a4] ss:$16 sps:$4 sm:$0xff]  }
  0xf9   :  { %7203 = vmatpush1.bf16.msra.mxu1 %v9975_v56  ;;  %v10056_v56 = vld [vmem:[#allocation2 + $0x8a0] ss:$16 sps:$4 sm:$0xff]  }
  0xfa   :  { %6629 = vmatpush1.bf16.msra.mxu0 %v9972_v55  ;;  %7204 = vmatprep.subr.bf16.mxu1 %v9983_v58  ;;  %v10061_v55 = vld [vmem:[#allocation2 + $0x4ac] ss:$16 sps:$4 sm:$0xff]   ;;  %v10064_v58 = vld [vmem:[#allocation2 + $0x8c4] ss:$16 sps:$4 sm:$0xff]  }
  0xfb   :  { %6630 = vmatprep.subr.bf16.mxu0 %v9980_v57  ;;  %v10059_v57 = vld [vmem:[#allocation2 + $0x4a8] ss:$16 sps:$4 sm:$0xff]  }
  0xfd   :  { %7205 = vmatpush1.bf16.msra.mxu1 %v9981_v60  ;;  %v10062_v60 = vld [vmem:[#allocation2 + $0x8c0] ss:$16 sps:$4 sm:$0xff]  }
  0xfe   :  { %6631 = vmatpush1.bf16.msra.mxu0 %v9978_v59  ;;  %7206 = vmatprep.subr.bf16.mxu1 %v9989_v62  ;;  %v10067_v59 = vld [vmem:[#allocation2 + $0x4cc] ss:$16 sps:$4 sm:$0xff]   ;;  %v10070_v62 = vld [vmem:[#allocation2 + $0x8e4] ss:$16 sps:$4 sm:$0xff]  }
  0xff   :  { %6632 = vmatprep.subr.bf16.mxu0 %v9986_v61  ;;  %v10065_v61 = vld [vmem:[#allocation2 + $0x4c8] ss:$16 sps:$4 sm:$0xff]  }
 0x101   :  { %7207 = vmatpush1.bf16.msra.mxu1 %v9987_v1  ;;  %v10068_v1 = vld [vmem:[#allocation2 + $0x8e0] ss:$16 sps:$4 sm:$0xff]  }
 0x102   :  { %6633 = vmatpush1.bf16.msra.mxu0 %v9984_v63  ;;  %7208 = vmatprep.subr.bf16.mxu1 %v9995_v3  ;;  %v10073_v63 = vld [vmem:[#allocation2 + $0x4ec] ss:$16 sps:$4 sm:$0xff]   ;;  %v10076_v3 = vld [vmem:[#allocation2 + $0x904] ss:$16 sps:$4 sm:$0xff]  }
 0x103   :  { %6634 = vmatprep.subr.bf16.mxu0 %v9992_v2  ;;  %v10071_v2 = vld [vmem:[#allocation2 + $0x4e8] ss:$16 sps:$4 sm:$0xff]  }
 0x105   :  { %7209 = vmatpush1.bf16.msra.mxu1 %v9993_v5  ;;  %v10074_v5 = vld [vmem:[#allocation2 + $0x900] ss:$16 sps:$4 sm:$0xff]  }
 0x106   :  { %6635 = vmatpush1.bf16.msra.mxu0 %v9990_v4  ;;  %7210 = vmatprep.subr.bf16.mxu1 %v10001_v7  ;;  %v10079_v4 = vld [vmem:[#allocation2 + $0x50c] ss:$16 sps:$4 sm:$0xff]   ;;  %v10082_v7 = vld [vmem:[#allocation2 + $0x924] ss:$16 sps:$4 sm:$0xff]  }
 0x107   :  { %6636 = vmatprep.subr.bf16.mxu0 %v9998_v6  ;;  %v10077_v6 = vld [vmem:[#allocation2 + $0x508] ss:$16 sps:$4 sm:$0xff]  }
 0x109   :  { %7211 = vmatpush1.bf16.msra.mxu1 %v9999_v9  ;;  %v10080_v9 = vld [vmem:[#allocation2 + $0x920] ss:$16 sps:$4 sm:$0xff]  }
 0x10a   :  { %6637 = vmatpush1.bf16.msra.mxu0 %v9996_v8  ;;  %7212 = vmatprep.subr.bf16.mxu1 %v10007_v13  ;;  %v10085_v8 = vld [vmem:[#allocation2 + $0x52c] ss:$16 sps:$4 sm:$0xff]   ;;  %v10088_v13 = vld [vmem:[#allocation2 + $0x944] ss:$16 sps:$4 sm:$0xff]  }
 0x10b   :  { %6638 = vmatprep.subr.bf16.mxu0 %v10004_v11  ;;  %v10083_v11 = vld [vmem:[#allocation2 + $0x528] ss:$16 sps:$4 sm:$0xff]  }
 0x10d   :  { %7213 = vmatpush1.bf16.msra.mxu1 %v10005_v15  ;;  %v10086_v15 = vld [vmem:[#allocation2 + $0x940] ss:$16 sps:$4 sm:$0xff]  }
 0x10e   :  { %6639 = vmatpush1.bf16.msra.mxu0 %v10002_v14  ;;  %7214 = vmatprep.subr.bf16.mxu1 %v10013_v17  ;;  %v10091_v14 = vld [vmem:[#allocation2 + $0x54c] ss:$16 sps:$4 sm:$0xff]   ;;  %v10094_v17 = vld [vmem:[#allocation2 + $0x964] ss:$16 sps:$4 sm:$0xff]  }
 0x10f   :  { %6640 = vmatprep.subr.bf16.mxu0 %v10010_v16  ;;  %v10089_v16 = vld [vmem:[#allocation2 + $0x548] ss:$16 sps:$4 sm:$0xff]  }
 0x111   :  { %7215 = vmatpush1.bf16.msra.mxu1 %v10011_v20  ;;  %v10092_v20 = vld [vmem:[#allocation2 + $0x960] ss:$16 sps:$4 sm:$0xff]  }
 0x112   :  { %6641 = vmatpush1.bf16.msra.mxu0 %v10008_v19  ;;  %7216 = vmatprep.subr.bf16.mxu1 %v10019_v23  ;;  %v10097_v19 = vld [vmem:[#allocation2 + $0x56c] ss:$16 sps:$4 sm:$0xff]   ;;  %v10100_v23 = vld [vmem:[#allocation2 + $0x984] ss:$16 sps:$4 sm:$0xff]  }
 0x113   :  { %6642 = vmatprep.subr.bf16.mxu0 %v10016_v21  ;;  %v10095_v21 = vld [vmem:[#allocation2 + $0x568] ss:$16 sps:$4 sm:$0xff]  }
 0x115   :  { %7217 = vmatpush1.bf16.msra.mxu1 %v10017_v26  ;;  %v10098_v26 = vld [vmem:[#allocation2 + $0x980] ss:$16 sps:$4 sm:$0xff]  }
 0x116   :  { %6643 = vmatpush1.bf16.msra.mxu0 %v10014_v25  ;;  %7218 = vmatprep.subr.bf16.mxu1 %v10025_v29  ;;  %v10103_v25 = vld [vmem:[#allocation2 + $0x58c] ss:$16 sps:$4 sm:$0xff]   ;;  %v10106_v29 = vld [vmem:[#allocation2 + $0x9a4] ss:$16 sps:$4 sm:$0xff]  }
 0x117   :  { %6644 = vmatprep.subr.bf16.mxu0 %v10022_v28  ;;  %v10101_v28 = vld [vmem:[#allocation2 + $0x588] ss:$16 sps:$4 sm:$0xff]  }
 0x119   :  { %7219 = vmatpush1.bf16.msra.mxu1 %v10023_v10  ;;  %v10104_v10 = vld [vmem:[#allocation2 + $0x9a0] ss:$16 sps:$4 sm:$0xff]  }
 0x11a   :  { %6645 = vmatpush1.bf16.msra.mxu0 %v10020_v32  ;;  %7229 = vmatprep.subr.bf16.mxu1 %v10031_v34  ;;  %v10109_v32 = vld [vmem:[#allocation2 + $0x5ac] ss:$16 sps:$4 sm:$0xff]   ;;  %v10112_v34 = vld [vmem:[#allocation2 + $0x9c4] ss:$16 sps:$4 sm:$0xff]  }
 0x11b   :  { %6655 = vmatprep.subr.bf16.mxu0 %v10028_v33  ;;  %v10107_v33 = vld [vmem:[#allocation2 + $0x5a8] ss:$16 sps:$4 sm:$0xff]  }
 0x11c   :  { %7221 = vmatmul.mubr.bf16.vlgmr.msra.gmra.mrb[4].mxu1 %v11651_v18  ;;  %v10049_v18 = vld [vmem:[#allocation2 + $0x46c] ss:$16 sps:$4 sm:$0xff]  }
 0x11d   :  { %6647 = vmatmul.mubr.bf16.vlgmr.msra.gmra.mrb[0].mxu0 %v11684_v37  ;;  %7230 = vmatpush1.bf16.msra.mxu1 %v10029_v12  ;;  %v10113_v12 = vld [vmem:[#allocation2 + $0x5c8] ss:$16 sps:$4 sm:$0xff]  }
 0x11e   :  { %6656 = vmatpush1.bf16.msra.mxu0 %v10026_v36  ;;  %7231 = vmatprep.subr.bf16.mxu1 %v10037_v39  ;;  %v10110_v36 = vld [vmem:[#allocation2 + $0x9c0] ss:$16 sps:$4 sm:$0xff]   ;;  %v10121_v39 = vld [vmem:[#allocation2 + $0x5ec] ss:$16 sps:$4 sm:$0xff]  }
 0x11f   :  { %6657 = vmatprep.subr.bf16.mxu0 %v10034_v38  ;;  %6687 = vmatprep.mubr.bf16.mxu0 %v11687_v40  ;;  %v10118_v38 = vld [vmem:[#allocation2 + $0x9e4] ss:$16 sps:$4 sm:$0xff]  }
 0x120   :  { %7261 = vmatprep.mubr.bf16.mxu1 %v11654_v22  ;;  %v10053_v22 = vld [vmem:[#allocation2 + $0x488] ss:$16 sps:$4 sm:$0xff]  }
 0x121   :  { %7232 = vmatpush1.bf16.msra.mxu1 %v10035_v43  ;;  %v10119_v43 = vld [vmem:[#allocation2 + $0x5e8] ss:$16 sps:$4 sm:$0xff]  }
 0x122   :  { %6658 = vmatpush1.bf16.msra.mxu0 %v10032_v41  ;;  %7233 = vmatprep.subr.bf16.mxu1 %v10043_v44  ;;  %v10116_v41 = vld [vmem:[#allocation2 + $0x9e0] ss:$16 sps:$4 sm:$0xff]   ;;  %v10127_v44 = vld [vmem:[#allocation2 + $0x60c] ss:$16 sps:$4 sm:$0xff]  }
 0x123   :  { %6659 = vmatprep.subr.bf16.mxu0 %v10040_v0  ;;  %v10124_v0 = vld [vmem:[#allocation2 + $0xa04] ss:$16 sps:$4 sm:$0xff]  }
 0x125   :  { %7234 = vmatpush1.bf16.msra.mxu1 %v10041_v46  ;;  %v11695_v46 = vrot.slane %v11678_v30, %v11631_v49  ;;  %v10131_v30 = vld [vmem:[#allocation2 + $0x628] ss:$16 sps:$4 sm:$0xff]  }
 0x126   :  { %6660 = vmatpush1.bf16.msra.mxu0 %v10038_v45  ;;  %7235 = vmatprep.subr.bf16.mxu1 %v10049_v18  ;;  %v10122_v45 = vld [vmem:[#allocation2 + $0xa00] ss:$16 sps:$4 sm:$0xff]   ;;  %v10130_v18 = vld [vmem:[#allocation2 + $0xa24] ss:$16 sps:$4 sm:$0xff]  }
 0x127   :  { %6661 = vmatprep.subr.bf16.mxu0 %v10046_v47  ;;  %v10125_v47 = vld [vmem:[#allocation2 + $0x608] ss:$16 sps:$4 sm:$0xff]  }
 0x129   :  { %7236 = vmatpush1.bf16.msra.mxu1 %v10047_v50  ;;  %v11699_v50 = vcombine.high %v11687_v40, %v11687_v40 }
 0x12a   :  { %6662 = vmatpush1.bf16.msra.mxu0 %v10044_v48  ;;  %7237 = vmatprep.subr.bf16.mxu1 %v10055_v52  ;;  %v10133_v48 = vld [vmem:[#allocation2 + $0x62c] ss:$16 sps:$4 sm:$0xff]   ;;  %v10136_v52 = vld [vmem:[#allocation2 + $0xa44] ss:$16 sps:$4 sm:$0xff]  }
 0x12b   :  { %6663 = vmatprep.subr.bf16.mxu0 %v10052_v51  ;;  %v10128_v51 = vld [vmem:[#allocation2 + $0xa20] ss:$16 sps:$4 sm:$0xff]  }
 0x12d   :  { %7238 = vmatpush1.bf16.msra.mxu1 %v10053_v22  ;;  %v10134_v22 = vld [vmem:[#allocation2 + $0xa40] ss:$16 sps:$4 sm:$0xff]  }
 0x12e   :  { %6664 = vmatpush1.bf16.msra.mxu0 %v10050_v53  ;;  %7239 = vmatprep.subr.bf16.mxu1 %v10061_v55  ;;  %v10139_v53 = vld [vmem:[#allocation2 + $0x64c] ss:$16 sps:$4 sm:$0xff]   ;;  %v10142_v55 = vld [vmem:[#allocation2 + $0xa64] ss:$16 sps:$4 sm:$0xff]  }
 0x12f   :  { %6665 = vmatprep.subr.bf16.mxu0 %v10058_v54  ;;  %v10137_v54 = vld [vmem:[#allocation2 + $0x648] ss:$16 sps:$4 sm:$0xff]  }
 0x131   :  { %7240 = vmatpush1.bf16.msra.mxu1 %v10059_v57  ;;  %v10143_v57 = vld [vmem:[#allocation2 + $0x668] ss:$16 sps:$4 sm:$0xff]  }
 0x132   :  { %6666 = vmatpush1.bf16.msra.mxu0 %v10056_v56  ;;  %7241 = vmatprep.subr.bf16.mxu1 %v10067_v59  ;;  %v10140_v56 = vld [vmem:[#allocation2 + $0xa60] ss:$16 sps:$4 sm:$0xff]   ;;  %v10151_v59 = vld [vmem:[#allocation2 + $0x68c] ss:$16 sps:$4 sm:$0xff]  }
 0x133   :  { %6667 = vmatprep.subr.bf16.mxu0 %v10064_v58  ;;  %v10148_v58 = vld [vmem:[#allocation2 + $0xa84] ss:$16 sps:$4 sm:$0xff]  }
 0x135   :  { %7242 = vmatpush1.bf16.msra.mxu1 %v10065_v61  ;;  %v10154_v61 = vld [vmem:[#allocation2 + $0xaa4] ss:$16 sps:$4 sm:$0xff]  }
 0x136   :  { %6668 = vmatpush1.bf16.msra.mxu0 %v10062_v60  ;;  %7243 = vmatprep.subr.bf16.mxu1 %v10073_v63  ;;  %v10146_v60 = vld [vmem:[#allocation2 + $0xa80] ss:$16 sps:$4 sm:$0xff]  }
 0x137   :  { %6669 = vmatprep.subr.bf16.mxu0 %v10070_v62  ;;  %v10157_v62 = vld [vmem:[#allocation2 + $0x6ac] ss:$16 sps:$4 sm:$0xff]   ;;  %v10152_v63 = vld [vmem:[#allocation2 + $0xaa0] ss:$16 sps:$4 sm:$0xff]  }
 0x139   :  { %7244 = vmatpush1.bf16.msra.mxu1 %v10071_v2  ;;  %v10160_v2 = vld [vmem:[#allocation2 + $0xac4] ss:$16 sps:$4 sm:$0xff]  }
 0x13a   :  { %6670 = vmatpush1.bf16.msra.mxu0 %v10068_v1  ;;  %7245 = vmatprep.subr.bf16.mxu1 %v10079_v4  ;;  %v10155_v1 = vld [vmem:[#allocation2 + $0x6a8] ss:$16 sps:$4 sm:$0xff]  }
 0x13b   :  { %6671 = vmatprep.subr.bf16.mxu0 %v10076_v3  ;;  %v10163_v3 = vld [vmem:[#allocation2 + $0x6cc] ss:$16 sps:$4 sm:$0xff]  }
 0x13d   :  { %7246 = vmatpush1.bf16.msra.mxu1 %v10077_v6 }
 0x13e   :  { %6672 = vmatpush1.bf16.msra.mxu0 %v10074_v5  ;;  %7247 = vmatprep.subr.bf16.mxu1 %v10085_v8  ;;  %v10161_v8 = vld [vmem:[#allocation2 + $0x6c8] ss:$16 sps:$4 sm:$0xff]  }
 0x13f   :  { %6673 = vmatprep.subr.bf16.mxu0 %v10082_v7  ;;  %v10158_v7 = vld [vmem:[#allocation2 + $0xac0] ss:$16 sps:$4 sm:$0xff]  }
 0x141   :  { %7248 = vmatpush1.bf16.msra.mxu1 %v10083_v11  ;;  %v10166_v11 = vld [vmem:[#allocation2 + $0xae4] ss:$16 sps:$4 sm:$0xff]  }
 0x142   :  { %6674 = vmatpush1.bf16.msra.mxu0 %v10080_v9  ;;  %7249 = vmatprep.subr.bf16.mxu1 %v10091_v14  ;;  %v10164_v14 = vld [vmem:[#allocation2 + $0xae0] ss:$16 sps:$4 sm:$0xff]  }
 0x143   :  { %6675 = vmatprep.subr.bf16.mxu0 %v10088_v13  ;;  %v10169_v13 = vld [vmem:[#allocation2 + $0x6ec] ss:$16 sps:$4 sm:$0xff]  }
 0x145   :  { %7250 = vmatpush1.bf16.msra.mxu1 %v10089_v16  ;;  %v10172_v16 = vld [vmem:[#allocation2 + $0xb04] ss:$16 sps:$4 sm:$0xff]  }
 0x146   :  { %6676 = vmatpush1.bf16.msra.mxu0 %v10086_v15  ;;  %7251 = vmatprep.subr.bf16.mxu1 %v10097_v19  ;;  %v10167_v15 = vld [vmem:[#allocation2 + $0x6e8] ss:$16 sps:$4 sm:$0xff]   ;;  %v10170_v19 = vld [vmem:[#allocation2 + $0xb00] ss:$16 sps:$4 sm:$0xff]  }
 0x147   :  { %6677 = vmatprep.subr.bf16.mxu0 %v10094_v17  ;;  %v10175_v17 = vld [vmem:[#allocation2 + $0x70c] ss:$16 sps:$4 sm:$0xff]  }
 0x149   :  { %7252 = vmatpush1.bf16.msra.mxu1 %v10095_v21  ;;  %v10178_v21 = vld [vmem:[#allocation2 + $0xb24] ss:$16 sps:$4 sm:$0xff]  }
 0x14a   :  { %6678 = vmatpush1.bf16.msra.mxu0 %v10092_v20  ;;  %7253 = vmatprep.subr.bf16.mxu1 %v10103_v25  ;;  %v10173_v20 = vld [vmem:[#allocation2 + $0x708] ss:$16 sps:$4 sm:$0xff]   ;;  %v10176_v25 = vld [vmem:[#allocation2 + $0xb20] ss:$16 sps:$4 sm:$0xff]  }
 0x14b   :  { %6679 = vmatprep.subr.bf16.mxu0 %v10100_v23  ;;  %v10181_v23 = vld [vmem:[#allocation2 + $0x72c] ss:$16 sps:$4 sm:$0xff]  }
 0x14d   :  { %7254 = vmatpush1.bf16.msra.mxu1 %v10101_v28  ;;  %v10184_v28 = vld [vmem:[#allocation2 + $0xb44] ss:$16 sps:$4 sm:$0xff]  }
 0x14e   :  { %6680 = vmatpush1.bf16.msra.mxu0 %v10098_v26  ;;  %7255 = vmatprep.subr.bf16.mxu1 %v10109_v32  ;;  %v10179_v26 = vld [vmem:[#allocation2 + $0x728] ss:$16 sps:$4 sm:$0xff]   ;;  %v10182_v32 = vld [vmem:[#allocation2 + $0xb40] ss:$16 sps:$4 sm:$0xff]  }
 0x14f   :  { %6681 = vmatprep.subr.bf16.mxu0 %v10106_v29  ;;  %v10187_v29 = vld [vmem:[#allocation2 + $0x74c] ss:$16 sps:$4 sm:$0xff]  }
 0x151   :  { %7256 = vmatpush1.bf16.msra.mxu1 %v10107_v33  ;;  %v10190_v33 = vld [vmem:[#allocation2 + $0xb64] ss:$16 sps:$4 sm:$0xff]  }
 0x152   :  { %6682 = vmatpush1.bf16.msra.mxu0 %v10104_v10  ;;  %7257 = vmatprep.subr.bf16.mxu1 %v10115_v35  ;;  %v10185_v10 = vld [vmem:[#allocation2 + $0x748] ss:$16 sps:$4 sm:$0xff]   ;;  %v10188_v35 = vld [vmem:[#allocation2 + $0xb60] ss:$16 sps:$4 sm:$0xff]  }
 0x153   :  { %6683 = vmatprep.subr.bf16.mxu0 %v10112_v34  ;;  %v10193_v34 = vld [vmem:[#allocation2 + $0x76c] ss:$16 sps:$4 sm:$0xff]  }
 0x155   :  { %7258 = vmatpush1.bf16.msra.mxu1 %v10113_v12  ;;  %v10196_v12 = vld [vmem:[#allocation2 + $0xb84] ss:$16 sps:$4 sm:$0xff]  }
 0x156   :  { %6684 = vmatpush1.bf16.msra.mxu0 %v10110_v36  ;;  %7259 = vmatprep.subr.bf16.mxu1 %v10121_v39  ;;  %v10191_v36 = vld [vmem:[#allocation2 + $0x768] ss:$16 sps:$4 sm:$0xff]   ;;  %v10194_v39 = vld [vmem:[#allocation2 + $0xb80] ss:$16 sps:$4 sm:$0xff]  }
 0x157   :  { %6685 = vmatprep.subr.bf16.mxu0 %v10118_v38  ;;  %v10199_v38 = vld [vmem:[#allocation2 + $0x78c] ss:$16 sps:$4 sm:$0xff]  }
 0x159   :  { %7260 = vmatpush1.bf16.msra.mxu1 %v10119_v43  ;;  %v10202_v43 = vld [vmem:[#allocation2 + $0xba4] ss:$16 sps:$4 sm:$0xff]  }
 0x15a   :  { %6686 = vmatpush1.bf16.msra.mxu0 %v10116_v41  ;;  %7270 = vmatprep.subr.bf16.mxu1 %v10127_v44  ;;  %v10197_v41 = vld [vmem:[#allocation2 + $0x788] ss:$16 sps:$4 sm:$0xff]   ;;  %v10200_v44 = vld [vmem:[#allocation2 + $0xba0] ss:$16 sps:$4 sm:$0xff]  }
 0x15b   :  { %6696 = vmatprep.subr.bf16.mxu0 %v10124_v0  ;;  %v10205_v0 = vld [vmem:[#allocation2 + $0x7ac] ss:$16 sps:$4 sm:$0xff]  }
 0x15c   :  { %7262 = vmatmul.mubr.bf16.vlgmr.msra.gmra.mrb[4].mxu1 %v11661_v27  ;;  %v10145_v27 = vld [vmem:[#allocation2 + $0x66c] ss:$16 sps:$4 sm:$0xff]  }
 0x15d   :  { %6688 = vmatmul.mubr.bf16.vlgmr.msra.gmra.mrb[0].mxu0 %v11695_v46  ;;  %7271 = vmatpush1.bf16.msra.mxu1 %v10125_v47  ;;  %v10208_v47 = vld [vmem:[#allocation2 + $0xbc4] ss:$16 sps:$4 sm:$0xff]  }
 0x15e   :  { %6697 = vmatpush1.bf16.msra.mxu0 %v10122_v45  ;;  %7272 = vmatprep.subr.bf16.mxu1 %v10133_v48  ;;  %v10203_v45 = vld [vmem:[#allocation2 + $0x7a8] ss:$16 sps:$4 sm:$0xff]   ;;  %v1192_v48 = vcombine.high %v11674_v24, %v11674_v24 }
 0x15f   :  { %6698 = vmatprep.subr.bf16.mxu0 %v10130_v18  ;;  %6728 = vmatprep.mubr.bf16.mxu0 %v11699_v50  ;;  %v10211_v18 = vld [vmem:[#allocation2 + $0x7cc] ss:$16 sps:$4 sm:$0xff]  }
 0x160   :  { %7302 = vmatprep.mubr.bf16.mxu1 %v11665_v31  ;;  %v10149_v31 = vld [vmem:[#allocation2 + $0x688] ss:$16 sps:$4 sm:$0xff]  }
 0x161   :  { %7273 = vmatpush1.bf16.msra.mxu1 %v10131_v30  ;;  %v10209_v30 = vld [vmem:[#allocation2 + $0x7c8] ss:$16 sps:$4 sm:$0xff]  }
 0x162   :  { %6699 = vmatpush1.bf16.msra.mxu0 %v10128_v51  ;;  %7274 = vmatprep.subr.bf16.mxu1 %v10139_v53  ;;  %v10206_v51 = vld [vmem:[#allocation2 + $0xbc0] ss:$16 sps:$4 sm:$0xff]   ;;  %v10217_v53 = vld [vmem:[#allocation2 + $0x7ec] ss:$16 sps:$4 sm:$0xff]  }
 0x163   :  { %6700 = vmatprep.subr.bf16.mxu0 %v10136_v52  ;;  %v10214_v52 = vld [vmem:[#allocation2 + $0xbe4] ss:$16 sps:$4 sm:$0xff]  }
 0x165   :  { %7275 = vmatpush1.bf16.msra.mxu1 %v10137_v54  ;;  %v10212_v54 = vld [vmem:[#allocation2 + $0xbe0] ss:$16 sps:$4 sm:$0xff]  }
 0x166   :  { %6701 = vmatpush1.bf16.msra.mxu0 %v10134_v22  ;;  %7276 = vmatprep.subr.bf16.mxu1 %v10145_v27  ;;  %v11712_v22 = vrot.slane %v1192_v48, %v11631_v49  ;;  %v10220_v27 = vld [vmem:[#allocation2 + $0xc04] ss:$16 sps:$4 sm:$0xff]   ;;  %v10287_v48 = vld [vmem:[#allocation2 + $0x968] ss:$16 sps:$4 sm:$0xff]  }
 0x167   :  { %6702 = vmatprep.subr.bf16.mxu0 %v10142_v55  ;;  %v10215_v55 = vld [vmem:[#allocation2 + $0x7e8] ss:$16 sps:$4 sm:$0xff]  }
 0x168   :  { %v1208_v24 = vcombine.high %v11712_v22, %v11712_v22 }
 0x169   :  { %7277 = vmatpush1.bf16.msra.mxu1 %v10143_v57  ;;  %v11718_v57 = vcombine.high %v11695_v46, %v11695_v46 }
 0x16a   :  { %6703 = vmatpush1.bf16.msra.mxu0 %v10140_v56  ;;  %7278 = vmatprep.subr.bf16.mxu1 %v10151_v59  ;;  %v10223_v56 = vld [vmem:[#allocation2 + $0x80c] ss:$16 sps:$4 sm:$0xff]   ;;  %v10221_v59 = vld [vmem:[#allocation2 + $0x808] ss:$16 sps:$4 sm:$0xff]  }
 0x16b   :  { %6704 = vmatprep.subr.bf16.mxu0 %v10148_v58  ;;  %v10218_v58 = vld [vmem:[#allocation2 + $0xc00] ss:$16 sps:$4 sm:$0xff]  }
 0x16d   :  { %7279 = vmatpush1.bf16.msra.mxu1 %v10149_v31  ;;  %v10229_v31 = vld [vmem:[#allocation2 + $0x82c] ss:$16 sps:$4 sm:$0xff]  }
 0x16e   :  { %6705 = vmatpush1.bf16.msra.mxu0 %v10146_v60  ;;  %7280 = vmatprep.subr.bf16.mxu1 %v10157_v62  ;;  %v10226_v60 = vld [vmem:[#allocation2 + $0xc24] ss:$16 sps:$4 sm:$0xff]   ;;  %v10224_v62 = vld [vmem:[#allocation2 + $0xc20] ss:$16 sps:$4 sm:$0xff]  }
 0x16f   :  { %6706 = vmatprep.subr.bf16.mxu0 %v10154_v61  ;;  %v11705_v4 = vpop.f32.mrb[0].mxu1  ;;  %v11721_v61 = vrot.slane %v1208_v24, %v11631_v49  ;;  %v10304_v24 = vld [vmem:[#allocation2 + $0xdc4] ss:$16 sps:$4 sm:$0xff]  }
 0x170   :  { %v11707_v5 = vpop.f32.mrb[1].mxu1 }
 0x171   :  { %v6529_v6 = vpop.f32.mrb[2].mxu1  ;;  %7281 = vmatpush1.bf16.msra.mxu1 %v10155_v1  ;;  %v10232_v1 = vld [vmem:[#allocation2 + $0xc44] ss:$16 sps:$4 sm:$0xff]  }
 0x172   :  { %6707 = vmatpush1.bf16.msra.mxu0 %v10152_v63  ;;  %v6530_v9 = vpop.f32.mrb[3].mxu1  ;;  %7282 = vmatprep.subr.bf16.mxu1 %v10163_v3  ;;  %v10227_v63 = vld [vmem:[#allocation2 + $0x828] ss:$16 sps:$4 sm:$0xff]   ;;  %v10230_v3 = vld [vmem:[#allocation2 + $0xc40] ss:$16 sps:$4 sm:$0xff]  }
 0x173   :  { %6708 = vmatprep.subr.bf16.mxu0 %v10160_v2  ;;  %v10235_v2 = vld [vmem:[#allocation2 + $0x84c] ss:$16 sps:$4 sm:$0xff]   ;;  %v10233_v6 = vld [vmem:[#allocation2 + $0x848] ss:$16 sps:$4 sm:$0xff]  }
 0x174   :  { %v10239_v9 = vld [vmem:[#allocation2 + $0x868] ss:$16 sps:$4 sm:$0xff]  }
 0x175   :  { %7283 = vmatpush1.bf16.msra.mxu1 %v10161_v8  ;;  %v10236_v8 = vld [vmem:[#allocation2 + $0xc60] ss:$16 sps:$4 sm:$0xff]  }
 0x176   :  { %6709 = vmatpush1.bf16.msra.mxu0 %v10158_v7  ;;  %7284 = vmatprep.subr.bf16.mxu1 %v10169_v13  ;;  %v10238_v7 = vld [vmem:[#allocation2 + $0xc64] ss:$16 sps:$4 sm:$0xff]   ;;  %v10247_v13 = vld [vmem:[#allocation2 + $0x88c] ss:$16 sps:$4 sm:$0xff]  }
 0x177   :  { %6710 = vmatprep.subr.bf16.mxu0 %v10166_v11  ;;  %v10244_v11 = vld [vmem:[#allocation2 + $0xc84] ss:$16 sps:$4 sm:$0xff]  }
 0x179   :  { %7285 = vmatpush1.bf16.msra.mxu1 %v10167_v15  ;;  %v10250_v15 = vld [vmem:[#allocation2 + $0xca4] ss:$16 sps:$4 sm:$0xff]  }
 0x17a   :  { %6711 = vmatpush1.bf16.msra.mxu0 %v10164_v14  ;;  %7286 = vmatprep.subr.bf16.mxu1 %v10175_v17  ;;  %v10242_v14 = vld [vmem:[#allocation2 + $0xc80] ss:$16 sps:$4 sm:$0xff]  }
 0x17b   :  { %6712 = vmatprep.subr.bf16.mxu0 %v10172_v16  ;;  %v10253_v16 = vld [vmem:[#allocation2 + $0x8ac] ss:$16 sps:$4 sm:$0xff]   ;;  %v10248_v17 = vld [vmem:[#allocation2 + $0xca0] ss:$16 sps:$4 sm:$0xff]  }
 0x17d   :  { %7287 = vmatpush1.bf16.msra.mxu1 %v10173_v20  ;;  %v10256_v20 = vld [vmem:[#allocation2 + $0xcc4] ss:$16 sps:$4 sm:$0xff]  }
 0x17e   :  { %6713 = vmatpush1.bf16.msra.mxu0 %v10170_v19  ;;  %7288 = vmatprep.subr.bf16.mxu1 %v10181_v23  ;;  %v10251_v19 = vld [vmem:[#allocation2 + $0x8a8] ss:$16 sps:$4 sm:$0xff]   ;;  %v10254_v23 = vld [vmem:[#allocation2 + $0xcc0] ss:$16 sps:$4 sm:$0xff]  }
 0x17f   :  { %6714 = vmatprep.subr.bf16.mxu0 %v10178_v21  ;;  %v10259_v21 = vld [vmem:[#allocation2 + $0x8cc] ss:$16 sps:$4 sm:$0xff]  }
 0x181   :  { %7289 = vmatpush1.bf16.msra.mxu1 %v10179_v26  ;;  %v10262_v26 = vld [vmem:[#allocation2 + $0xce4] ss:$16 sps:$4 sm:$0xff]  }
 0x182   :  { %6715 = vmatpush1.bf16.msra.mxu0 %v10176_v25  ;;  %7290 = vmatprep.subr.bf16.mxu1 %v10187_v29  ;;  %v10257_v25 = vld [vmem:[#allocation2 + $0x8c8] ss:$16 sps:$4 sm:$0xff]   ;;  %v10260_v29 = vld [vmem:[#allocation2 + $0xce0] ss:$16 sps:$4 sm:$0xff]  }
 0x183   :  { %6716 = vmatprep.subr.bf16.mxu0 %v10184_v28  ;;  %v10265_v28 = vld [vmem:[#allocation2 + $0x8ec] ss:$16 sps:$4 sm:$0xff]  }
 0x185   :  { %7291 = vmatpush1.bf16.msra.mxu1 %v10185_v10  ;;  %v10268_v10 = vld [vmem:[#allocation2 + $0xd04] ss:$16 sps:$4 sm:$0xff]  }
 0x186   :  { %6717 = vmatpush1.bf16.msra.mxu0 %v10182_v32  ;;  %7292 = vmatprep.subr.bf16.mxu1 %v10193_v34  ;;  %v10263_v32 = vld [vmem:[#allocation2 + $0x8e8] ss:$16 sps:$4 sm:$0xff]   ;;  %v10266_v34 = vld [vmem:[#allocation2 + $0xd00] ss:$16 sps:$4 sm:$0xff]  }
 0x187   :  { %6718 = vmatprep.subr.bf16.mxu0 %v10190_v33  ;;  %v10271_v33 = vld [vmem:[#allocation2 + $0x90c] ss:$16 sps:$4 sm:$0xff]  }
 0x189   :  { %7293 = vmatpush1.bf16.msra.mxu1 %v10191_v36  ;;  %v10274_v36 = vld [vmem:[#allocation2 + $0xd24] ss:$16 sps:$4 sm:$0xff]  }
 0x18a   :  { %6719 = vmatpush1.bf16.msra.mxu0 %v10188_v35  ;;  %7294 = vmatprep.subr.bf16.mxu1 %v10199_v38  ;;  %v10269_v35 = vld [vmem:[#allocation2 + $0x908] ss:$16 sps:$4 sm:$0xff]   ;;  %v10272_v38 = vld [vmem:[#allocation2 + $0xd20] ss:$16 sps:$4 sm:$0xff]  }
 0x18b   :  { %6720 = vmatprep.subr.bf16.mxu0 %v10196_v12  ;;  %v10277_v12 = vld [vmem:[#allocation2 + $0x92c] ss:$16 sps:$4 sm:$0xff]  }
 0x18d   :  { %7295 = vmatpush1.bf16.msra.mxu1 %v10197_v41  ;;  %v10280_v41 = vld [vmem:[#allocation2 + $0xd44] ss:$16 sps:$4 sm:$0xff]  }
 0x18e   :  { %6721 = vmatpush1.bf16.msra.mxu0 %v10194_v39  ;;  %7296 = vmatprep.subr.bf16.mxu1 %v10205_v0  ;;  %v10275_v39 = vld [vmem:[#allocation2 + $0x928] ss:$16 sps:$4 sm:$0xff]   ;;  %v10278_v0 = vld [vmem:[#allocation2 + $0xd40] ss:$16 sps:$4 sm:$0xff]  }
 0x18f   :  { %6722 = vmatprep.subr.bf16.mxu0 %v10202_v43  ;;  %v10283_v43 = vld [vmem:[#allocation2 + $0x94c] ss:$16 sps:$4 sm:$0xff]  }
 0x191   :  { %7297 = vmatpush1.bf16.msra.mxu1 %v10203_v45  ;;  %v10286_v45 = vld [vmem:[#allocation2 + $0xd64] ss:$16 sps:$4 sm:$0xff]  }
 0x192   :  { %6723 = vmatpush1.bf16.msra.mxu0 %v10200_v44  ;;  %7298 = vmatprep.subr.bf16.mxu1 %v10211_v18  ;;  %v10281_v44 = vld [vmem:[#allocation2 + $0x948] ss:$16 sps:$4 sm:$0xff]   ;;  %v10284_v18 = vld [vmem:[#allocation2 + $0xd60] ss:$16 sps:$4 sm:$0xff]  }
 0x193   :  { %6724 = vmatprep.subr.bf16.mxu0 %v10208_v47  ;;  %v10289_v47 = vld [vmem:[#allocation2 + $0x96c] ss:$16 sps:$4 sm:$0xff]  }
 0x195   :  { %7299 = vmatpush1.bf16.msra.mxu1 %v10209_v30  ;;  %v10295_v30 = vld [vmem:[#allocation2 + $0x98c] ss:$16 sps:$4 sm:$0xff]  }
 0x196   :  { %6725 = vmatpush1.bf16.msra.mxu0 %v10206_v51  ;;  %7300 = vmatprep.subr.bf16.mxu1 %v10217_v53  ;;  %v10292_v51 = vld [vmem:[#allocation2 + $0xd84] ss:$16 sps:$4 sm:$0xff]   ;;  %v10293_v53 = vld [vmem:[#allocation2 + $0x988] ss:$16 sps:$4 sm:$0xff]  }
 0x197   :  { %6726 = vmatprep.subr.bf16.mxu0 %v10214_v52  ;;  %v10290_v52 = vld [vmem:[#allocation2 + $0xd80] ss:$16 sps:$4 sm:$0xff]  }
 0x199   :  { %7301 = vmatpush1.bf16.msra.mxu1 %v10215_v55  ;;  %v10301_v55 = vld [vmem:[#allocation2 + $0x9ac] ss:$16 sps:$4 sm:$0xff]  }
 0x19a   :  { %6727 = vmatpush1.bf16.msra.mxu0 %v10212_v54  ;;  %7311 = vmatprep.subr.bf16.mxu1 %v10223_v56  ;;  %v10298_v54 = vld [vmem:[#allocation2 + $0xda4] ss:$16 sps:$4 sm:$0xff]   ;;  %v10299_v56 = vld [vmem:[#allocation2 + $0x9a8] ss:$16 sps:$4 sm:$0xff]  }
 0x19b   :  { %6737 = vmatprep.subr.bf16.mxu0 %v10220_v27  ;;  %v10296_v27 = vld [vmem:[#allocation2 + $0xda0] ss:$16 sps:$4 sm:$0xff]  }
 0x19c   :  { %7303 = vmatmul.mubr.bf16.vlgmr.msra.gmra.mrb[4].mxu1 %v11684_v37  ;;  %v10241_v37 = vld [vmem:[#allocation2 + $0x86c] ss:$16 sps:$4 sm:$0xff]  }
 0x19d   :  { %6729 = vmatmul.mubr.bf16.vlgmr.msra.gmra.mrb[0].mxu0 %v11718_v57  ;;  %7312 = vmatpush1.bf16.msra.mxu1 %v10221_v59  ;;  %v10302_v59 = vld [vmem:[#allocation2 + $0xdc0] ss:$16 sps:$4 sm:$0xff]  }
 0x19e   :  { %6738 = vmatpush1.bf16.msra.mxu0 %v10218_v58  ;;  %7313 = vmatprep.subr.bf16.mxu1 %v10229_v31  ;;  %v10307_v58 = vld [vmem:[#allocation2 + $0x9cc] ss:$16 sps:$4 sm:$0xff]   ;;  %v10310_v31 = vld [vmem:[#allocation2 + $0xde4] ss:$16 sps:$4 sm:$0xff]  }
 0x19f   :  { %6739 = vmatprep.subr.bf16.mxu0 %v10226_v60  ;;  %6769 = vmatprep.mubr.bf16.mxu0 %v11721_v61  ;;  %v10305_v60 = vld [vmem:[#allocation2 + $0x9c8] ss:$16 sps:$4 sm:$0xff]  }
 0x1a0   :  { %7343 = vmatprep.mubr.bf16.mxu1 %v11687_v40  ;;  %v10245_v40 = vld [vmem:[#allocation2 + $0x888] ss:$16 sps:$4 sm:$0xff]  }
 0x1a1   :  { %7314 = vmatpush1.bf16.msra.mxu1 %v10227_v63  ;;  %v10308_v63 = vld [vmem:[#allocation2 + $0xde0] ss:$16 sps:$4 sm:$0xff]  }
 0x1a2   :  { %6740 = vmatpush1.bf16.msra.mxu0 %v10224_v62  ;;  %7315 = vmatprep.subr.bf16.mxu1 %v10235_v2  ;;  %v10313_v62 = vld [vmem:[#allocation2 + $0x9ec] ss:$16 sps:$4 sm:$0xff]   ;;  %v10317_v2 = vld [vmem:[#allocation2 + $0xe04] ss:$16 sps:$4 sm:$0xff]  }
 0x1a3   :  { %6741 = vmatprep.subr.bf16.mxu0 %v10232_v1  ;;  %v10311_v1 = vld [vmem:[#allocation2 + $0x9e8] ss:$16 sps:$4 sm:$0xff]  }
 0x1a5   :  { %7316 = vmatpush1.bf16.msra.mxu1 %v10233_v6  ;;  %v11729_v6 = vrot.slane %v11712_v22, %v11631_v49  ;;  %v10321_v22 = vld [vmem:[#allocation2 + $0xe20] ss:$16 sps:$4 sm:$0xff]  }
 0x1a6   :  { %6742 = vmatpush1.bf16.msra.mxu0 %v10230_v3  ;;  %7317 = vmatprep.subr.bf16.mxu1 %v10241_v37  ;;  %v10320_v3 = vld [vmem:[#allocation2 + $0xa0c] ss:$16 sps:$4 sm:$0xff]   ;;  %v10318_v37 = vld [vmem:[#allocation2 + $0xa08] ss:$16 sps:$4 sm:$0xff]  }
 0x1a7   :  { %6743 = vmatprep.subr.bf16.mxu0 %v10238_v7  ;;  %v10315_v7 = vld [vmem:[#allocation2 + $0xe00] ss:$16 sps:$4 sm:$0xff]  }
 0x1a9   :  { %7318 = vmatpush1.bf16.msra.mxu1 %v10239_v9  ;;  %v10326_v9 = vld [vmem:[#allocation2 + $0xa2c] ss:$16 sps:$4 sm:$0xff]  }
 0x1aa   :  { %6744 = vmatpush1.bf16.msra.mxu0 %v10236_v8  ;;  %7319 = vmatprep.subr.bf16.mxu1 %v10247_v13  ;;  %v10323_v8 = vld [vmem:[#allocation2 + $0xe24] ss:$16 sps:$4 sm:$0xff]   ;;  %v10324_v13 = vld [vmem:[#allocation2 + $0xa28] ss:$16 sps:$4 sm:$0xff]  }
 0x1ab   :  { %6745 = vmatprep.subr.bf16.mxu0 %v10244_v11  ;;  %v11733_v11 = vcombine.high %v11721_v61, %v11721_v61 }
 0x1ad   :  { %7320 = vmatpush1.bf16.msra.mxu1 %v10245_v40  ;;  %v10332_v40 = vld [vmem:[#allocation2 + $0xa4c] ss:$16 sps:$4 sm:$0xff]  }
 0x1ae   :  { %6746 = vmatpush1.bf16.msra.mxu0 %v10242_v14  ;;  %7321 = vmatprep.subr.bf16.mxu1 %v10253_v16  ;;  %v10329_v14 = vld [vmem:[#allocation2 + $0xe44] ss:$16 sps:$4 sm:$0xff]   ;;  %v10330_v16 = vld [vmem:[#allocation2 + $0xa48] ss:$16 sps:$4 sm:$0xff]  }
 0x1af   :  { %6747 = vmatprep.subr.bf16.mxu0 %v10250_v15  ;;  %v10327_v15 = vld [vmem:[#allocation2 + $0xe40] ss:$16 sps:$4 sm:$0xff]  }
 0x1b1   :  { %7322 = vmatpush1.bf16.msra.mxu1 %v10251_v19  ;;  %v10333_v19 = vld [vmem:[#allocation2 + $0xe60] ss:$16 sps:$4 sm:$0xff]  }
 0x1b2   :  { %6748 = vmatpush1.bf16.msra.mxu0 %v10248_v17  ;;  %7323 = vmatprep.subr.bf16.mxu1 %v10259_v21  ;;  %v10335_v17 = vld [vmem:[#allocation2 + $0xe64] ss:$16 sps:$4 sm:$0xff]  }
 0x1b3   :  { %6749 = vmatprep.subr.bf16.mxu0 %v10256_v20  ;;  %v10336_v20 = vld [vmem:[#allocation2 + $0xa68] ss:$16 sps:$4 sm:$0xff]   ;;  %v10341_v21 = vld [vmem:[#allocation2 + $0xe84] ss:$16 sps:$4 sm:$0xff]  }
 0x1b5   :  { %7324 = vmatpush1.bf16.msra.mxu1 %v10257_v25  ;;  %v10339_v25 = vld [vmem:[#allocation2 + $0xe80] ss:$16 sps:$4 sm:$0xff]  }
 0x1b6   :  { %6750 = vmatpush1.bf16.msra.mxu0 %v10254_v23  ;;  %7325 = vmatprep.subr.bf16.mxu1 %v10265_v28  ;;  %v10344_v23 = vld [vmem:[#allocation2 + $0xa8c] ss:$16 sps:$4 sm:$0xff]  }
 0x1b7   :  { %6751 = vmatprep.subr.bf16.mxu0 %v10262_v26  ;;  %v10347_v26 = vld [vmem:[#allocation2 + $0xea4] ss:$16 sps:$4 sm:$0xff]   ;;  %v10350_v28 = vld [vmem:[#allocation2 + $0xaac] ss:$16 sps:$4 sm:$0xff]  }
 0x1b9   :  { %7326 = vmatpush1.bf16.msra.mxu1 %v10263_v32  ;;  %v10348_v32 = vld [vmem:[#allocation2 + $0xaa8] ss:$16 sps:$4 sm:$0xff]  }
 0x1ba   :  { %6752 = vmatpush1.bf16.msra.mxu0 %v10260_v29  ;;  %7327 = vmatprep.subr.bf16.mxu1 %v10271_v33  ;;  %v10345_v29 = vld [vmem:[#allocation2 + $0xea0] ss:$16 sps:$4 sm:$0xff]   ;;  %v10356_v33 = vld [vmem:[#allocation2 + $0xacc] ss:$16 sps:$4 sm:$0xff]  }
 0x1bb   :  { %6753 = vmatprep.subr.bf16.mxu0 %v10268_v10  ;;  %v10353_v10 = vld [vmem:[#allocation2 + $0xec4] ss:$16 sps:$4 sm:$0xff]  }
 0x1bd   :  { %7328 = vmatpush1.bf16.msra.mxu1 %v10269_v35  ;;  %v10354_v35 = vld [vmem:[#allocation2 + $0xac8] ss:$16 sps:$4 sm:$0xff]  }
 0x1be   :  { %6754 = vmatpush1.bf16.msra.mxu0 %v10266_v34  ;;  %7329 = vmatprep.subr.bf16.mxu1 %v10277_v12  ;;  %v10351_v34 = vld [vmem:[#allocation2 + $0xec0] ss:$16 sps:$4 sm:$0xff]   ;;  %v10362_v12 = vld [vmem:[#allocation2 + $0xaec] ss:$16 sps:$4 sm:$0xff]  }
 0x1bf   :  { %6755 = vmatprep.subr.bf16.mxu0 %v10274_v36  ;;  %v10359_v36 = vld [vmem:[#allocation2 + $0xee4] ss:$16 sps:$4 sm:$0xff]  }
 0x1c1   :  { %7330 = vmatpush1.bf16.msra.mxu1 %v10275_v39  ;;  %v10360_v39 = vld [vmem:[#allocation2 + $0xae8] ss:$16 sps:$4 sm:$0xff]  }
 0x1c2   :  { %6756 = vmatpush1.bf16.msra.mxu0 %v10272_v38  ;;  %7331 = vmatprep.subr.bf16.mxu1 %v10283_v43  ;;  %v10357_v38 = vld [vmem:[#allocation2 + $0xee0] ss:$16 sps:$4 sm:$0xff]   ;;  %v10368_v43 = vld [vmem:[#allocation2 + $0xb0c] ss:$16 sps:$4 sm:$0xff]  }
 0x1c3   :  { %6757 = vmatprep.subr.bf16.mxu0 %v10280_v41  ;;  %v10365_v41 = vld [vmem:[#allocation2 + $0xf04] ss:$16 sps:$4 sm:$0xff]  }
 0x1c5   :  { %7332 = vmatpush1.bf16.msra.mxu1 %v10281_v44  ;;  %v10366_v44 = vld [vmem:[#allocation2 + $0xb08] ss:$16 sps:$4 sm:$0xff]  }
 0x1c6   :  { %6758 = vmatpush1.bf16.msra.mxu0 %v10278_v0  ;;  %7333 = vmatprep.subr.bf16.mxu1 %v10289_v47  ;;  %v10363_v0 = vld [vmem:[#allocation2 + $0xf00] ss:$16 sps:$4 sm:$0xff]   ;;  %v10374_v47 = vld [vmem:[#allocation2 + $0xb2c] ss:$16 sps:$4 sm:$0xff]  }
 0x1c7   :  { %6759 = vmatprep.subr.bf16.mxu0 %v10286_v45  ;;  %v10371_v45 = vld [vmem:[#allocation2 + $0xf24] ss:$16 sps:$4 sm:$0xff]  }
 0x1c9   :  { %7334 = vmatpush1.bf16.msra.mxu1 %v10287_v48  ;;  %v10372_v48 = vld [vmem:[#allocation2 + $0xb28] ss:$16 sps:$4 sm:$0xff]  }
 0x1ca   :  { %6760 = vmatpush1.bf16.msra.mxu0 %v10284_v18  ;;  %7335 = vmatprep.subr.bf16.mxu1 %v10295_v30  ;;  %v10369_v18 = vld [vmem:[#allocation2 + $0xf20] ss:$16 sps:$4 sm:$0xff]   ;;  %v10380_v30 = vld [vmem:[#allocation2 + $0xb4c] ss:$16 sps:$4 sm:$0xff]  }
 0x1cb   :  { %6761 = vmatprep.subr.bf16.mxu0 %v10292_v51  ;;  %v10377_v51 = vld [vmem:[#allocation2 + $0xf44] ss:$16 sps:$4 sm:$0xff]  }
 0x1cd   :  { %7336 = vmatpush1.bf16.msra.mxu1 %v10293_v53  ;;  %v10378_v53 = vld [vmem:[#allocation2 + $0xb48] ss:$16 sps:$4 sm:$0xff]  }
 0x1ce   :  { %6762 = vmatpush1.bf16.msra.mxu0 %v10290_v52  ;;  %7337 = vmatprep.subr.bf16.mxu1 %v10301_v55  ;;  %v10375_v52 = vld [vmem:[#allocation2 + $0xf40] ss:$16 sps:$4 sm:$0xff]   ;;  %v10386_v55 = vld [vmem:[#allocation2 + $0xb6c] ss:$16 sps:$4 sm:$0xff]  }
 0x1cf   :  { %6763 = vmatprep.subr.bf16.mxu0 %v10298_v54  ;;  %v10383_v54 = vld [vmem:[#allocation2 + $0xf64] ss:$16 sps:$4 sm:$0xff]  }
 0x1d1   :  { %7338 = vmatpush1.bf16.msra.mxu1 %v10299_v56  ;;  %v10384_v56 = vld [vmem:[#allocation2 + $0xb68] ss:$16 sps:$4 sm:$0xff]  }
 0x1d2   :  { %6764 = vmatpush1.bf16.msra.mxu0 %v10296_v27  ;;  %7339 = vmatprep.subr.bf16.mxu1 %v10307_v58  ;;  %v10381_v27 = vld [vmem:[#allocation2 + $0xf60] ss:$16 sps:$4 sm:$0xff]   ;;  %v10392_v58 = vld [vmem:[#allocation2 + $0xb8c] ss:$16 sps:$4 sm:$0xff]  }
 0x1d3   :  { %6765 = vmatprep.subr.bf16.mxu0 %v10304_v24  ;;  %v10389_v24 = vld [vmem:[#allocation2 + $0xf84] ss:$16 sps:$4 sm:$0xff]  }
 0x1d5   :  { %7340 = vmatpush1.bf16.msra.mxu1 %v10305_v60  ;;  %v10390_v60 = vld [vmem:[#allocation2 + $0xb88] ss:$16 sps:$4 sm:$0xff]  }
 0x1d6   :  { %6766 = vmatpush1.bf16.msra.mxu0 %v10302_v59  ;;  %7341 = vmatprep.subr.bf16.mxu1 %v10313_v62  ;;  %v10387_v59 = vld [vmem:[#allocation2 + $0xf80] ss:$16 sps:$4 sm:$0xff]   ;;  %v10398_v62 = vld [vmem:[#allocation2 + $0xbac] ss:$16 sps:$4 sm:$0xff]  }
 0x1d7   :  { %6767 = vmatprep.subr.bf16.mxu0 %v10310_v31  ;;  %v10395_v31 = vld [vmem:[#allocation2 + $0xfa4] ss:$16 sps:$4 sm:$0xff]  }
 0x1d9   :  { %7342 = vmatpush1.bf16.msra.mxu1 %v10311_v1  ;;  %v10396_v1 = vld [vmem:[#allocation2 + $0xba8] ss:$16 sps:$4 sm:$0xff]  }
 0x1da   :  { %6768 = vmatpush1.bf16.msra.mxu0 %v10308_v63  ;;  %7352 = vmatprep.subr.bf16.mxu1 %v10320_v3  ;;  %v10393_v63 = vld [vmem:[#allocation2 + $0xfa0] ss:$16 sps:$4 sm:$0xff]   ;;  %v10404_v3 = vld [vmem:[#allocation2 + $0xbcc] ss:$16 sps:$4 sm:$0xff]  }
 0x1db   :  { %6778 = vmatprep.subr.bf16.mxu0 %v10317_v2  ;;  %v10401_v2 = vld [vmem:[#allocation2 + $0xfc4] ss:$16 sps:$4 sm:$0xff]  }
 0x1dc   :  { %7344 = vmatmul.mubr.bf16.vlgmr.msra.gmra.mrb[4].mxu1 %v11695_v46  ;;  %v10338_v46 = vld [vmem:[#allocation2 + $0xa6c] ss:$16 sps:$4 sm:$0xff]  }
 0x1dd   :  { %6770 = vmatmul.mubr.bf16.vlgmr.msra.gmra.mrb[0].mxu0 %v11729_v6  ;;  %7353 = vmatpush1.bf16.msra.mxu1 %v10318_v37  ;;  %v10399_v37 = vld [vmem:[#allocation2 + $0xfc0] ss:$16 sps:$4 sm:$0xff]  }
 0x1de   :  { %6779 = vmatpush1.bf16.msra.mxu0 %v10315_v7  ;;  %7354 = vmatprep.subr.bf16.mxu1 %v10326_v9  ;;  %v11742_v7 = vld.sshfl [vmem:[%s12002_s0 + $0x10] sm:$0xff pattern:$0x75316420] }
 0x1df   :  { %6780 = vmatprep.subr.bf16.mxu0 %v10323_v8  ;;  %6810 = vmatprep.mubr.bf16.mxu0 %v11733_v11  ;;  %v10402_v8 = vld [vmem:[#allocation2 + $0xbc8] ss:$16 sps:$4 sm:$0xff]   ;;  %v10407_v9 = vld [vmem:[#allocation2 + $0xfe4] ss:$16 sps:$4 sm:$0xff]  }
 0x1e0   :  { %7384 = vmatprep.mubr.bf16.mxu1 %v11699_v50  ;;  %v10342_v50 = vld [vmem:[#allocation2 + $0xa88] ss:$16 sps:$4 sm:$0xff]  }
 0x1e1   :  { %7355 = vmatpush1.bf16.msra.mxu1 %v10324_v13  ;;  %v10405_v13 = vld [vmem:[#allocation2 + $0xfe0] ss:$16 sps:$4 sm:$0xff]  }
 0x1e2   :  { %6781 = vmatpush1.bf16.msra.mxu0 %v10321_v22  ;;  %7356 = vmatprep.subr.bf16.mxu1 %v10332_v40  ;;  %v10410_v22 = vld [vmem:[#allocation2 + $0xbec] ss:$16 sps:$4 sm:$0xff]   ;;  %v10413_v40 = vld [vmem:[#allocation2 + $0x1004] ss:$16 sps:$4 sm:$0xff]  }
 0x1e3   :  { %6782 = vmatprep.subr.bf16.mxu0 %v10329_v14  ;;  %v10408_v14 = vld [vmem:[#allocation2 + $0xbe8] ss:$16 sps:$4 sm:$0xff]  }
 0x1e5   :  { %7357 = vmatpush1.bf16.msra.mxu1 %v10330_v16  ;;  %v1256_v16 = vcombine.high %v11742_v7, %v11742_v7 }
 0x1e6   :  { %6783 = vmatpush1.bf16.msra.mxu0 %v10327_v15  ;;  %7358 = vmatprep.subr.bf16.mxu1 %v10338_v46  ;;  %v10416_v15 = vld [vmem:[#allocation2 + $0xc0c] ss:$16 sps:$4 sm:$0xff]   ;;  %v10411_v46 = vld [vmem:[#allocation2 + $0x1000] ss:$16 sps:$4 sm:$0xff]  }
 0x1e7   :  { %6784 = vmatprep.subr.bf16.mxu0 %v10335_v17  ;;  %v11748_v17 = vcombine.high %v11729_v6, %v11729_v6 }
 0x1e9   :  { %7359 = vmatpush1.bf16.msra.mxu1 %v10336_v20  ;;  %v10419_v20 = vld [vmem:[#allocation2 + $0x1024] ss:$16 sps:$4 sm:$0xff]  }
 0x1ea   :  { %6785 = vmatpush1.bf16.msra.mxu0 %v10333_v19  ;;  %7360 = vmatprep.subr.bf16.mxu1 %v10344_v23  ;;  %v10414_v19 = vld [vmem:[#allocation2 + $0xc08] ss:$16 sps:$4 sm:$0xff]   ;;  %v11751_v23 = vrot.slane %v1256_v16, %v11631_v49  ;;  %v10497_v16 = vld [vmem:[#allocation2 + $0x11c4] ss:$16 sps:$4 sm:$0xff]  }
 0x1eb   :  { %6786 = vmatprep.subr.bf16.mxu0 %v10341_v21  ;;  %v10422_v21 = vld [vmem:[#allocation2 + $0xc2c] ss:$16 sps:$4 sm:$0xff]  }
 0x1ed   :  { %7361 = vmatpush1.bf16.msra.mxu1 %v10342_v50  ;;  %v10420_v50 = vld [vmem:[#allocation2 + $0xc28] ss:$16 sps:$4 sm:$0xff]  }
 0x1ee   :  { %6787 = vmatpush1.bf16.msra.mxu0 %v10339_v25  ;;  %7362 = vmatprep.subr.bf16.mxu1 %v10350_v28  ;;  %v10417_v25 = vld [vmem:[#allocation2 + $0x1020] ss:$16 sps:$4 sm:$0xff]   ;;  %v10428_v28 = vld [vmem:[#allocation2 + $0xc4c] ss:$16 sps:$4 sm:$0xff]  }
 0x1ef   :  { %6788 = vmatprep.subr.bf16.mxu0 %v10347_v26  ;;  %v10425_v26 = vld [vmem:[#allocation2 + $0x1044] ss:$16 sps:$4 sm:$0xff]  }
 0x1f1   :  { %7363 = vmatpush1.bf16.msra.mxu1 %v10348_v32  ;;  %v10426_v32 = vld [vmem:[#allocation2 + $0xc48] ss:$16 sps:$4 sm:$0xff]  }
 0x1f2   :  { %6789 = vmatpush1.bf16.msra.mxu0 %v10345_v29  ;;  %7364 = vmatprep.subr.bf16.mxu1 %v10356_v33  ;;  %v10423_v29 = vld [vmem:[#allocation2 + $0x1040] ss:$16 sps:$4 sm:$0xff]  }
 0x1f3   :  { %6790 = vmatprep.subr.bf16.mxu0 %v10353_v10  ;;  %v10431_v10 = vld [vmem:[#allocation2 + $0x1064] ss:$16 sps:$4 sm:$0xff]   ;;  %v10429_v33 = vld [vmem:[#allocation2 + $0x1060] ss:$16 sps:$4 sm:$0xff]  }
 0x1f5   :  { %7365 = vmatpush1.bf16.msra.mxu1 %v10354_v35  ;;  %v10437_v35 = vld [vmem:[#allocation2 + $0x1084] ss:$16 sps:$4 sm:$0xff]  }
 0x1f6   :  { %6791 = vmatpush1.bf16.msra.mxu0 %v10351_v34  ;;  %7366 = vmatprep.subr.bf16.mxu1 %v10362_v12  ;;  %v10432_v34 = vld [vmem:[#allocation2 + $0xc68] ss:$16 sps:$4 sm:$0xff]   ;;  %v10435_v12 = vld [vmem:[#allocation2 + $0x1080] ss:$16 sps:$4 sm:$0xff]  }
 0x1f7   :  { %6792 = vmatprep.subr.bf16.mxu0 %v10359_v36  ;;  %v10440_v36 = vld [vmem:[#allocation2 + $0xc8c] ss:$16 sps:$4 sm:$0xff]  }
 0x1f9   :  { %7367 = vmatpush1.bf16.msra.mxu1 %v10360_v39  ;;  %v10446_v39 = vld [vmem:[#allocation2 + $0xcac] ss:$16 sps:$4 sm:$0xff]  }
 0x1fa   :  { %6793 = vmatpush1.bf16.msra.mxu0 %v10357_v38  ;;  %7368 = vmatprep.subr.bf16.mxu1 %v10368_v43  ;;  %v10443_v38 = vld [vmem:[#allocation2 + $0x10a4] ss:$16 sps:$4 sm:$0xff]   ;;  %v10444_v43 = vld [vmem:[#allocation2 + $0xca8] ss:$16 sps:$4 sm:$0xff]  }
 0x1fb   :  { %6794 = vmatprep.subr.bf16.mxu0 %v10365_v41  ;;  %v10441_v41 = vld [vmem:[#allocation2 + $0x10a0] ss:$16 sps:$4 sm:$0xff]  }
 0x1fd   :  { %7369 = vmatpush1.bf16.msra.mxu1 %v10366_v44  ;;  %v10452_v44 = vld [vmem:[#allocation2 + $0xccc] ss:$16 sps:$4 sm:$0xff]  }
 0x1fe   :  { %6795 = vmatpush1.bf16.msra.mxu0 %v10363_v0  ;;  %7370 = vmatprep.subr.bf16.mxu1 %v10374_v47  ;;  %v10449_v0 = vld [vmem:[#allocation2 + $0x10c4] ss:$16 sps:$4 sm:$0xff]   ;;  %v10450_v47 = vld [vmem:[#allocation2 + $0xcc8] ss:$16 sps:$4 sm:$0xff]  }
 0x1ff   :  { %6796 = vmatprep.subr.bf16.mxu0 %v10371_v45  ;;  %v10447_v45 = vld [vmem:[#allocation2 + $0x10c0] ss:$16 sps:$4 sm:$0xff]  }
 0x201   :  { %7371 = vmatpush1.bf16.msra.mxu1 %v10372_v48  ;;  %v10458_v48 = vld [vmem:[#allocation2 + $0xcec] ss:$16 sps:$4 sm:$0xff]  }
 0x202   :  { %6797 = vmatpush1.bf16.msra.mxu0 %v10369_v18  ;;  %7372 = vmatprep.subr.bf16.mxu1 %v10380_v30  ;;  %v10455_v18 = vld [vmem:[#allocation2 + $0x10e4] ss:$16 sps:$4 sm:$0xff]   ;;  %v10456_v30 = vld [vmem:[#allocation2 + $0xce8] ss:$16 sps:$4 sm:$0xff]  }
 0x203   :  { %6798 = vmatprep.subr.bf16.mxu0 %v10377_v51  ;;  %v10453_v51 = vld [vmem:[#allocation2 + $0x10e0] ss:$16 sps:$4 sm:$0xff]  }
 0x205   :  { %7373 = vmatpush1.bf16.msra.mxu1 %v10378_v53  ;;  %v10464_v53 = vld [vmem:[#allocation2 + $0xd0c] ss:$16 sps:$4 sm:$0xff]  }
 0x206   :  { %6799 = vmatpush1.bf16.msra.mxu0 %v10375_v52  ;;  %7374 = vmatprep.subr.bf16.mxu1 %v10386_v55  ;;  %v10461_v52 = vld [vmem:[#allocation2 + $0x1104] ss:$16 sps:$4 sm:$0xff]   ;;  %v10462_v55 = vld [vmem:[#allocation2 + $0xd08] ss:$16 sps:$4 sm:$0xff]  }
 0x207   :  { %6800 = vmatprep.subr.bf16.mxu0 %v10383_v54  ;;  %v10459_v54 = vld [vmem:[#allocation2 + $0x1100] ss:$16 sps:$4 sm:$0xff]  }
 0x209   :  { %7375 = vmatpush1.bf16.msra.mxu1 %v10384_v56  ;;  %v10470_v56 = vld [vmem:[#allocation2 + $0xd2c] ss:$16 sps:$4 sm:$0xff]  }
 0x20a   :  { %6801 = vmatpush1.bf16.msra.mxu0 %v10381_v27  ;;  %7376 = vmatprep.subr.bf16.mxu1 %v10392_v58  ;;  %v10467_v27 = vld [vmem:[#allocation2 + $0x1124] ss:$16 sps:$4 sm:$0xff]   ;;  %v10468_v58 = vld [vmem:[#allocation2 + $0xd28] ss:$16 sps:$4 sm:$0xff]  }
 0x20b   :  { %6802 = vmatprep.subr.bf16.mxu0 %v10389_v24  ;;  %v10465_v24 = vld [vmem:[#allocation2 + $0x1120] ss:$16 sps:$4 sm:$0xff]  }
 0x20d   :  { %7377 = vmatpush1.bf16.msra.mxu1 %v10390_v60  ;;  %v10476_v60 = vld [vmem:[#allocation2 + $0xd4c] ss:$16 sps:$4 sm:$0xff]  }
 0x20e   :  { %6803 = vmatpush1.bf16.msra.mxu0 %v10387_v59  ;;  %7378 = vmatprep.subr.bf16.mxu1 %v10398_v62  ;;  %v10473_v59 = vld [vmem:[#allocation2 + $0x1144] ss:$16 sps:$4 sm:$0xff]   ;;  %v10474_v62 = vld [vmem:[#allocation2 + $0xd48] ss:$16 sps:$4 sm:$0xff]  }
 0x20f   :  { %6804 = vmatprep.subr.bf16.mxu0 %v10395_v31  ;;  %v10471_v31 = vld [vmem:[#allocation2 + $0x1140] ss:$16 sps:$4 sm:$0xff]  }
 0x211   :  { %7379 = vmatpush1.bf16.msra.mxu1 %v10396_v1  ;;  %v10482_v1 = vld [vmem:[#allocation2 + $0xd6c] ss:$16 sps:$4 sm:$0xff]  }
 0x212   :  { %6805 = vmatpush1.bf16.msra.mxu0 %v10393_v63  ;;  %7380 = vmatprep.subr.bf16.mxu1 %v10404_v3  ;;  %v10479_v63 = vld [vmem:[#allocation2 + $0x1164] ss:$16 sps:$4 sm:$0xff]   ;;  %v10480_v3 = vld [vmem:[#allocation2 + $0xd68] ss:$16 sps:$4 sm:$0xff]  }
 0x213   :  { %6806 = vmatprep.subr.bf16.mxu0 %v10401_v2  ;;  %v10477_v2 = vld [vmem:[#allocation2 + $0x1160] ss:$16 sps:$4 sm:$0xff]  }
 0x215   :  { %7381 = vmatpush1.bf16.msra.mxu1 %v10402_v8  ;;  %v10488_v8 = vld [vmem:[#allocation2 + $0xd8c] ss:$16 sps:$4 sm:$0xff]  }
 0x216   :  { %6807 = vmatpush1.bf16.msra.mxu0 %v10399_v37  ;;  %7382 = vmatprep.subr.bf16.mxu1 %v10410_v22  ;;  %v10485_v37 = vld [vmem:[#allocation2 + $0x1184] ss:$16 sps:$4 sm:$0xff]   ;;  %v10486_v22 = vld [vmem:[#allocation2 + $0xd88] ss:$16 sps:$4 sm:$0xff]  }
 0x217   :  { %6808 = vmatprep.subr.bf16.mxu0 %v10407_v9  ;;  %v10483_v9 = vld [vmem:[#allocation2 + $0x1180] ss:$16 sps:$4 sm:$0xff]  }
 0x219   :  { %7383 = vmatpush1.bf16.msra.mxu1 %v10408_v14  ;;  %v10494_v14 = vld [vmem:[#allocation2 + $0xdac] ss:$16 sps:$4 sm:$0xff]  }
 0x21a   :  { %6809 = vmatpush1.bf16.msra.mxu0 %v10405_v13  ;;  %7393 = vmatprep.subr.bf16.mxu1 %v10416_v15  ;;  %v10491_v13 = vld [vmem:[#allocation2 + $0x11a4] ss:$16 sps:$4 sm:$0xff]   ;;  %v10492_v15 = vld [vmem:[#allocation2 + $0xda8] ss:$16 sps:$4 sm:$0xff]  }
 0x21b   :  { %6819 = vmatprep.subr.bf16.mxu0 %v10413_v40  ;;  %v10489_v40 = vld [vmem:[#allocation2 + $0x11a0] ss:$16 sps:$4 sm:$0xff]  }
 0x21c   :  { %7385 = vmatmul.mubr.bf16.vlgmr.msra.gmra.mrb[4].mxu1 %v11718_v57  ;;  %v10434_v57 = vld [vmem:[#allocation2 + $0xc6c] ss:$16 sps:$4 sm:$0xff]  }
 0x21d   :  { %6811 = vmatmul.mubr.bf16.vlgmr.msra.gmra.mrb[0].mxu0 %v11748_v17  ;;  %7394 = vmatpush1.bf16.msra.mxu1 %v10414_v19  ;;  %v10495_v19 = vld [vmem:[#allocation2 + $0x11c0] ss:$16 sps:$4 sm:$0xff]  }
 0x21e   :  { %6820 = vmatpush1.bf16.msra.mxu0 %v10411_v46  ;;  %7395 = vmatprep.subr.bf16.mxu1 %v10422_v21  ;;  %v10500_v46 = vld [vmem:[#allocation2 + $0xdcc] ss:$16 sps:$4 sm:$0xff]   ;;  %v10503_v21 = vld [vmem:[#allocation2 + $0x11e4] ss:$16 sps:$4 sm:$0xff]  }
 0x21f   :  { %6821 = vmatprep.subr.bf16.mxu0 %v10419_v20  ;;  %6851 = vmatprep.mubr.bf16.mxu0 %v11751_v23  ;;  %v10498_v20 = vld [vmem:[#allocation2 + $0xdc8] ss:$16 sps:$4 sm:$0xff]  }
 0x220   :  { %7425 = vmatprep.mubr.bf16.mxu1 %v11721_v61  ;;  %v10438_v61 = vld [vmem:[#allocation2 + $0xc88] ss:$16 sps:$4 sm:$0xff]  }
 0x221   :  { %7396 = vmatpush1.bf16.msra.mxu1 %v10420_v50  ;;  %v10501_v50 = vld [vmem:[#allocation2 + $0x11e0] ss:$16 sps:$4 sm:$0xff]  }
 0x222   :  { %6822 = vmatpush1.bf16.msra.mxu0 %v10417_v25  ;;  %7397 = vmatprep.subr.bf16.mxu1 %v10428_v28  ;;  %v10506_v25 = vld [vmem:[#allocation2 + $0xdec] ss:$16 sps:$4 sm:$0xff]   ;;  %v10509_v28 = vld [vmem:[#allocation2 + $0x1204] ss:$16 sps:$4 sm:$0xff]  }
 0x223   :  { %6823 = vmatprep.subr.bf16.mxu0 %v10425_v26  ;;  %v10504_v26 = vld [vmem:[#allocation2 + $0xde8] ss:$16 sps:$4 sm:$0xff]  }
 0x225   :  { %7398 = vmatpush1.bf16.msra.mxu1 %v10426_v32  ;;  %v11759_v32 = vrot.slane %v11742_v7, %v11631_v49  ;;  %v10513_v7 = vld [vmem:[#allocation2 + $0x1220] ss:$16 sps:$4 sm:$0xff]  }
 0x226   :  { %6824 = vmatpush1.bf16.msra.mxu0 %v10423_v29  ;;  %7399 = vmatprep.subr.bf16.mxu1 %v10434_v57  ;;  %v10512_v29 = vld [vmem:[#allocation2 + $0xe0c] ss:$16 sps:$4 sm:$0xff]   ;;  %v10510_v57 = vld [vmem:[#allocation2 + $0xe08] ss:$16 sps:$4 sm:$0xff]  }
 0x227   :  { %6825 = vmatprep.subr.bf16.mxu0 %v10431_v10  ;;  %v10507_v10 = vld [vmem:[#allocation2 + $0x1200] ss:$16 sps:$4 sm:$0xff]  }
 0x229   :  { %7400 = vmatpush1.bf16.msra.mxu1 %v10432_v34  ;;  %v10518_v34 = vld [vmem:[#allocation2 + $0xe2c] ss:$16 sps:$4 sm:$0xff]  }
 0x22a   :  { %6826 = vmatpush1.bf16.msra.mxu0 %v10429_v33  ;;  %7401 = vmatprep.subr.bf16.mxu1 %v10440_v36  ;;  %v10515_v33 = vld [vmem:[#allocation2 + $0x1224] ss:$16 sps:$4 sm:$0xff]   ;;  %v10516_v36 = vld [vmem:[#allocation2 + $0xe28] ss:$16 sps:$4 sm:$0xff]  }
 0x22b   :  { %6827 = vmatprep.subr.bf16.mxu0 %v10437_v35  ;;  %v11763_v35 = vcombine.high %v11751_v23, %v11751_v23 }
 0x22d   :  { %7402 = vmatpush1.bf16.msra.mxu1 %v10438_v61  ;;  %v10524_v61 = vld [vmem:[#allocation2 + $0xe4c] ss:$16 sps:$4 sm:$0xff]  }
 0x22e   :  { %6828 = vmatpush1.bf16.msra.mxu0 %v10435_v12  ;;  %7403 = vmatprep.subr.bf16.mxu1 %v10446_v39  ;;  %v10521_v12 = vld [vmem:[#allocation2 + $0x1244] ss:$16 sps:$4 sm:$0xff]   ;;  %v10522_v39 = vld [vmem:[#allocation2 + $0xe48] ss:$16 sps:$4 sm:$0xff]  }
 0x22f   :  { %6829 = vmatprep.subr.bf16.mxu0 %v10443_v38  ;;  %v10519_v38 = vld [vmem:[#allocation2 + $0x1240] ss:$16 sps:$4 sm:$0xff]  }
 0x231   :  { %7404 = vmatpush1.bf16.msra.mxu1 %v10444_v43  ;;  %v10525_v43 = vld [vmem:[#allocation2 + $0x1260] ss:$16 sps:$4 sm:$0xff]  }
 0x232   :  { %6830 = vmatpush1.bf16.msra.mxu0 %v10441_v41  ;;  %7405 = vmatprep.subr.bf16.mxu1 %v10452_v44  ;;  %v10527_v41 = vld [vmem:[#allocation2 + $0x1264] ss:$16 sps:$4 sm:$0xff]  }
 0x233   :  { %6831 = vmatprep.subr.bf16.mxu0 %v10449_v0  ;;  %v10528_v0 = vld [vmem:[#allocation2 + $0xe68] ss:$16 sps:$4 sm:$0xff]   ;;  %v10533_v44 = vld [vmem:[#allocation2 + $0x1284] ss:$16 sps:$4 sm:$0xff]  }
 0x235   :  { %7406 = vmatpush1.bf16.msra.mxu1 %v10450_v47  ;;  %v10531_v47 = vld [vmem:[#allocation2 + $0x1280] ss:$16 sps:$4 sm:$0xff]  }
 0x236   :  { %6832 = vmatpush1.bf16.msra.mxu0 %v10447_v45  ;;  %7407 = vmatprep.subr.bf16.mxu1 %v10458_v48  ;;  %v10536_v45 = vld [vmem:[#allocation2 + $0xe8c] ss:$16 sps:$4 sm:$0xff]  }
 0x237   :  { %6833 = vmatprep.subr.bf16.mxu0 %v10455_v18  ;;  %v10539_v18 = vld [vmem:[#allocation2 + $0x12a4] ss:$16 sps:$4 sm:$0xff]   ;;  %v10542_v48 = vld [vmem:[#allocation2 + $0xeac] ss:$16 sps:$4 sm:$0xff]  }
 0x239   :  { %7408 = vmatpush1.bf16.msra.mxu1 %v10456_v30  ;;  %v10540_v30 = vld [vmem:[#allocation2 + $0xea8] ss:$16 sps:$4 sm:$0xff]  }
 0x23a   :  { %6834 = vmatpush1.bf16.msra.mxu0 %v10453_v51  ;;  %7409 = vmatprep.subr.bf16.mxu1 %v10464_v53  ;;  %v10537_v51 = vld [vmem:[#allocation2 + $0x12a0] ss:$16 sps:$4 sm:$0xff]   ;;  %v10548_v53 = vld [vmem:[#allocation2 + $0xecc] ss:$16 sps:$4 sm:$0xff]  }
 0x23b   :  { %6835 = vmatprep.subr.bf16.mxu0 %v10461_v52  ;;  %v10545_v52 = vld [vmem:[#allocation2 + $0x12c4] ss:$16 sps:$4 sm:$0xff]  }
 0x23d   :  { %7410 = vmatpush1.bf16.msra.mxu1 %v10462_v55  ;;  %v10546_v55 = vld [vmem:[#allocation2 + $0xec8] ss:$16 sps:$4 sm:$0xff]  }
 0x23e   :  { %6836 = vmatpush1.bf16.msra.mxu0 %v10459_v54  ;;  %7411 = vmatprep.subr.bf16.mxu1 %v10470_v56  ;;  %v10543_v54 = vld [vmem:[#allocation2 + $0x12c0] ss:$16 sps:$4 sm:$0xff]   ;;  %v10554_v56 = vld [vmem:[#allocation2 + $0xeec] ss:$16 sps:$4 sm:$0xff]  }
 0x23f   :  { %6837 = vmatprep.subr.bf16.mxu0 %v10467_v27  ;;  %v10551_v27 = vld [vmem:[#allocation2 + $0x12e4] ss:$16 sps:$4 sm:$0xff]  }
 0x241   :  { %7412 = vmatpush1.bf16.msra.mxu1 %v10468_v58  ;;  %v10552_v58 = vld [vmem:[#allocation2 + $0xee8] ss:$16 sps:$4 sm:$0xff]  }
 0x242   :  { %6838 = vmatpush1.bf16.msra.mxu0 %v10465_v24  ;;  %7413 = vmatprep.subr.bf16.mxu1 %v10476_v60  ;;  %v10549_v24 = vld [vmem:[#allocation2 + $0x12e0] ss:$16 sps:$4 sm:$0xff]   ;;  %v10560_v60 = vld [vmem:[#allocation2 + $0xf0c] ss:$16 sps:$4 sm:$0xff]  }
 0x243   :  { %6839 = vmatprep.subr.bf16.mxu0 %v10473_v59  ;;  %v10557_v59 = vld [vmem:[#allocation2 + $0x1304] ss:$16 sps:$4 sm:$0xff]  }
 0x245   :  { %7414 = vmatpush1.bf16.msra.mxu1 %v10474_v62  ;;  %v10558_v62 = vld [vmem:[#allocation2 + $0xf08] ss:$16 sps:$4 sm:$0xff]  }
 0x246   :  { %6840 = vmatpush1.bf16.msra.mxu0 %v10471_v31  ;;  %7415 = vmatprep.subr.bf16.mxu1 %v10482_v1  ;;  %v10555_v31 = vld [vmem:[#allocation2 + $0x1300] ss:$16 sps:$4 sm:$0xff]   ;;  %v10566_v1 = vld [vmem:[#allocation2 + $0xf2c] ss:$16 sps:$4 sm:$0xff]  }
 0x247   :  { %6841 = vmatprep.subr.bf16.mxu0 %v10479_v63  ;;  %v10563_v63 = vld [vmem:[#allocation2 + $0x1324] ss:$16 sps:$4 sm:$0xff]  }
 0x249   :  { %7416 = vmatpush1.bf16.msra.mxu1 %v10480_v3  ;;  %v10564_v3 = vld [vmem:[#allocation2 + $0xf28] ss:$16 sps:$4 sm:$0xff]  }
 0x24a   :  { %6842 = vmatpush1.bf16.msra.mxu0 %v10477_v2  ;;  %7417 = vmatprep.subr.bf16.mxu1 %v10488_v8  ;;  %v10561_v2 = vld [vmem:[#allocation2 + $0x1320] ss:$16 sps:$4 sm:$0xff]   ;;  %v10572_v8 = vld [vmem:[#allocation2 + $0xf4c] ss:$16 sps:$4 sm:$0xff]  }
 0x24b   :  { %6843 = vmatprep.subr.bf16.mxu0 %v10485_v37  ;;  %v10569_v37 = vld [vmem:[#allocation2 + $0x1344] ss:$16 sps:$4 sm:$0xff]  }
 0x24d   :  { %7418 = vmatpush1.bf16.msra.mxu1 %v10486_v22  ;;  %v10570_v22 = vld [vmem:[#allocation2 + $0xf48] ss:$16 sps:$4 sm:$0xff]  }
 0x24e   :  { %6844 = vmatpush1.bf16.msra.mxu0 %v10483_v9  ;;  %7419 = vmatprep.subr.bf16.mxu1 %v10494_v14  ;;  %v10567_v9 = vld [vmem:[#allocation2 + $0x1340] ss:$16 sps:$4 sm:$0xff]   ;;  %v10578_v14 = vld [vmem:[#allocation2 + $0xf6c] ss:$16 sps:$4 sm:$0xff]  }
 0x24f   :  { %6845 = vmatprep.subr.bf16.mxu0 %v10491_v13  ;;  %v10575_v13 = vld [vmem:[#allocation2 + $0x1364] ss:$16 sps:$4 sm:$0xff]  }
 0x251   :  { %7420 = vmatpush1.bf16.msra.mxu1 %v10492_v15  ;;  %v10576_v15 = vld [vmem:[#allocation2 + $0xf68] ss:$16 sps:$4 sm:$0xff]  }
 0x252   :  { %6846 = vmatpush1.bf16.msra.mxu0 %v10489_v40  ;;  %7421 = vmatprep.subr.bf16.mxu1 %v10500_v46  ;;  %v10573_v40 = vld [vmem:[#allocation2 + $0x1360] ss:$16 sps:$4 sm:$0xff]   ;;  %v10584_v46 = vld [vmem:[#allocation2 + $0xf8c] ss:$16 sps:$4 sm:$0xff]  }
 0x253   :  { %6847 = vmatprep.subr.bf16.mxu0 %v10497_v16  ;;  %v10581_v16 = vld [vmem:[#allocation2 + $0x1384] ss:$16 sps:$4 sm:$0xff]  }
 0x255   :  { %7422 = vmatpush1.bf16.msra.mxu1 %v10498_v20  ;;  %v10582_v20 = vld [vmem:[#allocation2 + $0xf88] ss:$16 sps:$4 sm:$0xff]  }
 0x256   :  { %6848 = vmatpush1.bf16.msra.mxu0 %v10495_v19  ;;  %7423 = vmatprep.subr.bf16.mxu1 %v10506_v25  ;;  %v10579_v19 = vld [vmem:[#allocation2 + $0x1380] ss:$16 sps:$4 sm:$0xff]   ;;  %v10590_v25 = vld [vmem:[#allocation2 + $0xfac] ss:$16 sps:$4 sm:$0xff]  }
 0x257   :  { %6849 = vmatprep.subr.bf16.mxu0 %v10503_v21  ;;  %v10587_v21 = vld [vmem:[#allocation2 + $0x13a4] ss:$16 sps:$4 sm:$0xff]  }
 0x259   :  { %7424 = vmatpush1.bf16.msra.mxu1 %v10504_v26  ;;  %v10588_v26 = vld [vmem:[#allocation2 + $0xfa8] ss:$16 sps:$4 sm:$0xff]  }
 0x25a   :  { %6850 = vmatpush1.bf16.msra.mxu0 %v10501_v50  ;;  %7434 = vmatprep.subr.bf16.mxu1 %v10512_v29  ;;  %v10585_v50 = vld [vmem:[#allocation2 + $0x13a0] ss:$16 sps:$4 sm:$0xff]   ;;  %v10596_v29 = vld [vmem:[#allocation2 + $0xfcc] ss:$16 sps:$4 sm:$0xff]  }
 0x25b   :  { %6860 = vmatprep.subr.bf16.mxu0 %v10509_v28  ;;  %v10593_v28 = vld [vmem:[#allocation2 + $0x13c4] ss:$16 sps:$4 sm:$0xff]  }
 0x25c   :  { %7426 = vmatmul.mubr.bf16.vlgmr.msra.gmra.mrb[4].mxu1 %v11729_v6  ;;  %v10530_v6 = vld [vmem:[#allocation2 + $0xe6c] ss:$16 sps:$4 sm:$0xff]  }
 0x25d   :  { %6852 = vmatmul.mubr.bf16.vlgmr.msra.gmra.mrb[0].mxu0 %v11759_v32  ;;  %7435 = vmatpush1.bf16.msra.mxu1 %v10510_v57 }
 0x25e   :  { %6861 = vmatpush1.bf16.msra.mxu0 %v10507_v10  ;;  %7436 = vmatprep.subr.bf16.mxu1 %v10518_v34  ;;  %v11373_v10 = vld [vmem:[%s12002_s0 + $0x10] sm:$0xff]  ;;  %v10594_v34 = vld [vmem:[#allocation2 + $0xfc8] ss:$16 sps:$4 sm:$0xff]  }
 0x25f   :  { %6862 = vmatprep.subr.bf16.mxu0 %v10515_v33  ;;  %6892 = vmatprep.mubr.bf16.mxu0 %v11763_v35  ;;  %v1241_v57 = vcombine.high %v11373_v10, %v11373_v10  ;;  %v10591_v33 = vld [vmem:[#allocation2 + $0x13c0] ss:$16 sps:$4 sm:$0xff]  }
 0x260   :  { %7466 = vmatprep.mubr.bf16.mxu1 %v11733_v11  ;;  %v10534_v11 = vld [vmem:[#allocation2 + $0xe88] ss:$16 sps:$4 sm:$0xff]   ;;  %v10669_v10 = vld [vmem:[#allocation2 + $0x1560] ss:$16 sps:$4 sm:$0xff]  }
 0x261   :  { %7437 = vmatpush1.bf16.msra.mxu1 %v10516_v36  ;;  %v10602_v36 = vld [vmem:[#allocation2 + $0xfec] ss:$16 sps:$4 sm:$0xff]  }
 0x262   :  { %6863 = vmatpush1.bf16.msra.mxu0 %v10513_v7  ;;  %7438 = vmatprep.subr.bf16.mxu1 %v10524_v61  ;;  %v10599_v7 = vld [vmem:[#allocation2 + $0x13e4] ss:$16 sps:$4 sm:$0xff]   ;;  %v10597_v61 = vld [vmem:[#allocation2 + $0x13e0] ss:$16 sps:$4 sm:$0xff]  }
 0x263   :  { %6864 = vmatprep.subr.bf16.mxu0 %v10521_v12  ;;  %v11773_v12 = vrot.slane %v1241_v57, %v11631_v49  ;;  %v10672_v57 = vld [vmem:[#allocation2 + $0x1168] ss:$16 sps:$4 sm:$0xff]  }
 0x265   :  { %7439 = vmatpush1.bf16.msra.mxu1 %v10522_v39  ;;  %v10605_v39 = vld [vmem:[#allocation2 + $0x1404] ss:$16 sps:$4 sm:$0xff]  }
 0x266   :  { %6865 = vmatpush1.bf16.msra.mxu0 %v10519_v38  ;;  %7440 = vmatprep.subr.bf16.mxu1 %v10530_v6  ;;  %v10600_v38 = vld [vmem:[#allocation2 + $0xfe8] ss:$16 sps:$4 sm:$0xff]   ;;  %v1257_v6 = vcombine.high %v11773_v12, %v11773_v12 }
 0x267   :  { %6866 = vmatprep.subr.bf16.mxu0 %v10527_v41  ;;  %v10608_v41 = vld [vmem:[#allocation2 + $0x100c] ss:$16 sps:$4 sm:$0xff]  }
 0x269   :  { %7441 = vmatpush1.bf16.msra.mxu1 %v10528_v0  ;;  %v10603_v0 = vld [vmem:[#allocation2 + $0x1400] ss:$16 sps:$4 sm:$0xff]  }
 0x26a   :  { %6867 = vmatpush1.bf16.msra.mxu0 %v10525_v43  ;;  %7442 = vmatprep.subr.bf16.mxu1 %v10536_v45  ;;  %v11779_v43 = vcombine.high %v11759_v32, %v11759_v32  ;;  %v10611_v45 = vld [vmem:[#allocation2 + $0x1424] ss:$16 sps:$4 sm:$0xff]  }
 0x26b   :  { %6868 = vmatprep.subr.bf16.mxu0 %v10533_v44  ;;  %v10606_v44 = vld [vmem:[#allocation2 + $0x1008] ss:$16 sps:$4 sm:$0xff]  }
 0x26d   :  { %7443 = vmatpush1.bf16.msra.mxu1 %v10534_v11  ;;  %v11782_v11 = vrot.slane %v1257_v6, %v11631_v49  ;;  %v10689_v6 = vld [vmem:[#allocation2 + $0x15c4] ss:$16 sps:$4 sm:$0xff]  }
 0x26e   :  { %6869 = vmatpush1.bf16.msra.mxu0 %v10531_v47  ;;  %7444 = vmatprep.subr.bf16.mxu1 %v10542_v48  ;;  %v10614_v47 = vld [vmem:[#allocation2 + $0x102c] ss:$16 sps:$4 sm:$0xff]   ;;  %v10612_v48 = vld [vmem:[#allocation2 + $0x1028] ss:$16 sps:$4 sm:$0xff]  }
 0x26f   :  { %6870 = vmatprep.subr.bf16.mxu0 %v10539_v18  ;;  %v10609_v18 = vld [vmem:[#allocation2 + $0x1420] ss:$16 sps:$4 sm:$0xff]  }
 0x271   :  { %7445 = vmatpush1.bf16.msra.mxu1 %v10540_v30  ;;  %v10620_v30 = vld [vmem:[#allocation2 + $0x104c] ss:$16 sps:$4 sm:$0xff]  }
 0x272   :  { %6871 = vmatpush1.bf16.msra.mxu0 %v10537_v51  ;;  %7446 = vmatprep.subr.bf16.mxu1 %v10548_v53  ;;  %v10617_v51 = vld [vmem:[#allocation2 + $0x1444] ss:$16 sps:$4 sm:$0xff]   ;;  %v10618_v53 = vld [vmem:[#allocation2 + $0x1048] ss:$16 sps:$4 sm:$0xff]  }
 0x273   :  { %6872 = vmatprep.subr.bf16.mxu0 %v10545_v52  ;;  %v10615_v52 = vld [vmem:[#allocation2 + $0x1440] ss:$16 sps:$4 sm:$0xff]  }
 0x275   :  { %7447 = vmatpush1.bf16.msra.mxu1 %v10546_v55  ;;  %v10621_v55 = vld [vmem:[#allocation2 + $0x1460] ss:$16 sps:$4 sm:$0xff]  }
 0x276   :  { %6873 = vmatpush1.bf16.msra.mxu0 %v10543_v54  ;;  %7448 = vmatprep.subr.bf16.mxu1 %v10554_v56  ;;  %v10623_v54 = vld [vmem:[#allocation2 + $0x1464] ss:$16 sps:$4 sm:$0xff]  }
 0x277   :  { %6874 = vmatprep.subr.bf16.mxu0 %v10551_v27  ;;  %v10624_v27 = vld [vmem:[#allocation2 + $0x1068] ss:$16 sps:$4 sm:$0xff]   ;;  %v10629_v56 = vld [vmem:[#allocation2 + $0x1484] ss:$16 sps:$4 sm:$0xff]  }
 0x279   :  { %7449 = vmatpush1.bf16.msra.mxu1 %v10552_v58  ;;  %v10627_v58 = vld [vmem:[#allocation2 + $0x1480] ss:$16 sps:$4 sm:$0xff]  }
 0x27a   :  { %6875 = vmatpush1.bf16.msra.mxu0 %v10549_v24  ;;  %7450 = vmatprep.subr.bf16.mxu1 %v10560_v60  ;;  %v10632_v24 = vld [vmem:[#allocation2 + $0x108c] ss:$16 sps:$4 sm:$0xff]  }
 0x27b   :  { %6876 = vmatprep.subr.bf16.mxu0 %v10557_v59  ;;  %v10635_v59 = vld [vmem:[#allocation2 + $0x14a4] ss:$16 sps:$4 sm:$0xff]   ;;  %v10638_v60 = vld [vmem:[#allocation2 + $0x10ac] ss:$16 sps:$4 sm:$0xff]  }
 0x27d   :  { %7451 = vmatpush1.bf16.msra.mxu1 %v10558_v62  ;;  %v10636_v62 = vld [vmem:[#allocation2 + $0x10a8] ss:$16 sps:$4 sm:$0xff]  }
 0x27e   :  { %6877 = vmatpush1.bf16.msra.mxu0 %v10555_v31  ;;  %7452 = vmatprep.subr.bf16.mxu1 %v10566_v1  ;;  %v10633_v31 = vld [vmem:[#allocation2 + $0x14a0] ss:$16 sps:$4 sm:$0xff]   ;;  %v10644_v1 = vld [vmem:[#allocation2 + $0x10cc] ss:$16 sps:$4 sm:$0xff]  }
 0x27f   :  { %6878 = vmatprep.subr.bf16.mxu0 %v10563_v63  ;;  %v10641_v63 = vld [vmem:[#allocation2 + $0x14c4] ss:$16 sps:$4 sm:$0xff]  }
 0x281   :  { %7453 = vmatpush1.bf16.msra.mxu1 %v10564_v3  ;;  %v10642_v3 = vld [vmem:[#allocation2 + $0x10c8] ss:$16 sps:$4 sm:$0xff]  }
 0x282   :  { %6879 = vmatpush1.bf16.msra.mxu0 %v10561_v2  ;;  %7454 = vmatprep.subr.bf16.mxu1 %v10572_v8  ;;  %v10639_v2 = vld [vmem:[#allocation2 + $0x14c0] ss:$16 sps:$4 sm:$0xff]   ;;  %v10650_v8 = vld [vmem:[#allocation2 + $0x10ec] ss:$16 sps:$4 sm:$0xff]  }
 0x283   :  { %6880 = vmatprep.subr.bf16.mxu0 %v10569_v37  ;;  %v10647_v37 = vld [vmem:[#allocation2 + $0x14e4] ss:$16 sps:$4 sm:$0xff]  }
 0x285   :  { %7455 = vmatpush1.bf16.msra.mxu1 %v10570_v22  ;;  %v10648_v22 = vld [vmem:[#allocation2 + $0x10e8] ss:$16 sps:$4 sm:$0xff]  }
 0x286   :  { %6881 = vmatpush1.bf16.msra.mxu0 %v10567_v9  ;;  %7456 = vmatprep.subr.bf16.mxu1 %v10578_v14  ;;  %v10645_v9 = vld [vmem:[#allocation2 + $0x14e0] ss:$16 sps:$4 sm:$0xff]   ;;  %v10656_v14 = vld [vmem:[#allocation2 + $0x110c] ss:$16 sps:$4 sm:$0xff]  }
 0x287   :  { %6882 = vmatprep.subr.bf16.mxu0 %v10575_v13  ;;  %v10653_v13 = vld [vmem:[#allocation2 + $0x1504] ss:$16 sps:$4 sm:$0xff]  }
 0x289   :  { %7457 = vmatpush1.bf16.msra.mxu1 %v10576_v15  ;;  %v10654_v15 = vld [vmem:[#allocation2 + $0x1108] ss:$16 sps:$4 sm:$0xff]  }
 0x28a   :  { %6883 = vmatpush1.bf16.msra.mxu0 %v10573_v40  ;;  %7458 = vmatprep.subr.bf16.mxu1 %v10584_v46  ;;  %v10651_v40 = vld [vmem:[#allocation2 + $0x1500] ss:$16 sps:$4 sm:$0xff]   ;;  %v10662_v46 = vld [vmem:[#allocation2 + $0x112c] ss:$16 sps:$4 sm:$0xff]  }
 0x28b   :  { %6884 = vmatprep.subr.bf16.mxu0 %v10581_v16  ;;  %v10659_v16 = vld [vmem:[#allocation2 + $0x1524] ss:$16 sps:$4 sm:$0xff]  }
 0x28d   :  { %7459 = vmatpush1.bf16.msra.mxu1 %v10582_v20  ;;  %v10660_v20 = vld [vmem:[#allocation2 + $0x1128] ss:$16 sps:$4 sm:$0xff]  }
 0x28e   :  { %6885 = vmatpush1.bf16.msra.mxu0 %v10579_v19  ;;  %7460 = vmatprep.subr.bf16.mxu1 %v10590_v25  ;;  %v10657_v19 = vld [vmem:[#allocation2 + $0x1520] ss:$16 sps:$4 sm:$0xff]   ;;  %v10668_v25 = vld [vmem:[#allocation2 + $0x114c] ss:$16 sps:$4 sm:$0xff]  }
 0x28f   :  { %6886 = vmatprep.subr.bf16.mxu0 %v10587_v21  ;;  %v10665_v21 = vld [vmem:[#allocation2 + $0x1544] ss:$16 sps:$4 sm:$0xff]  }
 0x291   :  { %7461 = vmatpush1.bf16.msra.mxu1 %v10588_v26  ;;  %v10666_v26 = vld [vmem:[#allocation2 + $0x1148] ss:$16 sps:$4 sm:$0xff]  }
 0x292   :  { %6887 = vmatpush1.bf16.msra.mxu0 %v10585_v50  ;;  %7462 = vmatprep.subr.bf16.mxu1 %v10596_v29  ;;  %v10663_v50 = vld [vmem:[#allocation2 + $0x1540] ss:$16 sps:$4 sm:$0xff]   ;;  %v10674_v29 = vld [vmem:[#allocation2 + $0x116c] ss:$16 sps:$4 sm:$0xff]  }
 0x293   :  { %6888 = vmatprep.subr.bf16.mxu0 %v10593_v28  ;;  %v10671_v28 = vld [vmem:[#allocation2 + $0x1564] ss:$16 sps:$4 sm:$0xff]  }
 0x295   :  { %7463 = vmatpush1.bf16.msra.mxu1 %v10594_v34  ;;  %v10680_v34 = vld [vmem:[#allocation2 + $0x118c] ss:$16 sps:$4 sm:$0xff]  }
 0x296   :  { %6889 = vmatpush1.bf16.msra.mxu0 %v10591_v33  ;;  %7464 = vmatprep.subr.bf16.mxu1 %v10602_v36  ;;  %v10677_v33 = vld [vmem:[#allocation2 + $0x1584] ss:$16 sps:$4 sm:$0xff]   ;;  %v10678_v36 = vld [vmem:[#allocation2 + $0x1188] ss:$16 sps:$4 sm:$0xff]  }
 0x297   :  { %6890 = vmatprep.subr.bf16.mxu0 %v10599_v7  ;;  %v10675_v7 = vld [vmem:[#allocation2 + $0x1580] ss:$16 sps:$4 sm:$0xff]  }
 0x299   :  { %7465 = vmatpush1.bf16.msra.mxu1 %v10600_v38  ;;  %v10686_v38 = vld [vmem:[#allocation2 + $0x11ac] ss:$16 sps:$4 sm:$0xff]  }
 0x29a   :  { %6891 = vmatpush1.bf16.msra.mxu0 %v10597_v61  ;;  %7475 = vmatprep.subr.bf16.mxu1 %v10608_v41  ;;  %v10683_v61 = vld [vmem:[#allocation2 + $0x15a4] ss:$16 sps:$4 sm:$0xff]   ;;  %v10684_v41 = vld [vmem:[#allocation2 + $0x11a8] ss:$16 sps:$4 sm:$0xff]  }
 0x29b   :  { %6901 = vmatprep.subr.bf16.mxu0 %v10605_v39  ;;  %v10681_v39 = vld [vmem:[#allocation2 + $0x15a0] ss:$16 sps:$4 sm:$0xff]  }
 0x29c   :  { %7467 = vmatmul.mubr.bf16.vlgmr.msra.gmra.mrb[4].mxu1 %v11748_v17  ;;  %v10626_v17 = vld [vmem:[#allocation2 + $0x106c] ss:$16 sps:$4 sm:$0xff]  }
 0x29d   :  { %6893 = vmatmul.mubr.bf16.vlgmr.msra.gmra.mrb[0].mxu0 %v11779_v43  ;;  %7476 = vmatpush1.bf16.msra.mxu1 %v10606_v44  ;;  %v10687_v44 = vld [vmem:[#allocation2 + $0x15c0] ss:$16 sps:$4 sm:$0xff]  }
 0x29e   :  { %6902 = vmatpush1.bf16.msra.mxu0 %v10603_v0  ;;  %7477 = vmatprep.subr.bf16.mxu1 %v10614_v47  ;;  %v10692_v0 = vld [vmem:[#allocation2 + $0x11cc] ss:$16 sps:$4 sm:$0xff]   ;;  %v10695_v47 = vld [vmem:[#allocation2 + $0x15e4] ss:$16 sps:$4 sm:$0xff]  }
 0x29f   :  { %6903 = vmatprep.subr.bf16.mxu0 %v10611_v45  ;;  %6933 = vmatprep.mubr.bf16.mxu0 %v11782_v11  ;;  %v10690_v45 = vld [vmem:[#allocation2 + $0x11c8] ss:$16 sps:$4 sm:$0xff]  }
 0x2a0   :  { %7507 = vmatprep.mubr.bf16.mxu1 %v11751_v23  ;;  %v10630_v23 = vld [vmem:[#allocation2 + $0x1088] ss:$16 sps:$4 sm:$0xff]  }
 0x2a1   :  { %7478 = vmatpush1.bf16.msra.mxu1 %v10612_v48  ;;  %v10693_v48 = vld [vmem:[#allocation2 + $0x15e0] ss:$16 sps:$4 sm:$0xff]  }
 0x2a2   :  { %6904 = vmatpush1.bf16.msra.mxu0 %v10609_v18  ;;  %7479 = vmatprep.subr.bf16.mxu1 %v10620_v30  ;;  %v10698_v18 = vld [vmem:[#allocation2 + $0x11ec] ss:$16 sps:$4 sm:$0xff]   ;;  %v10702_v30 = vld [vmem:[#allocation2 + $0x1604] ss:$16 sps:$4 sm:$0xff]  }
 0x2a3   :  { %6905 = vmatprep.subr.bf16.mxu0 %v10617_v51  ;;  %v10696_v51 = vld [vmem:[#allocation2 + $0x11e8] ss:$16 sps:$4 sm:$0xff]  }
 0x2a5   :  { %7480 = vmatpush1.bf16.msra.mxu1 %v10618_v53  ;;  %v11790_v53 = vrot.slane %v11773_v12, %v11631_v49  ;;  %v10706_v12 = vld [vmem:[#allocation2 + $0x1620] ss:$16 sps:$4 sm:$0xff]  }
 0x2a6   :  { %6906 = vmatpush1.bf16.msra.mxu0 %v10615_v52  ;;  %7481 = vmatprep.subr.bf16.mxu1 %v10626_v17  ;;  %v10705_v52 = vld [vmem:[#allocation2 + $0x120c] ss:$16 sps:$4 sm:$0xff]   ;;  %v10703_v17 = vld [vmem:[#allocation2 + $0x1208] ss:$16 sps:$4 sm:$0xff]  }
 0x2a7   :  { %6907 = vmatprep.subr.bf16.mxu0 %v10623_v54  ;;  %v10700_v54 = vld [vmem:[#allocation2 + $0x1600] ss:$16 sps:$4 sm:$0xff]  }
 0x2a9   :  { %7482 = vmatpush1.bf16.msra.mxu1 %v10624_v27  ;;  %v10711_v27 = vld [vmem:[#allocation2 + $0x122c] ss:$16 sps:$4 sm:$0xff]  }
 0x2aa   :  { %6908 = vmatpush1.bf16.msra.mxu0 %v10621_v55  ;;  %7483 = vmatprep.subr.bf16.mxu1 %v10632_v24  ;;  %v10708_v55 = vld [vmem:[#allocation2 + $0x1624] ss:$16 sps:$4 sm:$0xff]   ;;  %v10709_v24 = vld [vmem:[#allocation2 + $0x1228] ss:$16 sps:$4 sm:$0xff]  }
 0x2ab   :  { %6909 = vmatprep.subr.bf16.mxu0 %v10629_v56  ;;  %v11794_v56 = vcombine.high %v11782_v11, %v11782_v11 }
 0x2ad   :  { %7484 = vmatpush1.bf16.msra.mxu1 %v10630_v23  ;;  %v10717_v23 = vld [vmem:[#allocation2 + $0x124c] ss:$16 sps:$4 sm:$0xff]  }
 0x2ae   :  { %6910 = vmatpush1.bf16.msra.mxu0 %v10627_v58  ;;  %7485 = vmatprep.subr.bf16.mxu1 %v10638_v60  ;;  %v10714_v58 = vld [vmem:[#allocation2 + $0x1644] ss:$16 sps:$4 sm:$0xff]   ;;  %v10715_v60 = vld [vmem:[#allocation2 + $0x1248] ss:$16 sps:$4 sm:$0xff]  }
 0x2af   :  { %6911 = vmatprep.subr.bf16.mxu0 %v10635_v59  ;;  %v10712_v59 = vld [vmem:[#allocation2 + $0x1640] ss:$16 sps:$4 sm:$0xff]  }
 0x2b1   :  { %7486 = vmatpush1.bf16.msra.mxu1 %v10636_v62  ;;  %v10718_v62 = vld [vmem:[#allocation2 + $0x1660] ss:$16 sps:$4 sm:$0xff]  }
 0x2b2   :  { %6912 = vmatpush1.bf16.msra.mxu0 %v10633_v31  ;;  %7487 = vmatprep.subr.bf16.mxu1 %v10644_v1  ;;  %v10720_v31 = vld [vmem:[#allocation2 + $0x1664] ss:$16 sps:$4 sm:$0xff]  }
 0x2b3   :  { %6913 = vmatprep.subr.bf16.mxu0 %v10641_v63  ;;  %v10721_v63 = vld [vmem:[#allocation2 + $0x1268] ss:$16 sps:$4 sm:$0xff]   ;;  %v10726_v1 = vld [vmem:[#allocation2 + $0x1684] ss:$16 sps:$4 sm:$0xff]  }
 0x2b5   :  { %7488 = vmatpush1.bf16.msra.mxu1 %v10642_v3  ;;  %v10724_v3 = vld [vmem:[#allocation2 + $0x1680] ss:$16 sps:$4 sm:$0xff]  }
 0x2b6   :  { %6914 = vmatpush1.bf16.msra.mxu0 %v10639_v2  ;;  %7489 = vmatprep.subr.bf16.mxu1 %v10650_v8  ;;  %v10729_v2 = vld [vmem:[#allocation2 + $0x128c] ss:$16 sps:$4 sm:$0xff]  }
 0x2b7   :  { %6915 = vmatprep.subr.bf16.mxu0 %v10647_v37  ;;  %v10732_v37 = vld [vmem:[#allocation2 + $0x16a4] ss:$16 sps:$4 sm:$0xff]   ;;  %v10735_v8 = vld [vmem:[#allocation2 + $0x12ac] ss:$16 sps:$4 sm:$0xff]  }
 0x2b9   :  { %7490 = vmatpush1.bf16.msra.mxu1 %v10648_v22  ;;  %v10733_v22 = vld [vmem:[#allocation2 + $0x12a8] ss:$16 sps:$4 sm:$0xff]  }
 0x2ba   :  { %6916 = vmatpush1.bf16.msra.mxu0 %v10645_v9  ;;  %7491 = vmatprep.subr.bf16.mxu1 %v10656_v14  ;;  %v10730_v9 = vld [vmem:[#allocation2 + $0x16a0] ss:$16 sps:$4 sm:$0xff]   ;;  %v10741_v14 = vld [vmem:[#allocation2 + $0x12cc] ss:$16 sps:$4 sm:$0xff]  }
 0x2bb   :  { %6917 = vmatprep.subr.bf16.mxu0 %v10653_v13  ;;  %v10738_v13 = vld [vmem:[#allocation2 + $0x16c4] ss:$16 sps:$4 sm:$0xff]  }
 0x2bd   :  { %7492 = vmatpush1.bf16.msra.mxu1 %v10654_v15  ;;  %v10739_v15 = vld [vmem:[#allocation2 + $0x12c8] ss:$16 sps:$4 sm:$0xff]  }
 0x2be   :  { %6918 = vmatpush1.bf16.msra.mxu0 %v10651_v40  ;;  %7493 = vmatprep.subr.bf16.mxu1 %v10662_v46  ;;  %v10736_v40 = vld [vmem:[#allocation2 + $0x16c0] ss:$16 sps:$4 sm:$0xff]   ;;  %v10747_v46 = vld [vmem:[#allocation2 + $0x12ec] ss:$16 sps:$4 sm:$0xff]  }
 0x2bf   :  { %6919 = vmatprep.subr.bf16.mxu0 %v10659_v16  ;;  %v10744_v16 = vld [vmem:[#allocation2 + $0x16e4] ss:$16 sps:$4 sm:$0xff]  }
 0x2c1   :  { %7494 = vmatpush1.bf16.msra.mxu1 %v10660_v20  ;;  %v10745_v20 = vld [vmem:[#allocation2 + $0x12e8] ss:$16 sps:$4 sm:$0xff]  }
 0x2c2   :  { %6920 = vmatpush1.bf16.msra.mxu0 %v10657_v19  ;;  %7495 = vmatprep.subr.bf16.mxu1 %v10668_v25  ;;  %v10742_v19 = vld [vmem:[#allocation2 + $0x16e0] ss:$16 sps:$4 sm:$0xff]   ;;  %v10753_v25 = vld [vmem:[#allocation2 + $0x130c] ss:$16 sps:$4 sm:$0xff]  }
 0x2c3   :  { %6921 = vmatprep.subr.bf16.mxu0 %v10665_v21  ;;  %v10750_v21 = vld [vmem:[#allocation2 + $0x1704] ss:$16 sps:$4 sm:$0xff]  }
 0x2c5   :  { %7496 = vmatpush1.bf16.msra.mxu1 %v10666_v26  ;;  %v10751_v26 = vld [vmem:[#allocation2 + $0x1308] ss:$16 sps:$4 sm:$0xff]  }
 0x2c6   :  { %6922 = vmatpush1.bf16.msra.mxu0 %v10663_v50  ;;  %7497 = vmatprep.subr.bf16.mxu1 %v10674_v29  ;;  %v10748_v50 = vld [vmem:[#allocation2 + $0x1700] ss:$16 sps:$4 sm:$0xff]   ;;  %v10759_v29 = vld [vmem:[#allocation2 + $0x132c] ss:$16 sps:$4 sm:$0xff]  }
 0x2c7   :  { %6923 = vmatprep.subr.bf16.mxu0 %v10671_v28  ;;  %v10756_v28 = vld [vmem:[#allocation2 + $0x1724] ss:$16 sps:$4 sm:$0xff]  }
 0x2c9   :  { %7498 = vmatpush1.bf16.msra.mxu1 %v10672_v57  ;;  %v10757_v57 = vld [vmem:[#allocation2 + $0x1328] ss:$16 sps:$4 sm:$0xff]  }
 0x2ca   :  { %6924 = vmatpush1.bf16.msra.mxu0 %v10669_v10  ;;  %7499 = vmatprep.subr.bf16.mxu1 %v10680_v34  ;;  %v10754_v10 = vld [vmem:[#allocation2 + $0x1720] ss:$16 sps:$4 sm:$0xff]   ;;  %v10765_v34 = vld [vmem:[#allocation2 + $0x134c] ss:$16 sps:$4 sm:$0xff]  }
 0x2cb   :  { %6925 = vmatprep.subr.bf16.mxu0 %v10677_v33  ;;  %v10762_v33 = vld [vmem:[#allocation2 + $0x1744] ss:$16 sps:$4 sm:$0xff]  }
 0x2cd   :  { %7500 = vmatpush1.bf16.msra.mxu1 %v10678_v36  ;;  %v10763_v36 = vld [vmem:[#allocation2 + $0x1348] ss:$16 sps:$4 sm:$0xff]  }
 0x2ce   :  { %6926 = vmatpush1.bf16.msra.mxu0 %v10675_v7  ;;  %7501 = vmatprep.subr.bf16.mxu1 %v10686_v38  ;;  %v10760_v7 = vld [vmem:[#allocation2 + $0x1740] ss:$16 sps:$4 sm:$0xff]   ;;  %v10771_v38 = vld [vmem:[#allocation2 + $0x136c] ss:$16 sps:$4 sm:$0xff]  }
 0x2cf   :  { %6927 = vmatprep.subr.bf16.mxu0 %v10683_v61  ;;  %v10768_v61 = vld [vmem:[#allocation2 + $0x1764] ss:$16 sps:$4 sm:$0xff]  }
 0x2d1   :  { %7502 = vmatpush1.bf16.msra.mxu1 %v10684_v41  ;;  %v10769_v41 = vld [vmem:[#allocation2 + $0x1368] ss:$16 sps:$4 sm:$0xff]  }
 0x2d2   :  { %6928 = vmatpush1.bf16.msra.mxu0 %v10681_v39  ;;  %7503 = vmatprep.subr.bf16.mxu1 %v10692_v0  ;;  %v10766_v39 = vld [vmem:[#allocation2 + $0x1760] ss:$16 sps:$4 sm:$0xff]   ;;  %v10777_v0 = vld [vmem:[#allocation2 + $0x138c] ss:$16 sps:$4 sm:$0xff]  }
 0x2d3   :  { %6929 = vmatprep.subr.bf16.mxu0 %v10689_v6  ;;  %v10774_v6 = vld [vmem:[#allocation2 + $0x1784] ss:$16 sps:$4 sm:$0xff]  }
 0x2d5   :  { %7504 = vmatpush1.bf16.msra.mxu1 %v10690_v45  ;;  %v10775_v45 = vld [vmem:[#allocation2 + $0x1388] ss:$16 sps:$4 sm:$0xff]  }
 0x2d6   :  { %6930 = vmatpush1.bf16.msra.mxu0 %v10687_v44  ;;  %7505 = vmatprep.subr.bf16.mxu1 %v10698_v18  ;;  %v10772_v44 = vld [vmem:[#allocation2 + $0x1780] ss:$16 sps:$4 sm:$0xff]   ;;  %v10783_v18 = vld [vmem:[#allocation2 + $0x13ac] ss:$16 sps:$4 sm:$0xff]  }
 0x2d7   :  { %6931 = vmatprep.subr.bf16.mxu0 %v10695_v47  ;;  %v10780_v47 = vld [vmem:[#allocation2 + $0x17a4] ss:$16 sps:$4 sm:$0xff]  }
 0x2d9   :  { %7506 = vmatpush1.bf16.msra.mxu1 %v10696_v51  ;;  %v10781_v51 = vld [vmem:[#allocation2 + $0x13a8] ss:$16 sps:$4 sm:$0xff]  }
 0x2da   :  { %6932 = vmatpush1.bf16.msra.mxu0 %v10693_v48  ;;  %7516 = vmatprep.subr.bf16.mxu1 %v10705_v52  ;;  %v10778_v48 = vld [vmem:[#allocation2 + $0x17a0] ss:$16 sps:$4 sm:$0xff]   ;;  %v10789_v52 = vld [vmem:[#allocation2 + $0x13cc] ss:$16 sps:$4 sm:$0xff]  }
 0x2db   :  { %6942 = vmatprep.subr.bf16.mxu0 %v10702_v30  ;;  %v10786_v30 = vld [vmem:[#allocation2 + $0x17c4] ss:$16 sps:$4 sm:$0xff]  }
 0x2dc   :  { %7508 = vmatmul.mubr.bf16.vlgmr.msra.gmra.mrb[4].mxu1 %v11759_v32  ;;  %v10723_v32 = vld [vmem:[#allocation2 + $0x126c] ss:$16 sps:$4 sm:$0xff]  }
 0x2dd   :  { %6934 = vmatmul.mubr.bf16.vlgmr.msra.gmra.mrb[0].mxu0 %v11790_v53  ;;  %7517 = vmatpush1.bf16.msra.mxu1 %v10703_v17  ;;  %v10784_v17 = vld [vmem:[#allocation2 + $0x17c0] ss:$16 sps:$4 sm:$0xff]  }
 0x2de   :  { %6943 = vmatpush1.bf16.msra.mxu0 %v10700_v54  ;;  %7518 = vmatprep.subr.bf16.mxu1 %v10711_v27  ;;  %v11803_v54 = vld [vmem:[%s12002_s0 + $0x18] sm:$0xff]  ;;  %v10792_v27 = vld [vmem:[#allocation2 + $0x17e4] ss:$16 sps:$4 sm:$0xff]  }
 0x2df   :  { %6944 = vmatprep.subr.bf16.mxu0 %v10708_v55  ;;  %6974 = vmatprep.mubr.bf16.mxu0 %v11794_v56  ;;  %v10787_v55 = vld [vmem:[#allocation2 + $0x13c8] ss:$16 sps:$4 sm:$0xff]  }
 0x2e0   :  { %7548 = vmatprep.mubr.bf16.mxu1 %v11763_v35  ;;  %v10727_v35 = vld [vmem:[#allocation2 + $0x1288] ss:$16 sps:$4 sm:$0xff]  }
 0x2e1   :  { %7519 = vmatpush1.bf16.msra.mxu1 %v10709_v24  ;;  %v11807_v24 = vrot.slane %v11803_v54, %v11631_v49 }
 0x2e2   :  { %6945 = vmatpush1.bf16.msra.mxu0 %v10706_v12  ;;  %7520 = vmatprep.subr.bf16.mxu1 %v10717_v23  ;;  %v10795_v12 = vld [vmem:[#allocation2 + $0x13ec] ss:$16 sps:$4 sm:$0xff]   ;;  %v10793_v23 = vld [vmem:[#allocation2 + $0x13e8] ss:$16 sps:$4 sm:$0xff]  }
 0x2e3   :  { %6946 = vmatprep.subr.bf16.mxu0 %v10714_v58  ;;  %v10790_v58 = vld [vmem:[#allocation2 + $0x17e0] ss:$16 sps:$4 sm:$0xff]  }
 0x2e5   :  { %7521 = vmatpush1.bf16.msra.mxu1 %v10715_v60  ;;  %v10801_v60 = vld [vmem:[#allocation2 + $0x140c] ss:$16 sps:$4 sm:$0xff]  }
 0x2e6   :  { %6947 = vmatpush1.bf16.msra.mxu0 %v10712_v59  ;;  %7522 = vmatprep.subr.bf16.mxu1 %v10723_v32  ;;  %v10798_v59 = vld [vmem:[#allocation2 + $0x1804] ss:$16 sps:$4 sm:$0xff]   ;;  %v11813_v32 = vcombine.high %v11790_v53, %v11790_v53 }
 0x2e7   :  { %6948 = vmatprep.subr.bf16.mxu0 %v10720_v31  ;;  %v1305_v31 = vcombine.high %v11807_v24, %v11807_v24 }
 0x2e9   :  { %7523 = vmatpush1.bf16.msra.mxu1 %v10721_v63  ;;  %v10799_v63 = vld [vmem:[#allocation2 + $0x1408] ss:$16 sps:$4 sm:$0xff]  }
 0x2ea   :  { %6949 = vmatpush1.bf16.msra.mxu0 %v10718_v62  ;;  %7524 = vmatprep.subr.bf16.mxu1 %v10729_v2  ;;  %v10796_v62 = vld [vmem:[#allocation2 + $0x1800] ss:$16 sps:$4 sm:$0xff]   ;;  %v10807_v2 = vld [vmem:[#allocation2 + $0x142c] ss:$16 sps:$4 sm:$0xff]  }
 0x2eb   :  { %6950 = vmatprep.subr.bf16.mxu0 %v10726_v1  ;;  %v10804_v1 = vld [vmem:[#allocation2 + $0x1824] ss:$16 sps:$4 sm:$0xff]  }
 0x2ed   :  { %7525 = vmatpush1.bf16.msra.mxu1 %v10727_v35  ;;  %v10802_v35 = vld [vmem:[#allocation2 + $0x1820] ss:$16 sps:$4 sm:$0xff]  }
 0x2ee   :  { %6951 = vmatpush1.bf16.msra.mxu0 %v10724_v3  ;;  %7526 = vmatprep.subr.bf16.mxu1 %v10735_v8  ;;  %v11816_v3 = vrot.slane %v1305_v31, %v11631_v49  ;;  %v10810_v8 = vld [vmem:[#allocation2 + $0x1844] ss:$16 sps:$4 sm:$0xff]   ;;  %v10877_v31 = vld [vmem:[#allocation2 + $0x15a8] ss:$16 sps:$4 sm:$0xff]  }
 0x2ef   :  { %6952 = vmatprep.subr.bf16.mxu0 %v10732_v37  ;;  %v10805_v37 = vld [vmem:[#allocation2 + $0x1428] ss:$16 sps:$4 sm:$0xff]  }
 0x2f1   :  { %7527 = vmatpush1.bf16.msra.mxu1 %v10733_v22  ;;  %v10808_v22 = vld [vmem:[#allocation2 + $0x1840] ss:$16 sps:$4 sm:$0xff]  }
 0x2f2   :  { %6953 = vmatpush1.bf16.msra.mxu0 %v10730_v9  ;;  %7528 = vmatprep.subr.bf16.mxu1 %v10741_v14  ;;  %v10813_v9 = vld [vmem:[#allocation2 + $0x144c] ss:$16 sps:$4 sm:$0xff]   ;;  %v10816_v14 = vld [vmem:[#allocation2 + $0x1864] ss:$16 sps:$4 sm:$0xff]  }
 0x2f3   :  { %6954 = vmatprep.subr.bf16.mxu0 %v10738_v13  ;;  %v10811_v13 = vld [vmem:[#allocation2 + $0x1448] ss:$16 sps:$4 sm:$0xff]  }
 0x2f5   :  { %7529 = vmatpush1.bf16.msra.mxu1 %v10739_v15  ;;  %v10817_v15 = vld [vmem:[#allocation2 + $0x1468] ss:$16 sps:$4 sm:$0xff]  }
 0x2f6   :  { %6955 = vmatpush1.bf16.msra.mxu0 %v10736_v40  ;;  %7530 = vmatprep.subr.bf16.mxu1 %v10747_v46  ;;  %v10814_v40 = vld [vmem:[#allocation2 + $0x1860] ss:$16 sps:$4 sm:$0xff]   ;;  %v10825_v46 = vld [vmem:[#allocation2 + $0x148c] ss:$16 sps:$4 sm:$0xff]  }
 0x2f7   :  { %6956 = vmatprep.subr.bf16.mxu0 %v10744_v16  ;;  %v10822_v16 = vld [vmem:[#allocation2 + $0x1884] ss:$16 sps:$4 sm:$0xff]  }
 0x2f9   :  { %7531 = vmatpush1.bf16.msra.mxu1 %v10745_v20  ;;  %v10828_v20 = vld [vmem:[#allocation2 + $0x18a4] ss:$16 sps:$4 sm:$0xff]  }
 0x2fa   :  { %6957 = vmatpush1.bf16.msra.mxu0 %v10742_v19  ;;  %7532 = vmatprep.subr.bf16.mxu1 %v10753_v25  ;;  %v10820_v19 = vld [vmem:[#allocation2 + $0x1880] ss:$16 sps:$4 sm:$0xff]  }
 0x2fb   :  { %6958 = vmatprep.subr.bf16.mxu0 %v10750_v21  ;;  %v10831_v21 = vld [vmem:[#allocation2 + $0x14ac] ss:$16 sps:$4 sm:$0xff]   ;;  %v10826_v25 = vld [vmem:[#allocation2 + $0x18a0] ss:$16 sps:$4 sm:$0xff]  }
 0x2fd   :  { %7533 = vmatpush1.bf16.msra.mxu1 %v10751_v26  ;;  %v10834_v26 = vld [vmem:[#allocation2 + $0x18c4] ss:$16 sps:$4 sm:$0xff]  }
 0x2fe   :  { %6959 = vmatpush1.bf16.msra.mxu0 %v10748_v50  ;;  %7534 = vmatprep.subr.bf16.mxu1 %v10759_v29  ;;  %v10829_v50 = vld [vmem:[#allocation2 + $0x14a8] ss:$16 sps:$4 sm:$0xff]   ;;  %v10832_v29 = vld [vmem:[#allocation2 + $0x18c0] ss:$16 sps:$4 sm:$0xff]  }
 0x2ff   :  { %6960 = vmatprep.subr.bf16.mxu0 %v10756_v28  ;;  %v10837_v28 = vld [vmem:[#allocation2 + $0x14cc] ss:$16 sps:$4 sm:$0xff]  }
 0x301   :  { %7535 = vmatpush1.bf16.msra.mxu1 %v10757_v57  ;;  %v10840_v57 = vld [vmem:[#allocation2 + $0x18e4] ss:$16 sps:$4 sm:$0xff]  }
 0x302   :  { %6961 = vmatpush1.bf16.msra.mxu0 %v10754_v10  ;;  %7536 = vmatprep.subr.bf16.mxu1 %v10765_v34  ;;  %v10835_v10 = vld [vmem:[#allocation2 + $0x14c8] ss:$16 sps:$4 sm:$0xff]   ;;  %v10838_v34 = vld [vmem:[#allocation2 + $0x18e0] ss:$16 sps:$4 sm:$0xff]  }
 0x303   :  { %6962 = vmatprep.subr.bf16.mxu0 %v10762_v33  ;;  %v10843_v33 = vld [vmem:[#allocation2 + $0x14ec] ss:$16 sps:$4 sm:$0xff]  }
 0x305   :  { %7537 = vmatpush1.bf16.msra.mxu1 %v10763_v36  ;;  %v10846_v36 = vld [vmem:[#allocation2 + $0x1904] ss:$16 sps:$4 sm:$0xff]  }
 0x306   :  { %6963 = vmatpush1.bf16.msra.mxu0 %v10760_v7  ;;  %7538 = vmatprep.subr.bf16.mxu1 %v10771_v38  ;;  %v10841_v7 = vld [vmem:[#allocation2 + $0x14e8] ss:$16 sps:$4 sm:$0xff]   ;;  %v10844_v38 = vld [vmem:[#allocation2 + $0x1900] ss:$16 sps:$4 sm:$0xff]  }
 0x307   :  { %6964 = vmatprep.subr.bf16.mxu0 %v10768_v61  ;;  %v10849_v61 = vld [vmem:[#allocation2 + $0x150c] ss:$16 sps:$4 sm:$0xff]  }
 0x309   :  { %7539 = vmatpush1.bf16.msra.mxu1 %v10769_v41  ;;  %v10852_v41 = vld [vmem:[#allocation2 + $0x1924] ss:$16 sps:$4 sm:$0xff]  }
 0x30a   :  { %6965 = vmatpush1.bf16.msra.mxu0 %v10766_v39  ;;  %7540 = vmatprep.subr.bf16.mxu1 %v10777_v0  ;;  %v10847_v39 = vld [vmem:[#allocation2 + $0x1508] ss:$16 sps:$4 sm:$0xff]   ;;  %v10850_v0 = vld [vmem:[#allocation2 + $0x1920] ss:$16 sps:$4 sm:$0xff]  }
 0x30b   :  { %6966 = vmatprep.subr.bf16.mxu0 %v10774_v6  ;;  %v10855_v6 = vld [vmem:[#allocation2 + $0x152c] ss:$16 sps:$4 sm:$0xff]  }
 0x30d   :  { %7541 = vmatpush1.bf16.msra.mxu1 %v10775_v45  ;;  %v10858_v45 = vld [vmem:[#allocation2 + $0x1944] ss:$16 sps:$4 sm:$0xff]  }
 0x30e   :  { %6967 = vmatpush1.bf16.msra.mxu0 %v10772_v44  ;;  %7542 = vmatprep.subr.bf16.mxu1 %v10783_v18  ;;  %v10853_v44 = vld [vmem:[#allocation2 + $0x1528] ss:$16 sps:$4 sm:$0xff]   ;;  %v10856_v18 = vld [vmem:[#allocation2 + $0x1940] ss:$16 sps:$4 sm:$0xff]  }
 0x30f   :  { %6968 = vmatprep.subr.bf16.mxu0 %v10780_v47  ;;  %v10861_v47 = vld [vmem:[#allocation2 + $0x154c] ss:$16 sps:$4 sm:$0xff]  }
 0x311   :  { %7543 = vmatpush1.bf16.msra.mxu1 %v10781_v51  ;;  %v10864_v51 = vld [vmem:[#allocation2 + $0x1964] ss:$16 sps:$4 sm:$0xff]  }
 0x312   :  { %6969 = vmatpush1.bf16.msra.mxu0 %v10778_v48  ;;  %7544 = vmatprep.subr.bf16.mxu1 %v10789_v52  ;;  %v10859_v48 = vld [vmem:[#allocation2 + $0x1548] ss:$16 sps:$4 sm:$0xff]   ;;  %v10862_v52 = vld [vmem:[#allocation2 + $0x1960] ss:$16 sps:$4 sm:$0xff]  }
 0x313   :  { %6970 = vmatprep.subr.bf16.mxu0 %v10786_v30  ;;  %v10867_v30 = vld [vmem:[#allocation2 + $0x156c] ss:$16 sps:$4 sm:$0xff]  }
 0x315   :  { %7545 = vmatpush1.bf16.msra.mxu1 %v10787_v55  ;;  %v10870_v55 = vld [vmem:[#allocation2 + $0x1984] ss:$16 sps:$4 sm:$0xff]  }
 0x316   :  { %6971 = vmatpush1.bf16.msra.mxu0 %v10784_v17  ;;  %7546 = vmatprep.subr.bf16.mxu1 %v10795_v12  ;;  %v10865_v17 = vld [vmem:[#allocation2 + $0x1568] ss:$16 sps:$4 sm:$0xff]   ;;  %v10868_v12 = vld [vmem:[#allocation2 + $0x1980] ss:$16 sps:$4 sm:$0xff]  }
 0x317   :  { %6972 = vmatprep.subr.bf16.mxu0 %v10792_v27  ;;  %v10873_v27 = vld [vmem:[#allocation2 + $0x158c] ss:$16 sps:$4 sm:$0xff]  }
 0x319   :  { %7547 = vmatpush1.bf16.msra.mxu1 %v10793_v23  ;;  %v10876_v23 = vld [vmem:[#allocation2 + $0x19a4] ss:$16 sps:$4 sm:$0xff]  }
 0x31a   :  { %6973 = vmatpush1.bf16.msra.mxu0 %v10790_v58  ;;  %7557 = vmatprep.subr.bf16.mxu1 %v10801_v60  ;;  %v10871_v58 = vld [vmem:[#allocation2 + $0x1588] ss:$16 sps:$4 sm:$0xff]   ;;  %v10874_v60 = vld [vmem:[#allocation2 + $0x19a0] ss:$16 sps:$4 sm:$0xff]  }
 0x31b   :  { %6983 = vmatprep.subr.bf16.mxu0 %v10798_v59  ;;  %v10879_v59 = vld [vmem:[#allocation2 + $0x15ac] ss:$16 sps:$4 sm:$0xff]  }
 0x31c   :  { %7549 = vmatmul.mubr.bf16.vlgmr.msra.gmra.mrb[4].mxu1 %v11779_v43  ;;  %v10819_v43 = vld [vmem:[#allocation2 + $0x146c] ss:$16 sps:$4 sm:$0xff]  }
 0x31d   :  { %6975 = vmatmul.mubr.bf16.vlgmr.msra.gmra.mrb[0].mxu0 %v11813_v32  ;;  %7558 = vmatpush1.bf16.msra.mxu1 %v10799_v63  ;;  %v10885_v63 = vld [vmem:[#allocation2 + $0x15cc] ss:$16 sps:$4 sm:$0xff]  }
 0x31e   :  { %6984 = vmatpush1.bf16.msra.mxu0 %v10796_v62  ;;  %7559 = vmatprep.subr.bf16.mxu1 %v10807_v2  ;;  %v10882_v62 = vld [vmem:[#allocation2 + $0x19c4] ss:$16 sps:$4 sm:$0xff]   ;;  %v10883_v2 = vld [vmem:[#allocation2 + $0x15c8] ss:$16 sps:$4 sm:$0xff]  }
 0x31f   :  { %6985 = vmatprep.subr.bf16.mxu0 %v10804_v1  ;;  %7015 = vmatprep.mubr.bf16.mxu0 %v11816_v3  ;;  %v10880_v1 = vld [vmem:[#allocation2 + $0x19c0] ss:$16 sps:$4 sm:$0xff]  }
 0x320   :  { %7589 = vmatprep.mubr.bf16.mxu1 %v11782_v11  ;;  %v10823_v11 = vld [vmem:[#allocation2 + $0x1488] ss:$16 sps:$4 sm:$0xff]  }
 0x321   :  { %7560 = vmatpush1.bf16.msra.mxu1 %v10805_v37  ;;  %v10891_v37 = vld [vmem:[#allocation2 + $0x15ec] ss:$16 sps:$4 sm:$0xff]  }
 0x322   :  { %6986 = vmatpush1.bf16.msra.mxu0 %v10802_v35  ;;  %7561 = vmatprep.subr.bf16.mxu1 %v10813_v9  ;;  %v10888_v35 = vld [vmem:[#allocation2 + $0x19e4] ss:$16 sps:$4 sm:$0xff]   ;;  %v10889_v9 = vld [vmem:[#allocation2 + $0x15e8] ss:$16 sps:$4 sm:$0xff]  }
 0x323   :  { %6987 = vmatprep.subr.bf16.mxu0 %v10810_v8  ;;  %v10886_v8 = vld [vmem:[#allocation2 + $0x19e0] ss:$16 sps:$4 sm:$0xff]  }
 0x325   :  { %7562 = vmatpush1.bf16.msra.mxu1 %v10811_v13  ;;  %v10897_v13 = vld [vmem:[#allocation2 + $0x160c] ss:$16 sps:$4 sm:$0xff]  }
 0x326   :  { %6988 = vmatpush1.bf16.msra.mxu0 %v10808_v22  ;;  %7563 = vmatprep.subr.bf16.mxu1 %v10819_v43  ;;  %v10894_v22 = vld [vmem:[#allocation2 + $0x1a04] ss:$16 sps:$4 sm:$0xff]   ;;  %v10892_v43 = vld [vmem:[#allocation2 + $0x1a00] ss:$16 sps:$4 sm:$0xff]  }
 0x327   :  { %6989 = vmatprep.subr.bf16.mxu0 %v10816_v14  ;;  %v11824_v14 = vrot.slane %v11807_v24, %v11631_v49  ;;  %v10898_v24 = vld [vmem:[#allocation2 + $0x1a20] ss:$16 sps:$4 sm:$0xff]  }
 0x329   :  { %7564 = vmatpush1.bf16.msra.mxu1 %v10817_v15  ;;  %v10900_v15 = vld [vmem:[#allocation2 + $0x1a24] ss:$16 sps:$4 sm:$0xff]  }
 0x32a   :  { %6990 = vmatpush1.bf16.msra.mxu0 %v10814_v40  ;;  %7565 = vmatprep.subr.bf16.mxu1 %v10825_v46  ;;  %v10895_v40 = vld [vmem:[#allocation2 + $0x1608] ss:$16 sps:$4 sm:$0xff]   ;;  %v11828_v46 = vcombine.high %v11816_v3, %v11816_v3 }
 0x32b   :  { %6991 = vmatprep.subr.bf16.mxu0 %v10822_v16  ;;  %v10903_v16 = vld [vmem:[#allocation2 + $0x162c] ss:$16 sps:$4 sm:$0xff]  }
 0x32d   :  { %7566 = vmatpush1.bf16.msra.mxu1 %v10823_v11  ;;  %v10906_v11 = vld [vmem:[#allocation2 + $0x1a44] ss:$16 sps:$4 sm:$0xff]  }
 0x32e   :  { %6992 = vmatpush1.bf16.msra.mxu0 %v10820_v19  ;;  %7567 = vmatprep.subr.bf16.mxu1 %v10831_v21  ;;  %v10901_v19 = vld [vmem:[#allocation2 + $0x1628] ss:$16 sps:$4 sm:$0xff]   ;;  %v10904_v21 = vld [vmem:[#allocation2 + $0x1a40] ss:$16 sps:$4 sm:$0xff]  }
 0x32f   :  { %6993 = vmatprep.subr.bf16.mxu0 %v10828_v20  ;;  %v10909_v20 = vld [vmem:[#allocation2 + $0x164c] ss:$16 sps:$4 sm:$0xff]  }
 0x331   :  { %7568 = vmatpush1.bf16.msra.mxu1 %v10829_v50  ;;  %v10912_v50 = vld [vmem:[#allocation2 + $0x1a64] ss:$16 sps:$4 sm:$0xff]  }
 0x332   :  { %6994 = vmatpush1.bf16.msra.mxu0 %v10826_v25  ;;  %7569 = vmatprep.subr.bf16.mxu1 %v10837_v28  ;;  %v10907_v25 = vld [vmem:[#allocation2 + $0x1648] ss:$16 sps:$4 sm:$0xff]  }
 0x333   :  { %6995 = vmatprep.subr.bf16.mxu0 %v10834_v26  ;;  %v10910_v26 = vld [vmem:[#allocation2 + $0x1a60] ss:$16 sps:$4 sm:$0xff]   ;;  %v10913_v28 = vld [vmem:[#allocation2 + $0x1668] ss:$16 sps:$4 sm:$0xff]  }
 0x335   :  { %7570 = vmatpush1.bf16.msra.mxu1 %v10835_v10  ;;  %v10921_v10 = vld [vmem:[#allocation2 + $0x168c] ss:$16 sps:$4 sm:$0xff]  }
 0x336   :  { %6996 = vmatpush1.bf16.msra.mxu0 %v10832_v29  ;;  %7571 = vmatprep.subr.bf16.mxu1 %v10843_v33  ;;  %v10918_v29 = vld [vmem:[#allocation2 + $0x1a84] ss:$16 sps:$4 sm:$0xff]  }
 0x337   :  { %6997 = vmatprep.subr.bf16.mxu0 %v10840_v57  ;;  %v10916_v57 = vld [vmem:[#allocation2 + $0x1a80] ss:$16 sps:$4 sm:$0xff]   ;;  %v10924_v33 = vld [vmem:[#allocation2 + $0x1aa4] ss:$16 sps:$4 sm:$0xff]  }
 0x339   :  { %7572 = vmatpush1.bf16.msra.mxu1 %v10841_v7  ;;  %v10922_v7 = vld [vmem:[#allocation2 + $0x1aa0] ss:$16 sps:$4 sm:$0xff]  }
 0x33a   :  { %6998 = vmatpush1.bf16.msra.mxu0 %v10838_v34  ;;  %7573 = vmatprep.subr.bf16.mxu1 %v10849_v61  ;;  %v10927_v34 = vld [vmem:[#allocation2 + $0x16ac] ss:$16 sps:$4 sm:$0xff]   ;;  %v10930_v61 = vld [vmem:[#allocation2 + $0x1ac4] ss:$16 sps:$4 sm:$0xff]  }
 0x33b   :  { %6999 = vmatprep.subr.bf16.mxu0 %v10846_v36  ;;  %v10925_v36 = vld [vmem:[#allocation2 + $0x16a8] ss:$16 sps:$4 sm:$0xff]  }
 0x33d   :  { %7574 = vmatpush1.bf16.msra.mxu1 %v10847_v39  ;;  %v10928_v39 = vld [vmem:[#allocation2 + $0x1ac0] ss:$16 sps:$4 sm:$0xff]  }
 0x33e   :  { %7000 = vmatpush1.bf16.msra.mxu0 %v10844_v38  ;;  %7575 = vmatprep.subr.bf16.mxu1 %v10855_v6  ;;  %v10933_v38 = vld [vmem:[#allocation2 + $0x16cc] ss:$16 sps:$4 sm:$0xff]   ;;  %v10936_v6 = vld [vmem:[#allocation2 + $0x1ae4] ss:$16 sps:$4 sm:$0xff]  }
 0x33f   :  { %7001 = vmatprep.subr.bf16.mxu0 %v10852_v41  ;;  %v10931_v41 = vld [vmem:[#allocation2 + $0x16c8] ss:$16 sps:$4 sm:$0xff]  }
 0x341   :  { %7576 = vmatpush1.bf16.msra.mxu1 %v10853_v44  ;;  %v10934_v44 = vld [vmem:[#allocation2 + $0x1ae0] ss:$16 sps:$4 sm:$0xff]  }
 0x342   :  { %7002 = vmatpush1.bf16.msra.mxu0 %v10850_v0  ;;  %7577 = vmatprep.subr.bf16.mxu1 %v10861_v47  ;;  %v10939_v0 = vld [vmem:[#allocation2 + $0x16ec] ss:$16 sps:$4 sm:$0xff]   ;;  %v10942_v47 = vld [vmem:[#allocation2 + $0x1b04] ss:$16 sps:$4 sm:$0xff]  }
 0x343   :  { %7003 = vmatprep.subr.bf16.mxu0 %v10858_v45  ;;  %v10937_v45 = vld [vmem:[#allocation2 + $0x16e8] ss:$16 sps:$4 sm:$0xff]  }
 0x345   :  { %7578 = vmatpush1.bf16.msra.mxu1 %v10859_v48  ;;  %v10940_v48 = vld [vmem:[#allocation2 + $0x1b00] ss:$16 sps:$4 sm:$0xff]  }
 0x346   :  { %7004 = vmatpush1.bf16.msra.mxu0 %v10856_v18  ;;  %7579 = vmatprep.subr.bf16.mxu1 %v10867_v30  ;;  %v10945_v18 = vld [vmem:[#allocation2 + $0x170c] ss:$16 sps:$4 sm:$0xff]   ;;  %v10948_v30 = vld [vmem:[#allocation2 + $0x1b24] ss:$16 sps:$4 sm:$0xff]  }
 0x347   :  { %7005 = vmatprep.subr.bf16.mxu0 %v10864_v51  ;;  %v10943_v51 = vld [vmem:[#allocation2 + $0x1708] ss:$16 sps:$4 sm:$0xff]  }
 0x349   :  { %7580 = vmatpush1.bf16.msra.mxu1 %v10865_v17  ;;  %v10946_v17 = vld [vmem:[#allocation2 + $0x1b20] ss:$16 sps:$4 sm:$0xff]  }
 0x34a   :  { %7006 = vmatpush1.bf16.msra.mxu0 %v10862_v52  ;;  %7581 = vmatprep.subr.bf16.mxu1 %v10873_v27  ;;  %v10951_v52 = vld [vmem:[#allocation2 + $0x172c] ss:$16 sps:$4 sm:$0xff]   ;;  %v10954_v27 = vld [vmem:[#allocation2 + $0x1b44] ss:$16 sps:$4 sm:$0xff]  }
 0x34b   :  { %7007 = vmatprep.subr.bf16.mxu0 %v10870_v55  ;;  %v10949_v55 = vld [vmem:[#allocation2 + $0x1728] ss:$16 sps:$4 sm:$0xff]  }
 0x34d   :  { %7582 = vmatpush1.bf16.msra.mxu1 %v10871_v58  ;;  %v10952_v58 = vld [vmem:[#allocation2 + $0x1b40] ss:$16 sps:$4 sm:$0xff]  }
 0x34e   :  { %7008 = vmatpush1.bf16.msra.mxu0 %v10868_v12  ;;  %7583 = vmatprep.subr.bf16.mxu1 %v10879_v59  ;;  %v10957_v12 = vld [vmem:[#allocation2 + $0x174c] ss:$16 sps:$4 sm:$0xff]   ;;  %v10960_v59 = vld [vmem:[#allocation2 + $0x1b64] ss:$16 sps:$4 sm:$0xff]  }
 0x34f   :  { %7009 = vmatprep.subr.bf16.mxu0 %v10876_v23  ;;  %v10955_v23 = vld [vmem:[#allocation2 + $0x1748] ss:$16 sps:$4 sm:$0xff]  }
 0x351   :  { %7584 = vmatpush1.bf16.msra.mxu1 %v10877_v31  ;;  %v10958_v31 = vld [vmem:[#allocation2 + $0x1b60] ss:$16 sps:$4 sm:$0xff]  }
 0x352   :  { %7010 = vmatpush1.bf16.msra.mxu0 %v10874_v60  ;;  %7585 = vmatprep.subr.bf16.mxu1 %v10885_v63  ;;  %v10963_v60 = vld [vmem:[#allocation2 + $0x176c] ss:$16 sps:$4 sm:$0xff]   ;;  %v10966_v63 = vld [vmem:[#allocation2 + $0x1b84] ss:$16 sps:$4 sm:$0xff]  }
 0x353   :  { %7011 = vmatprep.subr.bf16.mxu0 %v10882_v62  ;;  %v10961_v62 = vld [vmem:[#allocation2 + $0x1768] ss:$16 sps:$4 sm:$0xff]  }
 0x355   :  { %7586 = vmatpush1.bf16.msra.mxu1 %v10883_v2  ;;  %v10964_v2 = vld [vmem:[#allocation2 + $0x1b80] ss:$16 sps:$4 sm:$0xff]  }
 0x356   :  { %7012 = vmatpush1.bf16.msra.mxu0 %v10880_v1  ;;  %7587 = vmatprep.subr.bf16.mxu1 %v10891_v37  ;;  %v10969_v1 = vld [vmem:[#allocation2 + $0x178c] ss:$16 sps:$4 sm:$0xff]   ;;  %v10972_v37 = vld [vmem:[#allocation2 + $0x1ba4] ss:$16 sps:$4 sm:$0xff]  }
 0x357   :  { %7013 = vmatprep.subr.bf16.mxu0 %v10888_v35  ;;  %v10967_v35 = vld [vmem:[#allocation2 + $0x1788] ss:$16 sps:$4 sm:$0xff]  }
 0x359   :  { %7588 = vmatpush1.bf16.msra.mxu1 %v10889_v9  ;;  %v10970_v9 = vld [vmem:[#allocation2 + $0x1ba0] ss:$16 sps:$4 sm:$0xff]  }
 0x35a   :  { %7014 = vmatpush1.bf16.msra.mxu0 %v10886_v8  ;;  %7598 = vmatprep.subr.bf16.mxu1 %v10897_v13  ;;  %v10975_v8 = vld [vmem:[#allocation2 + $0x17ac] ss:$16 sps:$4 sm:$0xff]   ;;  %v10978_v13 = vld [vmem:[#allocation2 + $0x1bc4] ss:$16 sps:$4 sm:$0xff]  }
 0x35b   :  { %7024 = vmatprep.subr.bf16.mxu0 %v10894_v22  ;;  %v10973_v22 = vld [vmem:[#allocation2 + $0x17a8] ss:$16 sps:$4 sm:$0xff]  }
 0x35c   :  { %7590 = vmatmul.mubr.bf16.vlgmr.msra.gmra.mrb[4].mxu1 %v11790_v53  ;;  %v10915_v53 = vld [vmem:[#allocation2 + $0x166c] ss:$16 sps:$4 sm:$0xff]  }
 0x35d   :  { %7016 = vmatmul.mubr.bf16.vlgmr.msra.gmra.mrb[0].mxu0 %v11824_v14  ;;  %7599 = vmatpush1.bf16.msra.mxu1 %v10895_v40  ;;  %v1290_v40 = vcombine.high %v11803_v54, %v11803_v54 }
 0x35e   :  { %7025 = vmatpush1.bf16.msra.mxu0 %v10892_v43  ;;  %7600 = vmatprep.subr.bf16.mxu1 %v10903_v16  ;;  %v10981_v43 = vld [vmem:[#allocation2 + $0x17cc] ss:$16 sps:$4 sm:$0xff]   ;;  %v10979_v16 = vld [vmem:[#allocation2 + $0x17c8] ss:$16 sps:$4 sm:$0xff]  }
 0x35f   :  { %7026 = vmatprep.subr.bf16.mxu0 %v10900_v15  ;;  %7056 = vmatprep.mubr.bf16.mxu0 %v11828_v46  ;;  %v10976_v15 = vld [vmem:[#allocation2 + $0x1bc0] ss:$16 sps:$4 sm:$0xff]  }
 0x360   :  { %7630 = vmatprep.mubr.bf16.mxu1 %v11794_v56  ;;  %v10919_v56 = vld [vmem:[#allocation2 + $0x1688] ss:$16 sps:$4 sm:$0xff]  }
 0x361   :  { %7601 = vmatpush1.bf16.msra.mxu1 %v10901_v19  ;;  %v10987_v19 = vld [vmem:[#allocation2 + $0x17ec] ss:$16 sps:$4 sm:$0xff]  }
 0x362   :  { %7027 = vmatpush1.bf16.msra.mxu0 %v10898_v24  ;;  %7602 = vmatprep.subr.bf16.mxu1 %v10909_v20  ;;  %v10984_v24 = vld [vmem:[#allocation2 + $0x1be4] ss:$16 sps:$4 sm:$0xff]   ;;  %v10982_v20 = vld [vmem:[#allocation2 + $0x1be0] ss:$16 sps:$4 sm:$0xff]  }
 0x363   :  { %7028 = vmatprep.subr.bf16.mxu0 %v10906_v11  ;;  %v11837_v11 = vrot.slane %v1290_v40, %v11631_v49  ;;  %v11057_v40 = vld [vmem:[#allocation2 + $0x1968] ss:$16 sps:$4 sm:$0xff]  }
 0x365   :  { %7603 = vmatpush1.bf16.msra.mxu1 %v10907_v25  ;;  %v10990_v25 = vld [vmem:[#allocation2 + $0x1c04] ss:$16 sps:$4 sm:$0xff]   ;;  %v1306_v54 = vcombine.high %v11837_v11, %v11837_v11 }
 0x366   :  { %7029 = vmatpush1.bf16.msra.mxu0 %v10904_v21  ;;  %7604 = vmatprep.subr.bf16.mxu1 %v10915_v53  ;;  %v10985_v21 = vld [vmem:[#allocation2 + $0x17e8] ss:$16 sps:$4 sm:$0xff]   ;;  %v11843_v53 = vcombine.high %v11824_v14, %v11824_v14 }
 0x367   :  { %7030 = vmatprep.subr.bf16.mxu0 %v10912_v50  ;;  %v10993_v50 = vld [vmem:[#allocation2 + $0x180c] ss:$16 sps:$4 sm:$0xff]  }
 0x369   :  { %7605 = vmatpush1.bf16.msra.mxu1 %v10913_v28  ;;  %v10991_v28 = vld [vmem:[#allocation2 + $0x1808] ss:$16 sps:$4 sm:$0xff]  }
 0x36a   :  { %7031 = vmatpush1.bf16.msra.mxu0 %v10910_v26  ;;  %7606 = vmatprep.subr.bf16.mxu1 %v10921_v10  ;;  %v10988_v26 = vld [vmem:[#allocation2 + $0x1c00] ss:$16 sps:$4 sm:$0xff]   ;;  %v10999_v10 = vld [vmem:[#allocation2 + $0x182c] ss:$16 sps:$4 sm:$0xff]  }
 0x36b   :  { %7032 = vmatprep.subr.bf16.mxu0 %v10918_v29  ;;  %v10996_v29 = vld [vmem:[#allocation2 + $0x1c24] ss:$16 sps:$4 sm:$0xff]  }
 0x36d   :  { %7607 = vmatpush1.bf16.msra.mxu1 %v10919_v56  ;;  %v10994_v56 = vld [vmem:[#allocation2 + $0x1c20] ss:$16 sps:$4 sm:$0xff]  }
 0x36e   :  { %7033 = vmatpush1.bf16.msra.mxu0 %v10916_v57  ;;  %7608 = vmatprep.subr.bf16.mxu1 %v10927_v34  ;;  %v11846_v57 = vrot.slane %v1306_v54, %v11631_v49  ;;  %v11002_v34 = vld [vmem:[#allocation2 + $0x1c44] ss:$16 sps:$4 sm:$0xff]  }
 0x36f   :  { %7034 = vmatprep.subr.bf16.mxu0 %v10924_v33  ;;  %v10997_v33 = vld [vmem:[#allocation2 + $0x1828] ss:$16 sps:$4 sm:$0xff]   ;;  %v11074_v54 = vld [vmem:[#allocation2 + $0x1dc4] ss:$16 sps:$4 sm:$0xff]  }
 0x371   :  { %7609 = vmatpush1.bf16.msra.mxu1 %v10925_v36  ;;  %v11000_v36 = vld [vmem:[#allocation2 + $0x1c40] ss:$16 sps:$4 sm:$0xff]  }
 0x372   :  { %7035 = vmatpush1.bf16.msra.mxu0 %v10922_v7  ;;  %7610 = vmatprep.subr.bf16.mxu1 %v10933_v38  ;;  %v11005_v7 = vld [vmem:[#allocation2 + $0x184c] ss:$16 sps:$4 sm:$0xff]   ;;  %v11008_v38 = vld [vmem:[#allocation2 + $0x1c64] ss:$16 sps:$4 sm:$0xff]  }
 0x373   :  { %7036 = vmatprep.subr.bf16.mxu0 %v10930_v61  ;;  %v11003_v61 = vld [vmem:[#allocation2 + $0x1848] ss:$16 sps:$4 sm:$0xff]  }
 0x375   :  { %7611 = vmatpush1.bf16.msra.mxu1 %v10931_v41  ;;  %v11009_v41 = vld [vmem:[#allocation2 + $0x1868] ss:$16 sps:$4 sm:$0xff]  }
 0x376   :  { %7037 = vmatpush1.bf16.msra.mxu0 %v10928_v39  ;;  %7612 = vmatprep.subr.bf16.mxu1 %v10939_v0  ;;  %v11006_v39 = vld [vmem:[#allocation2 + $0x1c60] ss:$16 sps:$4 sm:$0xff]   ;;  %v11017_v0 = vld [vmem:[#allocation2 + $0x188c] ss:$16 sps:$4 sm:$0xff]  }
 0x377   :  { %7038 = vmatprep.subr.bf16.mxu0 %v10936_v6  ;;  %v11014_v6 = vld [vmem:[#allocation2 + $0x1c84] ss:$16 sps:$4 sm:$0xff]  }
 0x379   :  { %7613 = vmatpush1.bf16.msra.mxu1 %v10937_v45  ;;  %v11020_v45 = vld [vmem:[#allocation2 + $0x1ca4] ss:$16 sps:$4 sm:$0xff]  }
 0x37a   :  { %7039 = vmatpush1.bf16.msra.mxu0 %v10934_v44  ;;  %7614 = vmatprep.subr.bf16.mxu1 %v10945_v18  ;;  %v11012_v44 = vld [vmem:[#allocation2 + $0x1c80] ss:$16 sps:$4 sm:$0xff]  }
 0x37b   :  { %7040 = vmatprep.subr.bf16.mxu0 %v10942_v47  ;;  %v11023_v47 = vld [vmem:[#allocation2 + $0x18ac] ss:$16 sps:$4 sm:$0xff]   ;;  %v11018_v18 = vld [vmem:[#allocation2 + $0x1ca0] ss:$16 sps:$4 sm:$0xff]  }
 0x37d   :  { %7615 = vmatpush1.bf16.msra.mxu1 %v10943_v51  ;;  %v11026_v51 = vld [vmem:[#allocation2 + $0x1cc4] ss:$16 sps:$4 sm:$0xff]  }
 0x37e   :  { %7041 = vmatpush1.bf16.msra.mxu0 %v10940_v48  ;;  %7616 = vmatprep.subr.bf16.mxu1 %v10951_v52  ;;  %v11021_v48 = vld [vmem:[#allocation2 + $0x18a8] ss:$16 sps:$4 sm:$0xff]   ;;  %v11024_v52 = vld [vmem:[#allocation2 + $0x1cc0] ss:$16 sps:$4 sm:$0xff]  }
 0x37f   :  { %7042 = vmatprep.subr.bf16.mxu0 %v10948_v30  ;;  %v11029_v30 = vld [vmem:[#allocation2 + $0x18cc] ss:$16 sps:$4 sm:$0xff]  }
 0x381   :  { %7617 = vmatpush1.bf16.msra.mxu1 %v10949_v55  ;;  %v11032_v55 = vld [vmem:[#allocation2 + $0x1ce4] ss:$16 sps:$4 sm:$0xff]  }
 0x382   :  { %7043 = vmatpush1.bf16.msra.mxu0 %v10946_v17  ;;  %7618 = vmatprep.subr.bf16.mxu1 %v10957_v12  ;;  %v11027_v17 = vld [vmem:[#allocation2 + $0x18c8] ss:$16 sps:$4 sm:$0xff]   ;;  %v11030_v12 = vld [vmem:[#allocation2 + $0x1ce0] ss:$16 sps:$4 sm:$0xff]  }
 0x383   :  { %7044 = vmatprep.subr.bf16.mxu0 %v10954_v27  ;;  %v11035_v27 = vld [vmem:[#allocation2 + $0x18ec] ss:$16 sps:$4 sm:$0xff]  }
 0x385   :  { %7619 = vmatpush1.bf16.msra.mxu1 %v10955_v23  ;;  %v11038_v23 = vld [vmem:[#allocation2 + $0x1d04] ss:$16 sps:$4 sm:$0xff]  }
 0x386   :  { %7045 = vmatpush1.bf16.msra.mxu0 %v10952_v58  ;;  %7620 = vmatprep.subr.bf16.mxu1 %v10963_v60  ;;  %v11033_v58 = vld [vmem:[#allocation2 + $0x18e8] ss:$16 sps:$4 sm:$0xff]   ;;  %v11036_v60 = vld [vmem:[#allocation2 + $0x1d00] ss:$16 sps:$4 sm:$0xff]  }
 0x387   :  { %7046 = vmatprep.subr.bf16.mxu0 %v10960_v59  ;;  %v11041_v59 = vld [vmem:[#allocation2 + $0x190c] ss:$16 sps:$4 sm:$0xff]  }
 0x389   :  { %7621 = vmatpush1.bf16.msra.mxu1 %v10961_v62  ;;  %v11044_v62 = vld [vmem:[#allocation2 + $0x1d24] ss:$16 sps:$4 sm:$0xff]  }
 0x38a   :  { %7047 = vmatpush1.bf16.msra.mxu0 %v10958_v31  ;;  %7622 = vmatprep.subr.bf16.mxu1 %v10969_v1  ;;  %v11039_v31 = vld [vmem:[#allocation2 + $0x1908] ss:$16 sps:$4 sm:$0xff]   ;;  %v11042_v1 = vld [vmem:[#allocation2 + $0x1d20] ss:$16 sps:$4 sm:$0xff]  }
 0x38b   :  { %7048 = vmatprep.subr.bf16.mxu0 %v10966_v63  ;;  %v11047_v63 = vld [vmem:[#allocation2 + $0x192c] ss:$16 sps:$4 sm:$0xff]  }
 0x38d   :  { %7623 = vmatpush1.bf16.msra.mxu1 %v10967_v35  ;;  %v11050_v35 = vld [vmem:[#allocation2 + $0x1d44] ss:$16 sps:$4 sm:$0xff]  }
 0x38e   :  { %7049 = vmatpush1.bf16.msra.mxu0 %v10964_v2  ;;  %7624 = vmatprep.subr.bf16.mxu1 %v10975_v8  ;;  %v11045_v2 = vld [vmem:[#allocation2 + $0x1928] ss:$16 sps:$4 sm:$0xff]   ;;  %v11048_v8 = vld [vmem:[#allocation2 + $0x1d40] ss:$16 sps:$4 sm:$0xff]  }
 0x38f   :  { %7050 = vmatprep.subr.bf16.mxu0 %v10972_v37  ;;  %v11053_v37 = vld [vmem:[#allocation2 + $0x194c] ss:$16 sps:$4 sm:$0xff]  }
 0x391   :  { %7625 = vmatpush1.bf16.msra.mxu1 %v10973_v22  ;;  %v11056_v22 = vld [vmem:[#allocation2 + $0x1d64] ss:$16 sps:$4 sm:$0xff]  }
 0x392   :  { %7051 = vmatpush1.bf16.msra.mxu0 %v10970_v9  ;;  %7626 = vmatprep.subr.bf16.mxu1 %v10981_v43  ;;  %v11051_v9 = vld [vmem:[#allocation2 + $0x1948] ss:$16 sps:$4 sm:$0xff]   ;;  %v11054_v43 = vld [vmem:[#allocation2 + $0x1d60] ss:$16 sps:$4 sm:$0xff]  }
 0x393   :  { %7052 = vmatprep.subr.bf16.mxu0 %v10978_v13  ;;  %v11059_v13 = vld [vmem:[#allocation2 + $0x196c] ss:$16 sps:$4 sm:$0xff]  }
 0x395   :  { %7627 = vmatpush1.bf16.msra.mxu1 %v10979_v16  ;;  %v11065_v16 = vld [vmem:[#allocation2 + $0x198c] ss:$16 sps:$4 sm:$0xff]  }
 0x396   :  { %7053 = vmatpush1.bf16.msra.mxu0 %v10976_v15  ;;  %7628 = vmatprep.subr.bf16.mxu1 %v10987_v19  ;;  %v11062_v15 = vld [vmem:[#allocation2 + $0x1d84] ss:$16 sps:$4 sm:$0xff]   ;;  %v11063_v19 = vld [vmem:[#allocation2 + $0x1988] ss:$16 sps:$4 sm:$0xff]  }
 0x397   :  { %7054 = vmatprep.subr.bf16.mxu0 %v10984_v24  ;;  %v11060_v24 = vld [vmem:[#allocation2 + $0x1d80] ss:$16 sps:$4 sm:$0xff]  }
 0x399   :  { %7629 = vmatpush1.bf16.msra.mxu1 %v10985_v21  ;;  %v11071_v21 = vld [vmem:[#allocation2 + $0x19ac] ss:$16 sps:$4 sm:$0xff]  }
 0x39a   :  { %7055 = vmatpush1.bf16.msra.mxu0 %v10982_v20  ;;  %7639 = vmatprep.subr.bf16.mxu1 %v10993_v50  ;;  %v11068_v20 = vld [vmem:[#allocation2 + $0x1da4] ss:$16 sps:$4 sm:$0xff]   ;;  %v11069_v50 = vld [vmem:[#allocation2 + $0x19a8] ss:$16 sps:$4 sm:$0xff]  }
 0x39b   :  { %7065 = vmatprep.subr.bf16.mxu0 %v10990_v25  ;;  %v11066_v25 = vld [vmem:[#allocation2 + $0x1da0] ss:$16 sps:$4 sm:$0xff]  }
 0x39c   :  { %7631 = vmatmul.mubr.bf16.vlgmr.msra.gmra.mrb[4].mxu1 %v11813_v32  ;;  %v11011_v32 = vld [vmem:[#allocation2 + $0x186c] ss:$16 sps:$4 sm:$0xff]  }
 0x39d   :  { %7057 = vmatmul.mubr.bf16.vlgmr.msra.gmra.mrb[0].mxu0 %v11843_v53  ;;  %7640 = vmatpush1.bf16.msra.mxu1 %v10991_v28  ;;  %v11072_v28 = vld [vmem:[#allocation2 + $0x1dc0] ss:$16 sps:$4 sm:$0xff]  }
 0x39e   :  { %7066 = vmatpush1.bf16.msra.mxu0 %v10988_v26  ;;  %7641 = vmatprep.subr.bf16.mxu1 %v10999_v10  ;;  %v11077_v26 = vld [vmem:[#allocation2 + $0x19cc] ss:$16 sps:$4 sm:$0xff]   ;;  %v11080_v10 = vld [vmem:[#allocation2 + $0x1de4] ss:$16 sps:$4 sm:$0xff]  }
 0x39f   :  { %7067 = vmatprep.subr.bf16.mxu0 %v10996_v29  ;;  %7097 = vmatprep.mubr.bf16.mxu0 %v11846_v57  ;;  %v11075_v29 = vld [vmem:[#allocation2 + $0x19c8] ss:$16 sps:$4 sm:$0xff]  }
 0x3a0   :  { %7671 = vmatprep.mubr.bf16.mxu1 %v11816_v3  ;;  %v11015_v3 = vld [vmem:[#allocation2 + $0x1888] ss:$16 sps:$4 sm:$0xff]  }
 0x3a1   :  { %7642 = vmatpush1.bf16.msra.mxu1 %v10997_v33  ;;  %v11078_v33 = vld [vmem:[#allocation2 + $0x1de0] ss:$16 sps:$4 sm:$0xff]  }
 0x3a2   :  { %7068 = vmatpush1.bf16.msra.mxu0 %v10994_v56  ;;  %7643 = vmatprep.subr.bf16.mxu1 %v11005_v7  ;;  %v11083_v56 = vld [vmem:[#allocation2 + $0x19ec] ss:$16 sps:$4 sm:$0xff]   ;;  %v11087_v7 = vld [vmem:[#allocation2 + $0x1e04] ss:$16 sps:$4 sm:$0xff]  }
 0x3a3   :  { %7069 = vmatprep.subr.bf16.mxu0 %v11002_v34  ;;  %v11081_v34 = vld [vmem:[#allocation2 + $0x19e8] ss:$16 sps:$4 sm:$0xff]  }
 0x3a5   :  { %7644 = vmatpush1.bf16.msra.mxu1 %v11003_v61  ;;  %v11854_v61 = vrot.slane %v11837_v11, %v11631_v49  ;;  %v11091_v49 = vld [vmem:[#allocation2 + $0x1e20] ss:$16 sps:$4 sm:$0xff]   ;;  %v11094_v11 = vld [vmem:[#allocation2 + $0x1a28] ss:$16 sps:$4 sm:$0xff]  }
 0x3a6   :  { %7070 = vmatpush1.bf16.msra.mxu0 %v11000_v36  ;;  %7645 = vmatprep.subr.bf16.mxu1 %v11011_v32  ;;  %v11090_v36 = vld [vmem:[#allocation2 + $0x1a0c] ss:$16 sps:$4 sm:$0xff]   ;;  %v11088_v32 = vld [vmem:[#allocation2 + $0x1a08] ss:$16 sps:$4 sm:$0xff]  }
 0x3a7   :  { %7071 = vmatprep.subr.bf16.mxu0 %v11008_v38  ;;  %v11085_v38 = vld [vmem:[#allocation2 + $0x1e00] ss:$16 sps:$4 sm:$0xff]  }
 0x3a9   :  { %7646 = vmatpush1.bf16.msra.mxu1 %v11009_v41  ;;  %v11096_v41 = vld [vmem:[#allocation2 + $0x1a2c] ss:$16 sps:$4 sm:$0xff]  }
 0x3aa   :  { %7072 = vmatpush1.bf16.msra.mxu0 %v11006_v39  ;;  %7647 = vmatprep.subr.bf16.mxu1 %v11017_v0  ;;  %v11093_v39 = vld [vmem:[#allocation2 + $0x1e24] ss:$16 sps:$4 sm:$0xff]  }
 0x3ab   :  { %7073 = vmatprep.subr.bf16.mxu0 %v11014_v6  ;;  %v11858_v6 = vcombine.high %v11846_v57, %v11846_v57  ;;  %v11099_v0 = vld [vmem:[#allocation2 + $0x1e44] ss:$16 sps:$4 sm:$0xff]  }
 0x3ad   :  { %7648 = vmatpush1.bf16.msra.mxu1 %v11015_v3  ;;  %v11097_v3 = vld [vmem:[#allocation2 + $0x1e40] ss:$16 sps:$4 sm:$0xff]  }
 0x3ae   :  { %7074 = vmatpush1.bf16.msra.mxu0 %v11012_v44  ;;  %7649 = vmatprep.subr.bf16.mxu1 %v11023_v47  ;;  %v11102_v44 = vld [vmem:[#allocation2 + $0x1a4c] ss:$16 sps:$4 sm:$0xff]   ;;  %v11105_v47 = vld [vmem:[#allocation2 + $0x1e64] ss:$16 sps:$4 sm:$0xff]  }
 0x3af   :  { %7075 = vmatprep.subr.bf16.mxu0 %v11020_v45  ;;  %v11100_v45 = vld [vmem:[#allocation2 + $0x1a48] ss:$16 sps:$4 sm:$0xff]  }
 0x3b1   :  { %7650 = vmatpush1.bf16.msra.mxu1 %v11021_v48  ;;  %v11106_v48 = vld [vmem:[#allocation2 + $0x1a68] ss:$16 sps:$4 sm:$0xff]  }
 0x3b2   :  { %7076 = vmatpush1.bf16.msra.mxu0 %v11018_v18  ;;  %7651 = vmatprep.subr.bf16.mxu1 %v11029_v30  ;;  %v11103_v18 = vld [vmem:[#allocation2 + $0x1e60] ss:$16 sps:$4 sm:$0xff]   ;;  %v11114_v30 = vld [vmem:[#allocation2 + $0x1a8c] ss:$16 sps:$4 sm:$0xff]  }
 0x3b3   :  { %7077 = vmatprep.subr.bf16.mxu0 %v11026_v51  ;;  %v11111_v51 = vld [vmem:[#allocation2 + $0x1e84] ss:$16 sps:$4 sm:$0xff]  }
 0x3b5   :  { %7652 = vmatpush1.bf16.msra.mxu1 %v11027_v17  ;;  %v11117_v17 = vld [vmem:[#allocation2 + $0x1ea4] ss:$16 sps:$4 sm:$0xff]  }
 0x3b6   :  { %7078 = vmatpush1.bf16.msra.mxu0 %v11024_v52  ;;  %7653 = vmatprep.subr.bf16.mxu1 %v11035_v27  ;;  %v11109_v52 = vld [vmem:[#allocation2 + $0x1e80] ss:$16 sps:$4 sm:$0xff]  }
 0x3b7   :  { %7079 = vmatprep.subr.bf16.mxu0 %v11032_v55  ;;  %v11120_v55 = vld [vmem:[#allocation2 + $0x1aac] ss:$16 sps:$4 sm:$0xff]   ;;  %v11115_v27 = vld [vmem:[#allocation2 + $0x1ea0] ss:$16 sps:$4 sm:$0xff]  }
 0x3b9   :  { %7654 = vmatpush1.bf16.msra.mxu1 %v11033_v58  ;;  %v11123_v58 = vld [vmem:[#allocation2 + $0x1ec4] ss:$16 sps:$4 sm:$0xff]  }
 0x3ba   :  { %7080 = vmatpush1.bf16.msra.mxu0 %v11030_v12  ;;  %7655 = vmatprep.subr.bf16.mxu1 %v11041_v59  ;;  %v11118_v12 = vld [vmem:[#allocation2 + $0x1aa8] ss:$16 sps:$4 sm:$0xff]   ;;  %v11121_v59 = vld [vmem:[#allocation2 + $0x1ec0] ss:$16 sps:$4 sm:$0xff]  }
 0x3bb   :  { %7081 = vmatprep.subr.bf16.mxu0 %v11038_v23  ;;  %v11126_v23 = vld [vmem:[#allocation2 + $0x1acc] ss:$16 sps:$4 sm:$0xff]  }
 0x3bd   :  { %7656 = vmatpush1.bf16.msra.mxu1 %v11039_v31  ;;  %v11129_v31 = vld [vmem:[#allocation2 + $0x1ee4] ss:$16 sps:$4 sm:$0xff]  }
 0x3be   :  { %7082 = vmatpush1.bf16.msra.mxu0 %v11036_v60  ;;  %7657 = vmatprep.subr.bf16.mxu1 %v11047_v63  ;;  %v11124_v60 = vld [vmem:[#allocation2 + $0x1ac8] ss:$16 sps:$4 sm:$0xff]   ;;  %v11127_v63 = vld [vmem:[#allocation2 + $0x1ee0] ss:$16 sps:$4 sm:$0xff]  }
 0x3bf   :  { %7083 = vmatprep.subr.bf16.mxu0 %v11044_v62  ;;  %v11132_v62 = vld [vmem:[#allocation2 + $0x1aec] ss:$16 sps:$4 sm:$0xff]  }
 0x3c1   :  { %7658 = vmatpush1.bf16.msra.mxu1 %v11045_v2  ;;  %v11135_v2 = vld [vmem:[#allocation2 + $0x1f04] ss:$16 sps:$4 sm:$0xff]  }
 0x3c2   :  { %7084 = vmatpush1.bf16.msra.mxu0 %v11042_v1  ;;  %7659 = vmatprep.subr.bf16.mxu1 %v11053_v37  ;;  %v11130_v1 = vld [vmem:[#allocation2 + $0x1ae8] ss:$16 sps:$4 sm:$0xff]   ;;  %v11133_v37 = vld [vmem:[#allocation2 + $0x1f00] ss:$16 sps:$4 sm:$0xff]  }
 0x3c3   :  { %7085 = vmatprep.subr.bf16.mxu0 %v11050_v35  ;;  %v11138_v35 = vld [vmem:[#allocation2 + $0x1b0c] ss:$16 sps:$4 sm:$0xff]  }
 0x3c5   :  { %7660 = vmatpush1.bf16.msra.mxu1 %v11051_v9  ;;  %v11141_v9 = vld [vmem:[#allocation2 + $0x1f24] ss:$16 sps:$4 sm:$0xff]  }
 0x3c6   :  { %7086 = vmatpush1.bf16.msra.mxu0 %v11048_v8  ;;  %7661 = vmatprep.subr.bf16.mxu1 %v11059_v13  ;;  %v11136_v8 = vld [vmem:[#allocation2 + $0x1b08] ss:$16 sps:$4 sm:$0xff]   ;;  %v11139_v13 = vld [vmem:[#allocation2 + $0x1f20] ss:$16 sps:$4 sm:$0xff]  }
 0x3c7   :  { %7087 = vmatprep.subr.bf16.mxu0 %v11056_v22  ;;  %v11144_v22 = vld [vmem:[#allocation2 + $0x1b2c] ss:$16 sps:$4 sm:$0xff]  }
 0x3c9   :  { %7662 = vmatpush1.bf16.msra.mxu1 %v11057_v40  ;;  %v11147_v40 = vld [vmem:[#allocation2 + $0x1f44] ss:$16 sps:$4 sm:$0xff]  }
 0x3ca   :  { %7088 = vmatpush1.bf16.msra.mxu0 %v11054_v43  ;;  %7663 = vmatprep.subr.bf16.mxu1 %v11065_v16  ;;  %v11142_v43 = vld [vmem:[#allocation2 + $0x1b28] ss:$16 sps:$4 sm:$0xff]   ;;  %v11145_v16 = vld [vmem:[#allocation2 + $0x1f40] ss:$16 sps:$4 sm:$0xff]  }
 0x3cb   :  { %7089 = vmatprep.subr.bf16.mxu0 %v11062_v15  ;;  %v11150_v15 = vld [vmem:[#allocation2 + $0x1b4c] ss:$16 sps:$4 sm:$0xff]  }
 0x3cd   :  { %7664 = vmatpush1.bf16.msra.mxu1 %v11063_v19  ;;  %v11153_v19 = vld [vmem:[#allocation2 + $0x1f64] ss:$16 sps:$4 sm:$0xff]  }
 0x3ce   :  { %7090 = vmatpush1.bf16.msra.mxu0 %v11060_v24  ;;  %7665 = vmatprep.subr.bf16.mxu1 %v11071_v21  ;;  %v11148_v24 = vld [vmem:[#allocation2 + $0x1b48] ss:$16 sps:$4 sm:$0xff]   ;;  %v11151_v21 = vld [vmem:[#allocation2 + $0x1f60] ss:$16 sps:$4 sm:$0xff]  }
 0x3cf   :  { %7091 = vmatprep.subr.bf16.mxu0 %v11068_v20  ;;  %v11156_v20 = vld [vmem:[#allocation2 + $0x1b6c] ss:$16 sps:$4 sm:$0xff]  }
 0x3d1   :  { %7666 = vmatpush1.bf16.msra.mxu1 %v11069_v50  ;;  %v11159_v50 = vld [vmem:[#allocation2 + $0x1f84] ss:$16 sps:$4 sm:$0xff]  }
 0x3d2   :  { %7092 = vmatpush1.bf16.msra.mxu0 %v11066_v25  ;;  %7667 = vmatprep.subr.bf16.mxu1 %v11077_v26  ;;  %v11154_v25 = vld [vmem:[#allocation2 + $0x1b68] ss:$16 sps:$4 sm:$0xff]   ;;  %v11157_v26 = vld [vmem:[#allocation2 + $0x1f80] ss:$16 sps:$4 sm:$0xff]  }
 0x3d3   :  { %7093 = vmatprep.subr.bf16.mxu0 %v11074_v54  ;;  %v11162_v54 = vld [vmem:[#allocation2 + $0x1b8c] ss:$16 sps:$4 sm:$0xff]  }
 0x3d5   :  { %7668 = vmatpush1.bf16.msra.mxu1 %v11075_v29  ;;  %v11165_v29 = vld [vmem:[#allocation2 + $0x1fa4] ss:$16 sps:$4 sm:$0xff]  }
 0x3d6   :  { %7094 = vmatpush1.bf16.msra.mxu0 %v11072_v28  ;;  %7669 = vmatprep.subr.bf16.mxu1 %v11083_v56  ;;  %v11160_v28 = vld [vmem:[#allocation2 + $0x1b88] ss:$16 sps:$4 sm:$0xff]   ;;  %v11163_v56 = vld [vmem:[#allocation2 + $0x1fa0] ss:$16 sps:$4 sm:$0xff]  }
 0x3d7   :  { %7095 = vmatprep.subr.bf16.mxu0 %v11080_v10  ;;  %v11168_v10 = vld [vmem:[#allocation2 + $0x1bac] ss:$16 sps:$4 sm:$0xff]  }
 0x3d9   :  { %7670 = vmatpush1.bf16.msra.mxu1 %v11081_v34  ;;  %v11171_v34 = vld [vmem:[#allocation2 + $0x1fc4] ss:$16 sps:$4 sm:$0xff]  }
 0x3da   :  { %7096 = vmatpush1.bf16.msra.mxu0 %v11078_v33  ;;  %7680 = vmatprep.subr.bf16.mxu1 %v11090_v36  ;;  %v11166_v33 = vld [vmem:[#allocation2 + $0x1ba8] ss:$16 sps:$4 sm:$0xff]   ;;  %v11169_v36 = vld [vmem:[#allocation2 + $0x1fc0] ss:$16 sps:$4 sm:$0xff]  }
 0x3db   :  { %7106 = vmatprep.subr.bf16.mxu0 %v11087_v7  ;;  %v11174_v7 = vld [vmem:[#allocation2 + $0x1bcc] ss:$16 sps:$4 sm:$0xff]  }
 0x3dc   :  { %7672 = vmatmul.mubr.bf16.vlgmr.msra.gmra.mrb[4].mxu1 %v11824_v14  ;;  %v11108_v14 = vld [vmem:[#allocation2 + $0x1a6c] ss:$16 sps:$4 sm:$0xff]  }
 0x3dd   :  { %7098 = vmatmul.mubr.bf16.vlgmr.msra.gmra.mrb[0].mxu0 %v11854_v61  ;;  %7681 = vmatpush1.bf16.msra.mxu1 %v11088_v32  ;;  %v11177_v32 = vld [vmem:[#allocation2 + $0x1fe4] ss:$16 sps:$4 sm:$0xff]  }
 0x3de   :  { %7107 = vmatpush1.bf16.msra.mxu0 %v11085_v38  ;;  %7682 = vmatprep.subr.bf16.mxu1 %v11096_v41  ;;  %v11172_v38 = vld [vmem:[#allocation2 + $0x1bc8] ss:$16 sps:$4 sm:$0xff]   ;;  %v11175_v41 = vld [vmem:[#allocation2 + $0x1fe0] ss:$16 sps:$4 sm:$0xff]  }
 0x3df   :  { %7108 = vmatprep.subr.bf16.mxu0 %v11093_v39  ;;  %7138 = vmatprep.mubr.bf16.mxu0 %v11858_v6  ;;  %v11180_v39 = vld [vmem:[#allocation2 + $0x1bec] ss:$16 sps:$4 sm:$0xff]  }
 0x3e0   :  { %7712 = vmatprep.mubr.bf16.mxu1 %v11828_v46  ;;  %v11112_v46 = vld [vmem:[#allocation2 + $0x1a88] ss:$16 sps:$4 sm:$0xff]  }
 0x3e1   :  { %7683 = vmatpush1.bf16.msra.mxu1 %v11094_v11  ;;  %v11183_v11 = vld [vmem:[#allocation2 + $0x1c0c] ss:$16 sps:$4 sm:$0xff]  }
 0x3e2   :  { %7109 = vmatpush1.bf16.msra.mxu0 %v11091_v49  ;;  %7684 = vmatprep.subr.bf16.mxu1 %v11102_v44  ;;  %v11178_v49 = vld [vmem:[#allocation2 + $0x1be8] ss:$16 sps:$4 sm:$0xff]  }
 0x3e3   :  { %7110 = vmatprep.subr.bf16.mxu0 %v11099_v0  ;;  %v11866_v0 = vcombine.high %v11854_v61, %v11854_v61  ;;  %v11181_v44 = vld [vmem:[#allocation2 + $0x1c08] ss:$16 sps:$4 sm:$0xff]  }
 0x3e5   :  { %7685 = vmatpush1.bf16.msra.mxu1 %v11100_v45  ;;  %v11277_v45 = vld [vmem:[#allocation7] ss:$8 sps:$4 sm:$0xff]  }
 0x3e6   :  { %7111 = vmatpush1.bf16.msra.mxu0 %v11097_v3  ;;  %7686 = vmatprep.subr.bf16.mxu1 %v11108_v14  ;;  %v11186_v3 = vld [vmem:[#allocation2 + $0x1c2c] ss:$16 sps:$4 sm:$0xff]   ;;  %v11184_v14 = vld [vmem:[#allocation2 + $0x1c28] ss:$16 sps:$4 sm:$0xff]  }
 0x3e7   :  { %7112 = vmatprep.subr.bf16.mxu0 %v11105_v47  ;;  %v11279_v47 = vld [vmem:[#allocation7 + $0x4] ss:$8 sps:$4 sm:$0xff]  }
 0x3e9   :  { %7687 = vmatpush1.bf16.msra.mxu1 %v11106_v48  ;;  %v11189_v48 = vld [vmem:[#allocation2 + $0x1c4c] ss:$16 sps:$4 sm:$0xff]  }
 0x3ea   :  { %7113 = vmatpush1.bf16.msra.mxu0 %v11103_v18  ;;  %7688 = vmatprep.subr.bf16.mxu1 %v11114_v30  ;;  %v11282_v18 = vld [vmem:[#allocation7 + $0x14] ss:$8 sps:$4 sm:$0xff]   ;;  %v11285_v30 = vld [vmem:[#allocation7 + $0x24] ss:$8 sps:$4 sm:$0xff]  }
 0x3eb   :  { %7114 = vmatprep.subr.bf16.mxu0 %v11111_v51  ;;  %v11280_v51 = vld [vmem:[#allocation7 + $0x10] ss:$8 sps:$4 sm:$0xff]  }
 0x3ed   :  { %7689 = vmatpush1.bf16.msra.mxu1 %v11112_v46  ;;  %v11192_v46 = vld [vmem:[#allocation2 + $0x1c6c] ss:$16 sps:$4 sm:$0xff]  }
 0x3ee   :  { %7115 = vmatpush1.bf16.msra.mxu0 %v11109_v52  ;;  %7690 = vmatprep.subr.bf16.mxu1 %v11120_v55  ;;  %v11187_v52 = vld [vmem:[#allocation2 + $0x1c48] ss:$16 sps:$4 sm:$0xff]  }
 0x3ef   :  { %7116 = vmatprep.subr.bf16.mxu0 %v11117_v17  ;;  %v11288_v17 = vld [vmem:[#allocation7 + $0x34] ss:$8 sps:$4 sm:$0xff]  }
 0x3f0   :  { %v11190_v55 = vld [vmem:[#allocation2 + $0x1c68] ss:$16 sps:$4 sm:$0xff]  }
 0x3f1   :  { %7691 = vmatpush1.bf16.msra.mxu1 %v11118_v12  ;;  %v11291_v12 = vld [vmem:[#allocation7 + $0x44] ss:$8 sps:$4 sm:$0xff]  }
 0x3f2   :  { %7117 = vmatpush1.bf16.msra.mxu0 %v11115_v27  ;;  %7692 = vmatprep.subr.bf16.mxu1 %v11126_v23  ;;  %v11286_v27 = vld [vmem:[#allocation7 + $0x30] ss:$8 sps:$4 sm:$0xff]  }
 0x3f3   :  { %7118 = vmatprep.subr.bf16.mxu0 %v11123_v58  ;;  %v11193_v58 = vld [vmem:[#allocation2 + $0x1c88] ss:$16 sps:$4 sm:$0xff]   ;;  %v11198_v23 = vld [vmem:[#allocation2 + $0x1cac] ss:$16 sps:$4 sm:$0xff]  }
 0x3f5   :  { %7693 = vmatpush1.bf16.msra.mxu1 %v11124_v60  ;;  %v11294_v60 = vld [vmem:[#allocation7 + $0x54] ss:$8 sps:$4 sm:$0xff]  }
 0x3f6   :  { %7119 = vmatpush1.bf16.msra.mxu0 %v11121_v59  ;;  %7694 = vmatprep.subr.bf16.mxu1 %v11132_v62  ;;  %v11289_v59 = vld [vmem:[#allocation7 + $0x40] ss:$8 sps:$4 sm:$0xff]  }
 0x3f7   :  { %7120 = vmatprep.subr.bf16.mxu0 %v11129_v31  ;;  %v11196_v31 = vld [vmem:[#allocation2 + $0x1ca8] ss:$16 sps:$4 sm:$0xff]   ;;  %v11201_v62 = vld [vmem:[#allocation2 + $0x1ccc] ss:$16 sps:$4 sm:$0xff]  }
 0x3f9   :  { %7695 = vmatpush1.bf16.msra.mxu1 %v11130_v1  ;;  %v11297_v1 = vld [vmem:[#allocation7 + $0x64] ss:$8 sps:$4 sm:$0xff]  }
 0x3fa   :  { %7121 = vmatpush1.bf16.msra.mxu0 %v11127_v63  ;;  %7696 = vmatprep.subr.bf16.mxu1 %v11138_v35  ;;  %v11292_v63 = vld [vmem:[#allocation7 + $0x50] ss:$8 sps:$4 sm:$0xff]  }
 0x3fb   :  { %7122 = vmatprep.subr.bf16.mxu0 %v11135_v2  ;;  %v11199_v2 = vld [vmem:[#allocation2 + $0x1cc8] ss:$16 sps:$4 sm:$0xff]   ;;  %v11204_v35 = vld [vmem:[#allocation2 + $0x1cec] ss:$16 sps:$4 sm:$0xff]  }
 0x3fd   :  { %7697 = vmatpush1.bf16.msra.mxu1 %v11136_v8  ;;  %v11300_v8 = vld [vmem:[#allocation7 + $0x74] ss:$8 sps:$4 sm:$0xff]  }
 0x3fe   :  { %7123 = vmatpush1.bf16.msra.mxu0 %v11133_v37  ;;  %7698 = vmatprep.subr.bf16.mxu1 %v11144_v22  ;;  %v11295_v37 = vld [vmem:[#allocation7 + $0x60] ss:$8 sps:$4 sm:$0xff]  }
 0x3ff   :  { %7124 = vmatprep.subr.bf16.mxu0 %v11141_v9  ;;  %v11202_v9 = vld [vmem:[#allocation2 + $0x1ce8] ss:$16 sps:$4 sm:$0xff]   ;;  %v11207_v22 = vld [vmem:[#allocation2 + $0x1d0c] ss:$16 sps:$4 sm:$0xff]  }
 0x401   :  { %7699 = vmatpush1.bf16.msra.mxu1 %v11142_v43  ;;  %v11303_v43 = vld [vmem:[#allocation7 + $0x84] ss:$8 sps:$4 sm:$0xff]  }
 0x402   :  { %7125 = vmatpush1.bf16.msra.mxu0 %v11139_v13  ;;  %7700 = vmatprep.subr.bf16.mxu1 %v11150_v15  ;;  %v11298_v13 = vld [vmem:[#allocation7 + $0x70] ss:$8 sps:$4 sm:$0xff]  }
 0x403   :  { %7126 = vmatprep.subr.bf16.mxu0 %v11147_v40  ;;  %v11205_v40 = vld [vmem:[#allocation2 + $0x1d08] ss:$16 sps:$4 sm:$0xff]   ;;  %v11210_v15 = vld [vmem:[#allocation2 + $0x1d2c] ss:$16 sps:$4 sm:$0xff]  }
 0x405   :  { %7701 = vmatpush1.bf16.msra.mxu1 %v11148_v24  ;;  %v11306_v24 = vld [vmem:[#allocation7 + $0x94] ss:$8 sps:$4 sm:$0xff]  }
 0x406   :  { %7127 = vmatpush1.bf16.msra.mxu0 %v11145_v16  ;;  %7702 = vmatprep.subr.bf16.mxu1 %v11156_v20  ;;  %v11301_v16 = vld [vmem:[#allocation7 + $0x80] ss:$8 sps:$4 sm:$0xff]  }
 0x407   :  { %7128 = vmatprep.subr.bf16.mxu0 %v11153_v19  ;;  %v11208_v19 = vld [vmem:[#allocation2 + $0x1d28] ss:$16 sps:$4 sm:$0xff]   ;;  %v11213_v20 = vld [vmem:[#allocation2 + $0x1d4c] ss:$16 sps:$4 sm:$0xff]  }
 0x409   :  { %7703 = vmatpush1.bf16.msra.mxu1 %v11154_v25  ;;  %v11309_v25 = vld [vmem:[#allocation7 + $0xa4] ss:$8 sps:$4 sm:$0xff]  }
 0x40a   :  { %7129 = vmatpush1.bf16.msra.mxu0 %v11151_v21  ;;  %7704 = vmatprep.subr.bf16.mxu1 %v11162_v54  ;;  %v11304_v21 = vld [vmem:[#allocation7 + $0x90] ss:$8 sps:$4 sm:$0xff]  }
 0x40b   :  { %7130 = vmatprep.subr.bf16.mxu0 %v11159_v50  ;;  %v11211_v50 = vld [vmem:[#allocation2 + $0x1d48] ss:$16 sps:$4 sm:$0xff]   ;;  %v11216_v54 = vld [vmem:[#allocation2 + $0x1d6c] ss:$16 sps:$4 sm:$0xff]  }
 0x40d   :  { %7705 = vmatpush1.bf16.msra.mxu1 %v11160_v28  ;;  %v11312_v28 = vld [vmem:[#allocation7 + $0xb4] ss:$8 sps:$4 sm:$0xff]  }
 0x40e   :  { %7131 = vmatpush1.bf16.msra.mxu0 %v11157_v26  ;;  %7706 = vmatprep.subr.bf16.mxu1 %v11168_v10  ;;  %v11307_v26 = vld [vmem:[#allocation7 + $0xa0] ss:$8 sps:$4 sm:$0xff]  }
 0x40f   :  { %7132 = vmatprep.subr.bf16.mxu0 %v11165_v29  ;;  %v11214_v29 = vld [vmem:[#allocation2 + $0x1d68] ss:$16 sps:$4 sm:$0xff]   ;;  %v11219_v10 = vld [vmem:[#allocation2 + $0x1d8c] ss:$16 sps:$4 sm:$0xff]  }
 0x411   :  { %7707 = vmatpush1.bf16.msra.mxu1 %v11166_v33  ;;  %v11315_v33 = vld [vmem:[#allocation7 + $0xc4] ss:$8 sps:$4 sm:$0xff]  }
 0x412   :  { %7133 = vmatpush1.bf16.msra.mxu0 %v11163_v56  ;;  %7708 = vmatprep.subr.bf16.mxu1 %v11174_v7  ;;  %v11310_v56 = vld [vmem:[#allocation7 + $0xb0] ss:$8 sps:$4 sm:$0xff]  }
 0x413   :  { %7134 = vmatprep.subr.bf16.mxu0 %v11171_v34  ;;  %v11217_v34 = vld [vmem:[#allocation2 + $0x1d88] ss:$16 sps:$4 sm:$0xff]   ;;  %v11222_v7 = vld [vmem:[#allocation2 + $0x1dac] ss:$16 sps:$4 sm:$0xff]  }
 0x415   :  { %7709 = vmatpush1.bf16.msra.mxu1 %v11172_v38  ;;  %v11318_v38 = vld [vmem:[#allocation7 + $0xd4] ss:$8 sps:$4 sm:$0xff]  }
 0x416   :  { %7135 = vmatpush1.bf16.msra.mxu0 %v11169_v36  ;;  %7710 = vmatprep.subr.bf16.mxu1 %v11180_v39  ;;  %v11313_v36 = vld [vmem:[#allocation7 + $0xc0] ss:$8 sps:$4 sm:$0xff]  }
 0x417   :  { %7136 = vmatprep.subr.bf16.mxu0 %v11177_v32  ;;  %v11220_v32 = vld [vmem:[#allocation2 + $0x1da8] ss:$16 sps:$4 sm:$0xff]   ;;  %v11225_v39 = vld [vmem:[#allocation2 + $0x1dcc] ss:$16 sps:$4 sm:$0xff]  }
 0x419   :  { %7711 = vmatpush1.bf16.msra.mxu1 %v11178_v49  ;;  %v11223_v49 = vld [vmem:[#allocation2 + $0x1dc8] ss:$16 sps:$4 sm:$0xff]  }
 0x41a   :  { %7137 = vmatpush1.bf16.msra.mxu0 %v11175_v41  ;;  %7721 = vmatprep.subr.bf16.mxu1 %v11183_v11  ;;  %v11316_v41 = vld [vmem:[#allocation7 + $0xd0] ss:$8 sps:$4 sm:$0xff]  }
 0x41b   :  { %8207 = vmatprep.subr.bf16.mxu0 %v11279_v47  ;;  %v11228_v11 = vld [vmem:[#allocation2 + $0x1dec] ss:$16 sps:$4 sm:$0xff]  }
 0x41c   :  { %7713 = vmatmul.mubr.bf16.vlgmr.msra.gmra.mrb[4].mxu1 %v11843_v53  ;;  %v11283_v53 = vld [vmem:[#allocation7 + $0x20] ss:$8 sps:$4 sm:$0xff]  }
 0x41d   :  { %7139 = vmatmul.mubr.bf16.vlgmr.msra.gmra.mrb[0].mxu0 %v11866_v0  ;;  %7722 = vmatpush1.bf16.msra.mxu1 %v11181_v44  ;;  %v11226_v44 = vld [vmem:[#allocation2 + $0x1de8] ss:$16 sps:$4 sm:$0xff]   ;;  %v11234_v47 = vld [vmem:[#allocation2 + $0x1e2c] ss:$16 sps:$4 sm:$0xff]  }
 0x41e   :  { %7753 = vmatprep.mubr.bf16.mxu1 %v11846_v57  ;;  %7723 = vmatprep.subr.bf16.mxu1 %v11186_v3  ;;  %v11195_v57 = vld [vmem:[#allocation2 + $0x1c8c] ss:$16 sps:$4 sm:$0xff]  }
 0x41f   :  { %8208 = vmatpush1.bf16.msra.mxu0 %v11277_v45  ;;  %v11231_v3 = vld [vmem:[#allocation2 + $0x1e0c] ss:$16 sps:$4 sm:$0xff]   ;;  %v11229_v45 = vld [vmem:[#allocation2 + $0x1e08] ss:$16 sps:$4 sm:$0xff]  }
 0x420   :  { %8209 = vmatprep.subr.bf16.mxu0 %v11282_v18  ;;  %v11237_v18 = vld [vmem:[#allocation2 + $0x1e4c] ss:$16 sps:$4 sm:$0xff]  }
 0x421   :  { %7724 = vmatpush1.bf16.msra.mxu1 %v11184_v14  ;;  %v11232_v14 = vld [vmem:[#allocation2 + $0x1e28] ss:$16 sps:$4 sm:$0xff]  }
 0x422   :  { %7725 = vmatprep.subr.bf16.mxu1 %v11189_v48  ;;  %v11235_v48 = vld [vmem:[#allocation2 + $0x1e48] ss:$16 sps:$4 sm:$0xff]  }
 0x423   :  { %8210 = vmatpush1.bf16.msra.mxu0 %v11280_v51  ;;  %v11240_v51 = vld [vmem:[#allocation2 + $0x1e6c] ss:$16 sps:$4 sm:$0xff]  }
 0x424   :  { %8211 = vmatprep.subr.bf16.mxu0 %v11285_v30  ;;  %v11238_v30 = vld [vmem:[#allocation2 + $0x1e68] ss:$16 sps:$4 sm:$0xff]  }
 0x425   :  { %7726 = vmatpush1.bf16.msra.mxu1 %v11187_v52  ;;  %v11243_v52 = vld [vmem:[#allocation2 + $0x1e8c] ss:$16 sps:$4 sm:$0xff]  }
 0x426   :  { %7727 = vmatprep.subr.bf16.mxu1 %v11192_v46  ;;  %v11241_v46 = vld [vmem:[#allocation2 + $0x1e88] ss:$16 sps:$4 sm:$0xff]  }
 0x427   :  { %8212 = vmatpush1.bf16.msra.mxu0 %v11283_v53  ;;  %v11246_v53 = vld [vmem:[#allocation2 + $0x1eac] ss:$16 sps:$4 sm:$0xff]  }
 0x428   :  { %8213 = vmatprep.subr.bf16.mxu0 %v11288_v17  ;;  %v11249_v17 = vld [vmem:[#allocation2 + $0x1ecc] ss:$16 sps:$4 sm:$0xff]  }
 0x429   :  { %7728 = vmatpush1.bf16.msra.mxu1 %v11190_v55  ;;  %v11321_v55 = vld [vmem:[#allocation7 + $0xe4] ss:$8 sps:$4 sm:$0xff]  }
 0x42a   :  { %7729 = vmatprep.subr.bf16.mxu1 %v11195_v57  ;;  %v11247_v57 = vld [vmem:[#allocation2 + $0x1ec8] ss:$16 sps:$4 sm:$0xff]  }
 0x42b   :  { %8214 = vmatpush1.bf16.msra.mxu0 %v11286_v27  ;;  %v11252_v27 = vld [vmem:[#allocation2 + $0x1eec] ss:$16 sps:$4 sm:$0xff]  }
 0x42c   :  { %8215 = vmatprep.subr.bf16.mxu0 %v11291_v12  ;;  %v11324_v12 = vld [vmem:[#allocation7 + $0xf4] ss:$8 sps:$4 sm:$0xff]  }
 0x42d   :  { %7730 = vmatpush1.bf16.msra.mxu1 %v11193_v58  ;;  %v11322_v58 = vld [vmem:[#allocation7 + $0xf0] ss:$8 sps:$4 sm:$0xff]  }
 0x42e   :  { %7731 = vmatprep.subr.bf16.mxu1 %v11198_v23  ;;  %v11250_v23 = vld [vmem:[#allocation2 + $0x1ee8] ss:$16 sps:$4 sm:$0xff]  }
 0x42f   :  { %8216 = vmatpush1.bf16.msra.mxu0 %v11289_v59  ;;  %v11255_v59 = vld [vmem:[#allocation2 + $0x1f0c] ss:$16 sps:$4 sm:$0xff]  }
 0x430   :  { %8217 = vmatprep.subr.bf16.mxu0 %v11294_v60  ;;  %v11327_v60 = vld [vmem:[#allocation7 + $0x104] ss:$8 sps:$4 sm:$0xff]  }
 0x431   :  { %7732 = vmatpush1.bf16.msra.mxu1 %v11196_v31  ;;  %v11253_v31 = vld [vmem:[#allocation2 + $0x1f08] ss:$16 sps:$4 sm:$0xff]  }
 0x432   :  { %7733 = vmatprep.subr.bf16.mxu1 %v11201_v62  ;;  %v11258_v62 = vld [vmem:[#allocation2 + $0x1f2c] ss:$16 sps:$4 sm:$0xff]  }
 0x433   :  { %8218 = vmatpush1.bf16.msra.mxu0 %v11292_v63  ;;  %v11256_v63 = vld [vmem:[#allocation2 + $0x1f28] ss:$16 sps:$4 sm:$0xff]  }
 0x434   :  { %8219 = vmatprep.subr.bf16.mxu0 %v11297_v1  ;;  %v11261_v1 = vld [vmem:[#allocation2 + $0x1f4c] ss:$16 sps:$4 sm:$0xff]  }
 0x435   :  { %7734 = vmatpush1.bf16.msra.mxu1 %v11199_v2  ;;  %v11259_v2 = vld [vmem:[#allocation2 + $0x1f48] ss:$16 sps:$4 sm:$0xff]  }
 0x436   :  { %7735 = vmatprep.subr.bf16.mxu1 %v11204_v35  ;;  %v11264_v35 = vld [vmem:[#allocation2 + $0x1f6c] ss:$16 sps:$4 sm:$0xff]  }
 0x437   :  { %8220 = vmatpush1.bf16.msra.mxu0 %v11295_v37  ;;  %v11262_v37 = vld [vmem:[#allocation2 + $0x1f68] ss:$16 sps:$4 sm:$0xff]  }
 0x438   :  { %8221 = vmatprep.subr.bf16.mxu0 %v11300_v8  ;;  %v11267_v8 = vld [vmem:[#allocation2 + $0x1f8c] ss:$16 sps:$4 sm:$0xff]  }
 0x439   :  { %7736 = vmatpush1.bf16.msra.mxu1 %v11202_v9  ;;  %v11265_v9 = vld [vmem:[#allocation2 + $0x1f88] ss:$16 sps:$4 sm:$0xff]  }
 0x43a   :  { %7737 = vmatprep.subr.bf16.mxu1 %v11207_v22  ;;  %v11270_v22 = vld [vmem:[#allocation2 + $0x1fac] ss:$16 sps:$4 sm:$0xff]  }
 0x43b   :  { %8222 = vmatpush1.bf16.msra.mxu0 %v11298_v13  ;;  %v11268_v13 = vld [vmem:[#allocation2 + $0x1fa8] ss:$16 sps:$4 sm:$0xff]  }
 0x43c   :  { %8223 = vmatprep.subr.bf16.mxu0 %v11303_v43  ;;  %v11273_v43 = vld [vmem:[#allocation2 + $0x1fcc] ss:$16 sps:$4 sm:$0xff]  }
 0x43d   :  { %7738 = vmatpush1.bf16.msra.mxu1 %v11205_v40  ;;  %v11271_v40 = vld [vmem:[#allocation2 + $0x1fc8] ss:$16 sps:$4 sm:$0xff]  }
 0x43e   :  { %7739 = vmatprep.subr.bf16.mxu1 %v11210_v15  ;;  %v11276_v15 = vld [vmem:[#allocation2 + $0x1fec] ss:$16 sps:$4 sm:$0xff]  }
 0x43f   :  { %8224 = vmatpush1.bf16.msra.mxu0 %v11301_v16  ;;  %v11274_v16 = vld [vmem:[#allocation2 + $0x1fe8] ss:$16 sps:$4 sm:$0xff]  }
 0x440   :  { %8225 = vmatprep.subr.bf16.mxu0 %v11306_v24  ;;  %v1121_v24 = vsub.s32 0, %v11628_v42 }
 0x441   :  { %7740 = vmatpush1.bf16.msra.mxu1 %v11208_v19  ;;  %v11875_v19 = vld [vmem:[#allocation5] sm:$0xf] }
 0x442   :  { %7741 = vmatprep.subr.bf16.mxu1 %v11213_v20  ;;  %v1125_v20 = vsub.s32 1, %v11628_v42 }
 0x443   :  { %8226 = vmatpush1.bf16.msra.mxu0 %v11304_v21  ;;  %v1122_v21 = vrot.slane %v11875_v19, %v1121_v24 }
 0x444   :  { %8227 = vmatprep.subr.bf16.mxu0 %v11309_v25  ;;  %v1126_v25 = vrot.slane %v11875_v19, %v1125_v20 }
 0x445   :  { %7742 = vmatpush1.bf16.msra.mxu1 %v11211_v50  ;;  %v6526_v50 = vadd.f32 %v11705_v4, %v1122_v21  ;;  %v8307_v4 = vld [vmem:[%s12007_s5 + $0x80] sm:$0xff]  ;;  %v11345_v21 = vld [vmem:[#allocation7 + $0x164] ss:$8 sps:$4 sm:$0xff]  }
 0x446   :  { %7743 = vmatprep.subr.bf16.mxu1 %v11216_v54  ;;  %v6528_v54 = vadd.f32 %v11707_v5, %v1126_v25  ;;  %v8308_v5 = vld [vmem:[%s12007_s5 + $0x88] sm:$0xff]  ;;  %v8319_v25 = vld [vmem:[%s12007_s5 + $0xe0] sm:$0xff] }
 0x447   :  { %8228 = vmatpush1.bf16.msra.mxu0 %v11307_v26 }
 0x448   :  { %8229 = vmatprep.subr.bf16.mxu0 %v11312_v28 }
 0x449   :  { %7744 = vmatpush1.bf16.msra.mxu1 %v11214_v29 }
 0x44a   :  { %7745 = vmatprep.subr.bf16.mxu1 %v11219_v10 }
 0x44b   :  { %8230 = vmatpush1.bf16.msra.mxu0 %v11310_v56 }
 0x44c   :  { %8231 = vmatprep.subr.bf16.mxu0 %v11315_v33 }
 0x44d   :  { %7746 = vmatpush1.bf16.msra.mxu1 %v11217_v34 }
 0x44e   :  { %7747 = vmatprep.subr.bf16.mxu1 %v11222_v7 }
 0x44f   :  { %8232 = vmatpush1.bf16.msra.mxu0 %v11313_v36  ;;  %v11325_v36 = vld [vmem:[#allocation7 + $0x100] ss:$8 sps:$4 sm:$0xff]  }
 0x450   :  { %8233 = vmatprep.subr.bf16.mxu0 %v11318_v38 }
 0x451   :  { %7748 = vmatpush1.bf16.msra.mxu1 %v11220_v32  ;;  %v11330_v32 = vld [vmem:[#allocation7 + $0x114] ss:$8 sps:$4 sm:$0xff]  }
 0x452   :  { %7749 = vmatprep.subr.bf16.mxu1 %v11225_v39  ;;  %v11328_v39 = vld [vmem:[#allocation7 + $0x110] ss:$8 sps:$4 sm:$0xff]  }
 0x453   :  { %8234 = vmatpush1.bf16.msra.mxu0 %v11316_v41  ;;  %v11333_v41 = vld [vmem:[#allocation7 + $0x124] ss:$8 sps:$4 sm:$0xff]  }
 0x454   :  { %8235 = vmatprep.subr.bf16.mxu0 %v11321_v55  ;;  %v11336_v55 = vld [vmem:[#allocation7 + $0x134] ss:$8 sps:$4 sm:$0xff]  }
 0x455   :  { %7750 = vmatpush1.bf16.msra.mxu1 %v11223_v49  ;;  %v8291_v49 = vld [vmem:[%s12007_s5] sm:$0xff] }
 0x456   :  { %7751 = vmatprep.subr.bf16.mxu1 %v11228_v11  ;;  %v9562_v11 = vpack.c.bf16 %v8308_v5, %v8307_v4  ;;  %v11366_v4 = vld [vmem:[#allocation7 + $0x1d4] ss:$8 sps:$4 sm:$0xff]   ;;  %v11364_v5 = vld [vmem:[#allocation7 + $0x1d0] ss:$8 sps:$4 sm:$0xff]  }
 0x459   :  { %7752 = vmatpush1.bf16.msra.mxu1 %v11226_v44  ;;  %v8292_v44 = vld [vmem:[%s12007_s5 + $0x8] sm:$0xff] }
 0x45a   :  { %7762 = vmatprep.subr.bf16.mxu1 %v11231_v3  ;;  %v8309_v3 = vld [vmem:[%s12007_s5 + $0x90] sm:$0xff] }
 0x45c   :  { %7754 = vmatmul.mubr.bf16.vlgmr.msra.gmra.mrb[4].mxu1 %v11854_v61  ;;  %v11244_v61 = vld [vmem:[#allocation2 + $0x1ea8] ss:$16 sps:$4 sm:$0xff]  }
 0x45d   :  { %7763 = vmatpush1.bf16.msra.mxu1 %v11229_v45  ;;  %7794 = vmatprep.mubr.bf16.mxu1 %v11858_v6  ;;  %v11319_v6 = vld [vmem:[#allocation7 + $0xe0] ss:$8 sps:$4 sm:$0xff]   ;;  %v8310_v45 = vld [vmem:[%s12007_s5 + $0x98] sm:$0xff] }
 0x45e   :  { %7764 = vmatprep.subr.bf16.mxu1 %v11234_v47  ;;  %8236 = vmatpush1.bf16.msra.mxu0 %v11319_v6  ;;  %v9564_v47 = vpack.c.bf16 %v8292_v44, %v8291_v49  ;;  %v8313_v6 = vld [vmem:[%s12007_s5 + $0xb0] sm:$0xff]  ;;  %v11372_v44 = vld [vmem:[#allocation7 + $0x1f4] ss:$8 sps:$4 sm:$0xff]  }
 0x45f   :  { %8237 = vmatprep.subr.bf16.mxu0 %v11324_v12  ;;  %v11334_v12 = vld [vmem:[#allocation7 + $0x130] ss:$8 sps:$4 sm:$0xff]   ;;  %v11369_v49 = vld [vmem:[#allocation7 + $0x1e4] ss:$8 sps:$4 sm:$0xff]  }
 0x461   :  { %7765 = vmatpush1.bf16.msra.mxu1 %v11232_v14  ;;  %v9566_v14 = vpack.c.bf16 %v8310_v45, %v8309_v3  ;;  %v11370_v3 = vld [vmem:[#allocation7 + $0x1f0] ss:$8 sps:$4 sm:$0xff]   ;;  %v1129_v45 = vsub.s32 2, %v11628_v42 }
 0x462   :  { %7766 = vmatprep.subr.bf16.mxu1 %v11237_v18  ;;  %8238 = vmatpush1.bf16.msra.mxu0 %v11322_v58  ;;  %v8293_v18 = vld [vmem:[%s12007_s5 + $0x10] sm:$0xff] }
 0x463   :  { %8248 = vmatprep.subr.bf16.mxu0 %v11327_v60  ;;  %v11339_v60 = vld [vmem:[#allocation7 + $0x144] ss:$8 sps:$4 sm:$0xff]  }
 0x465   :  { %7767 = vmatpush1.bf16.msra.mxu1 %v11235_v48  ;;  %v8294_v48 = vld [vmem:[%s12007_s5 + $0x18] sm:$0xff] }
 0x466   :  { %7768 = vmatprep.subr.bf16.mxu1 %v11240_v51  ;;  %v8311_v51 = vld [vmem:[%s12007_s5 + $0xa0] sm:$0xff] }
 0x469   :  { %7769 = vmatpush1.bf16.msra.mxu1 %v11238_v30  ;;  %v8312_v30 = vld [vmem:[%s12007_s5 + $0xa8] sm:$0xff] }
 0x46a   :  { %7770 = vmatprep.subr.bf16.mxu1 %v11243_v52  ;;  %v9568_v52 = vpack.c.bf16 %v8294_v48, %v8293_v18 }
 0x46d   :  { %7771 = vmatpush1.bf16.msra.mxu1 %v11241_v46  ;;  %v11331_v46 = vld [vmem:[#allocation7 + $0x120] ss:$8 sps:$4 sm:$0xff]  }
 0x46e   :  { %7772 = vmatprep.subr.bf16.mxu1 %v11246_v53  ;;  %v9570_v53 = vpack.c.bf16 %v8312_v30, %v8311_v51 }
 0x471   :  { %7773 = vmatpush1.bf16.msra.mxu1 %v11244_v61  ;;  %v8295_v61 = vld [vmem:[%s12007_s5 + $0x20] sm:$0xff] }
 0x472   :  { %7774 = vmatprep.subr.bf16.mxu1 %v11249_v17  ;;  %v8296_v17 = vld [vmem:[%s12007_s5 + $0x28] sm:$0xff] }
 0x475   :  { %7775 = vmatpush1.bf16.msra.mxu1 %v11247_v57  ;;  %v8314_v57 = vld [vmem:[%s12007_s5 + $0xb8] sm:$0xff] }
 0x476   :  { %7776 = vmatprep.subr.bf16.mxu1 %v11252_v27  ;;  %v9572_v27 = vpack.c.bf16 %v8296_v17, %v8295_v61  ;;  %v9574_v58 = vpack.c.bf16 %v8314_v57, %v8313_v6  ;;  %v8303_v57 = vld [vmem:[%s12007_s5 + $0x60] sm:$0xff] }
 0x479   :  { %7777 = vmatpush1.bf16.msra.mxu1 %v11250_v23  ;;  %v8297_v23 = vld [vmem:[%s12007_s5 + $0x30] sm:$0xff] }
 0x47a   :  { %7778 = vmatprep.subr.bf16.mxu1 %v11255_v59  ;;  %v8298_v59 = vld [vmem:[%s12007_s5 + $0x38] sm:$0xff] }
 0x47d   :  { %7779 = vmatpush1.bf16.msra.mxu1 %v11253_v31  ;;  %v8315_v31 = vld [vmem:[%s12007_s5 + $0xc0] sm:$0xff] }
 0x47e   :  { %7780 = vmatprep.subr.bf16.mxu1 %v11258_v62  ;;  %v8316_v62 = vld [vmem:[%s12007_s5 + $0xc8] sm:$0xff] }
 0x481   :  { %7781 = vmatpush1.bf16.msra.mxu1 %v11256_v63  ;;  %v9576_v63 = vpack.c.bf16 %v8298_v59, %v8297_v23  ;;  %v8305_v59 = vld [vmem:[%s12007_s5 + $0x70] sm:$0xff] }
 0x482   :  { %7782 = vmatprep.subr.bf16.mxu1 %v11261_v1  ;;  %v11337_v1 = vld [vmem:[#allocation7 + $0x140] ss:$8 sps:$4 sm:$0xff]  }
 0x485   :  { %7783 = vmatpush1.bf16.msra.mxu1 %v11259_v2  ;;  %v9578_v2 = vpack.c.bf16 %v8316_v62, %v8315_v31  ;;  %v7875_v62 = vld [vmem:[#allocation8] sm:$0x3] }
 0x486   :  { %7784 = vmatprep.subr.bf16.mxu1 %v11264_v35  ;;  %v8299_v35 = vld [vmem:[%s12007_s5 + $0x40] sm:$0xff] }
 0x489   :  { %7785 = vmatpush1.bf16.msra.mxu1 %v11262_v37  ;;  %v8300_v37 = vld [vmem:[%s12007_s5 + $0x48] sm:$0xff] }
 0x48a   :  { %7786 = vmatprep.subr.bf16.mxu1 %v11267_v8  ;;  %v11342_v8 = vld [vmem:[#allocation7 + $0x154] ss:$8 sps:$4 sm:$0xff]  }
 0x48d   :  { %7787 = vmatpush1.bf16.msra.mxu1 %v11265_v9  ;;  %v8317_v9 = vld [vmem:[%s12007_s5 + $0xd0] sm:$0xff] }
 0x48e   :  { %7788 = vmatprep.subr.bf16.mxu1 %v11270_v22  ;;  %v8318_v22 = vld [vmem:[%s12007_s5 + $0xd8] sm:$0xff] }
 0x491   :  { %7789 = vmatpush1.bf16.msra.mxu1 %v11268_v13  ;;  %v9580_v13 = vpack.c.bf16 %v8300_v37, %v8299_v35 }
 0x492   :  { %7790 = vmatprep.subr.bf16.mxu1 %v11273_v43  ;;  %v11340_v43 = vld [vmem:[#allocation7 + $0x150] ss:$8 sps:$4 sm:$0xff]  }
 0x495   :  { %7791 = vmatpush1.bf16.msra.mxu1 %v11271_v40  ;;  %v9582_v40 = vpack.c.bf16 %v8318_v22, %v8317_v9 }
 0x496   :  { %7792 = vmatprep.subr.bf16.mxu1 %v11276_v15  ;;  %v8301_v15 = vld [vmem:[%s12007_s5 + $0x50] sm:$0xff] }
 0x499   :  { %7793 = vmatpush1.bf16.msra.mxu1 %v11274_v16  ;;  %v8302_v16 = vld [vmem:[%s12007_s5 + $0x58] sm:$0xff] }
 0x49a   :  { %9563 = vmatprep.subr.bf16.mxu1 %v9562_v11  ;;  %v11367_v11 = vld [vmem:[#allocation7 + $0x1e0] ss:$8 sps:$4 sm:$0xff]  }
 0x49c   :  { %7795 = vmatmul.mubr.bf16.vlgmr.msra.gmra.mrb[4].mxu1 %v11866_v0 }
 0x49d   :  { %9565 = vmatpush3.bf16.msra.mxu1 %v9564_v47  ;;  %v1133_v47 = vsub.s32 3, %v11628_v42 }
 0x49e   :  { %9567 = vmatprep.subr.bf16.mxu1 %v9566_v14  ;;  %v1130_v14 = vrot.slane %v11875_v19, %v1129_v45 }
 0x49f   :  { %v1134_v18 = vrot.slane %v11875_v19, %v1133_v47  ;;  %v8304_v19 = vld [vmem:[%s12007_s5 + $0x68] sm:$0xff] }
 0x4a1   :  { %9569 = vmatpush3.bf16.msra.mxu1 %v9568_v52 }
 0x4a2   :  { %9571 = vmatprep.subr.bf16.mxu1 %v9570_v53 }
 0x4a5   :  { %9573 = vmatpush3.bf16.msra.mxu1 %v9572_v27  ;;  %v9588_v27 = vpack.c.bf16 %v8304_v19, %v8303_v57 }
 0x4a6   :  { %9575 = vmatprep.subr.bf16.mxu1 %v9574_v58  ;;  %v8322_v58 = vld [vmem:[%s12007_s5 + $0xf8] sm:$0xff] }
 0x4a9   :  { %9577 = vmatpush3.bf16.msra.mxu1 %v9576_v63  ;;  %v7880_v63 = vrot.slane %v7875_v62, %v1121_v24 }
 0x4aa   :  { %9579 = vmatprep.subr.bf16.mxu1 %v9578_v2 }
 0x4ad   :  { %9581 = vmatpush3.bf16.msra.mxu1 %v9580_v13 }
 0x4ae   :  { %9583 = vmatprep.subr.bf16.mxu1 %v9582_v40  ;;  %v11525_v40 = vmov 0  }
 0x4af   :  { %9735 = vset.pattern.permute.xlu1 %v11525_v40  ;;  %9736 = vset.pattern.permute.xlu0 %v11525_v40 }
 0x4f0   :  { %v7140_v26 = vpop.f32.mrb[0].mxu0 }
 0x4f1   :  { %v9595_v0 = vadd.f32 %v7140_v26, %v6526_v50  ;;  %v7142_v28 = vpop.f32.mrb[1].mxu0  ;;  %v8320_v50 = vld [vmem:[%s12007_s5 + $0xe8] sm:$0xff] }
 0x4f2   :  { %v9597_v29 = vadd.f32 %v7142_v28, %v6528_v54  ;;  %v7144_v10 = vpop.f32.mrb[2].mxu0  ;;  %v9584_v54 = vpack.c.bf16 %v8302_v16, %v8301_v15  ;;  %v11343_v26 = vld [vmem:[#allocation7 + $0x160] ss:$8 sps:$4 sm:$0xff]   ;;  %v11348_v28 = vld [vmem:[#allocation7 + $0x174] ss:$8 sps:$4 sm:$0xff]  }
 0x4f3   :  { %v7803_v56 = vmax.f32 %v9595_v0, 0.0  ;;  %v7145_v33 = vpop.f32.mrb[3].mxu0  ;;  %v9586_v0 = vpack.c.bf16 %v8320_v50, %v8319_v25  ;;  %v11351_v10 = vld [vmem:[#allocation7 + $0x184] ss:$8 sps:$4 sm:$0xff]   ;;  %v9526_v16 = vld [vmem:[#allocation10] ss:$0 sm:$0xff] }
 0x4f4   :  { %v7804_v34 = vmax.f32 %v9597_v29, 0.0  ;;  %9585 = vmatpush3.bf16.msra.mxu1 %v9584_v54  ;;  %v11346_v29 = vld [vmem:[#allocation7 + $0x170] ss:$8 sps:$4 sm:$0xff]   ;;  %v11354_v33 = vld [vmem:[#allocation7 + $0x194] ss:$8 sps:$4 sm:$0xff]  }
 0x4f5   :  { %v7807_v38 = vpack.c.bf16 %v7803_v56, %v7803_v56  ;;  %9587 = vmatprep.subr.bf16.mxu1 %v9586_v0  ;;  %v11349_v56 = vld [vmem:[#allocation7 + $0x180] ss:$8 sps:$4 sm:$0xff]  }
 0x4f6   :  { %v7808_v7 = vpack.c.bf16 %v7804_v34, %v7804_v34  ;;  %v11352_v34 = vld [vmem:[#allocation7 + $0x190] ss:$8 sps:$4 sm:$0xff]  }
 0x4f8   :  { %8239 = vmatprep.mubr.bf16.mxu0 %v7808_v7  ;;  %v11357_v7 = vld [vmem:[#allocation7 + $0x1a4] ss:$8 sps:$4 sm:$0xff]   ;;  %9589 = vmatpush3.bf16.msra.mxu1 %v9588_v27 }
 0x4f9   :  { %8240 = vmatmul.mubr.bf16.vlgmr.msra.gmra.mrb[4].mxu0 %v7807_v38  ;;  %v11360_v38 = vld [vmem:[#allocation7 + $0x1b4] ss:$8 sps:$4 sm:$0xff]  }
 0x4fa   :  { %8249 = vmatpush1.bf16.msra.mxu0 %v11325_v36  ;;  %v11355_v36 = vld [vmem:[#allocation7 + $0x1a0] ss:$8 sps:$4 sm:$0xff]  }
 0x4fb   :  { %8250 = vmatprep.subr.bf16.mxu0 %v11330_v32  ;;  %v11358_v32 = vld [vmem:[#allocation7 + $0x1b0] ss:$8 sps:$4 sm:$0xff]  }
 0x4fe   :  { %8251 = vmatpush1.bf16.msra.mxu0 %v11328_v39  ;;  %v11363_v39 = vld [vmem:[#allocation7 + $0x1c4] ss:$8 sps:$4 sm:$0xff]  }
 0x4ff   :  { %8252 = vmatprep.subr.bf16.mxu0 %v11333_v41  ;;  %v11361_v41 = vld [vmem:[#allocation7 + $0x1c0] ss:$8 sps:$4 sm:$0xff]  }
 0x502   :  { %8253 = vmatpush1.bf16.msra.mxu0 %v11331_v46 }
 0x503   :  { %8254 = vmatprep.subr.bf16.mxu0 %v11336_v55 }
 0x506   :  { %8255 = vmatpush1.bf16.msra.mxu0 %v11334_v12  ;;  %v8321_v12 = vld [vmem:[%s12007_s5 + $0xf0] sm:$0xff] }
 0x507   :  { %8256 = vmatprep.subr.bf16.mxu0 %v11339_v60  ;;  %v9590_v23 = vpack.c.bf16 %v8322_v58, %v8321_v12  ;;  %v8306_v60 = vld [vmem:[%s12007_s5 + $0x78] sm:$0xff]  ;;  %s11526_s5 = smov 127  }
 0x508   :  { %v9592_v31 = vpack.c.bf16 %v8306_v60, %v8305_v59 }
 0x509   :  { %9591 = vmatprep.subr.bf16.mxu1 %v9590_v23 }
 0x50a   :  { %8257 = vmatpush1.bf16.msra.mxu0 %v11337_v1  ;;  %9593 = vmatpush3.bf16.msra.mxu1 %v9592_v31  ;;  %v7884_v1 = vrot.slane %v7875_v62, %v1125_v20 }
 0x50b   :  { %8258 = vmatprep.subr.bf16.mxu0 %v11342_v8 }
 0x50e   :  { %8259 = vmatpush1.bf16.msra.mxu0 %v11340_v43 }
 0x50f   :  { %8260 = vmatprep.subr.bf16.mxu0 %v11345_v21 }
 0x512   :  { %8261 = vmatpush1.bf16.msra.mxu0 %v11343_v26 }
 0x513   :  { %8262 = vmatprep.subr.bf16.mxu0 %v11348_v28 }
 0x516   :  { %8263 = vmatpush1.bf16.msra.mxu0 %v11346_v29 }
 0x517   :  { %8264 = vmatprep.subr.bf16.mxu0 %v11351_v10 }
 0x51a   :  { %8265 = vmatpush1.bf16.msra.mxu0 %v11349_v56 }
 0x51b   :  { %8266 = vmatprep.subr.bf16.mxu0 %v11354_v33 }
 0x51e   :  { %8267 = vmatpush1.bf16.msra.mxu0 %v11352_v34 }
 0x51f   :  { %8268 = vmatprep.subr.bf16.mxu0 %v11357_v7 }
 0x522   :  { %8269 = vmatpush1.bf16.msra.mxu0 %v11355_v36 }
 0x523   :  { %8270 = vmatprep.subr.bf16.mxu0 %v11360_v38 }
 0x526   :  { %8271 = vmatpush1.bf16.msra.mxu0 %v11358_v32 }
 0x527   :  { %8272 = vmatprep.subr.bf16.mxu0 %v11363_v39 }
 0x52a   :  { %8273 = vmatpush1.bf16.msra.mxu0 %v11361_v41 }
 0x52b   :  { %8274 = vmatprep.subr.bf16.mxu0 %v11366_v4 }
 0x52e   :  { %8275 = vmatpush1.bf16.msra.mxu0 %v11364_v5 }
 0x52f   :  { %8276 = vmatprep.subr.bf16.mxu0 %v11369_v49 }
 0x532   :  { %8277 = vmatpush1.bf16.msra.mxu0 %v11367_v11 }
 0x533   :  { %8278 = vmatprep.subr.bf16.mxu0 %v11372_v44 }
 0x536   :  { %8279 = vmatpush1.bf16.msra.mxu0 %v11370_v3 }
 0x56f   :  { %v7796_v48 = vpop.f32.mrb[4].mxu1 }
 0x570   :  { %v9598_v51 = vadd.f32 %v7796_v48, %v1130_v14  ;;  %v7798_v30 = vpop.f32.mrb[5].mxu1 }
 0x571   :  { %v9599_v52 = vadd.f32 %v7798_v30, %v1134_v18  ;;  %v7800_v46 = vpop.f32.mrb[6].mxu1 }
 0x572   :  { %v7805_v53 = vmax.f32 %v9598_v51, 0.0  ;;  %v7801_v61 = vpop.f32.mrb[7].mxu1 }
 0x573   :  { %v7806_v17 = vmax.f32 %v9599_v52, 0.0 }
 0x574   :  { %v7809_v6 = vpack.c.bf16 %v7805_v53, %v7805_v53 }
 0x575   :  { %v7810_v55 = vpack.c.bf16 %v7806_v17, %v7806_v17 }
 0x577   :  { %8280 = vmatprep.mubr.bf16.mxu0 %v7810_v55 }
 0x578   :  { %8281 = vmatmul.mubr.bf16.vlgmr.msra.gmra.mrb[4].mxu0 %v7809_v6 }
 0x64b   :  { %v8282_v2 = vpop.f32.mrb[4].mxu0 }
 0x64c   :  { %v9600_v35 = vadd.f32 %v8282_v2, %v7880_v63  ;;  %v8284_v37 = vpop.f32.mrb[5].mxu0 }
 0x64d   :  { %v9601_v8 = vadd.f32 %v8284_v37, %v7884_v1  ;;  %v8286_v9 = vpop.f32.mrb[6].mxu0 }
 0x64e   :  { %v8287_v22 = vpop.f32.mrb[7].mxu0  ;;  %v8289_v43 = vmax.f32 %v9600_v35, 0.0 }
 0x64f   :  { %v8290_v13 = vmax.f32 %v9601_v8, 0.0 }
 0x651   :  { %8394 = vmatprep.mubr.f32.mxu1 %v8290_v13 }
 0x652   :  { %8395 = vmatmul.mubr.f32.vlgmr.msra.gmra.mrb[8].mxu1 %v8289_v43 }
 0x725   :  { %v9559_v15 = vpop.f32.mrb[8].mxu1 }
 0x726   :  { %v9560_v21 = vpop.f32.mrb[9].mxu1 }
 0x727   :  { %v9561_v24 = vadd.f32 %v9560_v21, %v9559_v15 }
 0x729   :  { %v8397_v25 = vadd.f32 %v9561_v24, %v9526_v16 }
 0x72b   :  { %8412 = vperm.xlu1 %9735, %v8397_v25   ;;  %8401 = vrot.lane.b32.xlu0 %v8397_v25, %s11526_s5 }
 0x79d   :  { %v8402_v42 = vpop.permute.xlu0 %8401 }
 0x79e   :  { %v8405_v20 = vsel %vm8404_vm0, %v8402_v42, 0.0 }
 0x79f   :  { %8406 = vadd.xlane.f32.xlu0 %v8405_v20 }
 0x7aa   :  { %v8413_v0 = vpop.permute.xlu1 %8412 }
 0x82c   :  { %v8407_v50 = vpop.xlane.xlu0 %8406 }
 0x82d   :  { %v8409_v54 = vmul.f32 0.25, %v8407_v50 }
 0x82f   :  { %v8410_v26 = vsub.f32 %v8397_v25, %v8409_v54 }
 0x831   :  { %v8415_v28 = vadd.f32 %v8413_v0, %v8410_v26 }
 0x833   :  { %8417 = vrot.lane.b32.xlu1 %v8415_v28, %s11526_s5 }
 0x8a5   :  { %v8418_v29 = vpop.permute.xlu1 %8417 }
 0x8a6   :  { %8420 = vst.msk [vmem:[#allocation11] sm:$0x3] %vm8404_vm0, %v8418_v29 }
 0x8a7   :  { %11496 = shalt.err (!%p11493_p2)
}
 0x8a8   :  { %s11497_s9 = scalar_lea.hbm %s12009_s7, 32 }
 0x8a9   :  { %p11498_p3 = scmp.ne.s32.totalorder %s12009_s7, %s11497_s9  ;;  %p11501_p4 = scmp.lt.u32.totalorder %s11497_s9, %s12009_s7 }
 0x8ab   :  { %p11503_p5 = pnand %p11501_p4, %p11498_p3 }
 0x8ad   :  { %11506 = shalt.err (!%p11503_p5)
}
 0x8ae   :  { %8430 = dma.vmem_to_hbm [thread:$0]  %s8428_s28, 32, %s12009_s7, [#allocation4]  }
 0x8af   :  { %11513 = dma.done.wait [#allocation4], 32  }
 0x8b0   :  { %11514 = vsyncadd [#allocation4], 4294967264 }
 0x8b1   :  { %8434 = vsyncpa [#allocation3], 1 }
 0x8b2   :  { %8435 = vsyncpa [#allocation6], 1 }
 0x8b3   :  { %8436 = vsyncpa [#allocation9], 1 }
 0x8b4   :  { %8437 = vsyncpa [#allocation4], 1 }

</bundles_post_ra>
